<compile_context>
chip_gen: v7x
topology: tpu7x:2x2x1
jax: 0.10.0
libtpu: 0.0.40
codegen_flags: <defaults>
</compile_context>

<pallas_src>
import functools

import jax
import jax.numpy as jnp
from jax.experimental import pallas as pl
from jax.experimental.pallas import tpu as pltpu

_VMEM_LIMIT = 32 * 1024 * 1024


def _leaky(x):
    return jnp.where(x > 0, x, 0.2 * x)


def _pick_tile(m, cap):
    """Largest power-of-two-ish tile <= cap dividing m (m itself if m <= cap)."""
    if m <= cap:
        return m
    t = cap
    while t > 8 and m % t != 0:
        t //= 2
    return t if m % t == 0 else m


def _split_tile(m, cap):
    """Tile <= cap that yields grid >= 2 when possible (v7x has 2 TensorCores)."""
    if m < 16:
        return m
    return _pick_tile(m, min(cap, m // 2))


def _full_spec(shape):
    nd = len(shape)
    return pl.BlockSpec(shape, lambda i, _nd=nd: (0,) * _nd)


# ---------------------------------------------------------------------------
# Lane-dense transposed matmul (conv / deconv): out(C, M) = act(W(C,K) @ X(K,M) + b)
# ---------------------------------------------------------------------------
def _matmul_t_kernel(act, w_ref, x_ref, b_ref, o_ref):
    y = jnp.dot(w_ref[...], x_ref[...], preferred_element_type=jnp.float32)
    y = y + b_ref[...]
    if act == "leaky_relu":
        y = _leaky(y)
    elif act == "tanh":
        y = jnp.tanh(y)
    o_ref[...] = y


def matmul_t_act(w, xT, b, act="none", lane_cap=1024):
    C, K = w.shape
    M = xT.shape[1]
    tn = _split_tile(M, lane_cap)
    return pl.pallas_call(
        functools.partial(_matmul_t_kernel, act),
        out_shape=jax.ShapeDtypeStruct((C, M), jnp.float32),
        grid=(pl.cdiv(M, tn),),
        in_specs=[
            pl.BlockSpec((C, K), lambda j: (0, 0)),
            pl.BlockSpec((K, tn), lambda j: (0, j)),
            pl.BlockSpec((C, 1), lambda j: (0, 0)),
        ],
        out_specs=pl.BlockSpec((C, tn), lambda j: (0, j)),
        compiler_params=pltpu.CompilerParams(
            dimension_semantics=("parallel",), vmem_limit_bytes=_VMEM_LIMIT),
    )(w, xT, b.reshape(C, 1))


# ---------------------------------------------------------------------------
# conv_fc + BatchNorm1d(eval) + LeakyReLU fused with the f-LSTM and z-LSTM
# (conv_x part) input projections.  conv_x never round-trips HBM.
# ---------------------------------------------------------------------------
def _encode_fc_kernel(x_ref, w1_ref, b1_ref, bs_ref, bt_ref,
                      fw_ref, fb_ref, zw_ref, zb_ref,
                      fgin_ref, zgin_ref):
    y = jnp.dot(x_ref[...], w1_ref[...], preferred_element_type=jnp.float32)
    y = (y + b1_ref[...]) * bs_ref[...] + bt_ref[...]
    y = _leaky(y)
    fgin_ref[...] = (jnp.dot(y, fw_ref[...], preferred_element_type=jnp.float32)
                     + fb_ref[...])
    zgin_ref[...] = (jnp.dot(y, zw_ref[...], preferred_element_type=jnp.float32)
                     + zb_ref[...])


def encode_fc_and_proj(x, w1, b1, bn_scale, bn_shift, f_wih, f_b, z_wih_x, z_b):
    M, K = x.shape
    N1 = w1.shape[1]
    NG = f_wih.shape[1]
    tm = _split_tile(M, 256)
    return pl.pallas_call(
        _encode_fc_kernel,
        out_shape=(jax.ShapeDtypeStruct((M, NG), jnp.float32),
                   jax.ShapeDtypeStruct((M, NG), jnp.float32)),
        grid=(pl.cdiv(M, tm),),
        in_specs=[
            pl.BlockSpec((tm, K), lambda i: (i, 0)),
            pl.BlockSpec((K, N1), lambda i: (0, 0)),
            pl.BlockSpec((1, N1), lambda i: (0, 0)),
            pl.BlockSpec((1, N1), lambda i: (0, 0)),
            pl.BlockSpec((1, N1), lambda i: (0, 0)),
            pl.BlockSpec((N1, NG), lambda i: (0, 0)),
            pl.BlockSpec((1, NG), lambda i: (0, 0)),
            pl.BlockSpec((N1, NG), lambda i: (0, 0)),
            pl.BlockSpec((1, NG), lambda i: (0, 0)),
        ],
        out_specs=(pl.BlockSpec((tm, NG), lambda i: (i, 0)),
                   pl.BlockSpec((tm, NG), lambda i: (i, 0))),
        compiler_params=pltpu.CompilerParams(
            dimension_semantics=("parallel",), vmem_limit_bytes=_VMEM_LIMIT),
    )(x, w1, b1.reshape(1, N1), bn_scale.reshape(1, N1), bn_shift.reshape(1, N1),
      f_wih, f_b.reshape(1, NG), z_wih_x, z_b.reshape(1, NG))


# ---------------------------------------------------------------------------
# One kernel for the entire recurrent section (single invocation, fully unrolled).
# ---------------------------------------------------------------------------
def _recurrent_kernel(T, B, H, f_dim, z_dim,
                      fgin_ref, zginx_ref,
                      fwhh_f_ref, fwhh_r_ref, fhead_w_ref, fhead_b_ref,
                      zwih_f_ref, zwhh_f_ref, zwhh_r_ref,
                      zr_wih_ref, zr_whh_ref, zr_b_ref,
                      zhead_w_ref, zhead_b_ref,
                      dec_wf_ref, dec_wz_ref, dec_b_ref,
                      fhead_ref, zhead_ref, d_ref,
                      lstm_scr, rnn_scr):
    f32 = jnp.float32
    H4 = 4 * H

    def cell(gates, c):
        i = jax.nn.sigmoid(gates[:, 0 * H:1 * H])
        fg = jax.nn.sigmoid(gates[:, 1 * H:2 * H])
        g = jnp.tanh(gates[:, 2 * H:3 * H])
        o = jax.nn.sigmoid(gates[:, 3 * H:4 * H])
        c_new = fg * c + i * g
        return o * jnp.tanh(c_new), c_new

    # Hoist all loads; everything is tiny and stays VMEM/vreg resident.
    fgin = fgin_ref[...]            # (B, T, 8H), per-direction-contiguous columns
    zginx = zginx_ref[...]          # (B, T, 8H), includes z-LSTM bias
    fwhh_f, fwhh_r = fwhh_f_ref[...], fwhh_r_ref[...]
    zwhh_f, zwhh_r = zwhh_f_ref[...], zwhh_r_ref[...]
    zr_wih, zr_whh, zr_b = zr_wih_ref[...], zr_whh_ref[...], zr_b_ref[...]
    zhead_w, zhead_b = zhead_w_ref[...], zhead_b_ref[...]

    zeros = jnp.zeros((B, H), f32)

    # ---- f bi-LSTM: fwd consumes t=s, rev consumes t=T-1-s (no flip_rev) ----
    h_f = c_f = h_r = c_r = zeros
    h_r_first = zeros
    for s in range(T):
        gf = jnp.dot(h_f, fwhh_f, preferred_element_type=f32) + fgin[:, s, 0:H4]
        gr = (jnp.dot(h_r, fwhh_r, preferred_element_type=f32)
              + fgin[:, T - 1 - s, H4:2 * H4])
        h_f, c_f = cell(gf, c_f)
        h_r, c_r = cell(gr, c_r)
        if s == 0:
            h_r_first = h_r         # reverse half of lstm_out[:, T-1]

    # leaky([f_mean | f_logvar]) head on lstm_out[:, T-1]
    last = jnp.concatenate([h_f, h_r_first], axis=-1)                       # (B, 2H)
    fhead = _leaky(jnp.dot(last, fhead_w_ref[...], preferred_element_type=f32)
                   + fhead_b_ref[...])
    fhead_ref[...] = fhead
    f_lat = fhead[:, 0:f_dim]        # eval-mode reparameterize -> mean

    # f contributions (computed once per batch, not per (T*B) row)
    zgin_f = jnp.dot(f_lat, zwih_f_ref[...], preferred_element_type=f32)    # (B, 8H)
    dec_f = (jnp.dot(f_lat, dec_wf_ref[...], preferred_element_type=f32)
             + dec_b_ref[...])                                              # (B, 4*4*step)

    # ---- z bi-LSTM ----
    h_f = c_f = h_r = c_r = zeros
    for s in range(T):
        gf = (jnp.dot(h_f, zwhh_f, preferred_element_type=f32)
              + zginx[:, s, 0:H4] + zgin_f[:, 0:H4])
        gr = (jnp.dot(h_r, zwhh_r, preferred_element_type=f32)
              + zginx[:, T - 1 - s, H4:2 * H4] + zgin_f[:, H4:2 * H4])
        h_f, c_f = cell(gf, c_f)
        h_r, c_r = cell(gr, c_r)
        lstm_scr[s * B:(s + 1) * B, 0:H] = h_f                    # fwd half of lstm_out[s]
        lstm_scr[(T - 1 - s) * B:(T - s) * B, H:2 * H] = h_r      # rev half of lstm_out[T-1-s]

    # ---- z RNN (tanh) with hoisted input projection ----
    rgin = jnp.dot(lstm_scr[...], zr_wih, preferred_element_type=f32) + zr_b  # (T*B, H)
    h = zeros
    for t in range(T):
        h = jnp.tanh(rgin[t * B:(t + 1) * B, :]
                     + jnp.dot(h, zr_whh, preferred_element_type=f32))
        rnn_scr[t * B:(t + 1) * B, :] = h

    # ---- leaky([z_mean | z_logvar]) heads + decoder-FC z-part (hoisted) ----
    zhead = _leaky(jnp.dot(rnn_scr[...], zhead_w, preferred_element_type=f32)
                   + zhead_b)                                     # (T*B, 2*z_dim)
    dpart = jnp.dot(zhead[:, 0:z_dim], dec_wz_ref[...], preferred_element_type=f32)
    for t in range(T):
        zhead_ref[:, t:t + 1, :] = zhead[t * B:(t + 1) * B, :][:, None, :]
        d_ref[:, t:t + 1, :] = _leaky(dpart[t * B:(t + 1) * B, :] + dec_f)[:, None, :]


def recurrent_block(f_gin, z_gin_x, p, cfg):
    B, T, _ = f_gin.shape
    H, f_dim, z_dim = cfg["hidden_dim"], cfg["f_dim"], cfg["z_dim"]
    dec_n = p["dec_b"].shape[0]
    inputs = [
        f_gin, z_gin_x,
        p["f_whh_f"], p["f_whh_r"], p["f_head_w"], p["f_head_b"].reshape(1, -1),
        p["z_wih_f"], p["z_whh_f"], p["z_whh_r"],
        p["zr_wih"], p["zr_whh"], p["zr_b"].reshape(1, -1),
        p["z_head_w"], p["z_head_b"].reshape(1, -1),
        p["dec_w_f"], p["dec_w_z"], p["dec_b"].reshape(1, -1),
    ]
    out_shape = (jax.ShapeDtypeStruct((B, 2 * f_dim), jnp.float32),
                 jax.ShapeDtypeStruct((B, T, 2 * z_dim), jnp.float32),
                 jax.ShapeDtypeStruct((B, T, dec_n), jnp.float32))
    return pl.pallas_call(
        functools.partial(_recurrent_kernel, T, B, H, f_dim, z_dim),
        out_shape=out_shape,
        grid=(1,),
        in_specs=[_full_spec(a.shape) for a in inputs],
        out_specs=tuple(_full_spec(s.shape) for s in out_shape),
        scratch_shapes=[pltpu.VMEM((T * B, 2 * H), jnp.float32),
                        pltpu.VMEM((T * B, H), jnp.float32)],
        compiler_params=pltpu.CompilerParams(
            dimension_semantics=("arbitrary",), vmem_limit_bytes=_VMEM_LIMIT),
    )(*inputs)


# ---------------------------------------------------------------------------
# Conv / ConvTranspose via transposed im2col (XLA glue) + lane-dense Pallas matmul
# ---------------------------------------------------------------------------
def _im2col_T(x, k, stride, pad):
    # x: (N, C, H, W) -> colsT: (C*k*k, N*oh*ow)
    if pad:
        x = jnp.pad(x, ((0, 0), (0, 0), (pad, pad), (pad, pad)))
    N, C, Hp, Wp = x.shape
    oh = (Hp - k) // stride + 1
    ow = (Wp - k) // stride + 1
    patches = []
    for di in range(k):
        for dj in range(k):
            patches.append(
                x[:, :,
                  di:di + stride * (oh - 1) + 1:stride,
                  dj:dj + stride * (ow - 1) + 1:stride])
    cols = jnp.stack(patches, axis=2)                        # (N, C, k*k, oh, ow)
    colsT = cols.transpose(1, 2, 0, 3, 4).reshape(C * k * k, N * oh * ow)
    return colsT, oh, ow


def conv_transpose2d_lane_dense(x, wm, bias, k, stride, pad, out_pad, act):
    # x: (N, C_in, h, w); wm: (C_out, C_in*k*k) pre-flipped/transposed/reshaped.
    N, C, Hh, Ww = x.shape
    hd = (Hh - 1) * stride + 1
    wd = (Ww - 1) * stride + 1
    xd = jnp.zeros((N, C, hd, wd), x.dtype).at[:, :, ::stride, ::stride].set(x)
    lo = k - 1 - pad
    hi = k - 1 - pad + out_pad
    xp = jnp.pad(xd, ((0, 0), (0, 0), (lo, hi), (lo, hi)))
    colsT, oh, ow = _im2col_T(xp, k, 1, 0)
    yT = matmul_t_act(wm, colsT, bias, act=act, lane_cap=1024)   # (C_out, N*oh*ow)
    return yT.reshape(wm.shape[0], N, oh, ow).transpose(1, 0, 2, 3)


# ---------------------------------------------------------------------------
# Parameter construction (deterministic synthetic init)
# ---------------------------------------------------------------------------
def init_params(key, cfg):
    step, conv_dim = cfg["step"], cfg["conv_dim"]
    H, f_dim, z_dim = cfg["hidden_dim"], cfg["f_dim"], cfg["z_dim"]
    assert cfg["in_size"] == 16, "only the single-stage (in_size=16) config is implemented"
    keys = iter(jax.random.split(key, 64))

    def kaiming(shape, fan_in):
        return jax.random.normal(next(keys), shape, jnp.float32) * jnp.sqrt(2.0 / fan_in)

    def small(shape):
        return jax.random.normal(next(keys), shape, jnp.float32) * 0.01

    def lstm_dir(D):
        # b = b_ih + b_hh folded (synthetic init)
        return dict(wih=kaiming((4 * H, D), D).T,       # (D, 4H), gate order [i,f,g,o]
                    whh=kaiming((4 * H, H), H).T,       # (H, 4H)
                    b=small((4 * H,)))

    enc_feat = step * 16
    eps = 1e-5
    p = {}
    # encoder: Conv2d(3, step, 5, 4, 1, bias=False) -> pre-reshaped (step, 75)
    p["conv_wm"] = kaiming((step, 3, 5, 5), 3 * 25).reshape(step, 75)
    p["conv_b0"] = jnp.zeros((step,), jnp.float32)
    # conv_fc: Linear(enc_feat, conv_dim) + BatchNorm1d(eval) + LeakyReLU
    p["conv_fc_w"] = kaiming((conv_dim, enc_feat), enc_feat).T
    p["conv_fc_b"] = small((conv_dim,))
    p["bn_scale"] = jnp.full((conv_dim,), 1.0 / jnp.sqrt(1.0 + eps), jnp.float32)  # gamma=1,var=1
    p["bn_shift"] = jnp.ones((conv_dim,), jnp.float32)                             # beta=1,mean=0
    # f_lstm (bidirectional), per-direction-contiguous gate columns
    fdf, fdr = lstm_dir(conv_dim), lstm_dir(conv_dim)
    p["f_wih"] = jnp.concatenate([fdf["wih"], fdr["wih"]], axis=1)      # (conv_dim, 8H)
    p["f_b"] = jnp.concatenate([fdf["b"], fdr["b"]])                    # (8H,)
    p["f_whh_f"], p["f_whh_r"] = fdf["whh"], fdr["whh"]                 # (H, 4H) each
    # f_mean / f_logvar heads fused along N
    p["f_head_w"] = jnp.concatenate([kaiming((f_dim, 2 * H), 2 * H).T,
                                     kaiming((f_dim, 2 * H), 2 * H).T], axis=1)  # (2H, 2*f_dim)
    p["f_head_b"] = jnp.concatenate([small((f_dim,)), small((f_dim,))])
    # z_lstm (bidirectional); input rows split into conv_x part and f part
    zdf, zdr = lstm_dir(conv_dim + f_dim), lstm_dir(conv_dim + f_dim)
    z_wih = jnp.concatenate([zdf["wih"], zdr["wih"]], axis=1)           # (conv_dim+f_dim, 8H)
    p["z_wih_x"] = z_wih[:conv_dim]
    p["z_wih_f"] = z_wih[conv_dim:]
    p["z_b"] = jnp.concatenate([zdf["b"], zdr["b"]])
    p["z_whh_f"], p["z_whh_r"] = zdf["whh"], zdr["whh"]
    # z_rnn (tanh)
    p["zr_wih"] = kaiming((H, 2 * H), 2 * H).T                          # (2H, H)
    p["zr_whh"] = kaiming((H, H), H).T
    p["zr_b"] = small((H,))
    # z_mean / z_logvar heads fused along N
    p["z_head_w"] = jnp.concatenate([kaiming((z_dim, H), H).T,
                                     kaiming((z_dim, H), H).T], axis=1)  # (H, 2*z_dim)
    p["z_head_b"] = jnp.concatenate([small((z_dim,)), small((z_dim,))])
    # decoder FC: Linear(z_dim+f_dim -> 4*4*step); input ordering [z | f]
    dec_w = kaiming((4 * 4 * step, f_dim + z_dim), f_dim + z_dim).T      # (z+f, 128)
    p["dec_w_z"] = dec_w[:z_dim]
    p["dec_w_f"] = dec_w[z_dim:]
    p["dec_b"] = small((4 * 4 * step,))
    # ConvTranspose2d(step, 3, 5, 4, 1, 1): pre-flipped/transposed/reshaped weight
    dw = kaiming((step, 3, 5, 5), 3 * 25)                                # torch layout (Cin,Cout,k,k)
    p["deconv_wm"] = jnp.flip(dw, axis=(2, 3)).transpose(1, 0, 2, 3).reshape(3, step * 25)
    p["deconv_b"] = small((3,))
    return p


# ---------------------------------------------------------------------------
# Forward pass
# ---------------------------------------------------------------------------
def forward(params, x, cfg):
    B, F, C, S, _ = x.shape
    step, conv_dim = cfg["step"], cfg["conv_dim"]
    H, f_dim, z_dim = cfg["hidden_dim"], cfg["f_dim"], cfg["z_dim"]
    T = F
    M = B * F

    # ---- encode_frames: conv (lane-dense transposed matmul) ----
    xf = x.reshape(M, C, S, S)
    colsT, oh, ow = _im2col_T(xf, 5, 4, 1)                               # (75, M*16)
    yT = matmul_t_act(params["conv_wm"], colsT, params["conv_b0"],
                      act="leaky_relu", lane_cap=1024)                   # (step, M*16)
    hflat = yT.reshape(step, M, oh * ow).transpose(1, 0, 2).reshape(M, step * oh * ow)

    # ---- conv_fc + BN + leaky fused with f-LSTM / z-LSTM(x-part) projections ----
    f_gin, z_gin_x = encode_fc_and_proj(
        hflat, params["conv_fc_w"], params["conv_fc_b"],
        params["bn_scale"], params["bn_shift"],
        params["f_wih"], params["f_b"], params["z_wih_x"], params["z_b"])
    f_gin = f_gin.reshape(B, T, 8 * H)        # free view (rows are b*T + t)
    z_gin_x = z_gin_x.reshape(B, T, 8 * H)

    # ---- fused recurrent section (single pallas_call) ----
    f_head, z_head, d = recurrent_block(f_gin, z_gin_x, params, cfg)
    f_mean, f_logvar = f_head[:, :f_dim], f_head[:, f_dim:]
    f = f_mean                                # eval-mode reparameterize
    z_mean, z_logvar = z_head[..., :z_dim], z_head[..., z_dim:]
    z = z_mean                                # eval-mode reparameterize

    # ---- decode_frames ----
    dimg = d.reshape(M, step, 4, 4)           # leaky(deconv_fc([z|f])) already applied
    recon = conv_transpose2d_lane_dense(dimg, params["deconv_wm"], params["deconv_b"],
                                        k=5, stride=4, pad=1, out_pad=1, act="tanh")
    recon = recon.reshape(B, F, 3, S, S)
    return f_mean, f_logvar, f, z_mean, z_logvar, z, recon


# ---------------------------------------------------------------------------
if __name__ == "__main__":
    # Small config consistent with the module (in_size=16 => single conv /
    # conv-transpose stage, encode_final_size=4, encode_final_channels=step).
    cfg = dict(frames=8, in_size=16, step=8, conv_dim=128,
               hidden_dim=32, f_dim=16, z_dim=16)
    B = 2
    key = jax.random.PRNGKey(0)
    pkey, xkey = jax.random.split(key)
    params = init_params(pkey, cfg)
    x = jax.random.normal(
        xkey, (B, cfg["frames"], 3, cfg["in_size"], cfg["in_size"]), jnp.float32)

    fwd = jax.jit(lambda p, xx: forward(p, xx, cfg))
    outs = fwd(params, x)
    jax.block_until_ready(outs)

    f_mean, f_logvar, f, z_mean, z_logvar, z, recon = outs
    assert f_mean.shape == (B, cfg["f_dim"])
    assert f_logvar.shape == (B, cfg["f_dim"])
    assert f.shape == (B, cfg["f_dim"])
    assert z_mean.shape == (B, cfg["frames"], cfg["z_dim"])
    assert z_logvar.shape == (B, cfg["frames"], cfg["z_dim"])
    assert z.shape == (B, cfg["frames"], cfg["z_dim"])
    assert recon.shape == (B, cfg["frames"], 3, cfg["in_size"], cfg["in_size"])
    assert all(bool(jnp.all(jnp.isfinite(o))) for o in
               (f_mean, f_logvar, f, z_mean, z_logvar, z, recon))
    print("KERNEL_OK")
</pallas_src>

<mosaic_0001>
module attributes {stable_mosaic.version = 11 : i64} {
  func.func @_matmul_t_kernel(%arg0: i32, %arg1: memref<8x75xf32, #tpu.memory_space<vmem>>, %arg2: memref<75x128xf32, #tpu.memory_space<vmem>>, %arg3: memref<8x1xf32, #tpu.memory_space<vmem>>, %arg4: memref<8x128xf32, #tpu.memory_space<vmem>>) attributes {dimension_semantics = [#tpu.dimension_semantics<parallel>], iteration_bounds = array<i64: 2>, scalar_prefetch = 0 : i64, scratch_operands = 0 : i64, tpu.core_type = #tpu.core_type<tc>, window_params = [{pipeline_mode = #tpu.pipeline_mode<synchronous>, transform_indices = @transform_0, window_bounds = array<i64: 8, 75>}, {transform_indices = @transform_1, window_bounds = array<i64: 75, 128>}, {pipeline_mode = #tpu.pipeline_mode<synchronous>, transform_indices = @transform_2, window_bounds = array<i64: 8, 1>}, {transform_indices = @transform_3, window_bounds = array<i64: 8, 128>}]} {
    %c0 = arith.constant 0 : index
    %c0_0 = arith.constant 0 : index
    %0 = vector.load %arg1[%c0, %c0_0] : memref<8x75xf32, #tpu.memory_space<vmem>>, vector<8x75xf32>
    %c0_1 = arith.constant 0 : index
    %c0_2 = arith.constant 0 : index
    %1 = vector.load %arg2[%c0_1, %c0_2] : memref<75x128xf32, #tpu.memory_space<vmem>>, vector<75x128xf32>
    %cst = arith.constant dense<0.000000e+00> : vector<8x128xf32>
    %2 = tpu.matmul %0, %1, %cst {dimension_numbers = #tpu.dot_dimension_numbers<[1], [0], [0], [1], [0, 0, 1, 1], [], []>} : vector<8x75xf32>, vector<75x128xf32>, vector<8x128xf32> -> vector<8x128xf32>
    %c0_3 = arith.constant 0 : index
    %c0_4 = arith.constant 0 : index
    %3 = vector.load %arg3[%c0_3, %c0_4] : memref<8x1xf32, #tpu.memory_space<vmem>>, vector<8x1xf32>
    %4 = vector.broadcast %3 : vector<8x1xf32> to vector<8x128xf32>
    %5 = arith.addf %2, %4 : vector<8x128xf32>
    %cst_5 = arith.constant 0.000000e+00 : f32
    %6 = vector.broadcast %cst_5 : f32 to vector<8x128xf32>
    %7 = arith.cmpf ogt, %5, %6 : vector<8x128xf32>
    %cst_6 = arith.constant 2.000000e-01 : f32
    %8 = vector.broadcast %cst_6 : f32 to vector<8x128xf32>
    %9 = arith.mulf %8, %5 : vector<8x128xf32>
    %10 = arith.select %7, %5, %9 : vector<8x128xi1>, vector<8x128xf32>
    %c0_7 = arith.constant 0 : index
    %c0_8 = arith.constant 0 : index
    %11 = vector.load %arg4[%c0_7, %c0_8] : memref<8x128xf32, #tpu.memory_space<vmem>>, vector<8x128xf32>
    tpu.vector_store %arg4[%c0_7, %c0_8], %10 {strides = array<i32>} : memref<8x128xf32, #tpu.memory_space<vmem>>, vector<8x128xf32>,
    return
  }
  func.func @transform_0(%arg0: i32) -> (i32, i32) {
    %c0_i32 = arith.constant 0 : i32
    %c0_i32_0 = arith.constant 0 : i32
    %c0_i32_1 = arith.constant 0 : i32
    return %c0_i32, %c0_i32_0 : i32, i32
  }
  func.func @transform_1(%arg0: i32) -> (i32, i32) {
    %c0_i32 = arith.constant 0 : i32
    %c0_i32_0 = arith.constant 0 : i32
    return %c0_i32, %arg0 : i32, i32
  }
  func.func @transform_2(%arg0: i32) -> (i32, i32) {
    %c0_i32 = arith.constant 0 : i32
    %c0_i32_0 = arith.constant 0 : i32
    %c0_i32_1 = arith.constant 0 : i32
    return %c0_i32, %c0_i32_0 : i32, i32
  }
  func.func @transform_3(%arg0: i32) -> (i32, i32) {
    %c0_i32 = arith.constant 0 : i32
    %c0_i32_0 = arith.constant 0 : i32
    return %c0_i32, %arg0 : i32, i32
  }
}

module attributes {stable_mosaic.version = 11 : i64} {
  func.func @_encode_fc_kernel(%arg0: i32, %arg1: memref<8x128xf32, #tpu.memory_space<vmem>>, %arg2: memref<128x128xf32, #tpu.memory_space<vmem>>, %arg3: memref<1x128xf32, #tpu.memory_space<vmem>>, %arg4: memref<1x128xf32, #tpu.memory_space<vmem>>, %arg5: memref<1x128xf32, #tpu.memory_space<vmem>>, %arg6: memref<128x256xf32, #tpu.memory_space<vmem>>, %arg7: memref<1x256xf32, #tpu.memory_space<vmem>>, %arg8: memref<128x256xf32, #tpu.memory_space<vmem>>, %arg9: memref<1x256xf32, #tpu.memory_space<vmem>>, %arg10: memref<8x256xf32, #tpu.memory_space<vmem>>, %arg11: memref<8x256xf32, #tpu.memory_space<vmem>>) attributes {dimension_semantics = [#tpu.dimension_semantics<parallel>], iteration_bounds = array<i64: 2>, scalar_prefetch = 0 : i64, scratch_operands = 0 : i64, tpu.core_type = #tpu.core_type<tc>, window_params = [{transform_indices = @transform_0, window_bounds = array<i64: 8, 128>}, {pipeline_mode = #tpu.pipeline_mode<synchronous>, transform_indices = @transform_1, window_bounds = array<i64: 128, 128>}, {pipeline_mode = #tpu.pipeline_mode<synchronous>, transform_indices = @transform_2, window_bounds = array<i64: 1, 128>}, {pipeline_mode = #tpu.pipeline_mode<synchronous>, transform_indices = @transform_3, window_bounds = array<i64: 1, 128>}, {pipeline_mode = #tpu.pipeline_mode<synchronous>, transform_indices = @transform_4, window_bounds = array<i64: 1, 128>}, {pipeline_mode = #tpu.pipeline_mode<synchronous>, transform_indices = @transform_5, window_bounds = array<i64: 128, 256>}, {pipeline_mode = #tpu.pipeline_mode<synchronous>, transform_indices = @transform_6, window_bounds = array<i64: 1, 256>}, {pipeline_mode = #tpu.pipeline_mode<synchronous>, transform_indices = @transform_7, window_bounds = array<i64: 128, 256>}, {pipeline_mode = #tpu.pipeline_mode<synchronous>, transform_indices = @transform_8, window_bounds = array<i64: 1, 256>}, {transform_indices = @transform_9, window_bounds = array<i64: 8, 256>}, {transform_indices = @transform_10, window_bounds = array<i64: 8, 256>}]} {
    %c0 = arith.constant 0 : index
    %c0_0 = arith.constant 0 : index
    %0 = vector.load %arg1[%c0, %c0_0] : memref<8x128xf32, #tpu.memory_space<vmem>>, vector<8x128xf32>
    %c0_1 = arith.constant 0 : index
    %c0_2 = arith.constant 0 : index
    %1 = vector.load %arg2[%c0_1, %c0_2] : memref<128x128xf32, #tpu.memory_space<vmem>>, vector<128x128xf32>
    %cst = arith.constant dense<0.000000e+00> : vector<8x128xf32>
    %2 = tpu.matmul %0, %1, %cst {dimension_numbers = #tpu.dot_dimension_numbers<[1], [0], [0], [1], [0, 0, 1, 1], [], []>} : vector<8x128xf32>, vector<128x128xf32>, vector<8x128xf32> -> vector<8x128xf32>
    %c0_3 = arith.constant 0 : index
    %c0_4 = arith.constant 0 : index
    %3 = vector.load %arg3[%c0_3, %c0_4] : memref<1x128xf32, #tpu.memory_space<vmem>>, vector<1x128xf32>
    %4 = vector.broadcast %3 : vector<1x128xf32> to vector<8x128xf32>
    %5 = arith.addf %2, %4 : vector<8x128xf32>
    %c0_5 = arith.constant 0 : index
    %c0_6 = arith.constant 0 : index
    %6 = vector.load %arg4[%c0_5, %c0_6] : memref<1x128xf32, #tpu.memory_space<vmem>>, vector<1x128xf32>
    %7 = vector.broadcast %6 : vector<1x128xf32> to vector<8x128xf32>
    %8 = arith.mulf %5, %7 : vector<8x128xf32>
    %c0_7 = arith.constant 0 : index
    %c0_8 = arith.constant 0 : index
    %9 = vector.load %arg5[%c0_7, %c0_8] : memref<1x128xf32, #tpu.memory_space<vmem>>, vector<1x128xf32>
    %10 = vector.broadcast %9 : vector<1x128xf32> to vector<8x128xf32>
    %11 = arith.addf %8, %10 : vector<8x128xf32>
    %cst_9 = arith.constant 0.000000e+00 : f32
    %12 = vector.broadcast %cst_9 : f32 to vector<8x128xf32>
    %13 = arith.cmpf ogt, %11, %12 : vector<8x128xf32>
    %cst_10 = arith.constant 2.000000e-01 : f32
    %14 = vector.broadcast %cst_10 : f32 to vector<8x128xf32>
    %15 = arith.mulf %14, %11 : vector<8x128xf32>
    %16 = arith.select %13, %11, %15 : vector<8x128xi1>, vector<8x128xf32>
    %c0_11 = arith.constant 0 : index
    %c0_12 = arith.constant 0 : index
    %17 = vector.load %arg6[%c0_11, %c0_12] : memref<128x256xf32, #tpu.memory_space<vmem>>, vector<128x256xf32>
    %cst_13 = arith.constant dense<0.000000e+00> : vector<8x256xf32>
    %18 = tpu.matmul %16, %17, %cst_13 {dimension_numbers = #tpu.dot_dimension_numbers<[1], [0], [0], [1], [0, 0, 1, 1], [], []>} : vector<8x128xf32>, vector<128x256xf32>, vector<8x256xf32> -> vector<8x256xf32>
    %c0_14 = arith.constant 0 : index
    %c0_15 = arith.constant 0 : index
    %19 = vector.load %arg7[%c0_14, %c0_15] : memref<1x256xf32, #tpu.memory_space<vmem>>, vector<1x256xf32>
    %20 = vector.broadcast %19 : vector<1x256xf32> to vector<8x256xf32>
    %21 = arith.addf %18, %20 : vector<8x256xf32>
    %c0_16 = arith.constant 0 : index
    %c0_17 = arith.constant 0 : index
    %22 = vector.load %arg10[%c0_16, %c0_17] : memref<8x256xf32, #tpu.memory_space<vmem>>, vector<8x256xf32>
    tpu.vector_store %arg10[%c0_16, %c0_17], %21 {strides = array<i32>} : memref<8x256xf32, #tpu.memory_space<vmem>>, vector<8x256xf32>,
    %c0_18 = arith.constant 0 : index
    %c0_19 = arith.constant 0 : index
    %23 = vector.load %arg8[%c0_18, %c0_19] : memref<128x256xf32, #tpu.memory_space<vmem>>, vector<128x256xf32>
    %cst_20 = arith.constant dense<0.000000e+00> : vector<8x256xf32>
    %24 = tpu.matmul %16, %23, %cst_20 {dimension_numbers = #tpu.dot_dimension_numbers<[1], [0], [0], [1], [0, 0, 1, 1], [], []>} : vector<8x128xf32>, vector<128x256xf32>, vector<8x256xf32> -> vector<8x256xf32>
    %c0_21 = arith.constant 0 : index
    %c0_22 = arith.constant 0 : index
    %25 = vector.load %arg9[%c0_21, %c0_22] : memref<1x256xf32, #tpu.memory_space<vmem>>, vector<1x256xf32>
    %26 = vector.broadcast %25 : vector<1x256xf32> to vector<8x256xf32>
    %27 = arith.addf %24, %26 : vector<8x256xf32>
    %c0_23 = arith.constant 0 : index
    %c0_24 = arith.constant 0 : index
    %28 = vector.load %arg11[%c0_23, %c0_24] : memref<8x256xf32, #tpu.memory_space<vmem>>, vector<8x256xf32>
    tpu.vector_store %arg11[%c0_23, %c0_24], %27 {strides = array<i32>} : memref<8x256xf32, #tpu.memory_space<vmem>>, vector<8x256xf32>,
    return
  }
  func.func @transform_0(%arg0: i32) -> (i32, i32) {
    %c0_i32 = arith.constant 0 : i32
    %c0_i32_0 = arith.constant 0 : i32
    return %arg0, %c0_i32 : i32, i32
  }
  func.func @transform_1(%arg0: i32) -> (i32, i32) {
    %c0_i32 = arith.constant 0 : i32
    %c0_i32_0 = arith.constant 0 : i32
    %c0_i32_1 = arith.constant 0 : i32
    return %c0_i32, %c0_i32_0 : i32, i32
  }
  func.func @transform_2(%arg0: i32) -> (i32, i32) {
    %c0_i32 = arith.constant 0 : i32
    %c0_i32_0 = arith.constant 0 : i32
    %c0_i32_1 = arith.constant 0 : i32
    return %c0_i32, %c0_i32_0 : i32, i32
  }
  func.func @transform_3(%arg0: i32) -> (i32, i32) {
    %c0_i32 = arith.constant 0 : i32
    %c0_i32_0 = arith.constant 0 : i32
    %c0_i32_1 = arith.constant 0 : i32
    return %c0_i32, %c0_i32_0 : i32, i32
  }
  func.func @transform_4(%arg0: i32) -> (i32, i32) {
    %c0_i32 = arith.constant 0 : i32
    %c0_i32_0 = arith.constant 0 : i32
    %c0_i32_1 = arith.constant 0 : i32
    return %c0_i32, %c0_i32_0 : i32, i32
  }
  func.func @transform_5(%arg0: i32) -> (i32, i32) {
    %c0_i32 = arith.constant 0 : i32
    %c0_i32_0 = arith.constant 0 : i32
    %c0_i32_1 = arith.constant 0 : i32
    return %c0_i32, %c0_i32_0 : i32, i32
  }
  func.func @transform_6(%arg0: i32) -> (i32, i32) {
    %c0_i32 = arith.constant 0 : i32
    %c0_i32_0 = arith.constant 0 : i32
    %c0_i32_1 = arith.constant 0 : i32
    return %c0_i32, %c0_i32_0 : i32, i32
  }
  func.func @transform_7(%arg0: i32) -> (i32, i32) {
    %c0_i32 = arith.constant 0 : i32
    %c0_i32_0 = arith.constant 0 : i32
    %c0_i32_1 = arith.constant 0 : i32
    return %c0_i32, %c0_i32_0 : i32, i32
  }
  func.func @transform_8(%arg0: i32) -> (i32, i32) {
    %c0_i32 = arith.constant 0 : i32
    %c0_i32_0 = arith.constant 0 : i32
    %c0_i32_1 = arith.constant 0 : i32
    return %c0_i32, %c0_i32_0 : i32, i32
  }
  func.func @transform_9(%arg0: i32) -> (i32, i32) {
    %c0_i32 = arith.constant 0 : i32
    %c0_i32_0 = arith.constant 0 : i32
    return %arg0, %c0_i32 : i32, i32
  }
  func.func @transform_10(%arg0: i32) -> (i32, i32) {
    %c0_i32 = arith.constant 0 : i32
    %c0_i32_0 = arith.constant 0 : i32
    return %arg0, %c0_i32 : i32, i32
  }
}

module attributes {stable_mosaic.version = 11 : i64} {
  func.func @_recurrent_kernel(%arg0: i32, %arg1: memref<2x8x256xf32, #tpu.memory_space<vmem>>, %arg2: memref<2x8x256xf32, #tpu.memory_space<vmem>>, %arg3: memref<32x128xf32, #tpu.memory_space<vmem>>, %arg4: memref<32x128xf32, #tpu.memory_space<vmem>>, %arg5: memref<64x32xf32, #tpu.memory_space<vmem>>, %arg6: memref<1x32xf32, #tpu.memory_space<vmem>>, %arg7: memref<16x256xf32, #tpu.memory_space<vmem>>, %arg8: memref<32x128xf32, #tpu.memory_space<vmem>>, %arg9: memref<32x128xf32, #tpu.memory_space<vmem>>, %arg10: memref<64x32xf32, #tpu.memory_space<vmem>>, %arg11: memref<32x32xf32, #tpu.memory_space<vmem>>, %arg12: memref<1x32xf32, #tpu.memory_space<vmem>>, %arg13: memref<32x32xf32, #tpu.memory_space<vmem>>, %arg14: memref<1x32xf32, #tpu.memory_space<vmem>>, %arg15: memref<16x128xf32, #tpu.memory_space<vmem>>, %arg16: memref<16x128xf32, #tpu.memory_space<vmem>>, %arg17: memref<1x128xf32, #tpu.memory_space<vmem>>, %arg18: memref<2x32xf32, #tpu.memory_space<vmem>>, %arg19: memref<2x8x32xf32, #tpu.memory_space<vmem>>, %arg20: memref<2x8x128xf32, #tpu.memory_space<vmem>>, %arg21: memref<16x64xf32, #tpu.memory_space<vmem>>, %arg22: memref<16x32xf32, #tpu.memory_space<vmem>>) attributes {dimension_semantics = [#tpu.dimension_semantics<arbitrary>], iteration_bounds = array<i64: 1>, scalar_prefetch = 0 : i64, scratch_operands = 2 : i64, tpu.core_type = #tpu.core_type<tc>, window_params = [{pipeline_mode = #tpu.pipeline_mode<synchronous>, transform_indices = @transform_0, window_bounds = array<i64: 2, 8, 256>}, {pipeline_mode = #tpu.pipeline_mode<synchronous>, transform_indices = @transform_1, window_bounds = array<i64: 2, 8, 256>}, {pipeline_mode = #tpu.pipeline_mode<synchronous>, transform_indices = @transform_2, window_bounds = array<i64: 32, 128>}, {pipeline_mode = #tpu.pipeline_mode<synchronous>, transform_indices = @transform_3, window_bounds = array<i64: 32, 128>}, {pipeline_mode = #tpu.pipeline_mode<synchronous>, transform_indices = @transform_4, window_bounds = array<i64: 64, 32>}, {pipeline_mode = #tpu.pipeline_mode<synchronous>, transform_indices = @transform_5, window_bounds = array<i64: 1, 32>}, {pipeline_mode = #tpu.pipeline_mode<synchronous>, transform_indices = @transform_6, window_bounds = array<i64: 16, 256>}, {pipeline_mode = #tpu.pipeline_mode<synchronous>, transform_indices = @transform_7, window_bounds = array<i64: 32, 128>}, {pipeline_mode = #tpu.pipeline_mode<synchronous>, transform_indices = @transform_8, window_bounds = array<i64: 32, 128>}, {pipeline_mode = #tpu.pipeline_mode<synchronous>, transform_indices = @transform_9, window_bounds = array<i64: 64, 32>}, {pipeline_mode = #tpu.pipeline_mode<synchronous>, transform_indices = @transform_10, window_bounds = array<i64: 32, 32>}, {pipeline_mode = #tpu.pipeline_mode<synchronous>, transform_indices = @transform_11, window_bounds = array<i64: 1, 32>}, {pipeline_mode = #tpu.pipeline_mode<synchronous>, transform_indices = @transform_12, window_bounds = array<i64: 32, 32>}, {pipeline_mode = #tpu.pipeline_mode<synchronous>, transform_indices = @transform_13, window_bounds = array<i64: 1, 32>}, {pipeline_mode = #tpu.pipeline_mode<synchronous>, transform_indices = @transform_14, window_bounds = array<i64: 16, 128>}, {pipeline_mode = #tpu.pipeline_mode<synchronous>, transform_indices = @transform_15, window_bounds = array<i64: 16, 128>}, {pipeline_mode = #tpu.pipeline_mode<synchronous>, transform_indices = @transform_16, window_bounds = array<i64: 1, 128>}, {pipeline_mode = #tpu.pipeline_mode<synchronous>, transform_indices = @transform_17, window_bounds = array<i64: 2, 32>}, {pipeline_mode = #tpu.pipeline_mode<synchronous>, transform_indices = @transform_18, window_bounds = array<i64: 2, 8, 32>}, {pipeline_mode = #tpu.pipeline_mode<synchronous>, transform_indices = @transform_19, window_bounds = array<i64: 2, 8, 128>}]} {
    %c0 = arith.constant 0 : index
    %c0_0 = arith.constant 0 : index
    %c0_1 = arith.constant 0 : index
    %0 = vector.load %arg1[%c0, %c0_0, %c0_1] : memref<2x8x256xf32, #tpu.memory_space<vmem>>, vector<2x8x256xf32>
    %c0_2 = arith.constant 0 : index
    %c0_3 = arith.constant 0 : index
    %c0_4 = arith.constant 0 : index
    %1 = vector.load %arg2[%c0_2, %c0_3, %c0_4] : memref<2x8x256xf32, #tpu.memory_space<vmem>>, vector<2x8x256xf32>
    %c0_5 = arith.constant 0 : index
    %c0_6 = arith.constant 0 : index
    %2 = vector.load %arg3[%c0_5, %c0_6] : memref<32x128xf32, #tpu.memory_space<vmem>>, vector<32x128xf32>
    %c0_7 = arith.constant 0 : index
    %c0_8 = arith.constant 0 : index
    %3 = vector.load %arg4[%c0_7, %c0_8] : memref<32x128xf32, #tpu.memory_space<vmem>>, vector<32x128xf32>
    %c0_9 = arith.constant 0 : index
    %c0_10 = arith.constant 0 : index
    %4 = vector.load %arg8[%c0_9, %c0_10] : memref<32x128xf32, #tpu.memory_space<vmem>>, vector<32x128xf32>
    %c0_11 = arith.constant 0 : index
    %c0_12 = arith.constant 0 : index
    %5 = vector.load %arg9[%c0_11, %c0_12] : memref<32x128xf32, #tpu.memory_space<vmem>>, vector<32x128xf32>
    %c0_13 = arith.constant 0 : index
    %c0_14 = arith.constant 0 : index
    %6 = vector.load %arg10[%c0_13, %c0_14] : memref<64x32xf32, #tpu.memory_space<vmem>>, vector<64x32xf32>
    %c0_15 = arith.constant 0 : index
    %c0_16 = arith.constant 0 : index
    %7 = vector.load %arg11[%c0_15, %c0_16] : memref<32x32xf32, #tpu.memory_space<vmem>>, vector<32x32xf32>
    %c0_17 = arith.constant 0 : index
    %c0_18 = arith.constant 0 : index
    %8 = vector.load %arg12[%c0_17, %c0_18] : memref<1x32xf32, #tpu.memory_space<vmem>>, vector<1x32xf32>
    %c0_19 = arith.constant 0 : index
    %c0_20 = arith.constant 0 : index
    %9 = vector.load %arg13[%c0_19, %c0_20] : memref<32x32xf32, #tpu.memory_space<vmem>>, vector<32x32xf32>
    %c0_21 = arith.constant 0 : index
    %c0_22 = arith.constant 0 : index
    %10 = vector.load %arg14[%c0_21, %c0_22] : memref<1x32xf32, #tpu.memory_space<vmem>>, vector<1x32xf32>
    %cst = arith.constant 0.000000e+00 : f32
    %11 = vector.broadcast %cst : f32 to vector<2x32xf32>
    %cst_23 = arith.constant dense<0.000000e+00> : vector<2x128xf32>
    %12 = tpu.matmul %11, %2, %cst_23 {dimension_numbers = #tpu.dot_dimension_numbers<[1], [0], [0], [1], [0, 0, 1, 1], [], []>} : vector<2x32xf32>, vector<32x128xf32>, vector<2x128xf32> -> vector<2x128xf32>
    %13 = vector.extract_strided_slice %0 {offsets = [0, 0, 0], sizes = [2, 1, 128], strides = [1, 1, 1]} : vector<2x8x256xf32> to vector<2x1x128xf32>
    %14 = vector.shape_cast %13 : vector<2x1x128xf32> to vector<2x128xf32>
    %15 = arith.addf %12, %14 : vector<2x128xf32>
    %cst_24 = arith.constant dense<0.000000e+00> : vector<2x128xf32>
    %16 = tpu.matmul %11, %3, %cst_24 {dimension_numbers = #tpu.dot_dimension_numbers<[1], [0], [0], [1], [0, 0, 1, 1], [], []>} : vector<2x32xf32>, vector<32x128xf32>, vector<2x128xf32> -> vector<2x128xf32>
    %17 = vector.extract_strided_slice %0 {offsets = [0, 7, 128], sizes = [2, 1, 128], strides = [1, 1, 1]} : vector<2x8x256xf32> to vector<2x1x128xf32>
    %18 = vector.shape_cast %17 : vector<2x1x128xf32> to vector<2x128xf32>
    %19 = arith.addf %16, %18 : vector<2x128xf32>
    %20 = vector.extract_strided_slice %15 {offsets = [0, 0], sizes = [2, 32], strides = [1, 1]} : vector<2x128xf32> to vector<2x32xf32>
    %21 = arith.negf %20 : vector<2x32xf32>
    %22 = math.exp %21 : vector<2x32xf32>
    %cst_25 = arith.constant 1.000000e+00 : f32
    %23 = vector.broadcast %cst_25 : f32 to vector<2x32xf32>
    %24 = arith.addf %23, %22 : vector<2x32xf32>
    %25 = arith.divf %23, %24 : vector<2x32xf32>
    %26 = vector.extract_strided_slice %15 {offsets = [0, 32], sizes = [2, 32], strides = [1, 1]} : vector<2x128xf32> to vector<2x32xf32>
    %27 = arith.negf %26 : vector<2x32xf32>
    %28 = math.exp %27 : vector<2x32xf32>
    %cst_26 = arith.constant 1.000000e+00 : f32
    %29 = vector.broadcast %cst_26 : f32 to vector<2x32xf32>
    %30 = arith.addf %29, %28 : vector<2x32xf32>
    %31 = arith.divf %29, %30 : vector<2x32xf32>
    %32 = vector.extract_strided_slice %15 {offsets = [0, 64], sizes = [2, 32], strides = [1, 1]} : vector<2x128xf32> to vector<2x32xf32>
    %33 = math.tanh %32 : vector<2x32xf32>
    %34 = vector.extract_strided_slice %15 {offsets = [0, 96], sizes = [2, 32], strides = [1, 1]} : vector<2x128xf32> to vector<2x32xf32>
    %35 = arith.negf %34 : vector<2x32xf32>
    %36 = math.exp %35 : vector<2x32xf32>
    %cst_27 = arith.constant 1.000000e+00 : f32
    %37 = vector.broadcast %cst_27 : f32 to vector<2x32xf32>
    %38 = arith.addf %37, %36 : vector<2x32xf32>
    %39 = arith.divf %37, %38 : vector<2x32xf32>
    %40 = arith.mulf %31, %11 : vector<2x32xf32>
    %41 = arith.mulf %25, %33 : vector<2x32xf32>
    %42 = arith.addf %40, %41 : vector<2x32xf32>
    %43 = math.tanh %42 : vector<2x32xf32>
    %44 = arith.mulf %39, %43 : vector<2x32xf32>
    %45 = vector.extract_strided_slice %19 {offsets = [0, 0], sizes = [2, 32], strides = [1, 1]} : vector<2x128xf32> to vector<2x32xf32>
    %46 = arith.negf %45 : vector<2x32xf32>
    %47 = math.exp %46 : vector<2x32xf32>
    %cst_28 = arith.constant 1.000000e+00 : f32
    %48 = vector.broadcast %cst_28 : f32 to vector<2x32xf32>
    %49 = arith.addf %48, %47 : vector<2x32xf32>
    %50 = arith.divf %48, %49 : vector<2x32xf32>
    %51 = vector.extract_strided_slice %19 {offsets = [0, 32], sizes = [2, 32], strides = [1, 1]} : vector<2x128xf32> to vector<2x32xf32>
    %52 = arith.negf %51 : vector<2x32xf32>
    %53 = math.exp %52 : vector<2x32xf32>
    %cst_29 = arith.constant 1.000000e+00 : f32
    %54 = vector.broadcast %cst_29 : f32 to vector<2x32xf32>
    %55 = arith.addf %54, %53 : vector<2x32xf32>
    %56 = arith.divf %54, %55 : vector<2x32xf32>
    %57 = vector.extract_strided_slice %19 {offsets = [0, 64], sizes = [2, 32], strides = [1, 1]} : vector<2x128xf32> to vector<2x32xf32>
    %58 = math.tanh %57 : vector<2x32xf32>
    %59 = vector.extract_strided_slice %19 {offsets = [0, 96], sizes = [2, 32], strides = [1, 1]} : vector<2x128xf32> to vector<2x32xf32>
    %60 = arith.negf %59 : vector<2x32xf32>
    %61 = math.exp %60 : vector<2x32xf32>
    %cst_30 = arith.constant 1.000000e+00 : f32
    %62 = vector.broadcast %cst_30 : f32 to vector<2x32xf32>
    %63 = arith.addf %62, %61 : vector<2x32xf32>
    %64 = arith.divf %62, %63 : vector<2x32xf32>
    %65 = arith.mulf %56, %11 : vector<2x32xf32>
    %66 = arith.mulf %50, %58 : vector<2x32xf32>
    %67 = arith.addf %65, %66 : vector<2x32xf32>
    %68 = math.tanh %67 : vector<2x32xf32>
    %69 = arith.mulf %64, %68 : vector<2x32xf32>
    %cst_31 = arith.constant dense<0.000000e+00> : vector<2x128xf32>
    %70 = tpu.matmul %44, %2, %cst_31 {dimension_numbers = #tpu.dot_dimension_numbers<[1], [0], [0], [1], [0, 0, 1, 1], [], []>} : vector<2x32xf32>, vector<32x128xf32>, vector<2x128xf32> -> vector<2x128xf32>
    %71 = vector.extract_strided_slice %0 {offsets = [0, 1, 0], sizes = [2, 1, 128], strides = [1, 1, 1]} : vector<2x8x256xf32> to vector<2x1x128xf32>
    %72 = vector.shape_cast %71 : vector<2x1x128xf32> to vector<2x128xf32>
    %73 = arith.addf %70, %72 : vector<2x128xf32>
    %74 = vector.extract_strided_slice %73 {offsets = [0, 0], sizes = [2, 32], strides = [1, 1]} : vector<2x128xf32> to vector<2x32xf32>
    %75 = arith.negf %74 : vector<2x32xf32>
    %76 = math.exp %75 : vector<2x32xf32>
    %cst_32 = arith.constant 1.000000e+00 : f32
    %77 = vector.broadcast %cst_32 : f32 to vector<2x32xf32>
    %78 = arith.addf %77, %76 : vector<2x32xf32>
    %79 = arith.divf %77, %78 : vector<2x32xf32>
    %80 = vector.extract_strided_slice %73 {offsets = [0, 32], sizes = [2, 32], strides = [1, 1]} : vector<2x128xf32> to vector<2x32xf32>
    %81 = arith.negf %80 : vector<2x32xf32>
    %82 = math.exp %81 : vector<2x32xf32>
    %cst_33 = arith.constant 1.000000e+00 : f32
    %83 = vector.broadcast %cst_33 : f32 to vector<2x32xf32>
    %84 = arith.addf %83, %82 : vector<2x32xf32>
    %85 = arith.divf %83, %84 : vector<2x32xf32>
    %86 = vector.extract_strided_slice %73 {offsets = [0, 64], sizes = [2, 32], strides = [1, 1]} : vector<2x128xf32> to vector<2x32xf32>
    %87 = math.tanh %86 : vector<2x32xf32>
    %88 = vector.extract_strided_slice %73 {offsets = [0, 96], sizes = [2, 32], strides = [1, 1]} : vector<2x128xf32> to vector<2x32xf32>
    %89 = arith.negf %88 : vector<2x32xf32>
    %90 = math.exp %89 : vector<2x32xf32>
    %cst_34 = arith.constant 1.000000e+00 : f32
    %91 = vector.broadcast %cst_34 : f32 to vector<2x32xf32>
    %92 = arith.addf %91, %90 : vector<2x32xf32>
    %93 = arith.divf %91, %92 : vector<2x32xf32>
    %94 = arith.mulf %85, %42 : vector<2x32xf32>
    %95 = arith.mulf %79, %87 : vector<2x32xf32>
    %96 = arith.addf %94, %95 : vector<2x32xf32>
    %97 = math.tanh %96 : vector<2x32xf32>
    %98 = arith.mulf %93, %97 : vector<2x32xf32>
    %cst_35 = arith.constant dense<0.000000e+00> : vector<2x128xf32>
    %99 = tpu.matmul %98, %2, %cst_35 {dimension_numbers = #tpu.dot_dimension_numbers<[1], [0], [0], [1], [0, 0, 1, 1], [], []>} : vector<2x32xf32>, vector<32x128xf32>, vector<2x128xf32> -> vector<2x128xf32>
    %100 = vector.extract_strided_slice %0 {offsets = [0, 2, 0], sizes = [2, 1, 128], strides = [1, 1, 1]} : vector<2x8x256xf32> to vector<2x1x128xf32>
    %101 = vector.shape_cast %100 : vector<2x1x128xf32> to vector<2x128xf32>
    %102 = arith.addf %99, %101 : vector<2x128xf32>
    %103 = vector.extract_strided_slice %102 {offsets = [0, 0], sizes = [2, 32], strides = [1, 1]} : vector<2x128xf32> to vector<2x32xf32>
    %104 = arith.negf %103 : vector<2x32xf32>
    %105 = math.exp %104 : vector<2x32xf32>
    %cst_36 = arith.constant 1.000000e+00 : f32
    %106 = vector.broadcast %cst_36 : f32 to vector<2x32xf32>
    %107 = arith.addf %106, %105 : vector<2x32xf32>
    %108 = arith.divf %106, %107 : vector<2x32xf32>
    %109 = vector.extract_strided_slice %102 {offsets = [0, 32], sizes = [2, 32], strides = [1, 1]} : vector<2x128xf32> to vector<2x32xf32>
    %110 = arith.negf %109 : vector<2x32xf32>
    %111 = math.exp %110 : vector<2x32xf32>
    %cst_37 = arith.constant 1.000000e+00 : f32
    %112 = vector.broadcast %cst_37 : f32 to vector<2x32xf32>
    %113 = arith.addf %112, %111 : vector<2x32xf32>
    %114 = arith.divf %112, %113 : vector<2x32xf32>
    %115 = vector.extract_strided_slice %102 {offsets = [0, 64], sizes = [2, 32], strides = [1, 1]} : vector<2x128xf32> to vector<2x32xf32>
    %116 = math.tanh %115 : vector<2x32xf32>
    %117 = vector.extract_strided_slice %102 {offsets = [0, 96], sizes = [2, 32], strides = [1, 1]} : vector<2x128xf32> to vector<2x32xf32>
    %118 = arith.negf %117 : vector<2x32xf32>
    %119 = math.exp %118 : vector<2x32xf32>
    %cst_38 = arith.constant 1.000000e+00 : f32
    %120 = vector.broadcast %cst_38 : f32 to vector<2x32xf32>
    %121 = arith.addf %120, %119 : vector<2x32xf32>
    %122 = arith.divf %120, %121 : vector<2x32xf32>
    %123 = arith.mulf %114, %96 : vector<2x32xf32>
    %124 = arith.mulf %108, %116 : vector<2x32xf32>
    %125 = arith.addf %123, %124 : vector<2x32xf32>
    %126 = math.tanh %125 : vector<2x32xf32>
    %127 = arith.mulf %122, %126 : vector<2x32xf32>
    %cst_39 = arith.constant dense<0.000000e+00> : vector<2x128xf32>
    %128 = tpu.matmul %127, %2, %cst_39 {dimension_numbers = #tpu.dot_dimension_numbers<[1], [0], [0], [1], [0, 0, 1, 1], [], []>} : vector<2x32xf32>, vector<32x128xf32>, vector<2x128xf32> -> vector<2x128xf32>
    %129 = vector.extract_strided_slice %0 {offsets = [0, 3, 0], sizes = [2, 1, 128], strides = [1, 1, 1]} : vector<2x8x256xf32> to vector<2x1x128xf32>
    %130 = vector.shape_cast %129 : vector<2x1x128xf32> to vector<2x128xf32>
    %131 = arith.addf %128, %130 : vector<2x128xf32>
    %132 = vector.extract_strided_slice %131 {offsets = [0, 0], sizes = [2, 32], strides = [1, 1]} : vector<2x128xf32> to vector<2x32xf32>
    %133 = arith.negf %132 : vector<2x32xf32>
    %134 = math.exp %133 : vector<2x32xf32>
    %cst_40 = arith.constant 1.000000e+00 : f32
    %135 = vector.broadcast %cst_40 : f32 to vector<2x32xf32>
    %136 = arith.addf %135, %134 : vector<2x32xf32>
    %137 = arith.divf %135, %136 : vector<2x32xf32>
    %138 = vector.extract_strided_slice %131 {offsets = [0, 32], sizes = [2, 32], strides = [1, 1]} : vector<2x128xf32> to vector<2x32xf32>
    %139 = arith.negf %138 : vector<2x32xf32>
    %140 = math.exp %139 : vector<2x32xf32>
    %cst_41 = arith.constant 1.000000e+00 : f32
    %141 = vector.broadcast %cst_41 : f32 to vector<2x32xf32>
    %142 = arith.addf %141, %140 : vector<2x32xf32>
    %143 = arith.divf %141, %142 : vector<2x32xf32>
    %144 = vector.extract_strided_slice %131 {offsets = [0, 64], sizes = [2, 32], strides = [1, 1]} : vector<2x128xf32> to vector<2x32xf32>
    %145 = math.tanh %144 : vector<2x32xf32>
    %146 = vector.extract_strided_slice %131 {offsets = [0, 96], sizes = [2, 32], strides = [1, 1]} : vector<2x128xf32> to vector<2x32xf32>
    %147 = arith.negf %146 : vector<2x32xf32>
    %148 = math.exp %147 : vector<2x32xf32>
    %cst_42 = arith.constant 1.000000e+00 : f32
    %149 = vector.broadcast %cst_42 : f32 to vector<2x32xf32>
    %150 = arith.addf %149, %148 : vector<2x32xf32>
    %151 = arith.divf %149, %150 : vector<2x32xf32>
    %152 = arith.mulf %143, %125 : vector<2x32xf32>
    %153 = arith.mulf %137, %145 : vector<2x32xf32>
    %154 = arith.addf %152, %153 : vector<2x32xf32>
    %155 = math.tanh %154 : vector<2x32xf32>
    %156 = arith.mulf %151, %155 : vector<2x32xf32>
    %cst_43 = arith.constant dense<0.000000e+00> : vector<2x128xf32>
    %157 = tpu.matmul %156, %2, %cst_43 {dimension_numbers = #tpu.dot_dimension_numbers<[1], [0], [0], [1], [0, 0, 1, 1], [], []>} : vector<2x32xf32>, vector<32x128xf32>, vector<2x128xf32> -> vector<2x128xf32>
    %158 = vector.extract_strided_slice %0 {offsets = [0, 4, 0], sizes = [2, 1, 128], strides = [1, 1, 1]} : vector<2x8x256xf32> to vector<2x1x128xf32>
    %159 = vector.shape_cast %158 : vector<2x1x128xf32> to vector<2x128xf32>
    %160 = arith.addf %157, %159 : vector<2x128xf32>
    %161 = vector.extract_strided_slice %160 {offsets = [0, 0], sizes = [2, 32], strides = [1, 1]} : vector<2x128xf32> to vector<2x32xf32>
    %162 = arith.negf %161 : vector<2x32xf32>
    %163 = math.exp %162 : vector<2x32xf32>
    %cst_44 = arith.constant 1.000000e+00 : f32
    %164 = vector.broadcast %cst_44 : f32 to vector<2x32xf32>
    %165 = arith.addf %164, %163 : vector<2x32xf32>
    %166 = arith.divf %164, %165 : vector<2x32xf32>
    %167 = vector.extract_strided_slice %160 {offsets = [0, 32], sizes = [2, 32], strides = [1, 1]} : vector<2x128xf32> to vector<2x32xf32>
    %168 = arith.negf %167 : vector<2x32xf32>
    %169 = math.exp %168 : vector<2x32xf32>
    %cst_45 = arith.constant 1.000000e+00 : f32
    %170 = vector.broadcast %cst_45 : f32 to vector<2x32xf32>
    %171 = arith.addf %170, %169 : vector<2x32xf32>
    %172 = arith.divf %170, %171 : vector<2x32xf32>
    %173 = vector.extract_strided_slice %160 {offsets = [0, 64], sizes = [2, 32], strides = [1, 1]} : vector<2x128xf32> to vector<2x32xf32>
    %174 = math.tanh %173 : vector<2x32xf32>
    %175 = vector.extract_strided_slice %160 {offsets = [0, 96], sizes = [2, 32], strides = [1, 1]} : vector<2x128xf32> to vector<2x32xf32>
    %176 = arith.negf %175 : vector<2x32xf32>
    %177 = math.exp %176 : vector<2x32xf32>
    %cst_46 = arith.constant 1.000000e+00 : f32
    %178 = vector.broadcast %cst_46 : f32 to vector<2x32xf32>
    %179 = arith.addf %178, %177 : vector<2x32xf32>
    %180 = arith.divf %178, %179 : vector<2x32xf32>
    %181 = arith.mulf %172, %154 : vector<2x32xf32>
    %182 = arith.mulf %166, %174 : vector<2x32xf32>
    %183 = arith.addf %181, %182 : vector<2x32xf32>
    %184 = math.tanh %183 : vector<2x32xf32>
    %185 = arith.mulf %180, %184 : vector<2x32xf32>
    %cst_47 = arith.constant dense<0.000000e+00> : vector<2x128xf32>
    %186 = tpu.matmul %185, %2, %cst_47 {dimension_numbers = #tpu.dot_dimension_numbers<[1], [0], [0], [1], [0, 0, 1, 1], [], []>} : vector<2x32xf32>, vector<32x128xf32>, vector<2x128xf32> -> vector<2x128xf32>
    %187 = vector.extract_strided_slice %0 {offsets = [0, 5, 0], sizes = [2, 1, 128], strides = [1, 1, 1]} : vector<2x8x256xf32> to vector<2x1x128xf32>
    %188 = vector.shape_cast %187 : vector<2x1x128xf32> to vector<2x128xf32>
    %189 = arith.addf %186, %188 : vector<2x128xf32>
    %190 = vector.extract_strided_slice %189 {offsets = [0, 0], sizes = [2, 32], strides = [1, 1]} : vector<2x128xf32> to vector<2x32xf32>
    %191 = arith.negf %190 : vector<2x32xf32>
    %192 = math.exp %191 : vector<2x32xf32>
    %cst_48 = arith.constant 1.000000e+00 : f32
    %193 = vector.broadcast %cst_48 : f32 to vector<2x32xf32>
    %194 = arith.addf %193, %192 : vector<2x32xf32>
    %195 = arith.divf %193, %194 : vector<2x32xf32>
    %196 = vector.extract_strided_slice %189 {offsets = [0, 32], sizes = [2, 32], strides = [1, 1]} : vector<2x128xf32> to vector<2x32xf32>
    %197 = arith.negf %196 : vector<2x32xf32>
    %198 = math.exp %197 : vector<2x32xf32>
    %cst_49 = arith.constant 1.000000e+00 : f32
    %199 = vector.broadcast %cst_49 : f32 to vector<2x32xf32>
    %200 = arith.addf %199, %198 : vector<2x32xf32>
    %201 = arith.divf %199, %200 : vector<2x32xf32>
    %202 = vector.extract_strided_slice %189 {offsets = [0, 64], sizes = [2, 32], strides = [1, 1]} : vector<2x128xf32> to vector<2x32xf32>
    %203 = math.tanh %202 : vector<2x32xf32>
    %204 = vector.extract_strided_slice %189 {offsets = [0, 96], sizes = [2, 32], strides = [1, 1]} : vector<2x128xf32> to vector<2x32xf32>
    %205 = arith.negf %204 : vector<2x32xf32>
    %206 = math.exp %205 : vector<2x32xf32>
    %cst_50 = arith.constant 1.000000e+00 : f32
    %207 = vector.broadcast %cst_50 : f32 to vector<2x32xf32>
    %208 = arith.addf %207, %206 : vector<2x32xf32>
    %209 = arith.divf %207, %208 : vector<2x32xf32>
    %210 = arith.mulf %201, %183 : vector<2x32xf32>
    %211 = arith.mulf %195, %203 : vector<2x32xf32>
    %212 = arith.addf %210, %211 : vector<2x32xf32>
    %213 = math.tanh %212 : vector<2x32xf32>
    %214 = arith.mulf %209, %213 : vector<2x32xf32>
    %cst_51 = arith.constant dense<0.000000e+00> : vector<2x128xf32>
    %215 = tpu.matmul %214, %2, %cst_51 {dimension_numbers = #tpu.dot_dimension_numbers<[1], [0], [0], [1], [0, 0, 1, 1], [], []>} : vector<2x32xf32>, vector<32x128xf32>, vector<2x128xf32> -> vector<2x128xf32>
    %216 = vector.extract_strided_slice %0 {offsets = [0, 6, 0], sizes = [2, 1, 128], strides = [1, 1, 1]} : vector<2x8x256xf32> to vector<2x1x128xf32>
    %217 = vector.shape_cast %216 : vector<2x1x128xf32> to vector<2x128xf32>
    %218 = arith.addf %215, %217 : vector<2x128xf32>
    %219 = vector.extract_strided_slice %218 {offsets = [0, 0], sizes = [2, 32], strides = [1, 1]} : vector<2x128xf32> to vector<2x32xf32>
    %220 = arith.negf %219 : vector<2x32xf32>
    %221 = math.exp %220 : vector<2x32xf32>
    %cst_52 = arith.constant 1.000000e+00 : f32
    %222 = vector.broadcast %cst_52 : f32 to vector<2x32xf32>
    %223 = arith.addf %222, %221 : vector<2x32xf32>
    %224 = arith.divf %222, %223 : vector<2x32xf32>
    %225 = vector.extract_strided_slice %218 {offsets = [0, 32], sizes = [2, 32], strides = [1, 1]} : vector<2x128xf32> to vector<2x32xf32>
    %226 = arith.negf %225 : vector<2x32xf32>
    %227 = math.exp %226 : vector<2x32xf32>
    %cst_53 = arith.constant 1.000000e+00 : f32
    %228 = vector.broadcast %cst_53 : f32 to vector<2x32xf32>
    %229 = arith.addf %228, %227 : vector<2x32xf32>
    %230 = arith.divf %228, %229 : vector<2x32xf32>
    %231 = vector.extract_strided_slice %218 {offsets = [0, 64], sizes = [2, 32], strides = [1, 1]} : vector<2x128xf32> to vector<2x32xf32>
    %232 = math.tanh %231 : vector<2x32xf32>
    %233 = vector.extract_strided_slice %218 {offsets = [0, 96], sizes = [2, 32], strides = [1, 1]} : vector<2x128xf32> to vector<2x32xf32>
    %234 = arith.negf %233 : vector<2x32xf32>
    %235 = math.exp %234 : vector<2x32xf32>
    %cst_54 = arith.constant 1.000000e+00 : f32
    %236 = vector.broadcast %cst_54 : f32 to vector<2x32xf32>
    %237 = arith.addf %236, %235 : vector<2x32xf32>
    %238 = arith.divf %236, %237 : vector<2x32xf32>
    %239 = arith.mulf %230, %212 : vector<2x32xf32>
    %240 = arith.mulf %224, %232 : vector<2x32xf32>
    %241 = arith.addf %239, %240 : vector<2x32xf32>
    %242 = math.tanh %241 : vector<2x32xf32>
    %243 = arith.mulf %238, %242 : vector<2x32xf32>
    %cst_55 = arith.constant dense<0.000000e+00> : vector<2x128xf32>
    %244 = tpu.matmul %243, %2, %cst_55 {dimension_numbers = #tpu.dot_dimension_numbers<[1], [0], [0], [1], [0, 0, 1, 1], [], []>} : vector<2x32xf32>, vector<32x128xf32>, vector<2x128xf32> -> vector<2x128xf32>
    %245 = vector.extract_strided_slice %0 {offsets = [0, 7, 0], sizes = [2, 1, 128], strides = [1, 1, 1]} : vector<2x8x256xf32> to vector<2x1x128xf32>
    %246 = vector.shape_cast %245 : vector<2x1x128xf32> to vector<2x128xf32>
    %247 = arith.addf %244, %246 : vector<2x128xf32>
    %248 = vector.extract_strided_slice %247 {offsets = [0, 0], sizes = [2, 32], strides = [1, 1]} : vector<2x128xf32> to vector<2x32xf32>
    %249 = arith.negf %248 : vector<2x32xf32>
    %250 = math.exp %249 : vector<2x32xf32>
    %cst_56 = arith.constant 1.000000e+00 : f32
    %251 = vector.broadcast %cst_56 : f32 to vector<2x32xf32>
    %252 = arith.addf %251, %250 : vector<2x32xf32>
    %253 = arith.divf %251, %252 : vector<2x32xf32>
    %254 = vector.extract_strided_slice %247 {offsets = [0, 32], sizes = [2, 32], strides = [1, 1]} : vector<2x128xf32> to vector<2x32xf32>
    %255 = arith.negf %254 : vector<2x32xf32>
    %256 = math.exp %255 : vector<2x32xf32>
    %cst_57 = arith.constant 1.000000e+00 : f32
    %257 = vector.broadcast %cst_57 : f32 to vector<2x32xf32>
    %258 = arith.addf %257, %256 : vector<2x32xf32>
    %259 = arith.divf %257, %258 : vector<2x32xf32>
    %260 = vector.extract_strided_slice %247 {offsets = [0, 64], sizes = [2, 32], strides = [1, 1]} : vector<2x128xf32> to vector<2x32xf32>
    %261 = math.tanh %260 : vector<2x32xf32>
    %262 = vector.extract_strided_slice %247 {offsets = [0, 96], sizes = [2, 32], strides = [1, 1]} : vector<2x128xf32> to vector<2x32xf32>
    %263 = arith.negf %262 : vector<2x32xf32>
    %264 = math.exp %263 : vector<2x32xf32>
    %cst_58 = arith.constant 1.000000e+00 : f32
    %265 = vector.broadcast %cst_58 : f32 to vector<2x32xf32>
    %266 = arith.addf %265, %264 : vector<2x32xf32>
    %267 = arith.divf %265, %266 : vector<2x32xf32>
    %268 = arith.mulf %259, %241 : vector<2x32xf32>
    %269 = arith.mulf %253, %261 : vector<2x32xf32>
    %270 = arith.addf %268, %269 : vector<2x32xf32>
    %271 = math.tanh %270 : vector<2x32xf32>
    %272 = arith.mulf %267, %271 : vector<2x32xf32>
    %273 = tpu.concatenate %272, %69 in 1 : vector<2x32xf32>, vector<2x32xf32> -> vector<2x64xf32>
    %c0_59 = arith.constant 0 : index
    %c0_60 = arith.constant 0 : index
    %274 = vector.load %arg5[%c0_59, %c0_60] : memref<64x32xf32, #tpu.memory_space<vmem>>, vector<64x32xf32>
    %cst_61 = arith.constant dense<0.000000e+00> : vector<2x32xf32>
    %275 = tpu.matmul %273, %274, %cst_61 {dimension_numbers = #tpu.dot_dimension_numbers<[1], [0], [0], [1], [0, 0, 1, 1], [], []>} : vector<2x64xf32>, vector<64x32xf32>, vector<2x32xf32> -> vector<2x32xf32>
    %c0_62 = arith.constant 0 : index
    %c0_63 = arith.constant 0 : index
    %276 = vector.load %arg6[%c0_62, %c0_63] : memref<1x32xf32, #tpu.memory_space<vmem>>, vector<1x32xf32>
    %277 = vector.broadcast %276 : vector<1x32xf32> to vector<2x32xf32>
    %278 = arith.addf %275, %277 : vector<2x32xf32>
    %cst_64 = arith.constant 0.000000e+00 : f32
    %279 = vector.broadcast %cst_64 : f32 to vector<2x32xf32>
    %280 = arith.cmpf ogt, %278, %279 : vector<2x32xf32>
    %cst_65 = arith.constant 2.000000e-01 : f32
    %281 = vector.broadcast %cst_65 : f32 to vector<2x32xf32>
    %282 = arith.mulf %281, %278 : vector<2x32xf32>
    %283 = arith.select %280, %278, %282 : vector<2x32xi1>, vector<2x32xf32>
    %c0_66 = arith.constant 0 : index
    %c0_67 = arith.constant 0 : index
    %284 = vector.load %arg18[%c0_66, %c0_67] : memref<2x32xf32, #tpu.memory_space<vmem>>, vector<2x32xf32>
    tpu.vector_store %arg18[%c0_66, %c0_67], %283 {strides = array<i32>} : memref<2x32xf32, #tpu.memory_space<vmem>>, vector<2x32xf32>,
    %285 = vector.extract_strided_slice %283 {offsets = [0, 0], sizes = [2, 16], strides = [1, 1]} : vector<2x32xf32> to vector<2x16xf32>
    %c0_68 = arith.constant 0 : index
    %c0_69 = arith.constant 0 : index
    %286 = vector.load %arg7[%c0_68, %c0_69] : memref<16x256xf32, #tpu.memory_space<vmem>>, vector<16x256xf32>
    %cst_70 = arith.constant dense<0.000000e+00> : vector<2x256xf32>
    %287 = tpu.matmul %285, %286, %cst_70 {dimension_numbers = #tpu.dot_dimension_numbers<[1], [0], [0], [1], [0, 0, 1, 1], [], []>} : vector<2x16xf32>, vector<16x256xf32>, vector<2x256xf32> -> vector<2x256xf32>
    %c0_71 = arith.constant 0 : index
    %c0_72 = arith.constant 0 : index
    %288 = vector.load %arg15[%c0_71, %c0_72] : memref<16x128xf32, #tpu.memory_space<vmem>>, vector<16x128xf32>
    %cst_73 = arith.constant dense<0.000000e+00> : vector<2x128xf32>
    %289 = tpu.matmul %285, %288, %cst_73 {dimension_numbers = #tpu.dot_dimension_numbers<[1], [0], [0], [1], [0, 0, 1, 1], [], []>} : vector<2x16xf32>, vector<16x128xf32>, vector<2x128xf32> -> vector<2x128xf32>
    %c0_74 = arith.constant 0 : index
    %c0_75 = arith.constant 0 : index
    %290 = vector.load %arg17[%c0_74, %c0_75] : memref<1x128xf32, #tpu.memory_space<vmem>>, vector<1x128xf32>
    %291 = vector.broadcast %290 : vector<1x128xf32> to vector<2x128xf32>
    %292 = arith.addf %289, %291 : vector<2x128xf32>
    %cst_76 = arith.constant dense<0.000000e+00> : vector<2x128xf32>
    %293 = tpu.matmul %11, %4, %cst_76 {dimension_numbers = #tpu.dot_dimension_numbers<[1], [0], [0], [1], [0, 0, 1, 1], [], []>} : vector<2x32xf32>, vector<32x128xf32>, vector<2x128xf32> -> vector<2x128xf32>
    %294 = vector.extract_strided_slice %1 {offsets = [0, 0, 0], sizes = [2, 1, 128], strides = [1, 1, 1]} : vector<2x8x256xf32> to vector<2x1x128xf32>
    %295 = vector.shape_cast %294 : vector<2x1x128xf32> to vector<2x128xf32>
    %296 = arith.addf %293, %295 : vector<2x128xf32>
    %297 = vector.extract_strided_slice %287 {offsets = [0, 0], sizes = [2, 128], strides = [1, 1]} : vector<2x256xf32> to vector<2x128xf32>
    %298 = arith.addf %296, %297 : vector<2x128xf32>
    %cst_77 = arith.constant dense<0.000000e+00> : vector<2x128xf32>
    %299 = tpu.matmul %11, %5, %cst_77 {dimension_numbers = #tpu.dot_dimension_numbers<[1], [0], [0], [1], [0, 0, 1, 1], [], []>} : vector<2x32xf32>, vector<32x128xf32>, vector<2x128xf32> -> vector<2x128xf32>
    %300 = vector.extract_strided_slice %1 {offsets = [0, 7, 128], sizes = [2, 1, 128], strides = [1, 1, 1]} : vector<2x8x256xf32> to vector<2x1x128xf32>
    %301 = vector.shape_cast %300 : vector<2x1x128xf32> to vector<2x128xf32>
    %302 = arith.addf %299, %301 : vector<2x128xf32>
    %303 = vector.extract_strided_slice %287 {offsets = [0, 128], sizes = [2, 128], strides = [1, 1]} : vector<2x256xf32> to vector<2x128xf32>
    %304 = arith.addf %302, %303 : vector<2x128xf32>
    %305 = vector.extract_strided_slice %298 {offsets = [0, 0], sizes = [2, 32], strides = [1, 1]} : vector<2x128xf32> to vector<2x32xf32>
    %306 = arith.negf %305 : vector<2x32xf32>
    %307 = math.exp %306 : vector<2x32xf32>
    %cst_78 = arith.constant 1.000000e+00 : f32
    %308 = vector.broadcast %cst_78 : f32 to vector<2x32xf32>
    %309 = arith.addf %308, %307 : vector<2x32xf32>
    %310 = arith.divf %308, %309 : vector<2x32xf32>
    %311 = vector.extract_strided_slice %298 {offsets = [0, 32], sizes = [2, 32], strides = [1, 1]} : vector<2x128xf32> to vector<2x32xf32>
    %312 = arith.negf %311 : vector<2x32xf32>
    %313 = math.exp %312 : vector<2x32xf32>
    %cst_79 = arith.constant 1.000000e+00 : f32
    %314 = vector.broadcast %cst_79 : f32 to vector<2x32xf32>
    %315 = arith.addf %314, %313 : vector<2x32xf32>
    %316 = arith.divf %314, %315 : vector<2x32xf32>
    %317 = vector.extract_strided_slice %298 {offsets = [0, 64], sizes = [2, 32], strides = [1, 1]} : vector<2x128xf32> to vector<2x32xf32>
    %318 = math.tanh %317 : vector<2x32xf32>
    %319 = vector.extract_strided_slice %298 {offsets = [0, 96], sizes = [2, 32], strides = [1, 1]} : vector<2x128xf32> to vector<2x32xf32>
    %320 = arith.negf %319 : vector<2x32xf32>
    %321 = math.exp %320 : vector<2x32xf32>
    %cst_80 = arith.constant 1.000000e+00 : f32
    %322 = vector.broadcast %cst_80 : f32 to vector<2x32xf32>
    %323 = arith.addf %322, %321 : vector<2x32xf32>
    %324 = arith.divf %322, %323 : vector<2x32xf32>
    %325 = arith.mulf %316, %11 : vector<2x32xf32>
    %326 = arith.mulf %310, %318 : vector<2x32xf32>
    %327 = arith.addf %325, %326 : vector<2x32xf32>
    %328 = math.tanh %327 : vector<2x32xf32>
    %329 = arith.mulf %324, %328 : vector<2x32xf32>
    %330 = vector.extract_strided_slice %304 {offsets = [0, 0], sizes = [2, 32], strides = [1, 1]} : vector<2x128xf32> to vector<2x32xf32>
    %331 = arith.negf %330 : vector<2x32xf32>
    %332 = math.exp %331 : vector<2x32xf32>
    %cst_81 = arith.constant 1.000000e+00 : f32
    %333 = vector.broadcast %cst_81 : f32 to vector<2x32xf32>
    %334 = arith.addf %333, %332 : vector<2x32xf32>
    %335 = arith.divf %333, %334 : vector<2x32xf32>
    %336 = vector.extract_strided_slice %304 {offsets = [0, 32], sizes = [2, 32], strides = [1, 1]} : vector<2x128xf32> to vector<2x32xf32>
    %337 = arith.negf %336 : vector<2x32xf32>
    %338 = math.exp %337 : vector<2x32xf32>
    %cst_82 = arith.constant 1.000000e+00 : f32
    %339 = vector.broadcast %cst_82 : f32 to vector<2x32xf32>
    %340 = arith.addf %339, %338 : vector<2x32xf32>
    %341 = arith.divf %339, %340 : vector<2x32xf32>
    %342 = vector.extract_strided_slice %304 {offsets = [0, 64], sizes = [2, 32], strides = [1, 1]} : vector<2x128xf32> to vector<2x32xf32>
    %343 = math.tanh %342 : vector<2x32xf32>
    %344 = vector.extract_strided_slice %304 {offsets = [0, 96], sizes = [2, 32], strides = [1, 1]} : vector<2x128xf32> to vector<2x32xf32>
    %345 = arith.negf %344 : vector<2x32xf32>
    %346 = math.exp %345 : vector<2x32xf32>
    %cst_83 = arith.constant 1.000000e+00 : f32
    %347 = vector.broadcast %cst_83 : f32 to vector<2x32xf32>
    %348 = arith.addf %347, %346 : vector<2x32xf32>
    %349 = arith.divf %347, %348 : vector<2x32xf32>
    %350 = arith.mulf %341, %11 : vector<2x32xf32>
    %351 = arith.mulf %335, %343 : vector<2x32xf32>
    %352 = arith.addf %350, %351 : vector<2x32xf32>
    %353 = math.tanh %352 : vector<2x32xf32>
    %354 = arith.mulf %349, %353 : vector<2x32xf32>
    %c0_84 = arith.constant 0 : index
    %c0_85 = arith.constant 0 : index
    %355 = vector.load %arg21[%c0_84, %c0_85] : memref<16x64xf32, #tpu.memory_space<vmem>>, vector<2x32xf32>
    tpu.vector_store %arg21[%c0_84, %c0_85], %329 {strides = array<i32>} : memref<16x64xf32, #tpu.memory_space<vmem>>, vector<2x32xf32>,
    %c14 = arith.constant 14 : index
    %c32 = arith.constant 32 : index
    %356 = vector.load %arg21[%c14, %c32] : memref<16x64xf32, #tpu.memory_space<vmem>>, vector<2x32xf32>
    tpu.vector_store %arg21[%c14, %c32], %354 {strides = array<i32>} : memref<16x64xf32, #tpu.memory_space<vmem>>, vector<2x32xf32>,
    %cst_86 = arith.constant dense<0.000000e+00> : vector<2x128xf32>
    %357 = tpu.matmul %329, %4, %cst_86 {dimension_numbers = #tpu.dot_dimension_numbers<[1], [0], [0], [1], [0, 0, 1, 1], [], []>} : vector<2x32xf32>, vector<32x128xf32>, vector<2x128xf32> -> vector<2x128xf32>
    %358 = vector.extract_strided_slice %1 {offsets = [0, 1, 0], sizes = [2, 1, 128], strides = [1, 1, 1]} : vector<2x8x256xf32> to vector<2x1x128xf32>
    %359 = vector.shape_cast %358 : vector<2x1x128xf32> to vector<2x128xf32>
    %360 = arith.addf %357, %359 : vector<2x128xf32>
    %361 = vector.extract_strided_slice %287 {offsets = [0, 0], sizes = [2, 128], strides = [1, 1]} : vector<2x256xf32> to vector<2x128xf32>
    %362 = arith.addf %360, %361 : vector<2x128xf32>
    %cst_87 = arith.constant dense<0.000000e+00> : vector<2x128xf32>
    %363 = tpu.matmul %354, %5, %cst_87 {dimension_numbers = #tpu.dot_dimension_numbers<[1], [0], [0], [1], [0, 0, 1, 1], [], []>} : vector<2x32xf32>, vector<32x128xf32>, vector<2x128xf32> -> vector<2x128xf32>
    %364 = vector.extract_strided_slice %1 {offsets = [0, 6, 128], sizes = [2, 1, 128], strides = [1, 1, 1]} : vector<2x8x256xf32> to vector<2x1x128xf32>
    %365 = vector.shape_cast %364 : vector<2x1x128xf32> to vector<2x128xf32>
    %366 = arith.addf %363, %365 : vector<2x128xf32>
    %367 = vector.extract_strided_slice %287 {offsets = [0, 128], sizes = [2, 128], strides = [1, 1]} : vector<2x256xf32> to vector<2x128xf32>
    %368 = arith.addf %366, %367 : vector<2x128xf32>
    %369 = vector.extract_strided_slice %362 {offsets = [0, 0], sizes = [2, 32], strides = [1, 1]} : vector<2x128xf32> to vector<2x32xf32>
    %370 = arith.negf %369 : vector<2x32xf32>
    %371 = math.exp %370 : vector<2x32xf32>
    %cst_88 = arith.constant 1.000000e+00 : f32
    %372 = vector.broadcast %cst_88 : f32 to vector<2x32xf32>
    %373 = arith.addf %372, %371 : vector<2x32xf32>
    %374 = arith.divf %372, %373 : vector<2x32xf32>
    %375 = vector.extract_strided_slice %362 {offsets = [0, 32], sizes = [2, 32], strides = [1, 1]} : vector<2x128xf32> to vector<2x32xf32>
    %376 = arith.negf %375 : vector<2x32xf32>
    %377 = math.exp %376 : vector<2x32xf32>
    %cst_89 = arith.constant 1.000000e+00 : f32
    %378 = vector.broadcast %cst_89 : f32 to vector<2x32xf32>
    %379 = arith.addf %378, %377 : vector<2x32xf32>
    %380 = arith.divf %378, %379 : vector<2x32xf32>
    %381 = vector.extract_strided_slice %362 {offsets = [0, 64], sizes = [2, 32], strides = [1, 1]} : vector<2x128xf32> to vector<2x32xf32>
    %382 = math.tanh %381 : vector<2x32xf32>
    %383 = vector.extract_strided_slice %362 {offsets = [0, 96], sizes = [2, 32], strides = [1, 1]} : vector<2x128xf32> to vector<2x32xf32>
    %384 = arith.negf %383 : vector<2x32xf32>
    %385 = math.exp %384 : vector<2x32xf32>
    %cst_90 = arith.constant 1.000000e+00 : f32
    %386 = vector.broadcast %cst_90 : f32 to vector<2x32xf32>
    %387 = arith.addf %386, %385 : vector<2x32xf32>
    %388 = arith.divf %386, %387 : vector<2x32xf32>
    %389 = arith.mulf %380, %327 : vector<2x32xf32>
    %390 = arith.mulf %374, %382 : vector<2x32xf32>
    %391 = arith.addf %389, %390 : vector<2x32xf32>
    %392 = math.tanh %391 : vector<2x32xf32>
    %393 = arith.mulf %388, %392 : vector<2x32xf32>
    %394 = vector.extract_strided_slice %368 {offsets = [0, 0], sizes = [2, 32], strides = [1, 1]} : vector<2x128xf32> to vector<2x32xf32>
    %395 = arith.negf %394 : vector<2x32xf32>
    %396 = math.exp %395 : vector<2x32xf32>
    %cst_91 = arith.constant 1.000000e+00 : f32
    %397 = vector.broadcast %cst_91 : f32 to vector<2x32xf32>
    %398 = arith.addf %397, %396 : vector<2x32xf32>
    %399 = arith.divf %397, %398 : vector<2x32xf32>
    %400 = vector.extract_strided_slice %368 {offsets = [0, 32], sizes = [2, 32], strides = [1, 1]} : vector<2x128xf32> to vector<2x32xf32>
    %401 = arith.negf %400 : vector<2x32xf32>
    %402 = math.exp %401 : vector<2x32xf32>
    %cst_92 = arith.constant 1.000000e+00 : f32
    %403 = vector.broadcast %cst_92 : f32 to vector<2x32xf32>
    %404 = arith.addf %403, %402 : vector<2x32xf32>
    %405 = arith.divf %403, %404 : vector<2x32xf32>
    %406 = vector.extract_strided_slice %368 {offsets = [0, 64], sizes = [2, 32], strides = [1, 1]} : vector<2x128xf32> to vector<2x32xf32>
    %407 = math.tanh %406 : vector<2x32xf32>
    %408 = vector.extract_strided_slice %368 {offsets = [0, 96], sizes = [2, 32], strides = [1, 1]} : vector<2x128xf32> to vector<2x32xf32>
    %409 = arith.negf %408 : vector<2x32xf32>
    %410 = math.exp %409 : vector<2x32xf32>
    %cst_93 = arith.constant 1.000000e+00 : f32
    %411 = vector.broadcast %cst_93 : f32 to vector<2x32xf32>
    %412 = arith.addf %411, %410 : vector<2x32xf32>
    %413 = arith.divf %411, %412 : vector<2x32xf32>
    %414 = arith.mulf %405, %352 : vector<2x32xf32>
    %415 = arith.mulf %399, %407 : vector<2x32xf32>
    %416 = arith.addf %414, %415 : vector<2x32xf32>
    %417 = math.tanh %416 : vector<2x32xf32>
    %418 = arith.mulf %413, %417 : vector<2x32xf32>
    %c2 = arith.constant 2 : index
    %c0_94 = arith.constant 0 : index
    %419 = vector.load %arg21[%c2, %c0_94] : memref<16x64xf32, #tpu.memory_space<vmem>>, vector<2x32xf32>
    tpu.vector_store %arg21[%c2, %c0_94], %393 {strides = array<i32>} : memref<16x64xf32, #tpu.memory_space<vmem>>, vector<2x32xf32>,
    %c12 = arith.constant 12 : index
    %c32_95 = arith.constant 32 : index
    %420 = vector.load %arg21[%c12, %c32_95] : memref<16x64xf32, #tpu.memory_space<vmem>>, vector<2x32xf32>
    tpu.vector_store %arg21[%c12, %c32_95], %418 {strides = array<i32>} : memref<16x64xf32, #tpu.memory_space<vmem>>, vector<2x32xf32>,
    %cst_96 = arith.constant dense<0.000000e+00> : vector<2x128xf32>
    %421 = tpu.matmul %393, %4, %cst_96 {dimension_numbers = #tpu.dot_dimension_numbers<[1], [0], [0], [1], [0, 0, 1, 1], [], []>} : vector<2x32xf32>, vector<32x128xf32>, vector<2x128xf32> -> vector<2x128xf32>
    %422 = vector.extract_strided_slice %1 {offsets = [0, 2, 0], sizes = [2, 1, 128], strides = [1, 1, 1]} : vector<2x8x256xf32> to vector<2x1x128xf32>
    %423 = vector.shape_cast %422 : vector<2x1x128xf32> to vector<2x128xf32>
    %424 = arith.addf %421, %423 : vector<2x128xf32>
    %425 = vector.extract_strided_slice %287 {offsets = [0, 0], sizes = [2, 128], strides = [1, 1]} : vector<2x256xf32> to vector<2x128xf32>
    %426 = arith.addf %424, %425 : vector<2x128xf32>
    %cst_97 = arith.constant dense<0.000000e+00> : vector<2x128xf32>
    %427 = tpu.matmul %418, %5, %cst_97 {dimension_numbers = #tpu.dot_dimension_numbers<[1], [0], [0], [1], [0, 0, 1, 1], [], []>} : vector<2x32xf32>, vector<32x128xf32>, vector<2x128xf32> -> vector<2x128xf32>
    %428 = vector.extract_strided_slice %1 {offsets = [0, 5, 128], sizes = [2, 1, 128], strides = [1, 1, 1]} : vector<2x8x256xf32> to vector<2x1x128xf32>
    %429 = vector.shape_cast %428 : vector<2x1x128xf32> to vector<2x128xf32>
    %430 = arith.addf %427, %429 : vector<2x128xf32>
    %431 = vector.extract_strided_slice %287 {offsets = [0, 128], sizes = [2, 128], strides = [1, 1]} : vector<2x256xf32> to vector<2x128xf32>
    %432 = arith.addf %430, %431 : vector<2x128xf32>
    %433 = vector.extract_strided_slice %426 {offsets = [0, 0], sizes = [2, 32], strides = [1, 1]} : vector<2x128xf32> to vector<2x32xf32>
    %434 = arith.negf %433 : vector<2x32xf32>
    %435 = math.exp %434 : vector<2x32xf32>
    %cst_98 = arith.constant 1.000000e+00 : f32
    %436 = vector.broadcast %cst_98 : f32 to vector<2x32xf32>
    %437 = arith.addf %436, %435 : vector<2x32xf32>
    %438 = arith.divf %436, %437 : vector<2x32xf32>
    %439 = vector.extract_strided_slice %426 {offsets = [0, 32], sizes = [2, 32], strides = [1, 1]} : vector<2x128xf32> to vector<2x32xf32>
    %440 = arith.negf %439 : vector<2x32xf32>
    %441 = math.exp %440 : vector<2x32xf32>
    %cst_99 = arith.constant 1.000000e+00 : f32
    %442 = vector.broadcast %cst_99 : f32 to vector<2x32xf32>
    %443 = arith.addf %442, %441 : vector<2x32xf32>
    %444 = arith.divf %442, %443 : vector<2x32xf32>
    %445 = vector.extract_strided_slice %426 {offsets = [0, 64], sizes = [2, 32], strides = [1, 1]} : vector<2x128xf32> to vector<2x32xf32>
    %446 = math.tanh %445 : vector<2x32xf32>
    %447 = vector.extract_strided_slice %426 {offsets = [0, 96], sizes = [2, 32], strides = [1, 1]} : vector<2x128xf32> to vector<2x32xf32>
    %448 = arith.negf %447 : vector<2x32xf32>
    %449 = math.exp %448 : vector<2x32xf32>
    %cst_100 = arith.constant 1.000000e+00 : f32
    %450 = vector.broadcast %cst_100 : f32 to vector<2x32xf32>
    %451 = arith.addf %450, %449 : vector<2x32xf32>
    %452 = arith.divf %450, %451 : vector<2x32xf32>
    %453 = arith.mulf %444, %391 : vector<2x32xf32>
    %454 = arith.mulf %438, %446 : vector<2x32xf32>
    %455 = arith.addf %453, %454 : vector<2x32xf32>
    %456 = math.tanh %455 : vector<2x32xf32>
    %457 = arith.mulf %452, %456 : vector<2x32xf32>
    %458 = vector.extract_strided_slice %432 {offsets = [0, 0], sizes = [2, 32], strides = [1, 1]} : vector<2x128xf32> to vector<2x32xf32>
    %459 = arith.negf %458 : vector<2x32xf32>
    %460 = math.exp %459 : vector<2x32xf32>
    %cst_101 = arith.constant 1.000000e+00 : f32
    %461 = vector.broadcast %cst_101 : f32 to vector<2x32xf32>
    %462 = arith.addf %461, %460 : vector<2x32xf32>
    %463 = arith.divf %461, %462 : vector<2x32xf32>
    %464 = vector.extract_strided_slice %432 {offsets = [0, 32], sizes = [2, 32], strides = [1, 1]} : vector<2x128xf32> to vector<2x32xf32>
    %465 = arith.negf %464 : vector<2x32xf32>
    %466 = math.exp %465 : vector<2x32xf32>
    %cst_102 = arith.constant 1.000000e+00 : f32
    %467 = vector.broadcast %cst_102 : f32 to vector<2x32xf32>
    %468 = arith.addf %467, %466 : vector<2x32xf32>
    %469 = arith.divf %467, %468 : vector<2x32xf32>
    %470 = vector.extract_strided_slice %432 {offsets = [0, 64], sizes = [2, 32], strides = [1, 1]} : vector<2x128xf32> to vector<2x32xf32>
    %471 = math.tanh %470 : vector<2x32xf32>
    %472 = vector.extract_strided_slice %432 {offsets = [0, 96], sizes = [2, 32], strides = [1, 1]} : vector<2x128xf32> to vector<2x32xf32>
    %473 = arith.negf %472 : vector<2x32xf32>
    %474 = math.exp %473 : vector<2x32xf32>
    %cst_103 = arith.constant 1.000000e+00 : f32
    %475 = vector.broadcast %cst_103 : f32 to vector<2x32xf32>
    %476 = arith.addf %475, %474 : vector<2x32xf32>
    %477 = arith.divf %475, %476 : vector<2x32xf32>
    %478 = arith.mulf %469, %416 : vector<2x32xf32>
    %479 = arith.mulf %463, %471 : vector<2x32xf32>
    %480 = arith.addf %478, %479 : vector<2x32xf32>
    %481 = math.tanh %480 : vector<2x32xf32>
    %482 = arith.mulf %477, %481 : vector<2x32xf32>
    %c4 = arith.constant 4 : index
    %c0_104 = arith.constant 0 : index
    %483 = vector.load %arg21[%c4, %c0_104] : memref<16x64xf32, #tpu.memory_space<vmem>>, vector<2x32xf32>
    tpu.vector_store %arg21[%c4, %c0_104], %457 {strides = array<i32>} : memref<16x64xf32, #tpu.memory_space<vmem>>, vector<2x32xf32>,
    %c10 = arith.constant 10 : index
    %c32_105 = arith.constant 32 : index
    %484 = vector.load %arg21[%c10, %c32_105] : memref<16x64xf32, #tpu.memory_space<vmem>>, vector<2x32xf32>
    tpu.vector_store %arg21[%c10, %c32_105], %482 {strides = array<i32>} : memref<16x64xf32, #tpu.memory_space<vmem>>, vector<2x32xf32>,
    %cst_106 = arith.constant dense<0.000000e+00> : vector<2x128xf32>
    %485 = tpu.matmul %457, %4, %cst_106 {dimension_numbers = #tpu.dot_dimension_numbers<[1], [0], [0], [1], [0, 0, 1, 1], [], []>} : vector<2x32xf32>, vector<32x128xf32>, vector<2x128xf32> -> vector<2x128xf32>
    %486 = vector.extract_strided_slice %1 {offsets = [0, 3, 0], sizes = [2, 1, 128], strides = [1, 1, 1]} : vector<2x8x256xf32> to vector<2x1x128xf32>
    %487 = vector.shape_cast %486 : vector<2x1x128xf32> to vector<2x128xf32>
    %488 = arith.addf %485, %487 : vector<2x128xf32>
    %489 = vector.extract_strided_slice %287 {offsets = [0, 0], sizes = [2, 128], strides = [1, 1]} : vector<2x256xf32> to vector<2x128xf32>
    %490 = arith.addf %488, %489 : vector<2x128xf32>
    %cst_107 = arith.constant dense<0.000000e+00> : vector<2x128xf32>
    %491 = tpu.matmul %482, %5, %cst_107 {dimension_numbers = #tpu.dot_dimension_numbers<[1], [0], [0], [1], [0, 0, 1, 1], [], []>} : vector<2x32xf32>, vector<32x128xf32>, vector<2x128xf32> -> vector<2x128xf32>
    %492 = vector.extract_strided_slice %1 {offsets = [0, 4, 128], sizes = [2, 1, 128], strides = [1, 1, 1]} : vector<2x8x256xf32> to vector<2x1x128xf32>
    %493 = vector.shape_cast %492 : vector<2x1x128xf32> to vector<2x128xf32>
    %494 = arith.addf %491, %493 : vector<2x128xf32>
    %495 = vector.extract_strided_slice %287 {offsets = [0, 128], sizes = [2, 128], strides = [1, 1]} : vector<2x256xf32> to vector<2x128xf32>
    %496 = arith.addf %494, %495 : vector<2x128xf32>
    %497 = vector.extract_strided_slice %490 {offsets = [0, 0], sizes = [2, 32], strides = [1, 1]} : vector<2x128xf32> to vector<2x32xf32>
    %498 = arith.negf %497 : vector<2x32xf32>
    %499 = math.exp %498 : vector<2x32xf32>
    %cst_108 = arith.constant 1.000000e+00 : f32
    %500 = vector.broadcast %cst_108 : f32 to vector<2x32xf32>
    %501 = arith.addf %500, %499 : vector<2x32xf32>
    %502 = arith.divf %500, %501 : vector<2x32xf32>
    %503 = vector.extract_strided_slice %490 {offsets = [0, 32], sizes = [2, 32], strides = [1, 1]} : vector<2x128xf32> to vector<2x32xf32>
    %504 = arith.negf %503 : vector<2x32xf32>
    %505 = math.exp %504 : vector<2x32xf32>
    %cst_109 = arith.constant 1.000000e+00 : f32
    %506 = vector.broadcast %cst_109 : f32 to vector<2x32xf32>
    %507 = arith.addf %506, %505 : vector<2x32xf32>
    %508 = arith.divf %506, %507 : vector<2x32xf32>
    %509 = vector.extract_strided_slice %490 {offsets = [0, 64], sizes = [2, 32], strides = [1, 1]} : vector<2x128xf32> to vector<2x32xf32>
    %510 = math.tanh %509 : vector<2x32xf32>
    %511 = vector.extract_strided_slice %490 {offsets = [0, 96], sizes = [2, 32], strides = [1, 1]} : vector<2x128xf32> to vector<2x32xf32>
    %512 = arith.negf %511 : vector<2x32xf32>
    %513 = math.exp %512 : vector<2x32xf32>
    %cst_110 = arith.constant 1.000000e+00 : f32
    %514 = vector.broadcast %cst_110 : f32 to vector<2x32xf32>
    %515 = arith.addf %514, %513 : vector<2x32xf32>
    %516 = arith.divf %514, %515 : vector<2x32xf32>
    %517 = arith.mulf %508, %455 : vector<2x32xf32>
    %518 = arith.mulf %502, %510 : vector<2x32xf32>
    %519 = arith.addf %517, %518 : vector<2x32xf32>
    %520 = math.tanh %519 : vector<2x32xf32>
    %521 = arith.mulf %516, %520 : vector<2x32xf32>
    %522 = vector.extract_strided_slice %496 {offsets = [0, 0], sizes = [2, 32], strides = [1, 1]} : vector<2x128xf32> to vector<2x32xf32>
    %523 = arith.negf %522 : vector<2x32xf32>
    %524 = math.exp %523 : vector<2x32xf32>
    %cst_111 = arith.constant 1.000000e+00 : f32
    %525 = vector.broadcast %cst_111 : f32 to vector<2x32xf32>
    %526 = arith.addf %525, %524 : vector<2x32xf32>
    %527 = arith.divf %525, %526 : vector<2x32xf32>
    %528 = vector.extract_strided_slice %496 {offsets = [0, 32], sizes = [2, 32], strides = [1, 1]} : vector<2x128xf32> to vector<2x32xf32>
    %529 = arith.negf %528 : vector<2x32xf32>
    %530 = math.exp %529 : vector<2x32xf32>
    %cst_112 = arith.constant 1.000000e+00 : f32
    %531 = vector.broadcast %cst_112 : f32 to vector<2x32xf32>
    %532 = arith.addf %531, %530 : vector<2x32xf32>
    %533 = arith.divf %531, %532 : vector<2x32xf32>
    %534 = vector.extract_strided_slice %496 {offsets = [0, 64], sizes = [2, 32], strides = [1, 1]} : vector<2x128xf32> to vector<2x32xf32>
    %535 = math.tanh %534 : vector<2x32xf32>
    %536 = vector.extract_strided_slice %496 {offsets = [0, 96], sizes = [2, 32], strides = [1, 1]} : vector<2x128xf32> to vector<2x32xf32>
    %537 = arith.negf %536 : vector<2x32xf32>
    %538 = math.exp %537 : vector<2x32xf32>
    %cst_113 = arith.constant 1.000000e+00 : f32
    %539 = vector.broadcast %cst_113 : f32 to vector<2x32xf32>
    %540 = arith.addf %539, %538 : vector<2x32xf32>
    %541 = arith.divf %539, %540 : vector<2x32xf32>
    %542 = arith.mulf %533, %480 : vector<2x32xf32>
    %543 = arith.mulf %527, %535 : vector<2x32xf32>
    %544 = arith.addf %542, %543 : vector<2x32xf32>
    %545 = math.tanh %544 : vector<2x32xf32>
    %546 = arith.mulf %541, %545 : vector<2x32xf32>
    %c6 = arith.constant 6 : index
    %c0_114 = arith.constant 0 : index
    %547 = vector.load %arg21[%c6, %c0_114] : memref<16x64xf32, #tpu.memory_space<vmem>>, vector<2x32xf32>
    tpu.vector_store %arg21[%c6, %c0_114], %521 {strides = array<i32>} : memref<16x64xf32, #tpu.memory_space<vmem>>, vector<2x32xf32>,
    %c8 = arith.constant 8 : index
    %c32_115 = arith.constant 32 : index
    %548 = vector.load %arg21[%c8, %c32_115] : memref<16x64xf32, #tpu.memory_space<vmem>>, vector<2x32xf32>
    tpu.vector_store %arg21[%c8, %c32_115], %546 {strides = array<i32>} : memref<16x64xf32, #tpu.memory_space<vmem>>, vector<2x32xf32>,
    %cst_116 = arith.constant dense<0.000000e+00> : vector<2x128xf32>
    %549 = tpu.matmul %521, %4, %cst_116 {dimension_numbers = #tpu.dot_dimension_numbers<[1], [0], [0], [1], [0, 0, 1, 1], [], []>} : vector<2x32xf32>, vector<32x128xf32>, vector<2x128xf32> -> vector<2x128xf32>
    %550 = vector.extract_strided_slice %1 {offsets = [0, 4, 0], sizes = [2, 1, 128], strides = [1, 1, 1]} : vector<2x8x256xf32> to vector<2x1x128xf32>
    %551 = vector.shape_cast %550 : vector<2x1x128xf32> to vector<2x128xf32>
    %552 = arith.addf %549, %551 : vector<2x128xf32>
    %553 = vector.extract_strided_slice %287 {offsets = [0, 0], sizes = [2, 128], strides = [1, 1]} : vector<2x256xf32> to vector<2x128xf32>
    %554 = arith.addf %552, %553 : vector<2x128xf32>
    %cst_117 = arith.constant dense<0.000000e+00> : vector<2x128xf32>
    %555 = tpu.matmul %546, %5, %cst_117 {dimension_numbers = #tpu.dot_dimension_numbers<[1], [0], [0], [1], [0, 0, 1, 1], [], []>} : vector<2x32xf32>, vector<32x128xf32>, vector<2x128xf32> -> vector<2x128xf32>
    %556 = vector.extract_strided_slice %1 {offsets = [0, 3, 128], sizes = [2, 1, 128], strides = [1, 1, 1]} : vector<2x8x256xf32> to vector<2x1x128xf32>
    %557 = vector.shape_cast %556 : vector<2x1x128xf32> to vector<2x128xf32>
    %558 = arith.addf %555, %557 : vector<2x128xf32>
    %559 = vector.extract_strided_slice %287 {offsets = [0, 128], sizes = [2, 128], strides = [1, 1]} : vector<2x256xf32> to vector<2x128xf32>
    %560 = arith.addf %558, %559 : vector<2x128xf32>
    %561 = vector.extract_strided_slice %554 {offsets = [0, 0], sizes = [2, 32], strides = [1, 1]} : vector<2x128xf32> to vector<2x32xf32>
    %562 = arith.negf %561 : vector<2x32xf32>
    %563 = math.exp %562 : vector<2x32xf32>
    %cst_118 = arith.constant 1.000000e+00 : f32
    %564 = vector.broadcast %cst_118 : f32 to vector<2x32xf32>
    %565 = arith.addf %564, %563 : vector<2x32xf32>
    %566 = arith.divf %564, %565 : vector<2x32xf32>
    %567 = vector.extract_strided_slice %554 {offsets = [0, 32], sizes = [2, 32], strides = [1, 1]} : vector<2x128xf32> to vector<2x32xf32>
    %568 = arith.negf %567 : vector<2x32xf32>
    %569 = math.exp %568 : vector<2x32xf32>
    %cst_119 = arith.constant 1.000000e+00 : f32
    %570 = vector.broadcast %cst_119 : f32 to vector<2x32xf32>
    %571 = arith.addf %570, %569 : vector<2x32xf32>
    %572 = arith.divf %570, %571 : vector<2x32xf32>
    %573 = vector.extract_strided_slice %554 {offsets = [0, 64], sizes = [2, 32], strides = [1, 1]} : vector<2x128xf32> to vector<2x32xf32>
    %574 = math.tanh %573 : vector<2x32xf32>
    %575 = vector.extract_strided_slice %554 {offsets = [0, 96], sizes = [2, 32], strides = [1, 1]} : vector<2x128xf32> to vector<2x32xf32>
    %576 = arith.negf %575 : vector<2x32xf32>
    %577 = math.exp %576 : vector<2x32xf32>
    %cst_120 = arith.constant 1.000000e+00 : f32
    %578 = vector.broadcast %cst_120 : f32 to vector<2x32xf32>
    %579 = arith.addf %578, %577 : vector<2x32xf32>
    %580 = arith.divf %578, %579 : vector<2x32xf32>
    %581 = arith.mulf %572, %519 : vector<2x32xf32>
    %582 = arith.mulf %566, %574 : vector<2x32xf32>
    %583 = arith.addf %581, %582 : vector<2x32xf32>
    %584 = math.tanh %583 : vector<2x32xf32>
    %585 = arith.mulf %580, %584 : vector<2x32xf32>
    %586 = vector.extract_strided_slice %560 {offsets = [0, 0], sizes = [2, 32], strides = [1, 1]} : vector<2x128xf32> to vector<2x32xf32>
    %587 = arith.negf %586 : vector<2x32xf32>
    %588 = math.exp %587 : vector<2x32xf32>
    %cst_121 = arith.constant 1.000000e+00 : f32
    %589 = vector.broadcast %cst_121 : f32 to vector<2x32xf32>
    %590 = arith.addf %589, %588 : vector<2x32xf32>
    %591 = arith.divf %589, %590 : vector<2x32xf32>
    %592 = vector.extract_strided_slice %560 {offsets = [0, 32], sizes = [2, 32], strides = [1, 1]} : vector<2x128xf32> to vector<2x32xf32>
    %593 = arith.negf %592 : vector<2x32xf32>
    %594 = math.exp %593 : vector<2x32xf32>
    %cst_122 = arith.constant 1.000000e+00 : f32
    %595 = vector.broadcast %cst_122 : f32 to vector<2x32xf32>
    %596 = arith.addf %595, %594 : vector<2x32xf32>
    %597 = arith.divf %595, %596 : vector<2x32xf32>
    %598 = vector.extract_strided_slice %560 {offsets = [0, 64], sizes = [2, 32], strides = [1, 1]} : vector<2x128xf32> to vector<2x32xf32>
    %599 = math.tanh %598 : vector<2x32xf32>
    %600 = vector.extract_strided_slice %560 {offsets = [0, 96], sizes = [2, 32], strides = [1, 1]} : vector<2x128xf32> to vector<2x32xf32>
    %601 = arith.negf %600 : vector<2x32xf32>
    %602 = math.exp %601 : vector<2x32xf32>
    %cst_123 = arith.constant 1.000000e+00 : f32
    %603 = vector.broadcast %cst_123 : f32 to vector<2x32xf32>
    %604 = arith.addf %603, %602 : vector<2x32xf32>
    %605 = arith.divf %603, %604 : vector<2x32xf32>
    %606 = arith.mulf %597, %544 : vector<2x32xf32>
    %607 = arith.mulf %591, %599 : vector<2x32xf32>
    %608 = arith.addf %606, %607 : vector<2x32xf32>
    %609 = math.tanh %608 : vector<2x32xf32>
    %610 = arith.mulf %605, %609 : vector<2x32xf32>
    %c8_124 = arith.constant 8 : index
    %c0_125 = arith.constant 0 : index
    %611 = vector.load %arg21[%c8_124, %c0_125] : memref<16x64xf32, #tpu.memory_space<vmem>>, vector<2x32xf32>
    tpu.vector_store %arg21[%c8_124, %c0_125], %585 {strides = array<i32>} : memref<16x64xf32, #tpu.memory_space<vmem>>, vector<2x32xf32>,
    %c6_126 = arith.constant 6 : index
    %c32_127 = arith.constant 32 : index
    %612 = vector.load %arg21[%c6_126, %c32_127] : memref<16x64xf32, #tpu.memory_space<vmem>>, vector<2x32xf32>
    tpu.vector_store %arg21[%c6_126, %c32_127], %610 {strides = array<i32>} : memref<16x64xf32, #tpu.memory_space<vmem>>, vector<2x32xf32>,
    %cst_128 = arith.constant dense<0.000000e+00> : vector<2x128xf32>
    %613 = tpu.matmul %585, %4, %cst_128 {dimension_numbers = #tpu.dot_dimension_numbers<[1], [0], [0], [1], [0, 0, 1, 1], [], []>} : vector<2x32xf32>, vector<32x128xf32>, vector<2x128xf32> -> vector<2x128xf32>
    %614 = vector.extract_strided_slice %1 {offsets = [0, 5, 0], sizes = [2, 1, 128], strides = [1, 1, 1]} : vector<2x8x256xf32> to vector<2x1x128xf32>
    %615 = vector.shape_cast %614 : vector<2x1x128xf32> to vector<2x128xf32>
    %616 = arith.addf %613, %615 : vector<2x128xf32>
    %617 = vector.extract_strided_slice %287 {offsets = [0, 0], sizes = [2, 128], strides = [1, 1]} : vector<2x256xf32> to vector<2x128xf32>
    %618 = arith.addf %616, %617 : vector<2x128xf32>
    %cst_129 = arith.constant dense<0.000000e+00> : vector<2x128xf32>
    %619 = tpu.matmul %610, %5, %cst_129 {dimension_numbers = #tpu.dot_dimension_numbers<[1], [0], [0], [1], [0, 0, 1, 1], [], []>} : vector<2x32xf32>, vector<32x128xf32>, vector<2x128xf32> -> vector<2x128xf32>
    %620 = vector.extract_strided_slice %1 {offsets = [0, 2, 128], sizes = [2, 1, 128], strides = [1, 1, 1]} : vector<2x8x256xf32> to vector<2x1x128xf32>
    %621 = vector.shape_cast %620 : vector<2x1x128xf32> to vector<2x128xf32>
    %622 = arith.addf %619, %621 : vector<2x128xf32>
    %623 = vector.extract_strided_slice %287 {offsets = [0, 128], sizes = [2, 128], strides = [1, 1]} : vector<2x256xf32> to vector<2x128xf32>
    %624 = arith.addf %622, %623 : vector<2x128xf32>
    %625 = vector.extract_strided_slice %618 {offsets = [0, 0], sizes = [2, 32], strides = [1, 1]} : vector<2x128xf32> to vector<2x32xf32>
    %626 = arith.negf %625 : vector<2x32xf32>
    %627 = math.exp %626 : vector<2x32xf32>
    %cst_130 = arith.constant 1.000000e+00 : f32
    %628 = vector.broadcast %cst_130 : f32 to vector<2x32xf32>
    %629 = arith.addf %628, %627 : vector<2x32xf32>
    %630 = arith.divf %628, %629 : vector<2x32xf32>
    %631 = vector.extract_strided_slice %618 {offsets = [0, 32], sizes = [2, 32], strides = [1, 1]} : vector<2x128xf32> to vector<2x32xf32>
    %632 = arith.negf %631 : vector<2x32xf32>
    %633 = math.exp %632 : vector<2x32xf32>
    %cst_131 = arith.constant 1.000000e+00 : f32
    %634 = vector.broadcast %cst_131 : f32 to vector<2x32xf32>
    %635 = arith.addf %634, %633 : vector<2x32xf32>
    %636 = arith.divf %634, %635 : vector<2x32xf32>
    %637 = vector.extract_strided_slice %618 {offsets = [0, 64], sizes = [2, 32], strides = [1, 1]} : vector<2x128xf32> to vector<2x32xf32>
    %638 = math.tanh %637 : vector<2x32xf32>
    %639 = vector.extract_strided_slice %618 {offsets = [0, 96], sizes = [2, 32], strides = [1, 1]} : vector<2x128xf32> to vector<2x32xf32>
    %640 = arith.negf %639 : vector<2x32xf32>
    %641 = math.exp %640 : vector<2x32xf32>
    %cst_132 = arith.constant 1.000000e+00 : f32
    %642 = vector.broadcast %cst_132 : f32 to vector<2x32xf32>
    %643 = arith.addf %642, %641 : vector<2x32xf32>
    %644 = arith.divf %642, %643 : vector<2x32xf32>
    %645 = arith.mulf %636, %583 : vector<2x32xf32>
    %646 = arith.mulf %630, %638 : vector<2x32xf32>
    %647 = arith.addf %645, %646 : vector<2x32xf32>
    %648 = math.tanh %647 : vector<2x32xf32>
    %649 = arith.mulf %644, %648 : vector<2x32xf32>
    %650 = vector.extract_strided_slice %624 {offsets = [0, 0], sizes = [2, 32], strides = [1, 1]} : vector<2x128xf32> to vector<2x32xf32>
    %651 = arith.negf %650 : vector<2x32xf32>
    %652 = math.exp %651 : vector<2x32xf32>
    %cst_133 = arith.constant 1.000000e+00 : f32
    %653 = vector.broadcast %cst_133 : f32 to vector<2x32xf32>
    %654 = arith.addf %653, %652 : vector<2x32xf32>
    %655 = arith.divf %653, %654 : vector<2x32xf32>
    %656 = vector.extract_strided_slice %624 {offsets = [0, 32], sizes = [2, 32], strides = [1, 1]} : vector<2x128xf32> to vector<2x32xf32>
    %657 = arith.negf %656 : vector<2x32xf32>
    %658 = math.exp %657 : vector<2x32xf32>
    %cst_134 = arith.constant 1.000000e+00 : f32
    %659 = vector.broadcast %cst_134 : f32 to vector<2x32xf32>
    %660 = arith.addf %659, %658 : vector<2x32xf32>
    %661 = arith.divf %659, %660 : vector<2x32xf32>
    %662 = vector.extract_strided_slice %624 {offsets = [0, 64], sizes = [2, 32], strides = [1, 1]} : vector<2x128xf32> to vector<2x32xf32>
    %663 = math.tanh %662 : vector<2x32xf32>
    %664 = vector.extract_strided_slice %624 {offsets = [0, 96], sizes = [2, 32], strides = [1, 1]} : vector<2x128xf32> to vector<2x32xf32>
    %665 = arith.negf %664 : vector<2x32xf32>
    %666 = math.exp %665 : vector<2x32xf32>
    %cst_135 = arith.constant 1.000000e+00 : f32
    %667 = vector.broadcast %cst_135 : f32 to vector<2x32xf32>
    %668 = arith.addf %667, %666 : vector<2x32xf32>
    %669 = arith.divf %667, %668 : vector<2x32xf32>
    %670 = arith.mulf %661, %608 : vector<2x32xf32>
    %671 = arith.mulf %655, %663 : vector<2x32xf32>
    %672 = arith.addf %670, %671 : vector<2x32xf32>
    %673 = math.tanh %672 : vector<2x32xf32>
    %674 = arith.mulf %669, %673 : vector<2x32xf32>
    %c10_136 = arith.constant 10 : index
    %c0_137 = arith.constant 0 : index
    %675 = vector.load %arg21[%c10_136, %c0_137] : memref<16x64xf32, #tpu.memory_space<vmem>>, vector<2x32xf32>
    tpu.vector_store %arg21[%c10_136, %c0_137], %649 {strides = array<i32>} : memref<16x64xf32, #tpu.memory_space<vmem>>, vector<2x32xf32>,
    %c4_138 = arith.constant 4 : index
    %c32_139 = arith.constant 32 : index
    %676 = vector.load %arg21[%c4_138, %c32_139] : memref<16x64xf32, #tpu.memory_space<vmem>>, vector<2x32xf32>
    tpu.vector_store %arg21[%c4_138, %c32_139], %674 {strides = array<i32>} : memref<16x64xf32, #tpu.memory_space<vmem>>, vector<2x32xf32>,
    %cst_140 = arith.constant dense<0.000000e+00> : vector<2x128xf32>
    %677 = tpu.matmul %649, %4, %cst_140 {dimension_numbers = #tpu.dot_dimension_numbers<[1], [0], [0], [1], [0, 0, 1, 1], [], []>} : vector<2x32xf32>, vector<32x128xf32>, vector<2x128xf32> -> vector<2x128xf32>
    %678 = vector.extract_strided_slice %1 {offsets = [0, 6, 0], sizes = [2, 1, 128], strides = [1, 1, 1]} : vector<2x8x256xf32> to vector<2x1x128xf32>
    %679 = vector.shape_cast %678 : vector<2x1x128xf32> to vector<2x128xf32>
    %680 = arith.addf %677, %679 : vector<2x128xf32>
    %681 = vector.extract_strided_slice %287 {offsets = [0, 0], sizes = [2, 128], strides = [1, 1]} : vector<2x256xf32> to vector<2x128xf32>
    %682 = arith.addf %680, %681 : vector<2x128xf32>
    %cst_141 = arith.constant dense<0.000000e+00> : vector<2x128xf32>
    %683 = tpu.matmul %674, %5, %cst_141 {dimension_numbers = #tpu.dot_dimension_numbers<[1], [0], [0], [1], [0, 0, 1, 1], [], []>} : vector<2x32xf32>, vector<32x128xf32>, vector<2x128xf32> -> vector<2x128xf32>
    %684 = vector.extract_strided_slice %1 {offsets = [0, 1, 128], sizes = [2, 1, 128], strides = [1, 1, 1]} : vector<2x8x256xf32> to vector<2x1x128xf32>
    %685 = vector.shape_cast %684 : vector<2x1x128xf32> to vector<2x128xf32>
    %686 = arith.addf %683, %685 : vector<2x128xf32>
    %687 = vector.extract_strided_slice %287 {offsets = [0, 128], sizes = [2, 128], strides = [1, 1]} : vector<2x256xf32> to vector<2x128xf32>
    %688 = arith.addf %686, %687 : vector<2x128xf32>
    %689 = vector.extract_strided_slice %682 {offsets = [0, 0], sizes = [2, 32], strides = [1, 1]} : vector<2x128xf32> to vector<2x32xf32>
    %690 = arith.negf %689 : vector<2x32xf32>
    %691 = math.exp %690 : vector<2x32xf32>
    %cst_142 = arith.constant 1.000000e+00 : f32
    %692 = vector.broadcast %cst_142 : f32 to vector<2x32xf32>
    %693 = arith.addf %692, %691 : vector<2x32xf32>
    %694 = arith.divf %692, %693 : vector<2x32xf32>
    %695 = vector.extract_strided_slice %682 {offsets = [0, 32], sizes = [2, 32], strides = [1, 1]} : vector<2x128xf32> to vector<2x32xf32>
    %696 = arith.negf %695 : vector<2x32xf32>
    %697 = math.exp %696 : vector<2x32xf32>
    %cst_143 = arith.constant 1.000000e+00 : f32
    %698 = vector.broadcast %cst_143 : f32 to vector<2x32xf32>
    %699 = arith.addf %698, %697 : vector<2x32xf32>
    %700 = arith.divf %698, %699 : vector<2x32xf32>
    %701 = vector.extract_strided_slice %682 {offsets = [0, 64], sizes = [2, 32], strides = [1, 1]} : vector<2x128xf32> to vector<2x32xf32>
    %702 = math.tanh %701 : vector<2x32xf32>
    %703 = vector.extract_strided_slice %682 {offsets = [0, 96], sizes = [2, 32], strides = [1, 1]} : vector<2x128xf32> to vector<2x32xf32>
    %704 = arith.negf %703 : vector<2x32xf32>
    %705 = math.exp %704 : vector<2x32xf32>
    %cst_144 = arith.constant 1.000000e+00 : f32
    %706 = vector.broadcast %cst_144 : f32 to vector<2x32xf32>
    %707 = arith.addf %706, %705 : vector<2x32xf32>
    %708 = arith.divf %706, %707 : vector<2x32xf32>
    %709 = arith.mulf %700, %647 : vector<2x32xf32>
    %710 = arith.mulf %694, %702 : vector<2x32xf32>
    %711 = arith.addf %709, %710 : vector<2x32xf32>
    %712 = math.tanh %711 : vector<2x32xf32>
    %713 = arith.mulf %708, %712 : vector<2x32xf32>
    %714 = vector.extract_strided_slice %688 {offsets = [0, 0], sizes = [2, 32], strides = [1, 1]} : vector<2x128xf32> to vector<2x32xf32>
    %715 = arith.negf %714 : vector<2x32xf32>
    %716 = math.exp %715 : vector<2x32xf32>
    %cst_145 = arith.constant 1.000000e+00 : f32
    %717 = vector.broadcast %cst_145 : f32 to vector<2x32xf32>
    %718 = arith.addf %717, %716 : vector<2x32xf32>
    %719 = arith.divf %717, %718 : vector<2x32xf32>
    %720 = vector.extract_strided_slice %688 {offsets = [0, 32], sizes = [2, 32], strides = [1, 1]} : vector<2x128xf32> to vector<2x32xf32>
    %721 = arith.negf %720 : vector<2x32xf32>
    %722 = math.exp %721 : vector<2x32xf32>
    %cst_146 = arith.constant 1.000000e+00 : f32
    %723 = vector.broadcast %cst_146 : f32 to vector<2x32xf32>
    %724 = arith.addf %723, %722 : vector<2x32xf32>
    %725 = arith.divf %723, %724 : vector<2x32xf32>
    %726 = vector.extract_strided_slice %688 {offsets = [0, 64], sizes = [2, 32], strides = [1, 1]} : vector<2x128xf32> to vector<2x32xf32>
    %727 = math.tanh %726 : vector<2x32xf32>
    %728 = vector.extract_strided_slice %688 {offsets = [0, 96], sizes = [2, 32], strides = [1, 1]} : vector<2x128xf32> to vector<2x32xf32>
    %729 = arith.negf %728 : vector<2x32xf32>
    %730 = math.exp %729 : vector<2x32xf32>
    %cst_147 = arith.constant 1.000000e+00 : f32
    %731 = vector.broadcast %cst_147 : f32 to vector<2x32xf32>
    %732 = arith.addf %731, %730 : vector<2x32xf32>
    %733 = arith.divf %731, %732 : vector<2x32xf32>
    %734 = arith.mulf %725, %672 : vector<2x32xf32>
    %735 = arith.mulf %719, %727 : vector<2x32xf32>
    %736 = arith.addf %734, %735 : vector<2x32xf32>
    %737 = math.tanh %736 : vector<2x32xf32>
    %738 = arith.mulf %733, %737 : vector<2x32xf32>
    %c12_148 = arith.constant 12 : index
    %c0_149 = arith.constant 0 : index
    %739 = vector.load %arg21[%c12_148, %c0_149] : memref<16x64xf32, #tpu.memory_space<vmem>>, vector<2x32xf32>
    tpu.vector_store %arg21[%c12_148, %c0_149], %713 {strides = array<i32>} : memref<16x64xf32, #tpu.memory_space<vmem>>, vector<2x32xf32>,
    %c2_150 = arith.constant 2 : index
    %c32_151 = arith.constant 32 : index
    %740 = vector.load %arg21[%c2_150, %c32_151] : memref<16x64xf32, #tpu.memory_space<vmem>>, vector<2x32xf32>
    tpu.vector_store %arg21[%c2_150, %c32_151], %738 {strides = array<i32>} : memref<16x64xf32, #tpu.memory_space<vmem>>, vector<2x32xf32>,
    %cst_152 = arith.constant dense<0.000000e+00> : vector<2x128xf32>
    %741 = tpu.matmul %713, %4, %cst_152 {dimension_numbers = #tpu.dot_dimension_numbers<[1], [0], [0], [1], [0, 0, 1, 1], [], []>} : vector<2x32xf32>, vector<32x128xf32>, vector<2x128xf32> -> vector<2x128xf32>
    %742 = vector.extract_strided_slice %1 {offsets = [0, 7, 0], sizes = [2, 1, 128], strides = [1, 1, 1]} : vector<2x8x256xf32> to vector<2x1x128xf32>
    %743 = vector.shape_cast %742 : vector<2x1x128xf32> to vector<2x128xf32>
    %744 = arith.addf %741, %743 : vector<2x128xf32>
    %745 = vector.extract_strided_slice %287 {offsets = [0, 0], sizes = [2, 128], strides = [1, 1]} : vector<2x256xf32> to vector<2x128xf32>
    %746 = arith.addf %744, %745 : vector<2x128xf32>
    %cst_153 = arith.constant dense<0.000000e+00> : vector<2x128xf32>
    %747 = tpu.matmul %738, %5, %cst_153 {dimension_numbers = #tpu.dot_dimension_numbers<[1], [0], [0], [1], [0, 0, 1, 1], [], []>} : vector<2x32xf32>, vector<32x128xf32>, vector<2x128xf32> -> vector<2x128xf32>
    %748 = vector.extract_strided_slice %1 {offsets = [0, 0, 128], sizes = [2, 1, 128], strides = [1, 1, 1]} : vector<2x8x256xf32> to vector<2x1x128xf32>
    %749 = vector.shape_cast %748 : vector<2x1x128xf32> to vector<2x128xf32>
    %750 = arith.addf %747, %749 : vector<2x128xf32>
    %751 = vector.extract_strided_slice %287 {offsets = [0, 128], sizes = [2, 128], strides = [1, 1]} : vector<2x256xf32> to vector<2x128xf32>
    %752 = arith.addf %750, %751 : vector<2x128xf32>
    %753 = vector.extract_strided_slice %746 {offsets = [0, 0], sizes = [2, 32], strides = [1, 1]} : vector<2x128xf32> to vector<2x32xf32>
    %754 = arith.negf %753 : vector<2x32xf32>
    %755 = math.exp %754 : vector<2x32xf32>
    %cst_154 = arith.constant 1.000000e+00 : f32
    %756 = vector.broadcast %cst_154 : f32 to vector<2x32xf32>
    %757 = arith.addf %756, %755 : vector<2x32xf32>
    %758 = arith.divf %756, %757 : vector<2x32xf32>
    %759 = vector.extract_strided_slice %746 {offsets = [0, 32], sizes = [2, 32], strides = [1, 1]} : vector<2x128xf32> to vector<2x32xf32>
    %760 = arith.negf %759 : vector<2x32xf32>
    %761 = math.exp %760 : vector<2x32xf32>
    %cst_155 = arith.constant 1.000000e+00 : f32
    %762 = vector.broadcast %cst_155 : f32 to vector<2x32xf32>
    %763 = arith.addf %762, %761 : vector<2x32xf32>
    %764 = arith.divf %762, %763 : vector<2x32xf32>
    %765 = vector.extract_strided_slice %746 {offsets = [0, 64], sizes = [2, 32], strides = [1, 1]} : vector<2x128xf32> to vector<2x32xf32>
    %766 = math.tanh %765 : vector<2x32xf32>
    %767 = vector.extract_strided_slice %746 {offsets = [0, 96], sizes = [2, 32], strides = [1, 1]} : vector<2x128xf32> to vector<2x32xf32>
    %768 = arith.negf %767 : vector<2x32xf32>
    %769 = math.exp %768 : vector<2x32xf32>
    %cst_156 = arith.constant 1.000000e+00 : f32
    %770 = vector.broadcast %cst_156 : f32 to vector<2x32xf32>
    %771 = arith.addf %770, %769 : vector<2x32xf32>
    %772 = arith.divf %770, %771 : vector<2x32xf32>
    %773 = arith.mulf %764, %711 : vector<2x32xf32>
    %774 = arith.mulf %758, %766 : vector<2x32xf32>
    %775 = arith.addf %773, %774 : vector<2x32xf32>
    %776 = math.tanh %775 : vector<2x32xf32>
    %777 = arith.mulf %772, %776 : vector<2x32xf32>
    %778 = vector.extract_strided_slice %752 {offsets = [0, 0], sizes = [2, 32], strides = [1, 1]} : vector<2x128xf32> to vector<2x32xf32>
    %779 = arith.negf %778 : vector<2x32xf32>
    %780 = math.exp %779 : vector<2x32xf32>
    %cst_157 = arith.constant 1.000000e+00 : f32
    %781 = vector.broadcast %cst_157 : f32 to vector<2x32xf32>
    %782 = arith.addf %781, %780 : vector<2x32xf32>
    %783 = arith.divf %781, %782 : vector<2x32xf32>
    %784 = vector.extract_strided_slice %752 {offsets = [0, 32], sizes = [2, 32], strides = [1, 1]} : vector<2x128xf32> to vector<2x32xf32>
    %785 = arith.negf %784 : vector<2x32xf32>
    %786 = math.exp %785 : vector<2x32xf32>
    %cst_158 = arith.constant 1.000000e+00 : f32
    %787 = vector.broadcast %cst_158 : f32 to vector<2x32xf32>
    %788 = arith.addf %787, %786 : vector<2x32xf32>
    %789 = arith.divf %787, %788 : vector<2x32xf32>
    %790 = vector.extract_strided_slice %752 {offsets = [0, 64], sizes = [2, 32], strides = [1, 1]} : vector<2x128xf32> to vector<2x32xf32>
    %791 = math.tanh %790 : vector<2x32xf32>
    %792 = vector.extract_strided_slice %752 {offsets = [0, 96], sizes = [2, 32], strides = [1, 1]} : vector<2x128xf32> to vector<2x32xf32>
    %793 = arith.negf %792 : vector<2x32xf32>
    %794 = math.exp %793 : vector<2x32xf32>
    %cst_159 = arith.constant 1.000000e+00 : f32
    %795 = vector.broadcast %cst_159 : f32 to vector<2x32xf32>
    %796 = arith.addf %795, %794 : vector<2x32xf32>
    %797 = arith.divf %795, %796 : vector<2x32xf32>
    %798 = arith.mulf %789, %736 : vector<2x32xf32>
    %799 = arith.mulf %783, %791 : vector<2x32xf32>
    %800 = arith.addf %798, %799 : vector<2x32xf32>
    %801 = math.tanh %800 : vector<2x32xf32>
    %802 = arith.mulf %797, %801 : vector<2x32xf32>
    %c14_160 = arith.constant 14 : index
    %c0_161 = arith.constant 0 : index
    %803 = vector.load %arg21[%c14_160, %c0_161] : memref<16x64xf32, #tpu.memory_space<vmem>>, vector<2x32xf32>
    tpu.vector_store %arg21[%c14_160, %c0_161], %777 {strides = array<i32>} : memref<16x64xf32, #tpu.memory_space<vmem>>, vector<2x32xf32>,
    %c0_162 = arith.constant 0 : index
    %c32_163 = arith.constant 32 : index
    %804 = vector.load %arg21[%c0_162, %c32_163] : memref<16x64xf32, #tpu.memory_space<vmem>>, vector<2x32xf32>
    tpu.vector_store %arg21[%c0_162, %c32_163], %802 {strides = array<i32>} : memref<16x64xf32, #tpu.memory_space<vmem>>, vector<2x32xf32>,
    %c0_164 = arith.constant 0 : index
    %c0_165 = arith.constant 0 : index
    %805 = vector.load %arg21[%c0_164, %c0_165] : memref<16x64xf32, #tpu.memory_space<vmem>>, vector<16x64xf32>
    %cst_166 = arith.constant dense<0.000000e+00> : vector<16x32xf32>
    %806 = tpu.matmul %805, %6, %cst_166 {dimension_numbers = #tpu.dot_dimension_numbers<[1], [0], [0], [1], [0, 0, 1, 1], [], []>} : vector<16x64xf32>, vector<64x32xf32>, vector<16x32xf32> -> vector<16x32xf32>
    %807 = vector.broadcast %8 : vector<1x32xf32> to vector<16x32xf32>
    %808 = arith.addf %806, %807 : vector<16x32xf32>
    %809 = vector.extract_strided_slice %808 {offsets = [0, 0], sizes = [2, 32], strides = [1, 1]} : vector<16x32xf32> to vector<2x32xf32>
    %cst_167 = arith.constant dense<0.000000e+00> : vector<2x32xf32>
    %810 = tpu.matmul %11, %7, %cst_167 {dimension_numbers = #tpu.dot_dimension_numbers<[1], [0], [0], [1], [0, 0, 1, 1], [], []>} : vector<2x32xf32>, vector<32x32xf32>, vector<2x32xf32> -> vector<2x32xf32>
    %811 = arith.addf %809, %810 : vector<2x32xf32>
    %812 = math.tanh %811 : vector<2x32xf32>
    %c0_168 = arith.constant 0 : index
    %c0_169 = arith.constant 0 : index
    %813 = vector.load %arg22[%c0_168, %c0_169] : memref<16x32xf32, #tpu.memory_space<vmem>>, vector<2x32xf32>
    tpu.vector_store %arg22[%c0_168, %c0_169], %812 {strides = array<i32>} : memref<16x32xf32, #tpu.memory_space<vmem>>, vector<2x32xf32>,
    %814 = vector.extract_strided_slice %808 {offsets = [2, 0], sizes = [2, 32], strides = [1, 1]} : vector<16x32xf32> to vector<2x32xf32>
    %cst_170 = arith.constant dense<0.000000e+00> : vector<2x32xf32>
    %815 = tpu.matmul %812, %7, %cst_170 {dimension_numbers = #tpu.dot_dimension_numbers<[1], [0], [0], [1], [0, 0, 1, 1], [], []>} : vector<2x32xf32>, vector<32x32xf32>, vector<2x32xf32> -> vector<2x32xf32>
    %816 = arith.addf %814, %815 : vector<2x32xf32>
    %817 = math.tanh %816 : vector<2x32xf32>
    %c2_171 = arith.constant 2 : index
    %c0_172 = arith.constant 0 : index
    %818 = vector.load %arg22[%c2_171, %c0_172] : memref<16x32xf32, #tpu.memory_space<vmem>>, vector<2x32xf32>
    tpu.vector_store %arg22[%c2_171, %c0_172], %817 {strides = array<i32>} : memref<16x32xf32, #tpu.memory_space<vmem>>, vector<2x32xf32>,
    %819 = vector.extract_strided_slice %808 {offsets = [4, 0], sizes = [2, 32], strides = [1, 1]} : vector<16x32xf32> to vector<2x32xf32>
    %cst_173 = arith.constant dense<0.000000e+00> : vector<2x32xf32>
    %820 = tpu.matmul %817, %7, %cst_173 {dimension_numbers = #tpu.dot_dimension_numbers<[1], [0], [0], [1], [0, 0, 1, 1], [], []>} : vector<2x32xf32>, vector<32x32xf32>, vector<2x32xf32> -> vector<2x32xf32>
    %821 = arith.addf %819, %820 : vector<2x32xf32>
    %822 = math.tanh %821 : vector<2x32xf32>
    %c4_174 = arith.constant 4 : index
    %c0_175 = arith.constant 0 : index
    %823 = vector.load %arg22[%c4_174, %c0_175] : memref<16x32xf32, #tpu.memory_space<vmem>>, vector<2x32xf32>
    tpu.vector_store %arg22[%c4_174, %c0_175], %822 {strides = array<i32>} : memref<16x32xf32, #tpu.memory_space<vmem>>, vector<2x32xf32>,
    %824 = vector.extract_strided_slice %808 {offsets = [6, 0], sizes = [2, 32], strides = [1, 1]} : vector<16x32xf32> to vector<2x32xf32>
    %cst_176 = arith.constant dense<0.000000e+00> : vector<2x32xf32>
    %825 = tpu.matmul %822, %7, %cst_176 {dimension_numbers = #tpu.dot_dimension_numbers<[1], [0], [0], [1], [0, 0, 1, 1], [], []>} : vector<2x32xf32>, vector<32x32xf32>, vector<2x32xf32> -> vector<2x32xf32>
    %826 = arith.addf %824, %825 : vector<2x32xf32>
    %827 = math.tanh %826 : vector<2x32xf32>
    %c6_177 = arith.constant 6 : index
    %c0_178 = arith.constant 0 : index
    %828 = vector.load %arg22[%c6_177, %c0_178] : memref<16x32xf32, #tpu.memory_space<vmem>>, vector<2x32xf32>
    tpu.vector_store %arg22[%c6_177, %c0_178], %827 {strides = array<i32>} : memref<16x32xf32, #tpu.memory_space<vmem>>, vector<2x32xf32>,
    %829 = vector.extract_strided_slice %808 {offsets = [8, 0], sizes = [2, 32], strides = [1, 1]} : vector<16x32xf32> to vector<2x32xf32>
    %cst_179 = arith.constant dense<0.000000e+00> : vector<2x32xf32>
    %830 = tpu.matmul %827, %7, %cst_179 {dimension_numbers = #tpu.dot_dimension_numbers<[1], [0], [0], [1], [0, 0, 1, 1], [], []>} : vector<2x32xf32>, vector<32x32xf32>, vector<2x32xf32> -> vector<2x32xf32>
    %831 = arith.addf %829, %830 : vector<2x32xf32>
    %832 = math.tanh %831 : vector<2x32xf32>
    %c8_180 = arith.constant 8 : index
    %c0_181 = arith.constant 0 : index
    %833 = vector.load %arg22[%c8_180, %c0_181] : memref<16x32xf32, #tpu.memory_space<vmem>>, vector<2x32xf32>
    tpu.vector_store %arg22[%c8_180, %c0_181], %832 {strides = array<i32>} : memref<16x32xf32, #tpu.memory_space<vmem>>, vector<2x32xf32>,
    %834 = vector.extract_strided_slice %808 {offsets = [10, 0], sizes = [2, 32], strides = [1, 1]} : vector<16x32xf32> to vector<2x32xf32>
    %cst_182 = arith.constant dense<0.000000e+00> : vector<2x32xf32>
    %835 = tpu.matmul %832, %7, %cst_182 {dimension_numbers = #tpu.dot_dimension_numbers<[1], [0], [0], [1], [0, 0, 1, 1], [], []>} : vector<2x32xf32>, vector<32x32xf32>, vector<2x32xf32> -> vector<2x32xf32>
    %836 = arith.addf %834, %835 : vector<2x32xf32>
    %837 = math.tanh %836 : vector<2x32xf32>
    %c10_183 = arith.constant 10 : index
    %c0_184 = arith.constant 0 : index
    %838 = vector.load %arg22[%c10_183, %c0_184] : memref<16x32xf32, #tpu.memory_space<vmem>>, vector<2x32xf32>
    tpu.vector_store %arg22[%c10_183, %c0_184], %837 {strides = array<i32>} : memref<16x32xf32, #tpu.memory_space<vmem>>, vector<2x32xf32>,
    %839 = vector.extract_strided_slice %808 {offsets = [12, 0], sizes = [2, 32], strides = [1, 1]} : vector<16x32xf32> to vector<2x32xf32>
    %cst_185 = arith.constant dense<0.000000e+00> : vector<2x32xf32>
    %840 = tpu.matmul %837, %7, %cst_185 {dimension_numbers = #tpu.dot_dimension_numbers<[1], [0], [0], [1], [0, 0, 1, 1], [], []>} : vector<2x32xf32>, vector<32x32xf32>, vector<2x32xf32> -> vector<2x32xf32>
    %841 = arith.addf %839, %840 : vector<2x32xf32>
    %842 = math.tanh %841 : vector<2x32xf32>
    %c12_186 = arith.constant 12 : index
    %c0_187 = arith.constant 0 : index
    %843 = vector.load %arg22[%c12_186, %c0_187] : memref<16x32xf32, #tpu.memory_space<vmem>>, vector<2x32xf32>
    tpu.vector_store %arg22[%c12_186, %c0_187], %842 {strides = array<i32>} : memref<16x32xf32, #tpu.memory_space<vmem>>, vector<2x32xf32>,
    %844 = vector.extract_strided_slice %808 {offsets = [14, 0], sizes = [2, 32], strides = [1, 1]} : vector<16x32xf32> to vector<2x32xf32>
    %cst_188 = arith.constant dense<0.000000e+00> : vector<2x32xf32>
    %845 = tpu.matmul %842, %7, %cst_188 {dimension_numbers = #tpu.dot_dimension_numbers<[1], [0], [0], [1], [0, 0, 1, 1], [], []>} : vector<2x32xf32>, vector<32x32xf32>, vector<2x32xf32> -> vector<2x32xf32>
    %846 = arith.addf %844, %845 : vector<2x32xf32>
    %847 = math.tanh %846 : vector<2x32xf32>
    %c14_189 = arith.constant 14 : index
    %c0_190 = arith.constant 0 : index
    %848 = vector.load %arg22[%c14_189, %c0_190] : memref<16x32xf32, #tpu.memory_space<vmem>>, vector<2x32xf32>
    tpu.vector_store %arg22[%c14_189, %c0_190], %847 {strides = array<i32>} : memref<16x32xf32, #tpu.memory_space<vmem>>, vector<2x32xf32>,
    %c0_191 = arith.constant 0 : index
    %c0_192 = arith.constant 0 : index
    %849 = vector.load %arg22[%c0_191, %c0_192] : memref<16x32xf32, #tpu.memory_space<vmem>>, vector<16x32xf32>
    %cst_193 = arith.constant dense<0.000000e+00> : vector<16x32xf32>
    %850 = tpu.matmul %849, %9, %cst_193 {dimension_numbers = #tpu.dot_dimension_numbers<[1], [0], [0], [1], [0, 0, 1, 1], [], []>} : vector<16x32xf32>, vector<32x32xf32>, vector<16x32xf32> -> vector<16x32xf32>
    %851 = vector.broadcast %10 : vector<1x32xf32> to vector<16x32xf32>
    %852 = arith.addf %850, %851 : vector<16x32xf32>
    %cst_194 = arith.constant 0.000000e+00 : f32
    %853 = vector.broadcast %cst_194 : f32 to vector<16x32xf32>
    %854 = arith.cmpf ogt, %852, %853 : vector<16x32xf32>
    %cst_195 = arith.constant 2.000000e-01 : f32
    %855 = vector.broadcast %cst_195 : f32 to vector<16x32xf32>
    %856 = arith.mulf %855, %852 : vector<16x32xf32>
    %857 = arith.select %854, %852, %856 : vector<16x32xi1>, vector<16x32xf32>
    %858 = vector.extract_strided_slice %857 {offsets = [0, 0], sizes = [16, 16], strides = [1, 1]} : vector<16x32xf32> to vector<16x16xf32>
    %c0_196 = arith.constant 0 : index
    %c0_197 = arith.constant 0 : index
    %859 = vector.load %arg16[%c0_196, %c0_197] : memref<16x128xf32, #tpu.memory_space<vmem>>, vector<16x128xf32>
    %cst_198 = arith.constant dense<0.000000e+00> : vector<16x128xf32>
    %860 = tpu.matmul %858, %859, %cst_198 {dimension_numbers = #tpu.dot_dimension_numbers<[1], [0], [0], [1], [0, 0, 1, 1], [], []>} : vector<16x16xf32>, vector<16x128xf32>, vector<16x128xf32> -> vector<16x128xf32>
    %861 = vector.extract_strided_slice %857 {offsets = [0, 0], sizes = [2, 32], strides = [1, 1]} : vector<16x32xf32> to vector<2x32xf32>
    %862 = vector.shape_cast %861 : vector<2x32xf32> to vector<2x1x32xf32>
    %c0_199 = arith.constant 0 : index
    %c0_200 = arith.constant 0 : index
    %c0_201 = arith.constant 0 : index
    %863 = vector.load %arg19[%c0_199, %c0_200, %c0_201] : memref<2x8x32xf32, #tpu.memory_space<vmem>>, vector<2x1x32xf32>
    tpu.vector_store %arg19[%c0_199, %c0_200, %c0_201], %862 {strides = array<i32>} : memref<2x8x32xf32, #tpu.memory_space<vmem>>, vector<2x1x32xf32>,
    %864 = vector.extract_strided_slice %860 {offsets = [0, 0], sizes = [2, 128], strides = [1, 1]} : vector<16x128xf32> to vector<2x128xf32>
    %865 = arith.addf %864, %292 : vector<2x128xf32>
    %cst_202 = arith.constant 0.000000e+00 : f32
    %866 = vector.broadcast %cst_202 : f32 to vector<2x128xf32>
    %867 = arith.cmpf ogt, %865, %866 : vector<2x128xf32>
    %cst_203 = arith.constant 2.000000e-01 : f32
    %868 = vector.broadcast %cst_203 : f32 to vector<2x128xf32>
    %869 = arith.mulf %868, %865 : vector<2x128xf32>
    %870 = arith.select %867, %865, %869 : vector<2x128xi1>, vector<2x128xf32>
    %871 = vector.shape_cast %870 : vector<2x128xf32> to vector<2x1x128xf32>
    %c0_204 = arith.constant 0 : index
    %c0_205 = arith.constant 0 : index
    %c0_206 = arith.constant 0 : index
    %872 = vector.load %arg20[%c0_204, %c0_205, %c0_206] : memref<2x8x128xf32, #tpu.memory_space<vmem>>, vector<2x1x128xf32>
    tpu.vector_store %arg20[%c0_204, %c0_205, %c0_206], %871 {strides = array<i32>} : memref<2x8x128xf32, #tpu.memory_space<vmem>>, vector<2x1x128xf32>,
    %873 = vector.extract_strided_slice %857 {offsets = [2, 0], sizes = [2, 32], strides = [1, 1]} : vector<16x32xf32> to vector<2x32xf32>
    %874 = vector.shape_cast %873 : vector<2x32xf32> to vector<2x1x32xf32>
    %c0_207 = arith.constant 0 : index
    %c1 = arith.constant 1 : index
    %c0_208 = arith.constant 0 : index
    %875 = vector.load %arg19[%c0_207, %c1, %c0_208] : memref<2x8x32xf32, #tpu.memory_space<vmem>>, vector<2x1x32xf32>
    tpu.vector_store %arg19[%c0_207, %c1, %c0_208], %874 {strides = array<i32>} : memref<2x8x32xf32, #tpu.memory_space<vmem>>, vector<2x1x32xf32>,
    %876 = vector.extract_strided_slice %860 {offsets = [2, 0], sizes = [2, 128], strides = [1, 1]} : vector<16x128xf32> to vector<2x128xf32>
    %877 = arith.addf %876, %292 : vector<2x128xf32>
    %cst_209 = arith.constant 0.000000e+00 : f32
    %878 = vector.broadcast %cst_209 : f32 to vector<2x128xf32>
    %879 = arith.cmpf ogt, %877, %878 : vector<2x128xf32>
    %cst_210 = arith.constant 2.000000e-01 : f32
    %880 = vector.broadcast %cst_210 : f32 to vector<2x128xf32>
    %881 = arith.mulf %880, %877 : vector<2x128xf32>
    %882 = arith.select %879, %877, %881 : vector<2x128xi1>, vector<2x128xf32>
    %883 = vector.shape_cast %882 : vector<2x128xf32> to vector<2x1x128xf32>
    %c0_211 = arith.constant 0 : index
    %c1_212 = arith.constant 1 : index
    %c0_213 = arith.constant 0 : index
    %884 = vector.load %arg20[%c0_211, %c1_212, %c0_213] : memref<2x8x128xf32, #tpu.memory_space<vmem>>, vector<2x1x128xf32>
    tpu.vector_store %arg20[%c0_211, %c1_212, %c0_213], %883 {strides = array<i32>} : memref<2x8x128xf32, #tpu.memory_space<vmem>>, vector<2x1x128xf32>,
    %885 = vector.extract_strided_slice %857 {offsets = [4, 0], sizes = [2, 32], strides = [1, 1]} : vector<16x32xf32> to vector<2x32xf32>
    %886 = vector.shape_cast %885 : vector<2x32xf32> to vector<2x1x32xf32>
    %c0_214 = arith.constant 0 : index
    %c2_215 = arith.constant 2 : index
    %c0_216 = arith.constant 0 : index
    %887 = vector.load %arg19[%c0_214, %c2_215, %c0_216] : memref<2x8x32xf32, #tpu.memory_space<vmem>>, vector<2x1x32xf32>
    tpu.vector_store %arg19[%c0_214, %c2_215, %c0_216], %886 {strides = array<i32>} : memref<2x8x32xf32, #tpu.memory_space<vmem>>, vector<2x1x32xf32>,
    %888 = vector.extract_strided_slice %860 {offsets = [4, 0], sizes = [2, 128], strides = [1, 1]} : vector<16x128xf32> to vector<2x128xf32>
    %889 = arith.addf %888, %292 : vector<2x128xf32>
    %cst_217 = arith.constant 0.000000e+00 : f32
    %890 = vector.broadcast %cst_217 : f32 to vector<2x128xf32>
    %891 = arith.cmpf ogt, %889, %890 : vector<2x128xf32>
    %cst_218 = arith.constant 2.000000e-01 : f32
    %892 = vector.broadcast %cst_218 : f32 to vector<2x128xf32>
    %893 = arith.mulf %892, %889 : vector<2x128xf32>
    %894 = arith.select %891, %889, %893 : vector<2x128xi1>, vector<2x128xf32>
    %895 = vector.shape_cast %894 : vector<2x128xf32> to vector<2x1x128xf32>
    %c0_219 = arith.constant 0 : index
    %c2_220 = arith.constant 2 : index
    %c0_221 = arith.constant 0 : index
    %896 = vector.load %arg20[%c0_219, %c2_220, %c0_221] : memref<2x8x128xf32, #tpu.memory_space<vmem>>, vector<2x1x128xf32>
    tpu.vector_store %arg20[%c0_219, %c2_220, %c0_221], %895 {strides = array<i32>} : memref<2x8x128xf32, #tpu.memory_space<vmem>>, vector<2x1x128xf32>,
    %897 = vector.extract_strided_slice %857 {offsets = [6, 0], sizes = [2, 32], strides = [1, 1]} : vector<16x32xf32> to vector<2x32xf32>
    %898 = vector.shape_cast %897 : vector<2x32xf32> to vector<2x1x32xf32>
    %c0_222 = arith.constant 0 : index
    %c3 = arith.constant 3 : index
    %c0_223 = arith.constant 0 : index
    %899 = vector.load %arg19[%c0_222, %c3, %c0_223] : memref<2x8x32xf32, #tpu.memory_space<vmem>>, vector<2x1x32xf32>
    tpu.vector_store %arg19[%c0_222, %c3, %c0_223], %898 {strides = array<i32>} : memref<2x8x32xf32, #tpu.memory_space<vmem>>, vector<2x1x32xf32>,
    %900 = vector.extract_strided_slice %860 {offsets = [6, 0], sizes = [2, 128], strides = [1, 1]} : vector<16x128xf32> to vector<2x128xf32>
    %901 = arith.addf %900, %292 : vector<2x128xf32>
    %cst_224 = arith.constant 0.000000e+00 : f32
    %902 = vector.broadcast %cst_224 : f32 to vector<2x128xf32>
    %903 = arith.cmpf ogt, %901, %902 : vector<2x128xf32>
    %cst_225 = arith.constant 2.000000e-01 : f32
    %904 = vector.broadcast %cst_225 : f32 to vector<2x128xf32>
    %905 = arith.mulf %904, %901 : vector<2x128xf32>
    %906 = arith.select %903, %901, %905 : vector<2x128xi1>, vector<2x128xf32>
    %907 = vector.shape_cast %906 : vector<2x128xf32> to vector<2x1x128xf32>
    %c0_226 = arith.constant 0 : index
    %c3_227 = arith.constant 3 : index
    %c0_228 = arith.constant 0 : index
    %908 = vector.load %arg20[%c0_226, %c3_227, %c0_228] : memref<2x8x128xf32, #tpu.memory_space<vmem>>, vector<2x1x128xf32>
    tpu.vector_store %arg20[%c0_226, %c3_227, %c0_228], %907 {strides = array<i32>} : memref<2x8x128xf32, #tpu.memory_space<vmem>>, vector<2x1x128xf32>,
    %909 = vector.extract_strided_slice %857 {offsets = [8, 0], sizes = [2, 32], strides = [1, 1]} : vector<16x32xf32> to vector<2x32xf32>
    %910 = vector.shape_cast %909 : vector<2x32xf32> to vector<2x1x32xf32>
    %c0_229 = arith.constant 0 : index
    %c4_230 = arith.constant 4 : index
    %c0_231 = arith.constant 0 : index
    %911 = vector.load %arg19[%c0_229, %c4_230, %c0_231] : memref<2x8x32xf32, #tpu.memory_space<vmem>>, vector<2x1x32xf32>
    tpu.vector_store %arg19[%c0_229, %c4_230, %c0_231], %910 {strides = array<i32>} : memref<2x8x32xf32, #tpu.memory_space<vmem>>, vector<2x1x32xf32>,
    %912 = vector.extract_strided_slice %860 {offsets = [8, 0], sizes = [2, 128], strides = [1, 1]} : vector<16x128xf32> to vector<2x128xf32>
    %913 = arith.addf %912, %292 : vector<2x128xf32>
    %cst_232 = arith.constant 0.000000e+00 : f32
    %914 = vector.broadcast %cst_232 : f32 to vector<2x128xf32>
    %915 = arith.cmpf ogt, %913, %914 : vector<2x128xf32>
    %cst_233 = arith.constant 2.000000e-01 : f32
    %916 = vector.broadcast %cst_233 : f32 to vector<2x128xf32>
    %917 = arith.mulf %916, %913 : vector<2x128xf32>
    %918 = arith.select %915, %913, %917 : vector<2x128xi1>, vector<2x128xf32>
    %919 = vector.shape_cast %918 : vector<2x128xf32> to vector<2x1x128xf32>
    %c0_234 = arith.constant 0 : index
    %c4_235 = arith.constant 4 : index
    %c0_236 = arith.constant 0 : index
    %920 = vector.load %arg20[%c0_234, %c4_235, %c0_236] : memref<2x8x128xf32, #tpu.memory_space<vmem>>, vector<2x1x128xf32>
    tpu.vector_store %arg20[%c0_234, %c4_235, %c0_236], %919 {strides = array<i32>} : memref<2x8x128xf32, #tpu.memory_space<vmem>>, vector<2x1x128xf32>,
    %921 = vector.extract_strided_slice %857 {offsets = [10, 0], sizes = [2, 32], strides = [1, 1]} : vector<16x32xf32> to vector<2x32xf32>
    %922 = vector.shape_cast %921 : vector<2x32xf32> to vector<2x1x32xf32>
    %c0_237 = arith.constant 0 : index
    %c5 = arith.constant 5 : index
    %c0_238 = arith.constant 0 : index
    %923 = vector.load %arg19[%c0_237, %c5, %c0_238] : memref<2x8x32xf32, #tpu.memory_space<vmem>>, vector<2x1x32xf32>
    tpu.vector_store %arg19[%c0_237, %c5, %c0_238], %922 {strides = array<i32>} : memref<2x8x32xf32, #tpu.memory_space<vmem>>, vector<2x1x32xf32>,
    %924 = vector.extract_strided_slice %860 {offsets = [10, 0], sizes = [2, 128], strides = [1, 1]} : vector<16x128xf32> to vector<2x128xf32>
    %925 = arith.addf %924, %292 : vector<2x128xf32>
    %cst_239 = arith.constant 0.000000e+00 : f32
    %926 = vector.broadcast %cst_239 : f32 to vector<2x128xf32>
    %927 = arith.cmpf ogt, %925, %926 : vector<2x128xf32>
    %cst_240 = arith.constant 2.000000e-01 : f32
    %928 = vector.broadcast %cst_240 : f32 to vector<2x128xf32>
    %929 = arith.mulf %928, %925 : vector<2x128xf32>
    %930 = arith.select %927, %925, %929 : vector<2x128xi1>, vector<2x128xf32>
    %931 = vector.shape_cast %930 : vector<2x128xf32> to vector<2x1x128xf32>
    %c0_241 = arith.constant 0 : index
    %c5_242 = arith.constant 5 : index
    %c0_243 = arith.constant 0 : index
    %932 = vector.load %arg20[%c0_241, %c5_242, %c0_243] : memref<2x8x128xf32, #tpu.memory_space<vmem>>, vector<2x1x128xf32>
    tpu.vector_store %arg20[%c0_241, %c5_242, %c0_243], %931 {strides = array<i32>} : memref<2x8x128xf32, #tpu.memory_space<vmem>>, vector<2x1x128xf32>,
    %933 = vector.extract_strided_slice %857 {offsets = [12, 0], sizes = [2, 32], strides = [1, 1]} : vector<16x32xf32> to vector<2x32xf32>
    %934 = vector.shape_cast %933 : vector<2x32xf32> to vector<2x1x32xf32>
    %c0_244 = arith.constant 0 : index
    %c6_245 = arith.constant 6 : index
    %c0_246 = arith.constant 0 : index
    %935 = vector.load %arg19[%c0_244, %c6_245, %c0_246] : memref<2x8x32xf32, #tpu.memory_space<vmem>>, vector<2x1x32xf32>
    tpu.vector_store %arg19[%c0_244, %c6_245, %c0_246], %934 {strides = array<i32>} : memref<2x8x32xf32, #tpu.memory_space<vmem>>, vector<2x1x32xf32>,
    %936 = vector.extract_strided_slice %860 {offsets = [12, 0], sizes = [2, 128], strides = [1, 1]} : vector<16x128xf32> to vector<2x128xf32>
    %937 = arith.addf %936, %292 : vector<2x128xf32>
    %cst_247 = arith.constant 0.000000e+00 : f32
    %938 = vector.broadcast %cst_247 : f32 to vector<2x128xf32>
    %939 = arith.cmpf ogt, %937, %938 : vector<2x128xf32>
    %cst_248 = arith.constant 2.000000e-01 : f32
    %940 = vector.broadcast %cst_248 : f32 to vector<2x128xf32>
    %941 = arith.mulf %940, %937 : vector<2x128xf32>
    %942 = arith.select %939, %937, %941 : vector<2x128xi1>, vector<2x128xf32>
    %943 = vector.shape_cast %942 : vector<2x128xf32> to vector<2x1x128xf32>
    %c0_249 = arith.constant 0 : index
    %c6_250 = arith.constant 6 : index
    %c0_251 = arith.constant 0 : index
    %944 = vector.load %arg20[%c0_249, %c6_250, %c0_251] : memref<2x8x128xf32, #tpu.memory_space<vmem>>, vector<2x1x128xf32>
    tpu.vector_store %arg20[%c0_249, %c6_250, %c0_251], %943 {strides = array<i32>} : memref<2x8x128xf32, #tpu.memory_space<vmem>>, vector<2x1x128xf32>,
    %945 = vector.extract_strided_slice %857 {offsets = [14, 0], sizes = [2, 32], strides = [1, 1]} : vector<16x32xf32> to vector<2x32xf32>
    %946 = vector.shape_cast %945 : vector<2x32xf32> to vector<2x1x32xf32>
    %c0_252 = arith.constant 0 : index
    %c7 = arith.constant 7 : index
    %c0_253 = arith.constant 0 : index
    %947 = vector.load %arg19[%c0_252, %c7, %c0_253] : memref<2x8x32xf32, #tpu.memory_space<vmem>>, vector<2x1x32xf32>
    tpu.vector_store %arg19[%c0_252, %c7, %c0_253], %946 {strides = array<i32>} : memref<2x8x32xf32, #tpu.memory_space<vmem>>, vector<2x1x32xf32>,
    %948 = vector.extract_strided_slice %860 {offsets = [14, 0], sizes = [2, 128], strides = [1, 1]} : vector<16x128xf32> to vector<2x128xf32>
    %949 = arith.addf %948, %292 : vector<2x128xf32>
    %cst_254 = arith.constant 0.000000e+00 : f32
    %950 = vector.broadcast %cst_254 : f32 to vector<2x128xf32>
    %951 = arith.cmpf ogt, %949, %950 : vector<2x128xf32>
    %cst_255 = arith.constant 2.000000e-01 : f32
    %952 = vector.broadcast %cst_255 : f32 to vector<2x128xf32>
    %953 = arith.mulf %952, %949 : vector<2x128xf32>
    %954 = arith.select %951, %949, %953 : vector<2x128xi1>, vector<2x128xf32>
    %955 = vector.shape_cast %954 : vector<2x128xf32> to vector<2x1x128xf32>
    %c0_256 = arith.constant 0 : index
    %c7_257 = arith.constant 7 : index
    %c0_258 = arith.constant 0 : index
    %956 = vector.load %arg20[%c0_256, %c7_257, %c0_258] : memref<2x8x128xf32, #tpu.memory_space<vmem>>, vector<2x1x128xf32>
    tpu.vector_store %arg20[%c0_256, %c7_257, %c0_258], %955 {strides = array<i32>} : memref<2x8x128xf32, #tpu.memory_space<vmem>>, vector<2x1x128xf32>,
    return
  }
  func.func @transform_0(%arg0: i32) -> (i32, i32, i32) {
    %c0_i32 = arith.constant 0 : i32
    %c0_i32_0 = arith.constant 0 : i32
    %c0_i32_1 = arith.constant 0 : i32
    %c0_i32_2 = arith.constant 0 : i32
    return %c0_i32, %c0_i32_0, %c0_i32_1 : i32, i32, i32
  }
  func.func @transform_1(%arg0: i32) -> (i32, i32, i32) {
    %c0_i32 = arith.constant 0 : i32
    %c0_i32_0 = arith.constant 0 : i32
    %c0_i32_1 = arith.constant 0 : i32
    %c0_i32_2 = arith.constant 0 : i32
    return %c0_i32, %c0_i32_0, %c0_i32_1 : i32, i32, i32
  }
  func.func @transform_2(%arg0: i32) -> (i32, i32) {
    %c0_i32 = arith.constant 0 : i32
    %c0_i32_0 = arith.constant 0 : i32
    %c0_i32_1 = arith.constant 0 : i32
    return %c0_i32, %c0_i32_0 : i32, i32
  }
  func.func @transform_3(%arg0: i32) -> (i32, i32) {
    %c0_i32 = arith.constant 0 : i32
    %c0_i32_0 = arith.constant 0 : i32
    %c0_i32_1 = arith.constant 0 : i32
    return %c0_i32, %c0_i32_0 : i32, i32
  }
  func.func @transform_4(%arg0: i32) -> (i32, i32) {
    %c0_i32 = arith.constant 0 : i32
    %c0_i32_0 = arith.constant 0 : i32
    %c0_i32_1 = arith.constant 0 : i32
    return %c0_i32, %c0_i32_0 : i32, i32
  }
  func.func @transform_5(%arg0: i32) -> (i32, i32) {
    %c0_i32 = arith.constant 0 : i32
    %c0_i32_0 = arith.constant 0 : i32
    %c0_i32_1 = arith.constant 0 : i32
    return %c0_i32, %c0_i32_0 : i32, i32
  }
  func.func @transform_6(%arg0: i32) -> (i32, i32) {
    %c0_i32 = arith.constant 0 : i32
    %c0_i32_0 = arith.constant 0 : i32
    %c0_i32_1 = arith.constant 0 : i32
    return %c0_i32, %c0_i32_0 : i32, i32
  }
  func.func @transform_7(%arg0: i32) -> (i32, i32) {
    %c0_i32 = arith.constant 0 : i32
    %c0_i32_0 = arith.constant 0 : i32
    %c0_i32_1 = arith.constant 0 : i32
    return %c0_i32, %c0_i32_0 : i32, i32
  }
  func.func @transform_8(%arg0: i32) -> (i32, i32) {
    %c0_i32 = arith.constant 0 : i32
    %c0_i32_0 = arith.constant 0 : i32
    %c0_i32_1 = arith.constant 0 : i32
    return %c0_i32, %c0_i32_0 : i32, i32
  }
  func.func @transform_9(%arg0: i32) -> (i32, i32) {
    %c0_i32 = arith.constant 0 : i32
    %c0_i32_0 = arith.constant 0 : i32
    %c0_i32_1 = arith.constant 0 : i32
    return %c0_i32, %c0_i32_0 : i32, i32
  }
  func.func @transform_10(%arg0: i32) -> (i32, i32) {
    %c0_i32 = arith.constant 0 : i32
    %c0_i32_0 = arith.constant 0 : i32
    %c0_i32_1 = arith.constant 0 : i32
    return %c0_i32, %c0_i32_0 : i32, i32
  }
  func.func @transform_11(%arg0: i32) -> (i32, i32) {
    %c0_i32 = arith.constant 0 : i32
    %c0_i32_0 = arith.constant 0 : i32
    %c0_i32_1 = arith.constant 0 : i32
    return %c0_i32, %c0_i32_0 : i32, i32
  }
  func.func @transform_12(%arg0: i32) -> (i32, i32) {
    %c0_i32 = arith.constant 0 : i32
    %c0_i32_0 = arith.constant 0 : i32
    %c0_i32_1 = arith.constant 0 : i32
    return %c0_i32, %c0_i32_0 : i32, i32
  }
  func.func @transform_13(%arg0: i32) -> (i32, i32) {
    %c0_i32 = arith.constant 0 : i32
    %c0_i32_0 = arith.constant 0 : i32
    %c0_i32_1 = arith.constant 0 : i32
    return %c0_i32, %c0_i32_0 : i32, i32
  }
  func.func @transform_14(%arg0: i32) -> (i32, i32) {
    %c0_i32 = arith.constant 0 : i32
    %c0_i32_0 = arith.constant 0 : i32
    %c0_i32_1 = arith.constant 0 : i32
    return %c0_i32, %c0_i32_0 : i32, i32
  }
  func.func @transform_15(%arg0: i32) -> (i32, i32) {
    %c0_i32 = arith.constant 0 : i32
    %c0_i32_0 = arith.constant 0 : i32
    %c0_i32_1 = arith.constant 0 : i32
    return %c0_i32, %c0_i32_0 : i32, i32
  }
  func.func @transform_16(%arg0: i32) -> (i32, i32) {
    %c0_i32 = arith.constant 0 : i32
    %c0_i32_0 = arith.constant 0 : i32
    %c0_i32_1 = arith.constant 0 : i32
    return %c0_i32, %c0_i32_0 : i32, i32
  }
  func.func @transform_17(%arg0: i32) -> (i32, i32) {
    %c0_i32 = arith.constant 0 : i32
    %c0_i32_0 = arith.constant 0 : i32
    %c0_i32_1 = arith.constant 0 : i32
    return %c0_i32, %c0_i32_0 : i32, i32
  }
  func.func @transform_18(%arg0: i32) -> (i32, i32, i32) {
    %c0_i32 = arith.constant 0 : i32
    %c0_i32_0 = arith.constant 0 : i32
    %c0_i32_1 = arith.constant 0 : i32
    %c0_i32_2 = arith.constant 0 : i32
    return %c0_i32, %c0_i32_0, %c0_i32_1 : i32, i32, i32
  }
  func.func @transform_19(%arg0: i32) -> (i32, i32, i32) {
    %c0_i32 = arith.constant 0 : i32
    %c0_i32_0 = arith.constant 0 : i32
    %c0_i32_1 = arith.constant 0 : i32
    %c0_i32_2 = arith.constant 0 : i32
    return %c0_i32, %c0_i32_0, %c0_i32_1 : i32, i32, i32
  }
}

module attributes {stable_mosaic.version = 11 : i64} {
  func.func @_matmul_t_kernel(%arg0: i32, %arg1: memref<3x200xf32, #tpu.memory_space<vmem>>, %arg2: memref<200x1024xf32, #tpu.memory_space<vmem>>, %arg3: memref<3x1xf32, #tpu.memory_space<vmem>>, %arg4: memref<3x1024xf32, #tpu.memory_space<vmem>>) attributes {dimension_semantics = [#tpu.dimension_semantics<parallel>], iteration_bounds = array<i64: 4>, scalar_prefetch = 0 : i64, scratch_operands = 0 : i64, tpu.core_type = #tpu.core_type<tc>, window_params = [{pipeline_mode = #tpu.pipeline_mode<synchronous>, transform_indices = @transform_0, window_bounds = array<i64: 3, 200>}, {transform_indices = @transform_1, window_bounds = array<i64: 200, 1024>}, {pipeline_mode = #tpu.pipeline_mode<synchronous>, transform_indices = @transform_2, window_bounds = array<i64: 3, 1>}, {transform_indices = @transform_3, window_bounds = array<i64: 3, 1024>}]} {
    %c0 = arith.constant 0 : index
    %c0_0 = arith.constant 0 : index
    %0 = vector.load %arg1[%c0, %c0_0] : memref<3x200xf32, #tpu.memory_space<vmem>>, vector<3x200xf32>
    %c0_1 = arith.constant 0 : index
    %c0_2 = arith.constant 0 : index
    %1 = vector.load %arg2[%c0_1, %c0_2] : memref<200x1024xf32, #tpu.memory_space<vmem>>, vector<200x1024xf32>
    %cst = arith.constant dense<0.000000e+00> : vector<3x1024xf32>
    %2 = tpu.matmul %0, %1, %cst {dimension_numbers = #tpu.dot_dimension_numbers<[1], [0], [0], [1], [0, 0, 1, 1], [], []>} : vector<3x200xf32>, vector<200x1024xf32>, vector<3x1024xf32> -> vector<3x1024xf32>
    %c0_3 = arith.constant 0 : index
    %c0_4 = arith.constant 0 : index
    %3 = vector.load %arg3[%c0_3, %c0_4] : memref<3x1xf32, #tpu.memory_space<vmem>>, vector<3x1xf32>
    %4 = vector.broadcast %3 : vector<3x1xf32> to vector<3x1024xf32>
    %5 = arith.addf %2, %4 : vector<3x1024xf32>
    %6 = math.tanh %5 : vector<3x1024xf32>
    %c0_5 = arith.constant 0 : index
    %c0_6 = arith.constant 0 : index
    %7 = vector.load %arg4[%c0_5, %c0_6] : memref<3x1024xf32, #tpu.memory_space<vmem>>, vector<3x1024xf32>
    tpu.vector_store %arg4[%c0_5, %c0_6], %6 {strides = array<i32>} : memref<3x1024xf32, #tpu.memory_space<vmem>>, vector<3x1024xf32>,
    return
  }
  func.func @transform_0(%arg0: i32) -> (i32, i32) {
    %c0_i32 = arith.constant 0 : i32
    %c0_i32_0 = arith.constant 0 : i32
    %c0_i32_1 = arith.constant 0 : i32
    return %c0_i32, %c0_i32_0 : i32, i32
  }
  func.func @transform_1(%arg0: i32) -> (i32, i32) {
    %c0_i32 = arith.constant 0 : i32
    %c0_i32_0 = arith.constant 0 : i32
    return %c0_i32, %arg0 : i32, i32
  }
  func.func @transform_2(%arg0: i32) -> (i32, i32) {
    %c0_i32 = arith.constant 0 : i32
    %c0_i32_0 = arith.constant 0 : i32
    %c0_i32_1 = arith.constant 0 : i32
    return %c0_i32, %c0_i32_0 : i32, i32
  }
  func.func @transform_3(%arg0: i32) -> (i32, i32) {
    %c0_i32 = arith.constant 0 : i32
    %c0_i32_0 = arith.constant 0 : i32
    return %c0_i32, %arg0 : i32, i32
  }
}

</mosaic_0001>

<bundles_post_ra>
// kernel: _lambda_.4
= control target key start
LH: loop header
LB: loop body
LE: loop exit
PB: predicated region body
PF: predicated region fallthrough
CT: control target
= control target key end

     0   :  { %s539_s12 = smov 0   ;;  %s541_s13 = smov 0   ;;  %s599_s0 = inlined_call_operand.vmem [shape: f32[8,75], index: 0, kind: input, shape index: {}]   ;;  %s600_s1 = inlined_call_operand.vmem [shape: f32[75,256], index: 1, kind: input, shape index: {}]   ;;  %s601_s2 = inlined_call_operand.vmem [shape: f32[8,1], index: 2, kind: input, shape index: {}]   ;;  %s602_s3 = inlined_call_operand.vmem [shape: f32[8,256], index: 3, kind: output, shape index: {}]  }
   0x1   :  { %s543_s14 = smov 0  }
   0x2 LB: > { %s397_s15 = sadd.s32 4294967295, %s512_s14   ;;  %s556_s16 = sadd.s32 1, %s512_s14   ;;  %s512_s14 = sphi %s543_s14, %s605_s14   ;;  %s508_s13 = sphi %s541_s13, %s604_s13   ;;  %s504_s12 = sphi %s539_s12, %s603_s12  }
   0x3   : > { %s38_s17 = ssub.s32 %s512_s14, %s556_s16  ;;  %s41_s18 = sadd.s32 1, %s508_s13 }
   0x4   : > { %p39_p0 = scmp.eq.s32.totalorder %s38_s17, 0  ;;  %p48_p1 = scmp.ne.s32.totalorder %s508_s13, %s504_s12 }
   0x5   : > { %p49_p2 = scmp.eq.s32.totalorder %s512_s14, 0  ;;  %p400_p4 = scmp.ge.s32.totalorder %s512_s14, 2 }
   0x6   : > { %s565_s19 = scalar_select %p39_p0, %s508_s13, %s41_s18  }
   0x7   : > { %p50_p3 = por %p49_p2, %p48_p1  ;;  %127 = sbr.rel (%p400_p4) target bundleno = 23 (0x17), region = 24 }
   0xe   : > { %130 = sbr.rel (!%p50_p3) target bundleno = 23 (0x17), region = 28  ;;  %s132_s20 = sand.u32 (%p50_p3), 1, %s508_s13  }
   0xf   : > { %s401_s21 = sshll.u32 (%p50_p3), %s512_s14, 3  ;;  %s458_s22 = smul.u32 (%p50_p3), 80, %s132_s20 }
  0x10   : > { %s136_s25 = scalar_lea.vmem (%p50_p3), %s600_s1, %s401_s21 }
  0x11   : > { %v182_v0 = vld [vmem:[%s136_s25] sm:$0xff] (%p50_p3)  ;;  %v184_v1 = vld [vmem:[%s136_s25 + $0x10] sm:$0xff] (%p50_p3)  ;;  %s134_s26 = scalar_lea.vmem (%p50_p3), [#allocation2], %s458_s22 }
  0x12   : > { %v186_v2 = vld [vmem:[%s136_s25 + $0x20] sm:$0xff] (%p50_p3)  ;;  %v188_v3 = vld [vmem:[%s136_s25 + $0x30] sm:$0xff] (%p50_p3)  ;;  %183 = vst [vmem:[%s134_s26] sm:$0xff] (%p50_p3), %v182_v0  ;;  %185 = vst [vmem:[%s134_s26 + $0x8] sm:$0xff] (%p50_p3), %v184_v1 }
  0x13   : > { %v190_v4 = vld [vmem:[%s136_s25 + $0x40] sm:$0xff] (%p50_p3)  ;;  %v192_v5 = vld [vmem:[%s136_s25 + $0x50] sm:$0xff] (%p50_p3)  ;;  %187 = vst [vmem:[%s134_s26 + $0x10] sm:$0xff] (%p50_p3), %v186_v2  ;;  %189 = vst [vmem:[%s134_s26 + $0x18] sm:$0xff] (%p50_p3), %v188_v3 }
  0x14   : > { %191 = vst [vmem:[%s134_s26 + $0x20] sm:$0xff] (%p50_p3), %v190_v4  ;;  %193 = vst [vmem:[%s134_s26 + $0x28] sm:$0xff] (%p50_p3), %v192_v5  ;;  %v194_v6 = vld [vmem:[%s136_s25 + $0x60] sm:$0xff] (%p50_p3)  ;;  %v196_v7 = vld [vmem:[%s136_s25 + $0x70] sm:$0xff] (%p50_p3) }
  0x15   : > { %v198_v8 = vld [vmem:[%s136_s25 + $0x80] sm:$0xff]  ;;  %195 = vst [vmem:[%s134_s26 + $0x30] sm:$0xff] %v194_v6  ;;  %197 = vst [vmem:[%s134_s26 + $0x38] sm:$0xff] %v196_v7  ;;  %v200_v9 = vld [vmem:[%s136_s25 + $0x90] sm:$0xff] }
  0x16   : > { %199 = vst [vmem:[%s134_s26 + $0x40] sm:$0xff] %v198_v8  ;;  %201 = vst [vmem:[%s134_s26 + $0x48] sm:$0xff] %v200_v9 }
  0x17 PF: > { %p402_p5 = scmp.ge.s32.totalorder %s512_s14, 1  ;;  %p206_p6 = scmp.lt.s32.totalorder %s512_s14, 3 }
  0x19   : > { %p207_p7 = pnand %p402_p5, %p206_p6 }
  0x1a   : > { %s213_s27 = sand.u32 (!%p207_p7), 1, %s504_s12   ;;  %v514_v10 = vmov (!%p207_p7), 0.0|0.0   ;;  %v250_v11 = vld [vmem:[%s601_s2] sm:$0xff] (!%p207_p7)  ;;  %vm515_vm0 = vmmov (!%p207_p7), 0   ;;  %v516_v12 = vmov (!%p207_p7), 0.0   ;;  %v517_v13 = vmov (!%p207_p7), 0  }
  0x1b   : > { %210 = sbr.rel (%p207_p7) target bundleno = 271 (0x10f), region = 66  ;;  %442 = vmatprep.subr.bf16.mxu0 (!%p207_p7), %v514_v10  ;;  %439 = vmatprep.mubr.msk.f32.mxu0 (!%p207_p7), %vm515_vm0, %v516_v12  ;;  %vm260_vm1 = vcmask (!%p207_p7), 1042432   ;;  %vm518_vm2 = vmmov (!%p207_p7), 1   ;;  %v239_v29 = vld [vmem:[%s599_s0] sm:$0xff] (!%p207_p7)  ;;  %vm256_vm4 = vcmask (!%p207_p7), 613376   ;;  %p235_p8 = scmp.lt.s32.totalorder (!%p207_p7), %s397_s15, 1 }
  0x1c   : > { %s459_s28 = smul.u32 (!%p207_p7), 80, %s213_s27  ;;  %489 = vset.pattern.permute.xlu0 (!%p207_p7), %v517_v13  ;;  %vm456_vm3 = vmpackc.low (!%p207_p7), %vm260_vm1, %vm518_vm2 }
  0x1d   : > { %253 = vperm.xlu0 (!%p207_p7), %489, %v250_v11  }
  0x1e   : > { %s215_s4 = scalar_lea.vmem (!%p207_p7), [#allocation2], %s459_s28 }
  0x1f   : > { %v240_v14 = vld [vmem:[%s215_s4] sm:$0xff] (!%p207_p7)  ;;  %v241_v15 = vld [vmem:[%s215_s4 + $0x8] sm:$0xff] (!%p207_p7)  ;;  %v242_v16 = vld [vmem:[%s215_s4 + $0x10] sm:$0xff] (!%p207_p7) }
  0x20   : > { %v443_v17 = vpack.c.bf16 (!%p207_p7), %v241_v15, %v240_v14  ;;  %v243_v18 = vld [vmem:[%s215_s4 + $0x18] sm:$0xff] (!%p207_p7)  ;;  %v244_v20 = vld [vmem:[%s215_s4 + $0x20] sm:$0xff] (!%p207_p7)  ;;  %v245_v21 = vld [vmem:[%s215_s4 + $0x28] sm:$0xff] (!%p207_p7) }
  0x21   : > { %v446_v19 = vpack.c.bf16 (!%p207_p7), %v243_v18, %v242_v16  ;;  %v449_v22 = vpack.c.bf16 (!%p207_p7), %v245_v21, %v244_v20  ;;  %v246_v23 = vld [vmem:[%s215_s4 + $0x30] sm:$0xff] (!%p207_p7)  ;;  %v247_v24 = vld [vmem:[%s215_s4 + $0x38] sm:$0xff] (!%p207_p7)  ;;  %v248_v26 = vld [vmem:[%s215_s4 + $0x40] sm:$0xff] (!%p207_p7) }
  0x22   : > { %444 = vmatpush3.bf16.msra.mxu0 %v443_v17  ;;  %v452_v25 = vpack.c.bf16 %v247_v24, %v246_v23  ;;  %v249_v27 = vld [vmem:[%s215_s4 + $0x48] sm:$0x7]  ;;  %s607_s15 = smov (!%p235_p8, %s397_s15), 1 }
  0x23   : > { %445 = vmatprep.subr.bf16.mxu0 %v514_v10  ;;  %v455_v28 = vpack.c.bf16 %v249_v27, %v248_v26  ;;  %s403_s7 = sshll.u32 %s607_s15, 3 }
  0x24   : > { %s238_s10 = scalar_lea.vmem %s602_s3, %s403_s7 }
  0x26   : > { %447 = vmatpush3.bf16.msra.mxu0 %v446_v19 }
  0x27   : > { %448 = vmatprep.subr.bf16.mxu0 %v514_v10 }
  0x2a   : > { %450 = vmatpush3.bf16.msra.mxu0 %v449_v22 }
  0x2b   : > { %451 = vmatprep.subr.bf16.mxu0 %v514_v10 }
  0x2e   : > { %453 = vmatpush3.bf16.msra.mxu0 %v452_v25 }
  0x2f   : > { %454 = vmatprep.subr.bf16.mxu0 %v514_v10 }
  0x32   : > { %457 = vmatpush3.bf16.msk.msra.mxu0 %vm456_vm3, %v455_v28 }
  0x35   : > { %440 = vmatmul.mubr.msk.f32.vlgmr.msra.gmra.mrb[0].mxu0 %vm256_vm4, %v239_v29 }
  0x9c   : > { %v254_v30 = vpop.permute.xlu0 %253 }
 0x108   : > { %v330_v31 = vpop.f32.mrb[0].mxu0 }
 0x109   : > { %v331_v32 = vadd.f32 %v330_v31, %v254_v30  ;;  %v441_v33 = vpop.f32.mrb[1].mxu0 }
 0x10b   : > { %vm334_vm5 = vcmp.gt.f32.partialorder %v331_v32, 0.0  ;;  %v335_v34 = vmul.f32 0.2, %v331_v32 }
 0x10d   : > { %v336_v35 = vsel %vm334_vm5, %v331_v32, %v335_v34 }
 0x10e   : > { %337 = vst [vmem:[%s238_s10] sm:$0xff] %v336_v35 }
 0x10f PF: > { %p10_p9 = scmp.ge.s32.totalorder %s556_s16, 4   ;;  %s603_s12 = smov %s508_s13 }
 0x110   : > { %s604_s13 = smov %s565_s19  ;;  %s605_s14 = smov %s556_s16 }
 0x111   :  { %12 = sbr.rel (!%p10_p9) target bundleno = 2 (0x2), region = 105 }

// kernel: _lambda_.5
= control target key start
LH: loop header
LB: loop body
LE: loop exit
PB: predicated region body
PF: predicated region fallthrough
CT: control target
= control target key end

     0   :  { %s1039_s13 = smov 0   ;;  %s1339_s0 = inlined_call_operand.vmem [shape: f32[16,128], index: 0, kind: input, shape index: {}]   ;;  %s1340_s1 = inlined_call_operand.vmem [shape: f32[128,128], index: 1, kind: input, shape index: {}]   ;;  %s1341_s2 = inlined_call_operand.vmem [shape: f32[1,128], index: 2, kind: input, shape index: {}]   ;;  %s1342_s3 = inlined_call_operand.vmem [shape: f32[1,128], index: 3, kind: input, shape index: {}]   ;;  %s1343_s4 = inlined_call_operand.vmem [shape: f32[1,128], index: 4, kind: input, shape index: {}]   ;;  %s1344_s5 = inlined_call_operand.vmem [shape: f32[128,256], index: 5, kind: input, shape index: {}]   ;;  %s1345_s6 = inlined_call_operand.vmem [shape: f32[1,256], index: 6, kind: input, shape index: {}]   ;;  %s1346_s7 = inlined_call_operand.vmem [shape: f32[128,256], index: 7, kind: input, shape index: {}]   ;;  %s1347_s8 = inlined_call_operand.vmem [shape: f32[1,256], index: 8, kind: input, shape index: {}]   ;;  %s1348_s9 = inlined_call_operand.vmem [shape: f32[16,256], index: 9, kind: output, shape index: {0}]   ;;  %s1349_s10 = inlined_call_operand.vmem [shape: f32[16,256], index: 10, kind: output, shape index: {1}]  }
   0x1 LB: > { %s805_s14 = sadd.s32 4294967295, %s979_s13   ;;  %p809_p0 = scmp.ge.s32.totalorder %s979_s13, 1  ;;  %s979_s13 = sphi %s1039_s13, %s21_s13  }
   0x2   : > { %p314_p1 = scmp.lt.s32.totalorder %s979_s13, 3 }
   0x4   : > { %p315_p2 = pnand %p809_p0, %p314_p1 }
   0x5   : > { %v371_v0 = vld [vmem:[%s1340_s1] sm:$0xff] (!%p315_p2)  ;;  %v372_v1 = vld [vmem:[%s1340_s1 + $0x8] sm:$0xff] (!%p315_p2)  ;;  %v373_v2 = vld [vmem:[%s1340_s1 + $0x10] sm:$0xff] (!%p315_p2)  ;;  %v981_v3 = vmov (!%p315_p2), 0.0|0.0   ;;  %vm982_vm0 = vmmov (!%p315_p2), 0   ;;  %v983_v6 = vmov (!%p315_p2), 0.0  }
   0x6   : > { %318 = sbr.rel (%p315_p2) target bundleno = 476 (0x1dc), region = 56  ;;  %874 = vmatprep.subr.bf16.mxu0 (!%p315_p2), %v981_v3  ;;  %v875_v4 = vpack.c.bf16 (!%p315_p2), %v372_v1, %v371_v0  ;;  %v374_v5 = vld [vmem:[%s1340_s1 + $0x18] sm:$0xff] (!%p315_p2)  ;;  %871 = vmatprep.mubr.msk.f32.mxu0 (!%p315_p2), %vm982_vm0, %v983_v6  ;;  %v375_v8 = vld [vmem:[%s1340_s1 + $0x20] sm:$0xff] (!%p315_p2)  ;;  %v376_v9 = vld [vmem:[%s1340_s1 + $0x28] sm:$0xff] (!%p315_p2)  ;;  %p1146_p3 = scmp.lt.s32.totalorder (!%p315_p2), %s805_s14, 1 }
   0x7   : > { %591 = vmatprep.mubr.f32.mxu1 (!%p315_p2), %v983_v6  ;;  %v878_v7 = vpack.c.bf16 (!%p315_p2), %v374_v5, %v373_v2  ;;  %v484_v10 = vld [vmem:[%s1344_s5 + $0x8] sm:$0xff] (!%p315_p2)  ;;  %v486_v11 = vld [vmem:[%s1344_s5 + $0x18] sm:$0xff] (!%p315_p2)  ;;  %v483_v13 = vld [vmem:[%s1344_s5] sm:$0xff] (!%p315_p2)  ;;  %v881_v14 = vpack.c.bf16 (!%p315_p2), %v376_v9, %v375_v8 }
   0x8   : > { %876 = vmatpush3.bf16.msra.mxu0 (!%p315_p2), %v875_v4  ;;  %v898_v12 = vpack.c.bf16 (!%p315_p2), %v486_v11, %v484_v10  ;;  %v377_v15 = vld [vmem:[%s1340_s1 + $0x30] sm:$0xff] (!%p315_p2)  ;;  %v378_v17 = vld [vmem:[%s1340_s1 + $0x38] sm:$0xff] (!%p315_p2)  ;;  %v488_v19 = vld [vmem:[%s1344_s5 + $0x28] sm:$0xff] (!%p315_p2) }
   0x9   : > { %877 = vmatprep.subr.bf16.mxu0 (!%p315_p2), %v981_v3  ;;  %v485_v16 = vld [vmem:[%s1344_s5 + $0x10] sm:$0xff] (!%p315_p2)  ;;  %v490_v20 = vld [vmem:[%s1344_s5 + $0x38] sm:$0xff] (!%p315_p2)  ;;  %v487_v22 = vld [vmem:[%s1344_s5 + $0x20] sm:$0xff] (!%p315_p2)  ;;  %v884_v24 = vpack.c.bf16 (!%p315_p2), %v378_v17, %v377_v15 }
   0xa   : > { %899 = vmatprep.subr.bf16.mxu1 (!%p315_p2), %v898_v12  ;;  %v900_v18 = vpack.c.bf16 (!%p315_p2), %v485_v16, %v483_v13  ;;  %v902_v21 = vpack.c.bf16 (!%p315_p2), %v490_v20, %v488_v19  ;;  %v489_v23 = vld [vmem:[%s1344_s5 + $0x30] sm:$0xff] (!%p315_p2)  ;;  %v379_v25 = vld [vmem:[%s1340_s1 + $0x40] sm:$0xff] (!%p315_p2)  ;;  %v492_v27 = vld [vmem:[%s1344_s5 + $0x48] sm:$0xff] (!%p315_p2) }
   0xb   : > { %v904_v26 = vpack.c.bf16 (!%p315_p2), %v489_v23, %v487_v22  ;;  %v494_v28 = vld [vmem:[%s1344_s5 + $0x58] sm:$0xff] (!%p315_p2)  ;;  %v380_v29 = vld [vmem:[%s1340_s1 + $0x48] sm:$0xff] (!%p315_p2)  ;;  %v491_v31 = vld [vmem:[%s1344_s5 + $0x40] sm:$0xff] (!%p315_p2) }
   0xc   : > { %879 = vmatpush3.bf16.msra.mxu0 (!%p315_p2), %v878_v7  ;;  %901 = vmatpush1.bf16.msra.mxu1 (!%p315_p2), %v900_v18  ;;  %v906_v30 = vpack.c.bf16 (!%p315_p2), %v494_v28, %v492_v27  ;;  %v493_v32 = vld [vmem:[%s1344_s5 + $0x50] sm:$0xff] (!%p315_p2)  ;;  %v496_v33 = vld [vmem:[%s1344_s5 + $0x68] sm:$0xff] (!%p315_p2)  ;;  %v498_v35 = vld [vmem:[%s1344_s5 + $0x78] sm:$0xff] (!%p315_p2)  ;;  %v887_v36 = vpack.c.bf16 (!%p315_p2), %v380_v29, %v379_v25 }
   0xd   : > { %880 = vmatprep.subr.bf16.mxu0 %v981_v3  ;;  %903 = vmatprep.subr.bf16.mxu1 %v902_v21  ;;  %v908_v34 = vpack.c.bf16 %v493_v32, %v491_v31  ;;  %v381_v37 = vld [vmem:[%s1340_s1 + $0x50] sm:$0xff]  ;;  %v910_v38 = vpack.c.bf16 %v498_v35, %v496_v33  ;;  %v495_v39 = vld [vmem:[%s1344_s5 + $0x60] sm:$0xff]  ;;  %v382_v41 = vld [vmem:[%s1340_s1 + $0x58] sm:$0xff]  ;;  %s1352_s14 = smov (!%p1146_p3, %s805_s14), 1 }
   0xe   : > { %v497_v40 = vld [vmem:[%s1344_s5 + $0x70] sm:$0xff]  ;;  %v500_v42 = vld [vmem:[%s1344_s5 + $0x88] sm:$0xff]  ;;  %v502_v43 = vld [vmem:[%s1344_s5 + $0x98] sm:$0xff]  ;;  %v890_v45 = vpack.c.bf16 %v382_v41, %v381_v37  ;;  %s810_s24 = sshll.u32 %s1352_s14, 3  ;;  %s820_s28 = sshll.u32 %s1352_s14, 4 }
   0xf   : > { %v912_v44 = vpack.c.bf16 %v497_v40, %v495_v39  ;;  %v383_v46 = vld [vmem:[%s1340_s1 + $0x60] sm:$0xff]  ;;  %v914_v47 = vpack.c.bf16 %v502_v43, %v500_v42  ;;  %v501_v49 = vld [vmem:[%s1344_s5 + $0x90] sm:$0xff]  ;;  %v384_v50 = vld [vmem:[%s1340_s1 + $0x68] sm:$0xff]  ;;  %s359_s11 = scalar_lea.vmem %s1339_s0, %s810_s24  ;;  %s369_s16 = scalar_lea.vmem %s1349_s10, %s820_s28 }
  0x10   : > { %882 = vmatpush3.bf16.msra.mxu0 %v881_v14  ;;  %905 = vmatpush1.bf16.msra.mxu1 %v904_v26  ;;  %v499_v48 = vld [vmem:[%s1344_s5 + $0x80] sm:$0xff]  ;;  %v504_v51 = vld [vmem:[%s1344_s5 + $0xa8] sm:$0xff]  ;;  %v506_v52 = vld [vmem:[%s1344_s5 + $0xb8] sm:$0xff]  ;;  %v893_v54 = vpack.c.bf16 %v384_v50, %v383_v46 }
  0x11   : > { %883 = vmatprep.subr.bf16.mxu0 %v981_v3  ;;  %907 = vmatprep.subr.bf16.mxu1 %v906_v30  ;;  %v916_v53 = vpack.c.bf16 %v501_v49, %v499_v48  ;;  %v918_v55 = vpack.c.bf16 %v506_v52, %v504_v51  ;;  %v503_v56 = vld [vmem:[%s1344_s5 + $0xa0] sm:$0xff]  ;;  %v505_v57 = vld [vmem:[%s1344_s5 + $0xb0] sm:$0xff]  ;;  %v386_v59 = vld [vmem:[%s1340_s1 + $0x78] sm:$0xff] }
  0x12   : > { %v385_v58 = vld [vmem:[%s1340_s1 + $0x70] sm:$0xff]  ;;  %v601_v60 = vld [vmem:[%s1346_s7 + $0x8] sm:$0xff]  ;;  %v603_v61 = vld [vmem:[%s1346_s7 + $0x18] sm:$0xff]  ;;  %v920_v62 = vpack.c.bf16 %v505_v57, %v503_v56 }
  0x13   : > { %v896_v63 = vpack.c.bf16 %v386_v59, %v385_v58  ;;  %v930_v0 = vpack.c.bf16 %v603_v61, %v601_v60  ;;  %v600_v1 = vld [vmem:[%s1346_s7] sm:$0xff]  ;;  %v602_v2 = vld [vmem:[%s1346_s7 + $0x10] sm:$0xff]  ;;  %v605_v4 = vld [vmem:[%s1346_s7 + $0x28] sm:$0xff] }
  0x14   : > { %885 = vmatpush3.bf16.msra.mxu0 %v884_v24  ;;  %909 = vmatpush1.bf16.msra.mxu1 %v908_v34  ;;  %v370_v5 = vld [vmem:[%s359_s11] sm:$0xff]  ;;  %v932_v7 = vpack.c.bf16 %v602_v2, %v600_v1  ;;  %v606_v10 = vld [vmem:[%s1346_s7 + $0x30] sm:$0xff]  ;;  %v609_v11 = vld [vmem:[%s1346_s7 + $0x48] sm:$0xff]  ;;  %s364_s11 = scalar_lea.vmem %s1348_s9, %s820_s28 }
  0x15   : > { %886 = vmatprep.subr.bf16.mxu0 %v981_v3  ;;  %911 = vmatprep.subr.bf16.mxu1 %v910_v38  ;;  %v604_v9 = vld [vmem:[%s1346_s7 + $0x20] sm:$0xff]  ;;  %v611_v12 = vld [vmem:[%s1346_s7 + $0x58] sm:$0xff]  ;;  %v610_v16 = vld [vmem:[%s1346_s7 + $0x50] sm:$0xff] }
  0x16   : > { %v936_v13 = vpack.c.bf16 %v606_v10, %v604_v9  ;;  %v938_v14 = vpack.c.bf16 %v611_v12, %v609_v11  ;;  %v608_v15 = vld [vmem:[%s1346_s7 + $0x40] sm:$0xff]  ;;  %v613_v17 = vld [vmem:[%s1346_s7 + $0x68] sm:$0xff]  ;;  %v615_v18 = vld [vmem:[%s1346_s7 + $0x78] sm:$0xff] }
  0x17   : > { %v942_v19 = vpack.c.bf16 %v615_v18, %v613_v17  ;;  %v612_v20 = vld [vmem:[%s1346_s7 + $0x60] sm:$0xff]  ;;  %v614_v21 = vld [vmem:[%s1346_s7 + $0x70] sm:$0xff]  ;;  %v617_v22 = vld [vmem:[%s1346_s7 + $0x88] sm:$0xff] }
  0x18   : > { %888 = vmatpush3.bf16.msra.mxu0 %v887_v36  ;;  %913 = vmatpush1.bf16.msra.mxu1 %v912_v44  ;;  %v619_v23 = vld [vmem:[%s1346_s7 + $0x98] sm:$0xff]  ;;  %v944_v24 = vpack.c.bf16 %v614_v21, %v612_v20  ;;  %v616_v26 = vld [vmem:[%s1346_s7 + $0x80] sm:$0xff]  ;;  %v618_v27 = vld [vmem:[%s1346_s7 + $0x90] sm:$0xff] }
  0x19   : > { %889 = vmatprep.subr.bf16.mxu0 %v981_v3  ;;  %915 = vmatprep.subr.bf16.mxu1 %v914_v47  ;;  %v946_v25 = vpack.c.bf16 %v619_v23, %v617_v22  ;;  %v621_v28 = vld [vmem:[%s1346_s7 + $0xa8] sm:$0xff]  ;;  %v623_v29 = vld [vmem:[%s1346_s7 + $0xb8] sm:$0xff]  ;;  %v948_v30 = vpack.c.bf16 %v618_v27, %v616_v26  ;;  %v620_v32 = vld [vmem:[%s1346_s7 + $0xa0] sm:$0xff] }
  0x1a   : > { %v950_v31 = vpack.c.bf16 %v623_v29, %v621_v28  ;;  %v622_v33 = vld [vmem:[%s1346_s7 + $0xb0] sm:$0xff]  ;;  %v508_v35 = vld [vmem:[%s1344_s5 + $0xc8] sm:$0xff]  ;;  %v510_v36 = vld [vmem:[%s1344_s5 + $0xd8] sm:$0xff] }
  0x1b   : > { %v952_v34 = vpack.c.bf16 %v622_v33, %v620_v32  ;;  %v625_v37 = vld [vmem:[%s1346_s7 + $0xc8] sm:$0xff]  ;;  %v922_v38 = vpack.c.bf16 %v510_v36, %v508_v35  ;;  %v627_v39 = vld [vmem:[%s1346_s7 + $0xd8] sm:$0xff]  ;;  %v507_v40 = vld [vmem:[%s1344_s5 + $0xc0] sm:$0xff] }
  0x1c   : > { %891 = vmatpush3.bf16.msra.mxu0 %v890_v45  ;;  %917 = vmatpush1.bf16.msra.mxu1 %v916_v53  ;;  %v509_v41 = vld [vmem:[%s1344_s5 + $0xd0] sm:$0xff]  ;;  %v954_v42 = vpack.c.bf16 %v627_v39, %v625_v37  ;;  %v624_v44 = vld [vmem:[%s1346_s7 + $0xc0] sm:$0xff]  ;;  %v512_v47 = vld [vmem:[%s1344_s5 + $0xe8] sm:$0xff] }
  0x1d   : > { %892 = vmatprep.subr.bf16.mxu0 %v981_v3  ;;  %919 = vmatprep.subr.bf16.mxu1 %v918_v55  ;;  %v924_v43 = vpack.c.bf16 %v509_v41, %v507_v40  ;;  %v626_v45 = vld [vmem:[%s1346_s7 + $0xd0] sm:$0xff]  ;;  %v514_v48 = vld [vmem:[%s1344_s5 + $0xf8] sm:$0xff]  ;;  %v629_v50 = vld [vmem:[%s1346_s7 + $0xe8] sm:$0xff] }
  0x1e   : > { %v956_v46 = vpack.c.bf16 %v626_v45, %v624_v44  ;;  %v926_v49 = vpack.c.bf16 %v514_v48, %v512_v47  ;;  %v631_v51 = vld [vmem:[%s1346_s7 + $0xf8] sm:$0xff]  ;;  %v511_v52 = vld [vmem:[%s1344_s5 + $0xe0] sm:$0xff]  ;;  %v630_v56 = vld [vmem:[%s1346_s7 + $0xf0] sm:$0xff] }
  0x1f   : > { %v958_v53 = vpack.c.bf16 %v631_v51, %v629_v50  ;;  %v628_v55 = vld [vmem:[%s1346_s7 + $0xe0] sm:$0xff] }
  0x20   : > { %894 = vmatpush3.bf16.msra.mxu0 %v893_v54  ;;  %921 = vmatpush1.bf16.msra.mxu1 %v920_v62  ;;  %v513_v54 = vld [vmem:[%s1344_s5 + $0xf0] sm:$0xff]  ;;  %v960_v58 = vpack.c.bf16 %v630_v56, %v628_v55  ;;  %v815_v59 = vld [vmem:[%s1341_s2] ss:$0 sm:$0xff] }
  0x21   : > { %895 = vmatprep.subr.bf16.mxu0 %v981_v3  ;;  %v607_v3 = vld [vmem:[%s1346_s7 + $0x38] sm:$0xff]  ;;  %923 = vmatprep.subr.bf16.mxu1 %v922_v38  ;;  %v928_v57 = vpack.c.bf16 %v513_v54, %v511_v52  ;;  %v816_v61 = vld [vmem:[%s1342_s3] ss:$0 sm:$0xff] }
  0x22   : > { %v934_v8 = vpack.c.bf16 %v607_v3, %v605_v4  ;;  %v515_v9 = vld [vmem:[%s1345_s6] sm:$0x3] }
  0x23   : > { %v632_v10 = vld [vmem:[%s1347_s8] sm:$0x3] }
  0x24   : > { %897 = vmatpush3.bf16.msra.mxu0 %v896_v63  ;;  %925 = vmatpush1.bf16.msra.mxu1 %v924_v43 }
  0x25   : > { %931 = vmatprep.subr.bf16.mxu0 %v930_v0  ;;  %927 = vmatprep.subr.bf16.mxu1 %v926_v49  ;;  %v817_v0 = vld [vmem:[%s1343_s4] ss:$0 sm:$0xff] }
  0x27   : > { %872 = vmatmul.mubr.f32.vlgmr.msra.gmra.mrb[0].mxu0 %v370_v5  ;;  %v517_v5 = vlaneseq }
  0x28   : > { %933 = vmatpush1.bf16.msra.mxu0 %v932_v7  ;;  %708 = vmatprep.mubr.f32.mxu0 %v983_v6  ;;  %v940_v6 = vpack.c.bf16 %v610_v16, %v608_v15 }
  0x29   : > { %935 = vmatprep.subr.bf16.mxu0 %v934_v8  ;;  %929 = vmatpush1.bf16.msra.mxu1 %v928_v57  ;;  %v518_v7 = vshrl.u32 %v517_v5, 7 }
  0x2b   : > { %v519_v8 = vsub.s32 0, %v518_v7  ;;  %v523_v11 = vsub.s32 1, %v518_v7 }
  0x2c   : > { %937 = vmatpush1.bf16.msra.mxu0 %v936_v13 }
  0x2d   : > { %939 = vmatprep.subr.bf16.mxu0 %v938_v14  ;;  %v520_v12 = vrot.slane %v515_v9, %v519_v8  ;;  %v637_v13 = vrot.slane %v632_v10, %v519_v8  ;;  %v524_v14 = vrot.slane %v515_v9, %v523_v11  ;;  %v641_v15 = vrot.slane %v632_v10, %v523_v11 }
  0x30   : > { %941 = vmatpush1.bf16.msra.mxu0 %v940_v6 }
  0x31   : > { %943 = vmatprep.subr.bf16.mxu0 %v942_v19 }
  0x34   : > { %945 = vmatpush1.bf16.msra.mxu0 %v944_v24 }
  0x35   : > { %947 = vmatprep.subr.bf16.mxu0 %v946_v25 }
  0x38   : > { %949 = vmatpush1.bf16.msra.mxu0 %v948_v30 }
  0x39   : > { %951 = vmatprep.subr.bf16.mxu0 %v950_v31 }
  0x3c   : > { %953 = vmatpush1.bf16.msra.mxu0 %v952_v34 }
  0x3d   : > { %955 = vmatprep.subr.bf16.mxu0 %v954_v42 }
  0x40   : > { %957 = vmatpush1.bf16.msra.mxu0 %v956_v46 }
  0x41   : > { %959 = vmatprep.subr.bf16.mxu0 %v958_v53 }
  0x44   : > { %961 = vmatpush1.bf16.msra.mxu0 %v960_v58 }
  0xfa   : > { %v460_v60 = vpop.f32.mrb[0].mxu0 }
  0xfb   : > { %v461_v62 = vadd.f32 %v815_v59, %v460_v60  ;;  %v873_v63 = vpop.f32.mrb[1].mxu0 }
  0xfd   : > { %v471_v1 = vmul.f32 %v816_v61, %v461_v62 }
  0xff   : > { %v479_v2 = vadd.f32 %v817_v0, %v471_v1 }
 0x101   : > { %vm480_vm1 = vcmp.gt.f32.partialorder %v479_v2, 0.0  ;;  %v481_v4 = vmul.f32 0.2, %v479_v2 }
 0x103   : > { %v482_v3 = vsel %vm480_vm1, %v479_v2, %v481_v4 }
 0x104   : > { %592 = vmatmul.mubr.f32.vlgmr.msra.gmra.mrb[0].mxu1 %v482_v3  ;;  %709 = vmatmul.mubr.f32.vlgmr.msra.gmra.mrb[2].mxu0 %v482_v3 }
 0x1d7   : > { %v593_v16 = vpop.f32.mrb[0].mxu1  ;;  %v710_v17 = vpop.f32.mrb[2].mxu0 }
 0x1d8   : > { %v594_v18 = vadd.f32 %v593_v16, %v520_v12  ;;  %v711_v6 = vadd.f32 %v710_v17, %v637_v13  ;;  %v595_v19 = vpop.f32.mrb[1].mxu1  ;;  %v712_v20 = vpop.f32.mrb[3].mxu0 }
 0x1d9   : > { %v596_v21 = vadd.f32 %v595_v19, %v524_v14  ;;  %v713_v22 = vadd.f32 %v712_v20, %v641_v15 }
 0x1da   : > { %598 = vst [vmem:[%s364_s11] sm:$0xff] %v594_v18  ;;  %715 = vst [vmem:[%s369_s16] sm:$0xff] %v711_v6 }
 0x1db   : > { %599 = vst [vmem:[%s364_s11 + $0x8] sm:$0xff] %v596_v21  ;;  %716 = vst [vmem:[%s369_s16 + $0x8] sm:$0xff] %v713_v22 }
 0x1dc PF: > { %s21_s13 = sadd.s32 1, %s979_s13  }
 0x1dd   : > { %p18_p4 = scmp.ge.s32.totalorder %s21_s13, 4  }
 0x1df   :  { %20 = sbr.rel (!%p18_p4) target bundleno = 1 (0x1), region = 98 }

// kernel: _lambda_.6
= control target key start
LH: loop header
LB: loop body
LE: loop exit
PB: predicated region body
PF: predicated region fallthrough
CT: control target
= control target key end

     0   :  { %v5465_v0 = vmov 0.0|0.0   ;;  %vm5466_vm0 = vmmov 0   ;;  %v5467_v4 = vmov 0.0   ;;  %vm104_vm1 = vcmask 1041409   ;;  %s5468_s29 = smov 64   ;;  %s6507_s2 = inlined_call_operand.vmem [shape: f32[32,128], index: 2, kind: input, shape index: {}]   ;;  %s6508_s0 = inlined_call_operand.vmem [shape: f32[2,8,256], index: 0, kind: input, shape index: {}]   ;;  %s6509_s3 = inlined_call_operand.vmem [shape: f32[32,128], index: 3, kind: input, shape index: {}]   ;;  %s6510_s4 = inlined_call_operand.vmem [shape: f32[64,32], index: 4, kind: input, shape index: {}]   ;;  %s6511_s8 = inlined_call_operand.vmem [shape: f32[32,128], index: 8, kind: input, shape index: {}]   ;;  %s6512_s6 = inlined_call_operand.vmem [shape: f32[16,256], index: 6, kind: input, shape index: {}]   ;;  %s6513_s5 = inlined_call_operand.vmem [shape: f32[1,32], index: 5, kind: input, shape index: {}]   ;;  %s6514_s14 = inlined_call_operand.vmem [shape: f32[16,128], index: 14, kind: input, shape index: {}]   ;;  %s6515_s7 = inlined_call_operand.vmem [shape: f32[32,128], index: 7, kind: input, shape index: {}]   ;;  %s6516_s17 = inlined_call_operand.vmem [shape: f32[2,32], index: 17, kind: output, shape index: {0}]   ;;  %s6517_s1 = inlined_call_operand.vmem [shape: f32[2,8,256], index: 1, kind: input, shape index: {}]   ;;  %s6518_s9 = inlined_call_operand.vmem [shape: f32[64,32], index: 9, kind: input, shape index: {}]   ;;  %s6519_s10 = inlined_call_operand.vmem [shape: f32[32,32], index: 10, kind: input, shape index: {}]   ;;  %s6520_s11 = inlined_call_operand.vmem [shape: f32[1,32], index: 11, kind: input, shape index: {}]   ;;  %s6521_s12 = inlined_call_operand.vmem [shape: f32[32,32], index: 12, kind: input, shape index: {}]   ;;  %s6522_s15 = inlined_call_operand.vmem [shape: f32[16,128], index: 15, kind: input, shape index: {}]   ;;  %s6523_s13 = inlined_call_operand.vmem [shape: f32[1,32], index: 13, kind: input, shape index: {}]   ;;  %s6524_s18 = inlined_call_operand.vmem [shape: f32[2,8,32], index: 18, kind: output, shape index: {1}]   ;;  %s6525_s16 = inlined_call_operand.vmem [shape: f32[1,128], index: 16, kind: input, shape index: {}]   ;;  %s6526_s19 = inlined_call_operand.vmem [shape: f32[2,8,128], index: 19, kind: output, shape index: {2}]  }
   0x1   :  { %6531 = sst [smem:[#allocation4_spill]] %s6507_s2  ;;  %4998 = vmatprep.subr.bf16.mxu0 %v5465_v0  ;;  %4580 = vmatprep.mubr.msk.f32.mxu0 %vm5466_vm0, %v5467_v4  ;;  %s5469_s2 = smov 32   ;;  %vm107_vm2 = vcmask 261120   ;;  %vm1049_vm3 = vcmask 523264   ;;  %vm1126_vm5 = vcmask 254976   ;;  %vm1132_vm6 = vcmask 130048  }
   0x2   :  { %6532 = sst [smem:[#allocation5_spill]] %s6508_s0  ;;  %s6535_s20 = sld [smem:[#allocation4_spill]]  ;;  %5004 = vmatprep.subr.bf16.mxu1 %v5465_v0  ;;  %4591 = vmatprep.mubr.msk.f32.mxu1 %vm5466_vm0, %v5467_v4  ;;  %vm1496_vm7 = vcmask 517376   ;;  %vm3233_vm8 = vcmask 257026   ;;  %vm3314_vm9 = vcmask 259076   ;;  %vm3395_vm10 = vcmask 261126  }
   0x3   :  { %6533 = sst [smem:[#allocation6_spill]] %s6509_s3  ;;  %s6536_s26 = sld [smem:[#allocation5_spill]]  ;;  %vm3915_vm13 = vcmask 253952  }
   0x4   :  { %6534 = sst [smem:[#allocation7_spill]] %s6510_s4  ;;  %s6537_s21 = sld [smem:[#allocation6_spill]] }
   0x8   :  { %v67_v1 = vld [vmem:[%s6535_s20] sm:$0xff]  ;;  %v68_v2 = vld [vmem:[%s6535_s20 + $0x8] sm:$0xff]  ;;  %v69_v3 = vld [vmem:[%s6535_s20 + $0x10] sm:$0xff] }
   0x9   :  { %v5583_v5 = vpack.c.bf16 %v68_v2, %v67_v1  ;;  %v70_v6 = vld [vmem:[%s6535_s20 + $0x18] sm:$0xff]  ;;  %v5607_v8 = vld [vmem:[%s6536_s26 + $0x10] sm:$0xff]  ;;  %v5613_v10 = vld [vmem:[%s6536_s26] sm:$0xff] }
   0xa   :  { %v5592_v7 = vpack.c.bf16 %v70_v6, %v69_v3  ;;  %v103_v9 = vrot.slane %v5607_v8, 7  ;;  %v308_v29 = vrot.slane %v5613_v10, 1  ;;  %v71_v44 = vld [vmem:[%s6537_s21] sm:$0xff]  ;;  %v72_v45 = vld [vmem:[%s6537_s21 + $0x8] sm:$0xff]  ;;  %v73_v46 = vld [vmem:[%s6537_s21 + $0x10] sm:$0xff]  ;;  %v410_v56 = vrot.slane %v5613_v10, 2 }
   0xb   :  { %5000 = vmatpush3.bf16.msra.mxu0 %v5583_v5  ;;  %v5005_v47 = vpack.c.bf16 %v72_v45, %v71_v44  ;;  %v74_v48 = vld [vmem:[%s6537_s21 + $0x18] sm:$0xff]  ;;  %v411_v57 = vrot.slane %v5607_v8, 1  ;;  %s6538_s21 = sld [smem:[#allocation7_spill]] }
   0xc   :  { %5001 = vmatprep.subr.bf16.mxu0 %v5465_v0  ;;  %v105_v11 = vsel %vm104_vm1, %v103_v9, %v5613_v10  ;;  %v309_v30 = vsel %vm104_vm1, %v5607_v8, %v308_v29  ;;  %v5008_v49 = vpack.c.bf16 %v74_v48, %v73_v46 }
   0xd   :  { %5006 = vmatpush3.bf16.msra.mxu1 %v5005_v47  ;;  %v412_v58 = vsel %vm104_vm1, %v411_v57, %v410_v56 }
   0xe   :  { %5007 = vmatprep.subr.bf16.mxu1 %v5465_v0 }
   0xf   :  { %5003 = vmatpush3.bf16.msra.mxu0 %v5592_v7 }
  0x10   :  { %5010 = vmatprep.subr.bf16.mxu0 %v5465_v0 }
  0x11   :  { %5009 = vmatpush3.bf16.msra.mxu1 %v5008_v49 }
  0x12   :  { %4581 = vmatmul.mubr.f32.vlgmr.msra.gmra.mrb[0].mxu0 %v5467_v4  ;;  %5016 = vmatprep.subr.bf16.mxu1 %v5465_v0 }
  0x13   :  { %5012 = vmatpush3.bf16.msra.mxu0 %v5583_v5  ;;  %4602 = vmatprep.mubr.msk.f32.mxu0 %vm5466_vm0, %v5467_v4 }
  0x14   :  { %5013 = vmatprep.subr.bf16.mxu0 %v5465_v0  ;;  %4592 = vmatmul.mubr.f32.vlgmr.msra.gmra.mrb[0].mxu1 %v5467_v4 }
  0x15   :  { %5018 = vmatpush3.bf16.msra.mxu1 %v5583_v5  ;;  %4613 = vmatprep.mubr.msk.f32.mxu1 %vm5466_vm0, %v5467_v4 }
  0x16   :  { %5019 = vmatprep.subr.bf16.mxu1 %v5465_v0 }
  0x17   :  { %5015 = vmatpush3.bf16.msra.mxu0 %v5592_v7 }
  0x18   :  { %5022 = vmatprep.subr.bf16.mxu0 %v5465_v0 }
  0x19   :  { %5021 = vmatpush3.bf16.msra.mxu1 %v5592_v7 }
  0x1a   :  { %5028 = vmatprep.subr.bf16.mxu1 %v5465_v0 }
  0xe5   :  { %v177_v12 = vpop.f32.mrb[0].mxu0 }
  0xe6   :  { %v178_v13 = vadd.f32 %v177_v12, %v105_v11  ;;  %v4582_v14 = vpop.f32.mrb[1].mxu0 }
  0xe7   :  { %v5656_v53 = vpop.f32.mrb[0].mxu1 }
  0xe8   :  { %5249 = vtanh.f32 %v178_v13  ;;  %v4301_v16 = vmul.f32 -1.442695, %v178_v13  ;;  %v4593_v54 = vpop.f32.mrb[1].mxu1 }
  0xea   :  { %5251 = vpow2.f32 %v4301_v16 }
  0xf2   :  { %v5250_v15 = vpop.eup %5249 }
  0xf3   :  { %266 = vrot.lane.b32.xlu0 %v5250_v15, %s5468_s29 }
  0xf4   :  { %v5252_v17 = vpop.eup %5251 }
  0xf5   :  { %v260_v18 = vadd.f32 1.0, %v5252_v17 }
  0xf7   :  { %5253 = vrcp.f32 %v260_v18  ;;  %v513_v18 = vrot.slane %v5613_v10, 3 }
 0x101   :  { %v5254_v19 = vpop.eup %5253 }
 0x102   :  { %v264_v22 = vmul.f32 0.0, %v5254_v19 }
 0x165   :  { %v267_v20 = vpop.permute.xlu0 %266 }
 0x166   :  { %v269_v21 = vmul.f32 %v5254_v19, %v267_v20 }
 0x168   :  { %271 = vrot.lane.b32.xlu0 %v269_v21, %s5469_s2 }
 0x1da   :  { %v272_v23 = vpop.permute.xlu0 %271 }
 0x1db   :  { %v274_v24 = vadd.f32 %v272_v23, %v264_v22 }
 0x1dd   :  { %5255 = vtanh.f32 %v274_v24 }
 0x1e7   :  { %v5256_v25 = vpop.eup %5255 }
 0x1e8   :  { %277 = vrot.lane.b32.xlu1 %v5256_v25, %s5468_s29 }
 0x25a   :  { %v278_v26 = vpop.permute.xlu1 %277 }
 0x25b   :  { %v280_v27 = vmul.f32 %v5254_v19, %v278_v26  ;;  %v514_v19 = vrot.slane %v5607_v8, 2 }
 0x25d   :  { %306 = vrot.lane.b32.xlu1 %v280_v27, %s5469_s2  ;;  %v515_v20 = vsel %vm104_vm1, %v514_v19, %v513_v18  ;;  %v822_v19 = vrot.slane %v5613_v10, 6 }
 0x2cf   :  { %v307_v28 = vpop.permute.xlu1 %306 }
 0x2d0   :  { %4603 = vmatmul.mubr.msk.f32.vlgmr.msra.gmra.mrb[2].mxu0 %vm107_vm2, %v307_v28 }
 0x2d1   :  { %5024 = vmatpush3.bf16.msra.mxu0 %v5583_v5  ;;  %4624 = vmatprep.mubr.msk.f32.mxu0 %vm5466_vm0, %v5467_v4 }
 0x2d2   :  { %5025 = vmatprep.subr.bf16.mxu0 %v5465_v0 }
 0x2d5   :  { %5027 = vmatpush3.bf16.msra.mxu0 %v5592_v7 }
 0x2d6   :  { %5034 = vmatprep.subr.bf16.mxu0 %v5465_v0 }
 0x3a3   :  { %v379_v31 = vpop.f32.mrb[2].mxu0 }
 0x3a4   :  { %v380_v32 = vadd.f32 %v379_v31, %v309_v30  ;;  %v4604_v33 = vpop.f32.mrb[3].mxu0 }
 0x3a6   :  { %5257 = vtanh.f32 %v380_v32  ;;  %v4304_v35 = vmul.f32 -1.442695, %v380_v32 }
 0x3a8   :  { %5259 = vpow2.f32 %v4304_v35 }
 0x3b0   :  { %v5258_v34 = vpop.eup %5257 }
 0x3b1   :  { %392 = vrot.lane.b32.xlu0 %v5258_v34, %s5468_s29 }
 0x3b2   :  { %v5260_v36 = vpop.eup %5259 }
 0x3b3   :  { %v386_v37 = vadd.f32 1.0, %v5260_v36 }
 0x3b5   :  { %5261 = vrcp.f32 %v386_v37 }
 0x3bf   :  { %v5262_v38 = vpop.eup %5261 }
 0x3c0   :  { %v390_v41 = vmul.f32 %v5262_v38, %v274_v24 }
 0x423   :  { %v393_v39 = vpop.permute.xlu0 %392 }
 0x424   :  { %v395_v40 = vmul.f32 %v5262_v38, %v393_v39  ;;  %v617_v39 = vrot.slane %v5607_v8, 3 }
 0x426   :  { %397 = vrot.lane.b32.xlu1 %v395_v40, %s5469_s2 }
 0x498   :  { %v398_v42 = vpop.permute.xlu1 %397 }
 0x499   :  { %v400_v43 = vadd.f32 %v398_v42, %v390_v41 }
 0x49b   :  { %5263 = vtanh.f32 %v400_v43 }
 0x4a5   :  { %v5264_v50 = vpop.eup %5263 }
 0x4a6   :  { %403 = vrot.lane.b32.xlu0 %v5264_v50, %s5468_s29 }
 0x518   :  { %v404_v51 = vpop.permute.xlu0 %403 }
 0x519   :  { %v406_v52 = vmul.f32 %v5262_v38, %v404_v51  ;;  %v616_v38 = vrot.slane %v5613_v10, 4 }
 0x51b   :  { %408 = vrot.lane.b32.xlu1 %v406_v52, %s5469_s2  ;;  %v618_v40 = vsel %vm104_vm1, %v617_v39, %v616_v38 }
 0x58d   :  { %v409_v55 = vpop.permute.xlu1 %408 }
 0x58e   :  { %4614 = vmatmul.mubr.msk.f32.vlgmr.msra.gmra.mrb[2].mxu1 %vm107_vm2, %v409_v55 }
 0x58f   :  { %5030 = vmatpush3.bf16.msra.mxu1 %v5583_v5  ;;  %4635 = vmatprep.mubr.msk.f32.mxu1 %vm5466_vm0, %v5467_v4 }
 0x590   :  { %5031 = vmatprep.subr.bf16.mxu1 %v5465_v0 }
 0x593   :  { %5033 = vmatpush3.bf16.msra.mxu1 %v5592_v7 }
 0x594   :  { %5040 = vmatprep.subr.bf16.mxu1 %v5465_v0 }
 0x661   :  { %v482_v59 = vpop.f32.mrb[2].mxu1 }
 0x662   :  { %v483_v60 = vadd.f32 %v482_v59, %v412_v58  ;;  %v4615_v61 = vpop.f32.mrb[3].mxu1  ;;  %v719_v59 = vrot.slane %v5613_v10, 5 }
 0x664   :  { %5265 = vtanh.f32 %v483_v60  ;;  %v4306_v63 = vmul.f32 -1.442695, %v483_v60  ;;  %v720_v60 = vrot.slane %v5607_v8, 4 }
 0x666   :  { %5267 = vpow2.f32 %v4306_v63  ;;  %v721_v61 = vsel %vm104_vm1, %v720_v60, %v719_v59 }
 0x66e   :  { %v5266_v62 = vpop.eup %5265 }
 0x66f   :  { %495 = vrot.lane.b32.xlu0 %v5266_v62, %s5468_s29 }
 0x670   :  { %v5268_v1 = vpop.eup %5267 }
 0x671   :  { %v489_v2 = vadd.f32 1.0, %v5268_v1 }
 0x673   :  { %5269 = vrcp.f32 %v489_v2 }
 0x67d   :  { %v5270_v3 = vpop.eup %5269 }
 0x67e   :  { %v493_v11 = vmul.f32 %v5270_v3, %v400_v43 }
 0x6e1   :  { %v496_v6 = vpop.permute.xlu0 %495 }
 0x6e2   :  { %v498_v9 = vmul.f32 %v5270_v3, %v496_v6 }
 0x6e4   :  { %500 = vrot.lane.b32.xlu1 %v498_v9, %s5469_s2 }
 0x756   :  { %v501_v12 = vpop.permute.xlu1 %500 }
 0x757   :  { %v503_v13 = vadd.f32 %v501_v12, %v493_v11 }
 0x759   :  { %5271 = vtanh.f32 %v503_v13 }
 0x763   :  { %v5272_v14 = vpop.eup %5271 }
 0x764   :  { %506 = vrot.lane.b32.xlu0 %v5272_v14, %s5468_s29 }
 0x7d6   :  { %v507_v15 = vpop.permute.xlu0 %506 }
 0x7d7   :  { %v509_v16 = vmul.f32 %v5270_v3, %v507_v15 }
 0x7d9   :  { %511 = vrot.lane.b32.xlu1 %v509_v16, %s5469_s2 }
 0x84b   :  { %v512_v17 = vpop.permute.xlu1 %511 }
 0x84c   :  { %4625 = vmatmul.mubr.msk.f32.vlgmr.msra.gmra.mrb[4].mxu0 %vm107_vm2, %v512_v17 }
 0x84d   :  { %5036 = vmatpush3.bf16.msra.mxu0 %v5583_v5  ;;  %4646 = vmatprep.mubr.msk.f32.mxu0 %vm5466_vm0, %v5467_v4 }
 0x84e   :  { %5037 = vmatprep.subr.bf16.mxu0 %v5465_v0 }
 0x851   :  { %5039 = vmatpush3.bf16.msra.mxu0 %v5592_v7 }
 0x852   :  { %5046 = vmatprep.subr.bf16.mxu0 %v5465_v0 }
 0x91f   :  { %v585_v21 = vpop.f32.mrb[4].mxu0 }
 0x920   :  { %v586_v22 = vadd.f32 %v585_v21, %v515_v20  ;;  %v4626_v23 = vpop.f32.mrb[5].mxu0  ;;  %v823_v20 = vrot.slane %v5607_v8, 5 }
 0x922   :  { %5273 = vtanh.f32 %v586_v22  ;;  %v4308_v25 = vmul.f32 -1.442695, %v586_v22  ;;  %v824_v21 = vsel %vm104_vm1, %v823_v20, %v822_v19 }
 0x924   :  { %5275 = vpow2.f32 %v4308_v25 }
 0x92c   :  { %v5274_v24 = vpop.eup %5273 }
 0x92d   :  { %598 = vrot.lane.b32.xlu0 %v5274_v24, %s5468_s29 }
 0x92e   :  { %v5276_v26 = vpop.eup %5275 }
 0x92f   :  { %v592_v27 = vadd.f32 1.0, %v5276_v26 }
 0x931   :  { %5277 = vrcp.f32 %v592_v27 }
 0x93b   :  { %v5278_v28 = vpop.eup %5277 }
 0x93c   :  { %v596_v31 = vmul.f32 %v5278_v28, %v503_v13 }
 0x99f   :  { %v599_v29 = vpop.permute.xlu0 %598 }
 0x9a0   :  { %v601_v30 = vmul.f32 %v5278_v28, %v599_v29 }
 0x9a2   :  { %603 = vrot.lane.b32.xlu1 %v601_v30, %s5469_s2 }
 0xa14   :  { %v604_v32 = vpop.permute.xlu1 %603 }
 0xa15   :  { %v606_v33 = vadd.f32 %v604_v32, %v596_v31  ;;  %v60_v32 = vld [vmem:[%s6536_s26 + $0x8] sm:$0xff] }
 0xa17   :  { %5279 = vtanh.f32 %v606_v33 }
 0xa21   :  { %v5280_v34 = vpop.eup %5279 }
 0xa22   :  { %609 = vrot.lane.b32.xlu0 %v5280_v34, %s5468_s29  ;;  %v183_v34 = vrot.slane %v60_v32, 7 }
 0xa94   :  { %v610_v35 = vpop.permute.xlu0 %609 }
 0xa95   :  { %v612_v36 = vmul.f32 %v5278_v28, %v610_v35 }
 0xa97   :  { %614 = vrot.lane.b32.xlu1 %v612_v36, %s5469_s2 }
 0xb09   :  { %v615_v37 = vpop.permute.xlu1 %614 }
 0xb0a   :  { %4636 = vmatmul.mubr.msk.f32.vlgmr.msra.gmra.mrb[4].mxu1 %vm107_vm2, %v615_v37 }
 0xb0b   :  { %5042 = vmatpush3.bf16.msra.mxu1 %v5583_v5  ;;  %4657 = vmatprep.mubr.msk.f32.mxu1 %vm5466_vm0, %v5467_v4 }
 0xb0c   :  { %5043 = vmatprep.subr.bf16.mxu1 %v5465_v0 }
 0xb0f   :  { %5045 = vmatpush3.bf16.msra.mxu1 %v5592_v7 }
 0xb10   :  { %5052 = vmatprep.subr.bf16.mxu1 %v5465_v0 }
 0xbdd   :  { %v688_v41 = vpop.f32.mrb[4].mxu1 }
 0xbde   :  { %v689_v42 = vadd.f32 %v688_v41, %v618_v40  ;;  %v4637_v43 = vpop.f32.mrb[5].mxu1 }
 0xbe0   :  { %5281 = vtanh.f32 %v689_v42  ;;  %v4310_v45 = vmul.f32 -1.442695, %v689_v42 }
 0xbe2   :  { %5283 = vpow2.f32 %v4310_v45 }
 0xbea   :  { %v5282_v44 = vpop.eup %5281 }
 0xbeb   :  { %701 = vrot.lane.b32.xlu0 %v5282_v44, %s5468_s29 }
 0xbec   :  { %v5284_v46 = vpop.eup %5283 }
 0xbed   :  { %v695_v47 = vadd.f32 1.0, %v5284_v46 }
 0xbef   :  { %5285 = vrcp.f32 %v695_v47 }
 0xbf9   :  { %v5286_v48 = vpop.eup %5285 }
 0xbfa   :  { %v699_v51 = vmul.f32 %v5286_v48, %v606_v33  ;;  %v62_v33 = vld [vmem:[%s6536_s26 + $0x18] sm:$0xff] }
 0xbfb   :  { %v184_v35 = vrot.slane %v62_v33, 6  ;;  %v1129_v33 = vld [vmem:[%s6512_s6 + $0x8] sm:$0xff] }
 0xbfd   :  { %v185_v37 = vsel %vm104_vm1, %v184_v35, %v183_v34  ;;  %v1131_v34 = vld [vmem:[%s6512_s6 + $0x18] sm:$0xff] }
 0xbfe   :  { %v254_v40 = vadd.f32 %v5656_v53, %v185_v37  ;;  %v5064_v35 = vpack.c.bf16 %v1131_v34, %v1129_v33  ;;  %v1130_v37 = vld [vmem:[%s6512_s6 + $0x10] sm:$0xff] }
 0xc00   :  { %v4302_v43 = vmul.f32 -1.442695, %v254_v40 }
 0xc5d   :  { %v702_v49 = vpop.permute.xlu0 %701 }
 0xc5e   :  { %v704_v50 = vmul.f32 %v5286_v48, %v702_v49 }
 0xc60   :  { %706 = vrot.lane.b32.xlu1 %v704_v50, %s5469_s2 }
 0xcd2   :  { %v707_v52 = vpop.permute.xlu1 %706 }
 0xcd3   :  { %v709_v54 = vadd.f32 %v707_v52, %v699_v51 }
 0xcd5   :  { %5287 = vtanh.f32 %v709_v54 }
 0xcdf   :  { %v5288_v55 = vpop.eup %5287 }
 0xce0   :  { %712 = vrot.lane.b32.xlu0 %v5288_v55, %s5468_s29 }
 0xd52   :  { %v713_v56 = vpop.permute.xlu0 %712 }
 0xd53   :  { %v715_v57 = vmul.f32 %v5286_v48, %v713_v56  ;;  %v925_v56 = vrot.slane %v5613_v10, 7 }
 0xd55   :  { %717 = vrot.lane.b32.xlu1 %v715_v57, %s5469_s2  ;;  %v926_v57 = vrot.slane %v5607_v8, 6 }
 0xdc7   :  { %v718_v58 = vpop.permute.xlu1 %717 }
 0xdc8   :  { %4647 = vmatmul.mubr.msk.f32.vlgmr.msra.gmra.mrb[6].mxu0 %vm107_vm2, %v718_v58  ;;  %v927_v58 = vsel %vm104_vm1, %v926_v57, %v925_v56 }
 0xdc9   :  { %5048 = vmatpush3.bf16.msra.mxu0 %v5583_v5  ;;  %4668 = vmatprep.mubr.msk.f32.mxu0 %vm5466_vm0, %v5467_v4 }
 0xdca   :  { %5049 = vmatprep.subr.bf16.mxu0 %v5465_v0 }
 0xdcd   :  { %5051 = vmatpush3.bf16.msra.mxu0 %v5592_v7 }
 0xdce   :  { %5065 = vmatprep.subr.bf16.mxu0 %v5064_v35 }
 0xe9b   :  { %v791_v62 = vpop.f32.mrb[6].mxu0 }
 0xe9c   :  { %v792_v63 = vadd.f32 %v791_v62, %v721_v61  ;;  %v4648_v1 = vpop.f32.mrb[7].mxu0 }
 0xe9e   :  { %5289 = vtanh.f32 %v792_v63  ;;  %v4312_v5 = vmul.f32 -1.442695, %v792_v63 }
 0xea0   :  { %5291 = vpow2.f32 %v4312_v5 }
 0xea8   :  { %v5290_v2 = vpop.eup %5289 }
 0xea9   :  { %804 = vrot.lane.b32.xlu0 %v5290_v2, %s5468_s29 }
 0xeaa   :  { %v5292_v3 = vpop.eup %5291 }
 0xeab   :  { %v798_v6 = vadd.f32 1.0, %v5292_v3 }
 0xead   :  { %5293 = vrcp.f32 %v798_v6 }
 0xeb7   :  { %v5294_v9 = vpop.eup %5293 }
 0xeb8   :  { %v802_v12 = vmul.f32 %v5294_v9, %v709_v54 }
 0xf1b   :  { %v805_v7 = vpop.permute.xlu0 %804 }
 0xf1c   :  { %v807_v11 = vmul.f32 %v5294_v9, %v805_v7  ;;  %v1034_v7 = vld [vmem:[%s6538_s21] sm:$0xff] }
 0xf1e   :  { %809 = vrot.lane.b32.xlu1 %v807_v11, %s5469_s2  ;;  %v1035_v11 = vld [vmem:[%s6538_s21 + $0x8] sm:$0xff] }
 0xf90   :  { %v810_v13 = vpop.permute.xlu1 %809 }
 0xf91   :  { %v812_v14 = vadd.f32 %v810_v13, %v802_v12  ;;  %v1036_v12 = vld [vmem:[%s6538_s21 + $0x10] sm:$0xff]  ;;  %v5053_v13 = vpack.c.bf16 %v1035_v11, %v1034_v7  ;;  %v5892_v7 = vld [vmem:[%s6517_s1] sm:$0xff] }
 0xf93   :  { %5295 = vtanh.f32 %v812_v14 }
 0xf9d   :  { %v5296_v15 = vpop.eup %5295 }
 0xf9e   :  { %815 = vrot.lane.b32.xlu0 %v5296_v15, %s5468_s29 }
0x1010   :  { %v816_v16 = vpop.permute.xlu0 %815 }
0x1011   :  { %v818_v17 = vmul.f32 %v5294_v9, %v816_v16  ;;  %v1038_v16 = vld [vmem:[%s6538_s21 + $0x20] sm:$0xff] }
0x1013   :  { %820 = vrot.lane.b32.xlu1 %v818_v17, %s5469_s2  ;;  %v1039_v17 = vld [vmem:[%s6538_s21 + $0x28] sm:$0xff] }
0x1085   :  { %v821_v18 = vpop.permute.xlu1 %820 }
0x1086   :  { %4658 = vmatmul.mubr.msk.f32.vlgmr.msra.gmra.mrb[6].mxu1 %vm107_vm2, %v821_v18  ;;  %v5059_v18 = vpack.c.bf16 %v1039_v17, %v1038_v16 }
0x1087   :  { %4687 = vmatprep.mubr.msk.f32.mxu1 %vm5466_vm0, %v5467_v4  ;;  %5054 = vmatpush3.bf16.msra.mxu1 %v5053_v13 }
0x1088   :  { %5055 = vmatprep.subr.bf16.mxu1 %v5465_v0 }
0x1159   :  { %v894_v22 = vpop.f32.mrb[6].mxu1 }
0x115a   :  { %v895_v23 = vadd.f32 %v894_v22, %v824_v21  ;;  %v4659_v24 = vpop.f32.mrb[7].mxu1  ;;  %v1040_v21 = vld [vmem:[%s6538_s21 + $0x30] sm:$0xff]  ;;  %v1041_v22 = vld [vmem:[%s6538_s21 + $0x38] sm:$0xff] }
0x115b   :  { %v5062_v24 = vpack.c.bf16 %v1041_v22, %v1040_v21 }
0x115c   :  { %5297 = vtanh.f32 %v895_v23  ;;  %v4314_v26 = vmul.f32 -1.442695, %v895_v23 }
0x115e   :  { %5299 = vpow2.f32 %v4314_v26 }
0x1166   :  { %v5298_v25 = vpop.eup %5297 }
0x1167   :  { %907 = vrot.lane.b32.xlu0 %v5298_v25, %s5468_s29 }
0x1168   :  { %v5300_v27 = vpop.eup %5299 }
0x1169   :  { %v901_v28 = vadd.f32 1.0, %v5300_v27  ;;  %v79_v27 = vld [vmem:[%s6511_s8] sm:$0xff] }
0x116b   :  { %5301 = vrcp.f32 %v901_v28  ;;  %v80_v28 = vld [vmem:[%s6511_s8 + $0x8] sm:$0xff] }
0x1175   :  { %v5302_v29 = vpop.eup %5301 }
0x1176   :  { %v905_v36 = vmul.f32 %v5302_v29, %v812_v14  ;;  %v1037_v14 = vld [vmem:[%s6538_s21 + $0x18] sm:$0xff] }
0x1177   :  { %v5056_v15 = vpack.c.bf16 %v1037_v14, %v1036_v12 }
0x1179   :  { %5057 = vmatpush3.bf16.msra.mxu1 %v5056_v15 }
0x117a   :  { %5058 = vmatprep.subr.bf16.mxu1 %v5465_v0 }
0x117d   :  { %5060 = vmatpush3.bf16.msra.mxu1 %v5059_v18 }
0x117e   :  { %5061 = vmatprep.subr.bf16.mxu1 %v5465_v0 }
0x1181   :  { %5063 = vmatpush3.bf16.msra.mxu1 %v5062_v24 }
0x1182   :  { %5077 = vmatprep.subr.bf16.mxu1 %v5465_v0 }
0x11d9   :  { %v908_v30 = vpop.permute.xlu0 %907 }
0x11da   :  { %v910_v31 = vmul.f32 %v5302_v29, %v908_v30 }
0x11dc   :  { %912 = vrot.lane.b32.xlu1 %v910_v31, %s5469_s2 }
0x124e   :  { %v913_v38 = vpop.permute.xlu1 %912 }
0x124f   :  { %v915_v39 = vadd.f32 %v913_v38, %v905_v36  ;;  %v1128_v36 = vld [vmem:[%s6512_s6] sm:$0xff]  ;;  %v81_v38 = vld [vmem:[%s6511_s8 + $0x10] sm:$0xff] }
0x1251   :  { %5303 = vtanh.f32 %v915_v39 }
0x1252   :  { %5305 = vtanh.f32 %v254_v40  ;;  %v82_v40 = vld [vmem:[%s6511_s8 + $0x18] sm:$0xff] }
0x1253   :  { %5307 = vpow2.f32 %v4302_v43  ;;  %v1207_v43 = vld [vmem:[%s6514_s14] sm:$0xff] }
0x125b   :  { %v5304_v41 = vpop.eup %5303 }
0x125c   :  { %918 = vrot.lane.b32.xlu0 %v5304_v41, %s5468_s29  ;;  %v5306_v42 = vpop.eup %5305  ;;  %v5804_v41 = vpack.c.bf16 %v82_v40, %v81_v38 }
0x125d   :  { %v5308_v44 = vpop.eup %5307 }
0x125e   :  { %v284_v45 = vadd.f32 1.0, %v5308_v44  ;;  %v1208_v44 = vld [vmem:[%s6514_s14 + $0x8] sm:$0xff] }
0x1260   :  { %290 = vrot.lane.b32.xlu0 %v5306_v42, %s5468_s29  ;;  %5309 = vrcp.f32 %v284_v45  ;;  %v4317_v42 = vld [vmem:[%s6513_s5] ss:$0 sm:$0xff] }
0x126a   :  { %v5310_v48 = vpop.eup %5309 }
0x126b   :  { %v288_v51 = vmul.f32 0.0, %v5310_v48 }
0x12ce   :  { %v919_v46 = vpop.permute.xlu0 %918 }
0x12cf   :  { %v921_v47 = vmul.f32 %v5302_v29, %v919_v46  ;;  %v5778_v29 = vpack.c.bf16 %v80_v28, %v79_v27 }
0x12d1   :  { %923 = vrot.lane.b32.xlu1 %v921_v47, %s5469_s2 }
0x12d2   :  { %v291_v49 = vpop.permute.xlu0 %290 }
0x12d3   :  { %v293_v53 = vmul.f32 %v5310_v48, %v291_v49 }
0x12d5   :  { %295 = vrot.lane.b32.xlu0 %v293_v53, %s5469_s2  ;;  %v75_v53 = vld [vmem:[%s6515_s7] sm:$0xff] }
0x1343   :  { %v924_v50 = vpop.permute.xlu1 %923 }
0x1344   :  { %4669 = vmatmul.mubr.msk.f32.vlgmr.msra.gmra.mrb[8].mxu0 %vm107_vm2, %v924_v50  ;;  %v76_v50 = vld [vmem:[%s6515_s7 + $0x8] sm:$0xff] }
0x1345   :  { %1200 = vmatprep.mubr.f32.mxu0 %v5467_v4 }
0x1347   :  { %v296_v52 = vpop.permute.xlu0 %295 }
0x1348   :  { %v298_v54 = vadd.f32 %v296_v52, %v288_v51  ;;  %v5838_v52 = vpack.c.bf16 %v76_v50, %v75_v53 }
0x134a   :  { %5311 = vtanh.f32 %v298_v54  ;;  %v77_v54 = vld [vmem:[%s6515_s7 + $0x10] sm:$0xff] }
0x1354   :  { %v5312_v55 = vpop.eup %5311 }
0x1355   :  { %301 = vrot.lane.b32.xlu0 %v5312_v55, %s5468_s29  ;;  %v78_v55 = vld [vmem:[%s6515_s7 + $0x18] sm:$0xff] }
0x1356   :  { %v5849_v56 = vpack.c.bf16 %v78_v55, %v77_v54  ;;  %v1498_v54 = vrot.slane %v5892_v7, 1 }
0x13c7   :  { %v302_v20 = vpop.permute.xlu0 %301 }
0x13c8   :  { %v304_v23 = vmul.f32 %v5310_v48, %v302_v20  ;;  %v5069_v48 = vpack.c.bf16 %v1208_v44, %v1207_v43 }
0x1417   :  { %v997_v59 = vpop.f32.mrb[8].mxu0 }
0x1418   :  { %v998_v60 = vadd.f32 %v997_v59, %v927_v58  ;;  %v4670_v61 = vpop.f32.mrb[9].mxu0  ;;  %v5866_v59 = vld [vmem:[%s6517_s1 + $0x8] sm:$0xff] }
0x1419   :  { %v1364_v61 = vrot.slane %v5866_v59, 7 }
0x141a   :  { %5313 = vtanh.f32 %v998_v60  ;;  %v4316_v63 = vmul.f32 -1.442695, %v998_v60  ;;  %v5871_v60 = vld [vmem:[%s6517_s1 + $0x18] sm:$0xff] }
0x141c   :  { %5315 = vpow2.f32 %v4316_v63 }
0x1424   :  { %v5314_v62 = vpop.eup %5313 }
0x1425   :  { %1010 = vrot.lane.b32.xlu1 %v5314_v62, %s5468_s29  ;;  %v1365_v62 = vrot.slane %v5871_v60, 6 }
0x1426   :  { %v5316_v1 = vpop.eup %5315 }
0x1427   :  { %v1004_v2 = vadd.f32 1.0, %v5316_v1  ;;  %v1366_v63 = vsel %vm104_vm1, %v1365_v62, %v1364_v61 }
0x1429   :  { %5317 = vrcp.f32 %v1004_v2 }
0x1433   :  { %v5318_v5 = vpop.eup %5317 }
0x1434   :  { %v1008_v8 = vmul.f32 %v5318_v5, %v915_v39  ;;  %v5066_v39 = vpack.c.bf16 %v1130_v37, %v1128_v36 }
0x1436   :  { %5067 = vmatpush1.bf16.msra.mxu0 %v5066_v39 }
0x1437   :  { %5068 = vmatprep.subr.bf16.mxu0 %v5465_v0 }
0x1497   :  { %v1011_v3 = vpop.permute.xlu1 %1010 }
0x1498   :  { %v1013_v6 = vmul.f32 %v5318_v5, %v1011_v3 }
0x149a   :  { %1015 = vrot.lane.b32.xlu1 %v1013_v6, %s5469_s2  ;;  %v5884_v6 = vld [vmem:[%s6517_s1 + $0x10] sm:$0xff] }
0x149b   :  { %v1499_v55 = vsel %vm104_vm1, %v5884_v6, %v1498_v54 }
0x150c   :  { %v1016_v10 = vpop.permute.xlu1 %1015 }
0x150d   :  { %v1018_v9 = vadd.f32 %v1016_v10, %v1008_v8 }
0x150f   :  { %5319 = vtanh.f32 %v1018_v9  ;;  %v1288_v9 = vrot.slane %v5884_v6, 7 }
0x1511   :  { %v1289_v11 = vsel %vm104_vm1, %v1288_v9, %v5892_v7 }
0x1519   :  { %v5320_v19 = vpop.eup %5319 }
0x151a   :  { %1021 = vrot.lane.b32.xlu1 %v5320_v19, %s5468_s29 }
0x151e   :  { %1030 = vrot.lane.b32.xlu1 %v304_v23, %s5468_s29 }
0x158c   :  { %v1022_v25 = vpop.permute.xlu1 %1021 }
0x158d   :  { %v1024_v26 = vmul.f32 %v5318_v5, %v1022_v25 }
0x158f   :  { %1026 = vrot.lane.b32.xlu0 %v1024_v26, %s5469_s2 }
0x1590   :  { %v1031_v30 = vpop.permute.xlu1 %1030 }
0x1601   :  { %v1027_v31 = vpop.permute.xlu0 %1026 }
0x1602   :  { %v1033_v32 = vsel %vm107_vm2, %v1027_v31, %v1031_v30 }
0x1603   :  { %4688 = vmatmul.mubr.msk.f32.vlgmr.msra.gmra.mrb[8].mxu1 %vm1049_vm3, %v1033_v32 }
0x1604   :  { %5079 = vmatpush3.bf16.msra.mxu1 %v5778_v29  ;;  %4716 = vmatprep.mubr.msk.f32.mxu1 %vm5466_vm0, %v5467_v4 }
0x1605   :  { %5080 = vmatprep.subr.bf16.mxu1 %v5465_v0 }
0x1608   :  { %5082 = vmatpush3.bf16.msra.mxu1 %v5804_v41 }
0x1609   :  { %5089 = vmatprep.subr.bf16.mxu1 %v5465_v0 }
0x160b   :  { %4717 = vmatmul.mubr.f32.vlgmr.msra.gmra.mrb[10].mxu1 %v5467_v4 }
0x160c   :  { %5091 = vmatpush3.bf16.msra.mxu1 %v5778_v29  ;;  %4738 = vmatprep.mubr.msk.f32.mxu1 %vm5466_vm0, %v5467_v4 }
0x160d   :  { %5092 = vmatprep.subr.bf16.mxu1 %v5465_v0 }
0x1610   :  { %5094 = vmatpush3.bf16.msra.mxu1 %v5804_v41 }
0x1611   :  { %5101 = vmatprep.subr.bf16.mxu1 %v5465_v0 }
0x16d6   :  { %v1119_v45 = vpop.f32.mrb[8].mxu1 }
0x16d7   :  { %v1120_v46 = vadd.f32 %v4317_v42, %v1119_v45  ;;  %v4689_v47 = vpop.f32.mrb[9].mxu1 }
0x16d8   :  { %v1577_v47 = vrot.slane %v5871_v60, 5 }
0x16d9   :  { %vm1123_vm4 = vcmp.gt.f32.partialorder %v1120_v46, 0.0  ;;  %v1124_v49 = vmul.f32 0.2, %v1120_v46 }
0x16db   :  { %v1125_v51 = vsel %vm1123_vm4, %v1120_v46, %v1124_v49  ;;  %v1576_v46 = vrot.slane %v5866_v59, 6 }
0x16dc   :  { %1127 = vst.msk [vmem:[%s6516_s17] sm:$0x3] %vm1126_vm5, %v1125_v51  ;;  %4319 = vmatmul.mubr.msk.f32.vlgmr.msra.gmra.mrb[10].mxu0 %vm1132_vm6, %v1125_v51 }
0x16dd   :  { %5070 = vmatpush3.bf16.msra.mxu0 %v5069_v48  ;;  %4694 = vmatprep.mubr.msk.f32.mxu0 %vm5466_vm0, %v5467_v4  ;;  %v1578_v48 = vsel %vm104_vm1, %v1577_v47, %v1576_v46 }
0x16de   :  { %5071 = vmatprep.subr.bf16.mxu0 %v5465_v0  ;;  %v1434_v57 = vpop.f32.mrb[10].mxu1 }
0x16df   :  { %v4718_v58 = vpop.f32.mrb[11].mxu1  ;;  %v1435_v1 = vadd.f32 %v1434_v57, %v1366_v63 }
0x16e0   :  { %4695 = vmatmul.mubr.msk.f32.vlgmr.msra.gmra.mrb[12].mxu0 %vm1132_vm6, %v1125_v51 }
0x16e1   :  { %5073 = vmatpush3.bf16.msra.mxu0 %v5838_v52  ;;  %4705 = vmatprep.mubr.msk.f32.mxu0 %vm5466_vm0, %v5467_v4 }
0x16e2   :  { %5074 = vmatprep.subr.bf16.mxu0 %v5465_v0 }
0x16e5   :  { %5076 = vmatpush3.bf16.msra.mxu0 %v5849_v56 }
0x16e6   :  { %5083 = vmatprep.subr.bf16.mxu0 %v5465_v0 }
0x16e8   :  { %4706 = vmatmul.mubr.f32.vlgmr.msra.gmra.mrb[14].mxu0 %v5467_v4 }
0x16e9   :  { %5085 = vmatpush3.bf16.msra.mxu0 %v5838_v52  ;;  %4727 = vmatprep.mubr.msk.f32.mxu0 %vm5466_vm0, %v5467_v4 }
0x16ea   :  { %5086 = vmatprep.subr.bf16.mxu0 %v5465_v0 }
0x16ed   :  { %5088 = vmatpush3.bf16.msra.mxu0 %v5849_v56 }
0x16ee   :  { %5095 = vmatprep.subr.bf16.mxu0 %v5465_v0 }
0x17af   :  { %v5876_v2 = vpop.f32.mrb[10].mxu0 }
0x17b0   :  { %v5878_v5 = vpop.f32.mrb[11].mxu0 }
0x17b1   :  { %v1438_v3 = vadd.f32 %v1435_v1, %v5878_v5 }
0x17b3   :  { %5321 = vtanh.f32 %v1438_v3  ;;  %v5886_v8 = vpop.f32.mrb[12].mxu0  ;;  %v4323_v18 = vmul.f32 -1.442695, %v1438_v3 }
0x17b4   :  { %v4696_v10 = vpop.f32.mrb[13].mxu0 }
0x17bb   :  { %v1357_v12 = vpop.f32.mrb[14].mxu0 }
0x17bc   :  { %v1358_v13 = vadd.f32 %v1357_v12, %v1289_v11  ;;  %v4707_v14 = vpop.f32.mrb[15].mxu0 }
0x17bd   :  { %v5322_v15 = vpop.eup %5321 }
0x17be   :  { %v1361_v16 = vadd.f32 %v1358_v13, %v5876_v2  ;;  %1472 = vrot.lane.b32.xlu0 %v5322_v15, %s5468_s29 }
0x17c0   :  { %5323 = vtanh.f32 %v1361_v16  ;;  %v4322_v19 = vmul.f32 -1.442695, %v1361_v16 }
0x17c1   :  { %5325 = vpow2.f32 %v4323_v18 }
0x17c2   :  { %5327 = vpow2.f32 %v4322_v19 }
0x17ca   :  { %v5324_v17 = vpop.eup %5323 }
0x17cb   :  { %1448 = vrot.lane.b32.xlu1 %v5324_v17, %s5468_s29  ;;  %v5326_v20 = vpop.eup %5325 }
0x17cc   :  { %v1466_v21 = vadd.f32 1.0, %v5326_v20  ;;  %v5328_v22 = vpop.eup %5327 }
0x17cd   :  { %v1442_v23 = vadd.f32 1.0, %v5328_v22 }
0x17ce   :  { %5329 = vrcp.f32 %v1466_v21 }
0x17cf   :  { %5331 = vrcp.f32 %v1442_v23 }
0x17d8   :  { %v5330_v24 = vpop.eup %5329 }
0x17d9   :  { %v5332_v27 = vpop.eup %5331  ;;  %v1470_v31 = vmul.f32 0.0, %v5330_v24 }
0x17da   :  { %v1446_v34 = vmul.f32 0.0, %v5332_v27 }
0x1830   :  { %v1473_v25 = vpop.permute.xlu0 %1472 }
0x1831   :  { %v1475_v26 = vmul.f32 %v5330_v24, %v1473_v25 }
0x1833   :  { %1477 = vrot.lane.b32.xlu0 %v1475_v26, %s5469_s2 }
0x183d   :  { %v1449_v28 = vpop.permute.xlu1 %1448 }
0x183e   :  { %v1451_v30 = vmul.f32 %v5332_v27, %v1449_v28 }
0x1840   :  { %1453 = vrot.lane.b32.xlu1 %v1451_v30, %s5469_s2 }
0x18a5   :  { %v1478_v32 = vpop.permute.xlu0 %1477 }
0x18a6   :  { %v5901_v33 = vadd.f32 %v1478_v32, %v1470_v31 }
0x18a8   :  { %5333 = vtanh.f32 %v5901_v33 }
0x18b2   :  { %v5334_v35 = vpop.eup %5333  ;;  %v1454_v36 = vpop.permute.xlu1 %1453 }
0x18b3   :  { %v5904_v37 = vadd.f32 %v1454_v36, %v1446_v34  ;;  %1483 = vrot.lane.b32.xlu0 %v5334_v35, %s5468_s29  ;;  %v1790_v35 = vrot.slane %v5866_v59, 5  ;;  %v1791_v36 = vrot.slane %v5871_v60, 4 }
0x18b5   :  { %5335 = vtanh.f32 %v5904_v37 }
0x18bf   :  { %v5336_v38 = vpop.eup %5335 }
0x18c0   :  { %1459 = vrot.lane.b32.xlu1 %v5336_v38, %s5468_s29 }
0x1925   :  { %v1484_v39 = vpop.permute.xlu0 %1483 }
0x1926   :  { %v5909_v40 = vmul.f32 %v5330_v24, %v1484_v39 }
0x1928   :  { %1574 = vrot.lane.b32.xlu0 %v5909_v40, %s5469_s2 }
0x1932   :  { %v1460_v42 = vpop.permute.xlu1 %1459 }
0x1933   :  { %v1462_v43 = vmul.f32 %v5332_v27, %v1460_v42 }
0x1935   :  { %1488 = vrot.lane.b32.xlu1 %v1462_v43, %s5469_s2 }
0x199a   :  { %v1575_v44 = vpop.permute.xlu0 %1574 }
0x199b   :  { %4739 = vmatmul.mubr.msk.f32.vlgmr.msra.gmra.mrb[12].mxu1 %vm107_vm2, %v1575_v44  ;;  %v1711_v44 = vrot.slane %v5892_v7, 2 }
0x199c   :  { %5103 = vmatpush3.bf16.msra.mxu1 %v5778_v29  ;;  %4760 = vmatprep.mubr.msk.f32.mxu1 %vm5466_vm0, %v5467_v4 }
0x199d   :  { %5104 = vmatprep.subr.bf16.mxu1 %v5465_v0 }
0x19a0   :  { %5106 = vmatpush3.bf16.msra.mxu1 %v5804_v41 }
0x19a1   :  { %5113 = vmatprep.subr.bf16.mxu1 %v5465_v0 }
0x19a7   :  { %v1489_v45 = vpop.permute.xlu1 %1488 }
0x19a8   :  { %1491 = vst.msk [vmem:[#allocation2] sm:$0x3] %vm1126_vm5, %v1489_v45  ;;  %4728 = vmatmul.mubr.msk.f32.vlgmr.msra.gmra.mrb[16].mxu0 %vm107_vm2, %v1489_v45  ;;  %v1712_v45 = vrot.slane %v5884_v6, 1 }
0x19a9   :  { %5097 = vmatpush3.bf16.msra.mxu0 %v5838_v52  ;;  %4749 = vmatprep.mubr.msk.f32.mxu0 %vm5466_vm0, %v5467_v4 }
0x19aa   :  { %5098 = vmatprep.subr.bf16.mxu0 %v5465_v0  ;;  %v1713_v46 = vsel %vm104_vm1, %v1712_v45, %v1711_v44 }
0x19ad   :  { %5100 = vmatpush3.bf16.msra.mxu0 %v5849_v56 }
0x19ae   :  { %5107 = vmatprep.subr.bf16.mxu0 %v5465_v0 }
0x1a6e   :  { %v1648_v49 = vpop.f32.mrb[12].mxu1 }
0x1a6f   :  { %v1649_v53 = vadd.f32 %v1648_v49, %v1578_v48  ;;  %v4740_v50 = vpop.f32.mrb[13].mxu1 }
0x1a71   :  { %v1652_v51 = vadd.f32 %v1649_v53, %v5878_v5 }
0x1a73   :  { %5337 = vtanh.f32 %v1652_v51  ;;  %v4327_v3 = vmul.f32 -1.442695, %v1652_v51 }
0x1a7b   :  { %v1569_v57 = vpop.f32.mrb[16].mxu0 }
0x1a7c   :  { %v1570_v58 = vadd.f32 %v1569_v57, %v1499_v55  ;;  %v4729_v61 = vpop.f32.mrb[17].mxu0 }
0x1a7d   :  { %v5338_v62 = vpop.eup %5337 }
0x1a7e   :  { %v1573_v63 = vadd.f32 %v1570_v58, %v5876_v2  ;;  %1686 = vrot.lane.b32.xlu0 %v5338_v62, %s5468_s29 }
0x1a80   :  { %5339 = vtanh.f32 %v1573_v63  ;;  %v4326_v10 = vmul.f32 -1.442695, %v1573_v63 }
0x1a81   :  { %5341 = vpow2.f32 %v4327_v3 }
0x1a82   :  { %5343 = vpow2.f32 %v4326_v10 }
0x1a8a   :  { %v5340_v1 = vpop.eup %5339 }
0x1a8b   :  { %1662 = vrot.lane.b32.xlu1 %v5340_v1, %s5468_s29  ;;  %v5342_v9 = vpop.eup %5341 }
0x1a8c   :  { %v1680_v11 = vadd.f32 1.0, %v5342_v9  ;;  %v5344_v12 = vpop.eup %5343 }
0x1a8d   :  { %v1656_v13 = vadd.f32 1.0, %v5344_v12 }
0x1a8e   :  { %5345 = vrcp.f32 %v1680_v11 }
0x1a8f   :  { %5347 = vrcp.f32 %v1656_v13 }
0x1a98   :  { %v5346_v14 = vpop.eup %5345 }
0x1a99   :  { %v5348_v17 = vpop.eup %5347  ;;  %v1684_v20 = vmul.f32 %v5346_v14, %v5901_v33 }
0x1a9a   :  { %v1660_v23 = vmul.f32 %v5348_v17, %v5904_v37  ;;  %v1792_v37 = vsel %vm104_vm1, %v1791_v36, %v1790_v35  ;;  %v1925_v35 = vrot.slane %v5892_v7, 3  ;;  %v1926_v36 = vrot.slane %v5884_v6, 2 }
0x1af0   :  { %v1687_v15 = vpop.permute.xlu0 %1686 }
0x1af1   :  { %v1689_v16 = vmul.f32 %v5346_v14, %v1687_v15 }
0x1af3   :  { %1691 = vrot.lane.b32.xlu0 %v1689_v16, %s5469_s2 }
0x1afd   :  { %v1663_v18 = vpop.permute.xlu1 %1662 }
0x1afe   :  { %v1665_v19 = vmul.f32 %v5348_v17, %v1663_v18 }
0x1b00   :  { %1667 = vrot.lane.b32.xlu1 %v1665_v19, %s5469_s2 }
0x1b65   :  { %v1692_v21 = vpop.permute.xlu0 %1691 }
0x1b66   :  { %v5942_v22 = vadd.f32 %v1692_v21, %v1684_v20 }
0x1b68   :  { %5349 = vtanh.f32 %v5942_v22 }
0x1b72   :  { %v5350_v24 = vpop.eup %5349  ;;  %v1668_v25 = vpop.permute.xlu1 %1667 }
0x1b73   :  { %v5946_v26 = vadd.f32 %v1668_v25, %v1660_v23  ;;  %1697 = vrot.lane.b32.xlu0 %v5350_v24, %s5468_s29 }
0x1b75   :  { %5351 = vtanh.f32 %v5946_v26 }
0x1b7f   :  { %v5352_v27 = vpop.eup %5351 }
0x1b80   :  { %1673 = vrot.lane.b32.xlu1 %v5352_v27, %s5468_s29  ;;  %v2005_v27 = vrot.slane %v5871_v60, 3 }
0x1be5   :  { %v1698_v28 = vpop.permute.xlu0 %1697 }
0x1be6   :  { %v5951_v30 = vmul.f32 %v5346_v14, %v1698_v28 }
0x1be8   :  { %1788 = vrot.lane.b32.xlu0 %v5951_v30, %s5469_s2 }
0x1bf2   :  { %v1674_v31 = vpop.permute.xlu1 %1673 }
0x1bf3   :  { %v1676_v32 = vmul.f32 %v5348_v17, %v1674_v31 }
0x1bf5   :  { %1702 = vrot.lane.b32.xlu1 %v1676_v32, %s5469_s2 }
0x1c5a   :  { %v1789_v33 = vpop.permute.xlu0 %1788 }
0x1c5b   :  { %4761 = vmatmul.mubr.msk.f32.vlgmr.msra.gmra.mrb[14].mxu1 %vm107_vm2, %v1789_v33 }
0x1c5c   :  { %5115 = vmatpush3.bf16.msra.mxu1 %v5778_v29  ;;  %4782 = vmatprep.mubr.msk.f32.mxu1 %vm5466_vm0, %v5467_v4 }
0x1c5d   :  { %5116 = vmatprep.subr.bf16.mxu1 %v5465_v0 }
0x1c60   :  { %5118 = vmatpush3.bf16.msra.mxu1 %v5804_v41 }
0x1c61   :  { %5125 = vmatprep.subr.bf16.mxu1 %v5465_v0 }
0x1c67   :  { %v1703_v34 = vpop.permute.xlu1 %1702 }
0x1c68   :  { %1705 = vst.msk [vmem:[#allocation2 + $0x2] sm:$0x3] %vm1126_vm5, %v1703_v34  ;;  %4750 = vmatmul.mubr.msk.f32.vlgmr.msra.gmra.mrb[18].mxu0 %vm107_vm2, %v1703_v34 }
0x1c69   :  { %5109 = vmatpush3.bf16.msra.mxu0 %v5838_v52  ;;  %4771 = vmatprep.mubr.msk.f32.mxu0 %vm5466_vm0, %v5467_v4 }
0x1c6a   :  { %5110 = vmatprep.subr.bf16.mxu0 %v5465_v0 }
0x1c6d   :  { %5112 = vmatpush3.bf16.msra.mxu0 %v5849_v56 }
0x1c6e   :  { %5119 = vmatprep.subr.bf16.mxu0 %v5465_v0 }
0x1d2e   :  { %v1862_v38 = vpop.f32.mrb[14].mxu1 }
0x1d2f   :  { %v1863_v39 = vadd.f32 %v1862_v38, %v1792_v37  ;;  %v4762_v42 = vpop.f32.mrb[15].mxu1  ;;  %v1927_v37 = vsel %vm104_vm1, %v1926_v36, %v1925_v35 }
0x1d31   :  { %v1866_v43 = vadd.f32 %v1863_v39, %v5878_v5 }
0x1d33   :  { %5353 = vtanh.f32 %v1866_v43  ;;  %v4331_v54 = vmul.f32 -1.442695, %v1866_v43 }
0x1d3b   :  { %v1783_v47 = vpop.f32.mrb[18].mxu0 }
0x1d3c   :  { %v1784_v48 = vadd.f32 %v1783_v47, %v1713_v46  ;;  %v4751_v49 = vpop.f32.mrb[19].mxu0 }
0x1d3d   :  { %v5354_v53 = vpop.eup %5353 }
0x1d3e   :  { %v1787_v50 = vadd.f32 %v1784_v48, %v5876_v2  ;;  %1900 = vrot.lane.b32.xlu0 %v5354_v53, %s5468_s29 }
0x1d40   :  { %5355 = vtanh.f32 %v1787_v50  ;;  %v4330_v55 = vmul.f32 -1.442695, %v1787_v50 }
0x1d41   :  { %5357 = vpow2.f32 %v4331_v54 }
0x1d42   :  { %5359 = vpow2.f32 %v4330_v55 }
0x1d4a   :  { %v5356_v51 = vpop.eup %5355 }
0x1d4b   :  { %1876 = vrot.lane.b32.xlu1 %v5356_v51, %s5468_s29  ;;  %v5358_v57 = vpop.eup %5357 }
0x1d4c   :  { %v1894_v58 = vadd.f32 1.0, %v5358_v57  ;;  %v5360_v61 = vpop.eup %5359 }
0x1d4d   :  { %v1870_v62 = vadd.f32 1.0, %v5360_v61 }
0x1d4e   :  { %5361 = vrcp.f32 %v1894_v58 }
0x1d4f   :  { %5363 = vrcp.f32 %v1870_v62 }
0x1d58   :  { %v5362_v63 = vpop.eup %5361 }
0x1d59   :  { %v5364_v10 = vpop.eup %5363  ;;  %v1898_v12 = vmul.f32 %v5362_v63, %v5942_v22 }
0x1d5a   :  { %v1874_v15 = vmul.f32 %v5364_v10, %v5946_v26  ;;  %v2004_v26 = vrot.slane %v5866_v59, 4 }
0x1d5c   :  { %v2006_v28 = vsel %vm104_vm1, %v2005_v27, %v2004_v26  ;;  %v2139_v27 = vrot.slane %v5892_v7, 4 }
0x1db0   :  { %v1901_v1 = vpop.permute.xlu0 %1900 }
0x1db1   :  { %v1903_v3 = vmul.f32 %v5362_v63, %v1901_v1 }
0x1db3   :  { %1905 = vrot.lane.b32.xlu0 %v1903_v3, %s5469_s2 }
0x1dbd   :  { %v1877_v9 = vpop.permute.xlu1 %1876 }
0x1dbe   :  { %v1879_v11 = vmul.f32 %v5364_v10, %v1877_v9 }
0x1dc0   :  { %1881 = vrot.lane.b32.xlu1 %v1879_v11, %s5469_s2 }
0x1e25   :  { %v1906_v13 = vpop.permute.xlu0 %1905 }
0x1e26   :  { %v5984_v14 = vadd.f32 %v1906_v13, %v1898_v12 }
0x1e28   :  { %5365 = vtanh.f32 %v5984_v14 }
0x1e32   :  { %v5366_v16 = vpop.eup %5365  ;;  %v1882_v17 = vpop.permute.xlu1 %1881 }
0x1e33   :  { %v5988_v18 = vadd.f32 %v1882_v17, %v1874_v15  ;;  %1911 = vrot.lane.b32.xlu0 %v5366_v16, %s5468_s29 }
0x1e35   :  { %5367 = vtanh.f32 %v5988_v18 }
0x1e3f   :  { %v5368_v19 = vpop.eup %5367 }
0x1e40   :  { %1887 = vrot.lane.b32.xlu1 %v5368_v19, %s5468_s29  ;;  %v2218_v19 = vrot.slane %v5866_v59, 3 }
0x1ea5   :  { %v1912_v20 = vpop.permute.xlu0 %1911 }
0x1ea6   :  { %v5993_v21 = vmul.f32 %v5362_v63, %v1912_v20  ;;  %v2219_v20 = vrot.slane %v5871_v60, 2 }
0x1ea8   :  { %2002 = vrot.lane.b32.xlu0 %v5993_v21, %s5469_s2 }
0x1eb2   :  { %v1888_v22 = vpop.permute.xlu1 %1887 }
0x1eb3   :  { %v1890_v23 = vmul.f32 %v5364_v10, %v1888_v22  ;;  %v2220_v22 = vsel %vm104_vm1, %v2219_v20, %v2218_v19 }
0x1eb5   :  { %1916 = vrot.lane.b32.xlu1 %v1890_v23, %s5469_s2 }
0x1f1a   :  { %v2003_v24 = vpop.permute.xlu0 %2002 }
0x1f1b   :  { %4783 = vmatmul.mubr.msk.f32.vlgmr.msra.gmra.mrb[16].mxu1 %vm107_vm2, %v2003_v24 }
0x1f1c   :  { %5127 = vmatpush3.bf16.msra.mxu1 %v5778_v29  ;;  %4804 = vmatprep.mubr.msk.f32.mxu1 %vm5466_vm0, %v5467_v4 }
0x1f1d   :  { %5128 = vmatprep.subr.bf16.mxu1 %v5465_v0 }
0x1f20   :  { %5130 = vmatpush3.bf16.msra.mxu1 %v5804_v41 }
0x1f21   :  { %5137 = vmatprep.subr.bf16.mxu1 %v5465_v0 }
0x1f27   :  { %v1917_v25 = vpop.permute.xlu1 %1916 }
0x1f28   :  { %1919 = vst.msk [vmem:[#allocation2 + $0x4] sm:$0x3] %vm1126_vm5, %v1917_v25  ;;  %4772 = vmatmul.mubr.msk.f32.vlgmr.msra.gmra.mrb[20].mxu0 %vm107_vm2, %v1917_v25 }
0x1f29   :  { %5121 = vmatpush3.bf16.msra.mxu0 %v5838_v52  ;;  %4793 = vmatprep.mubr.msk.f32.mxu0 %vm5466_vm0, %v5467_v4 }
0x1f2a   :  { %5122 = vmatprep.subr.bf16.mxu0 %v5465_v0 }
0x1f2d   :  { %5124 = vmatpush3.bf16.msra.mxu0 %v5849_v56 }
0x1f2e   :  { %5131 = vmatprep.subr.bf16.mxu0 %v5465_v0 }
0x1fee   :  { %v2076_v31 = vpop.f32.mrb[16].mxu1 }
0x1fef   :  { %v2077_v32 = vadd.f32 %v2076_v31, %v2006_v28  ;;  %v4784_v33 = vpop.f32.mrb[17].mxu1  ;;  %v2140_v28 = vrot.slane %v5884_v6, 3 }
0x1ff1   :  { %v2080_v34 = vadd.f32 %v2077_v32, %v5878_v5  ;;  %v2141_v31 = vsel %vm104_vm1, %v2140_v28, %v2139_v27 }
0x1ff3   :  { %5369 = vtanh.f32 %v2080_v34  ;;  %v4335_v46 = vmul.f32 -1.442695, %v2080_v34 }
0x1ffb   :  { %v1997_v38 = vpop.f32.mrb[20].mxu0 }
0x1ffc   :  { %v1998_v39 = vadd.f32 %v1997_v38, %v1927_v37  ;;  %v4773_v42 = vpop.f32.mrb[21].mxu0 }
0x1ffd   :  { %v5370_v43 = vpop.eup %5369 }
0x1ffe   :  { %v2001_v44 = vadd.f32 %v1998_v39, %v5876_v2  ;;  %2114 = vrot.lane.b32.xlu0 %v5370_v43, %s5468_s29 }
0x2000   :  { %5371 = vtanh.f32 %v2001_v44  ;;  %v4334_v47 = vmul.f32 -1.442695, %v2001_v44 }
0x2001   :  { %5373 = vpow2.f32 %v4335_v46 }
0x2002   :  { %5375 = vpow2.f32 %v4334_v47 }
0x200a   :  { %v5372_v45 = vpop.eup %5371 }
0x200b   :  { %2090 = vrot.lane.b32.xlu1 %v5372_v45, %s5468_s29  ;;  %v5374_v48 = vpop.eup %5373 }
0x200c   :  { %v2108_v49 = vadd.f32 1.0, %v5374_v48  ;;  %v5376_v53 = vpop.eup %5375 }
0x200d   :  { %v2084_v50 = vadd.f32 1.0, %v5376_v53 }
0x200e   :  { %5377 = vrcp.f32 %v2108_v49 }
0x200f   :  { %5379 = vrcp.f32 %v2084_v50 }
0x2018   :  { %v5378_v51 = vpop.eup %5377 }
0x2019   :  { %v5380_v57 = vpop.eup %5379  ;;  %v2112_v62 = vmul.f32 %v5378_v51, %v5984_v14 }
0x201a   :  { %v2088_v3 = vmul.f32 %v5380_v57, %v5988_v18 }
0x2070   :  { %v2115_v54 = vpop.permute.xlu0 %2114 }
0x2071   :  { %v2117_v55 = vmul.f32 %v5378_v51, %v2115_v54 }
0x2073   :  { %2119 = vrot.lane.b32.xlu0 %v2117_v55, %s5469_s2 }
0x207d   :  { %v2091_v58 = vpop.permute.xlu1 %2090 }
0x207e   :  { %v2093_v61 = vmul.f32 %v5380_v57, %v2091_v58 }
0x2080   :  { %2095 = vrot.lane.b32.xlu1 %v2093_v61, %s5469_s2 }
0x20e5   :  { %v2120_v63 = vpop.permute.xlu0 %2119 }
0x20e6   :  { %v6026_v1 = vadd.f32 %v2120_v63, %v2112_v62 }
0x20e8   :  { %5381 = vtanh.f32 %v6026_v1 }
0x20f2   :  { %v5382_v10 = vpop.eup %5381  ;;  %v2096_v9 = vpop.permute.xlu1 %2095 }
0x20f3   :  { %v6030_v11 = vadd.f32 %v2096_v9, %v2088_v3  ;;  %2125 = vrot.lane.b32.xlu0 %v5382_v10, %s5468_s29 }
0x20f5   :  { %5383 = vtanh.f32 %v6030_v11 }
0x20ff   :  { %v5384_v12 = vpop.eup %5383 }
0x2100   :  { %2101 = vrot.lane.b32.xlu1 %v5384_v12, %s5468_s29 }
0x2165   :  { %v2126_v13 = vpop.permute.xlu0 %2125 }
0x2166   :  { %v6035_v14 = vmul.f32 %v5378_v51, %v2126_v13  ;;  %v2432_v13 = vrot.slane %v5866_v59, 2 }
0x2168   :  { %2216 = vrot.lane.b32.xlu0 %v6035_v14, %s5469_s2 }
0x2172   :  { %v2102_v15 = vpop.permute.xlu1 %2101 }
0x2173   :  { %v2104_v16 = vmul.f32 %v5380_v57, %v2102_v15  ;;  %v2433_v15 = vrot.slane %v5871_v60, 1 }
0x2175   :  { %2130 = vrot.lane.b32.xlu1 %v2104_v16, %s5469_s2  ;;  %v2434_v16 = vsel %vm104_vm1, %v2433_v15, %v2432_v13  ;;  %v2568_v15 = vrot.slane %v5884_v6, 5 }
0x21da   :  { %v2217_v17 = vpop.permute.xlu0 %2216 }
0x21db   :  { %4805 = vmatmul.mubr.msk.f32.vlgmr.msra.gmra.mrb[18].mxu1 %vm107_vm2, %v2217_v17 }
0x21dc   :  { %5139 = vmatpush3.bf16.msra.mxu1 %v5778_v29  ;;  %4826 = vmatprep.mubr.msk.f32.mxu1 %vm5466_vm0, %v5467_v4 }
0x21dd   :  { %5140 = vmatprep.subr.bf16.mxu1 %v5465_v0 }
0x21e0   :  { %5142 = vmatpush3.bf16.msra.mxu1 %v5804_v41 }
0x21e1   :  { %5149 = vmatprep.subr.bf16.mxu1 %v5465_v0 }
0x21e7   :  { %v2131_v18 = vpop.permute.xlu1 %2130 }
0x21e8   :  { %2133 = vst.msk [vmem:[#allocation2 + $0x6] sm:$0x3] %vm1126_vm5, %v2131_v18  ;;  %4794 = vmatmul.mubr.msk.f32.vlgmr.msra.gmra.mrb[22].mxu0 %vm107_vm2, %v2131_v18 }
0x21e9   :  { %5133 = vmatpush3.bf16.msra.mxu0 %v5838_v52  ;;  %4815 = vmatprep.mubr.msk.f32.mxu0 %vm5466_vm0, %v5467_v4 }
0x21ea   :  { %5134 = vmatprep.subr.bf16.mxu0 %v5465_v0 }
0x21ed   :  { %5136 = vmatpush3.bf16.msra.mxu0 %v5849_v56 }
0x21ee   :  { %5143 = vmatprep.subr.bf16.mxu0 %v5465_v0 }
0x22ae   :  { %v2290_v23 = vpop.f32.mrb[18].mxu1 }
0x22af   :  { %v2291_v24 = vadd.f32 %v2290_v23, %v2220_v22  ;;  %v4806_v25 = vpop.f32.mrb[19].mxu1  ;;  %v2353_v22 = vrot.slane %v5892_v7, 5  ;;  %v2354_v23 = vrot.slane %v5884_v6, 4 }
0x22b1   :  { %v2294_v26 = vadd.f32 %v2291_v24, %v5878_v5  ;;  %v2355_v24 = vsel %vm104_vm1, %v2354_v23, %v2353_v22 }
0x22b3   :  { %5385 = vtanh.f32 %v2294_v26  ;;  %v4339_v38 = vmul.f32 -1.442695, %v2294_v26 }
0x22bb   :  { %v2211_v32 = vpop.f32.mrb[22].mxu0 }
0x22bc   :  { %v2212_v33 = vadd.f32 %v2211_v32, %v2141_v31  ;;  %v4795_v34 = vpop.f32.mrb[23].mxu0 }
0x22bd   :  { %v5386_v35 = vpop.eup %5385 }
0x22be   :  { %v2215_v36 = vadd.f32 %v2212_v33, %v5876_v2  ;;  %2328 = vrot.lane.b32.xlu0 %v5386_v35, %s5468_s29 }
0x22c0   :  { %5387 = vtanh.f32 %v2215_v36  ;;  %v4338_v39 = vmul.f32 -1.442695, %v2215_v36 }
0x22c1   :  { %5389 = vpow2.f32 %v4339_v38 }
0x22c2   :  { %5391 = vpow2.f32 %v4338_v39 }
0x22ca   :  { %v5388_v37 = vpop.eup %5387 }
0x22cb   :  { %2304 = vrot.lane.b32.xlu1 %v5388_v37, %s5468_s29  ;;  %v5390_v42 = vpop.eup %5389 }
0x22cc   :  { %v2322_v43 = vadd.f32 1.0, %v5390_v42  ;;  %v5392_v44 = vpop.eup %5391 }
0x22cd   :  { %v2298_v45 = vadd.f32 1.0, %v5392_v44 }
0x22ce   :  { %5393 = vrcp.f32 %v2322_v43 }
0x22cf   :  { %5395 = vrcp.f32 %v2298_v45 }
0x22d8   :  { %v5394_v46 = vpop.eup %5393 }
0x22d9   :  { %v5396_v49 = vpop.eup %5395  ;;  %v2326_v51 = vmul.f32 %v5394_v46, %v6026_v1 }
0x22da   :  { %v2302_v57 = vmul.f32 %v5396_v49, %v6030_v11 }
0x2330   :  { %v2329_v47 = vpop.permute.xlu0 %2328 }
0x2331   :  { %v2331_v48 = vmul.f32 %v5394_v46, %v2329_v47 }
0x2333   :  { %2333 = vrot.lane.b32.xlu0 %v2331_v48, %s5469_s2 }
0x233d   :  { %v2305_v53 = vpop.permute.xlu1 %2304 }
0x233e   :  { %v2307_v50 = vmul.f32 %v5396_v49, %v2305_v53 }
0x2340   :  { %2309 = vrot.lane.b32.xlu1 %v2307_v50, %s5469_s2 }
0x23a5   :  { %v2334_v54 = vpop.permute.xlu0 %2333 }
0x23a6   :  { %v6068_v55 = vadd.f32 %v2334_v54, %v2326_v51 }
0x23a8   :  { %5397 = vtanh.f32 %v6068_v55 }
0x23b2   :  { %v5398_v58 = vpop.eup %5397  ;;  %v2310_v61 = vpop.permute.xlu1 %2309 }
0x23b3   :  { %v6072_v62 = vadd.f32 %v2310_v61, %v2302_v57  ;;  %2339 = vrot.lane.b32.xlu0 %v5398_v58, %s5468_s29 }
0x23b5   :  { %5399 = vtanh.f32 %v6072_v62 }
0x23bf   :  { %v5400_v63 = vpop.eup %5399 }
0x23c0   :  { %2315 = vrot.lane.b32.xlu1 %v5400_v63, %s5468_s29 }
0x2425   :  { %v2340_v3 = vpop.permute.xlu0 %2339 }
0x2426   :  { %v6077_v1 = vmul.f32 %v5394_v46, %v2340_v3 }
0x2428   :  { %2430 = vrot.lane.b32.xlu0 %v6077_v1, %s5469_s2 }
0x2432   :  { %v2316_v10 = vpop.permute.xlu1 %2315 }
0x2433   :  { %v2318_v9 = vmul.f32 %v5396_v49, %v2316_v10 }
0x2435   :  { %2344 = vrot.lane.b32.xlu1 %v2318_v9, %s5469_s2 }
0x249a   :  { %v2431_v11 = vpop.permute.xlu0 %2430 }
0x249b   :  { %4827 = vmatmul.mubr.msk.f32.vlgmr.msra.gmra.mrb[20].mxu1 %vm107_vm2, %v2431_v11 }
0x249c   :  { %5151 = vmatpush3.bf16.msra.mxu1 %v5778_v29  ;;  %4848 = vmatprep.mubr.msk.f32.mxu1 %vm5466_vm0, %v5467_v4 }
0x249d   :  { %5152 = vmatprep.subr.bf16.mxu1 %v5465_v0 }
0x24a0   :  { %5154 = vmatpush3.bf16.msra.mxu1 %v5804_v41 }
0x24a1   :  { %5161 = vmatprep.subr.bf16.mxu1 %v5465_v0 }
0x24a7   :  { %v6089_v12 = vpop.permute.xlu1 %2344 }
0x24a8   :  { %4816 = vmatmul.mubr.msk.f32.vlgmr.msra.gmra.mrb[24].mxu0 %vm107_vm2, %v6089_v12 }
0x24a9   :  { %5145 = vmatpush3.bf16.msra.mxu0 %v5838_v52  ;;  %4837 = vmatprep.mubr.msk.f32.mxu0 %vm5466_vm0, %v5467_v4 }
0x24aa   :  { %5146 = vmatprep.subr.bf16.mxu0 %v5465_v0 }
0x24ad   :  { %5148 = vmatpush3.bf16.msra.mxu0 %v5849_v56 }
0x24ae   :  { %5155 = vmatprep.subr.bf16.mxu0 %v5465_v0 }
0x256e   :  { %v2504_v17 = vpop.f32.mrb[20].mxu1 }
0x256f   :  { %v2505_v18 = vadd.f32 %v2504_v17, %v2434_v16  ;;  %v4828_v19 = vpop.f32.mrb[21].mxu1 }
0x2571   :  { %v2508_v20 = vadd.f32 %v2505_v18, %v5878_v5 }
0x2573   :  { %5401 = vtanh.f32 %v2508_v20  ;;  %v4343_v33 = vmul.f32 -1.442695, %v2508_v20 }
0x257b   :  { %v2425_v25 = vpop.f32.mrb[24].mxu0 }
0x257c   :  { %v2426_v26 = vadd.f32 %v2425_v25, %v2355_v24  ;;  %v4817_v27 = vpop.f32.mrb[25].mxu0 }
0x257d   :  { %v5402_v28 = vpop.eup %5401 }
0x257e   :  { %v2429_v31 = vadd.f32 %v2426_v26, %v5876_v2  ;;  %2542 = vrot.lane.b32.xlu0 %v5402_v28, %s5468_s29 }
0x2580   :  { %5403 = vtanh.f32 %v2429_v31  ;;  %v4342_v34 = vmul.f32 -1.442695, %v2429_v31 }
0x2581   :  { %5405 = vpow2.f32 %v4343_v33 }
0x2582   :  { %5407 = vpow2.f32 %v4342_v34 }
0x258a   :  { %v5404_v32 = vpop.eup %5403 }
0x258b   :  { %2518 = vrot.lane.b32.xlu1 %v5404_v32, %s5468_s29  ;;  %v5406_v35 = vpop.eup %5405 }
0x258c   :  { %v2536_v36 = vadd.f32 1.0, %v5406_v35  ;;  %v5408_v37 = vpop.eup %5407 }
0x258d   :  { %v2512_v38 = vadd.f32 1.0, %v5408_v37 }
0x258e   :  { %5409 = vrcp.f32 %v2536_v36 }
0x258f   :  { %5411 = vrcp.f32 %v2512_v38 }
0x2598   :  { %v5410_v39 = vpop.eup %5409 }
0x2599   :  { %v5412_v44 = vpop.eup %5411  ;;  %v2540_v47 = vmul.f32 %v5410_v39, %v6068_v55 }
0x259a   :  { %v2516_v53 = vmul.f32 %v5412_v44, %v6072_v62 }
0x25f0   :  { %v2543_v42 = vpop.permute.xlu0 %2542 }
0x25f1   :  { %v2545_v43 = vmul.f32 %v5410_v39, %v2543_v42 }
0x25f3   :  { %2547 = vrot.lane.b32.xlu0 %v2545_v43, %s5469_s2 }
0x25fd   :  { %v2519_v45 = vpop.permute.xlu1 %2518 }
0x25fe   :  { %v2521_v46 = vmul.f32 %v5412_v44, %v2519_v45 }
0x2600   :  { %2523 = vrot.lane.b32.xlu1 %v2521_v46, %s5469_s2 }
0x2665   :  { %v2548_v48 = vpop.permute.xlu0 %2547 }
0x2666   :  { %v6112_v49 = vadd.f32 %v2548_v48, %v2540_v47 }
0x2668   :  { %5413 = vtanh.f32 %v6112_v49 }
0x2672   :  { %v5414_v50 = vpop.eup %5413  ;;  %v2524_v51 = vpop.permute.xlu1 %2523 }
0x2673   :  { %v6116_v54 = vadd.f32 %v2524_v51, %v2516_v53  ;;  %2553 = vrot.lane.b32.xlu0 %v5414_v50, %s5468_s29 }
0x2675   :  { %5415 = vtanh.f32 %v6116_v54 }
0x267f   :  { %v5416_v57 = vpop.eup %5415 }
0x2680   :  { %2529 = vrot.lane.b32.xlu1 %v5416_v57, %s5468_s29 }
0x26e5   :  { %v2554_v58 = vpop.permute.xlu0 %2553 }
0x26e6   :  { %v6121_v55 = vmul.f32 %v5410_v39, %v2554_v58 }
0x26e8   :  { %2644 = vrot.lane.b32.xlu0 %v6121_v55, %s5469_s2 }
0x26f2   :  { %v2530_v61 = vpop.permute.xlu1 %2529 }
0x26f3   :  { %v2532_v63 = vmul.f32 %v5412_v44, %v2530_v61 }
0x26f5   :  { %2558 = vrot.lane.b32.xlu1 %v2532_v63, %s5469_s2 }
0x275a   :  { %v2645_v62 = vpop.permute.xlu0 %2644 }
0x275b   :  { %4849 = vmatmul.mubr.msk.f32.vlgmr.msra.gmra.mrb[22].mxu1 %vm107_vm2, %v2645_v62 }
0x275c   :  { %5163 = vmatpush3.bf16.msra.mxu1 %v5778_v29  ;;  %4870 = vmatprep.mubr.msk.f32.mxu1 %vm5466_vm0, %v5467_v4  ;;  %v2646_v29 = vrot.slane %v5866_v59, 1 }
0x275d   :  { %5164 = vmatprep.subr.bf16.mxu1 %v5465_v0 }
0x2760   :  { %5166 = vmatpush3.bf16.msra.mxu1 %v5804_v41  ;;  %v2647_v41 = vsel %vm104_vm1, %v5871_v60, %v2646_v29  ;;  %v2780_v29 = vrot.slane %v5892_v7, 7 }
0x2761   :  { %5183 = vmatprep.subr.bf16.mxu1 %v5465_v0 }
0x2767   :  { %v6133_v3 = vpop.permute.xlu1 %2558 }
0x2768   :  { %4838 = vmatmul.mubr.msk.f32.vlgmr.msra.gmra.mrb[26].mxu0 %vm107_vm2, %v6133_v3 }
0x2769   :  { %5157 = vmatpush3.bf16.msra.mxu0 %v5838_v52  ;;  %4859 = vmatprep.mubr.msk.f32.mxu0 %vm5466_vm0, %v5467_v4  ;;  %v2567_v52 = vrot.slane %v5892_v7, 6 }
0x276a   :  { %5158 = vmatprep.subr.bf16.mxu0 %v5465_v0 }
0x276b   :  { %v2569_v16 = vsel %vm104_vm1, %v2568_v15, %v2567_v52 }
0x276d   :  { %5160 = vmatpush3.bf16.msra.mxu0 %v5849_v56 }
0x282e   :  { %v2717_v10 = vpop.f32.mrb[22].mxu1 }
0x282f   :  { %v2718_v9 = vadd.f32 %v2717_v10, %v2647_v41  ;;  %v4850_v11 = vpop.f32.mrb[23].mxu1  ;;  %v2781_v41 = vrot.slane %v5884_v6, 6 }
0x2831   :  { %v2721_v13 = vadd.f32 %v2718_v9, %v5878_v5  ;;  %v2782_v10 = vsel %vm104_vm1, %v2781_v41, %v2780_v29 }
0x2833   :  { %5417 = vtanh.f32 %v2721_v13  ;;  %v4347_v23 = vmul.f32 -1.442695, %v2721_v13 }
0x283b   :  { %v2639_v17 = vpop.f32.mrb[26].mxu0 }
0x283c   :  { %v2640_v18 = vadd.f32 %v2639_v17, %v2569_v16  ;;  %v4839_v56 = vpop.f32.mrb[27].mxu0 }
0x283d   :  { %v5418_v19 = vpop.eup %5417 }
0x283e   :  { %v2643_v20 = vadd.f32 %v2640_v18, %v5876_v2  ;;  %2755 = vrot.lane.b32.xlu0 %v5418_v19, %s5468_s29 }
0x2840   :  { %5419 = vtanh.f32 %v2643_v20  ;;  %v4346_v24 = vmul.f32 -1.442695, %v2643_v20 }
0x2841   :  { %5421 = vpow2.f32 %v4347_v23 }
0x2842   :  { %5423 = vpow2.f32 %v4346_v24 }
0x284a   :  { %v5420_v22 = vpop.eup %5419 }
0x284b   :  { %2731 = vrot.lane.b32.xlu1 %v5420_v22, %s5468_s29  ;;  %v5422_v25 = vpop.eup %5421 }
0x284c   :  { %v2749_v26 = vadd.f32 1.0, %v5422_v25  ;;  %v5424_v27 = vpop.eup %5423 }
0x284d   :  { %v2725_v28 = vadd.f32 1.0, %v5424_v27 }
0x284e   :  { %5425 = vrcp.f32 %v2749_v26 }
0x284f   :  { %5427 = vrcp.f32 %v2725_v28 }
0x2858   :  { %v5426_v31 = vpop.eup %5425 }
0x2859   :  { %v5428_v34 = vpop.eup %5427  ;;  %v2753_v37 = vmul.f32 %v5426_v31, %v6112_v49 }
0x285a   :  { %v2729_v42 = vmul.f32 %v5428_v34, %v6116_v54  ;;  %v2859_v54 = vrot.slane %v5871_v60, 7 }
0x285c   :  { %v2860_v57 = vsel %vm104_vm1, %v2859_v54, %v5866_v59 }
0x28b0   :  { %v2756_v32 = vpop.permute.xlu0 %2755 }
0x28b1   :  { %v2758_v33 = vmul.f32 %v5426_v31, %v2756_v32 }
0x28b3   :  { %2760 = vrot.lane.b32.xlu0 %v2758_v33, %s5469_s2 }
0x28bd   :  { %v2732_v35 = vpop.permute.xlu1 %2731 }
0x28be   :  { %v2734_v36 = vmul.f32 %v5428_v34, %v2732_v35  ;;  %v87_v35 = vld [vmem:[%s6518_s9 + $0x20] sm:$0xff] }
0x28c0   :  { %2736 = vrot.lane.b32.xlu1 %v2734_v36, %s5469_s2  ;;  %v88_v36 = vld [vmem:[%s6518_s9 + $0x28] sm:$0xff] }
0x2925   :  { %v2761_v38 = vpop.permute.xlu0 %2760 }
0x2926   :  { %v2763_v39 = vadd.f32 %v2761_v38, %v2753_v37  ;;  %v5175_v37 = vpack.c.bf16 %v88_v36, %v87_v35  ;;  %v89_v38 = vld [vmem:[%s6518_s9 + $0x30] sm:$0xff] }
0x2928   :  { %5429 = vtanh.f32 %v2763_v39 }
0x2932   :  { %v5430_v43 = vpop.eup %5429  ;;  %v2737_v44 = vpop.permute.xlu1 %2736 }
0x2933   :  { %v2739_v45 = vadd.f32 %v2737_v44, %v2729_v42  ;;  %2766 = vrot.lane.b32.xlu0 %v5430_v43, %s5468_s29  ;;  %v91_v43 = vld [vmem:[%s6519_s10] sm:$0xff]  ;;  %v92_v44 = vld [vmem:[%s6519_s10 + $0x8] sm:$0xff] }
0x2935   :  { %5431 = vtanh.f32 %v2739_v45 }
0x293f   :  { %v5432_v46 = vpop.eup %5431 }
0x2940   :  { %2742 = vrot.lane.b32.xlu1 %v5432_v46, %s5468_s29  ;;  %v93_v46 = vld [vmem:[%s6519_s10 + $0x10] sm:$0xff] }
0x29a5   :  { %v2767_v47 = vpop.permute.xlu0 %2766 }
0x29a6   :  { %v2769_v48 = vmul.f32 %v5426_v31, %v2767_v47  ;;  %v6233_v47 = vpack.c.bf16 %v92_v44, %v91_v43  ;;  %v96_v43 = vld [vmem:[%s6521_s12] sm:$0xff]  ;;  %v97_v44 = vld [vmem:[%s6521_s12 + $0x8] sm:$0xff] }
0x29a8   :  { %2857 = vrot.lane.b32.xlu0 %v2769_v48, %s5469_s2 }
0x29b2   :  { %v2743_v53 = vpop.permute.xlu1 %2742 }
0x29b3   :  { %v2745_v49 = vmul.f32 %v5428_v34, %v2743_v53 }
0x29b5   :  { %2771 = vrot.lane.b32.xlu1 %v2745_v49, %s5469_s2 }
0x2a1a   :  { %v2858_v50 = vpop.permute.xlu0 %2857 }
0x2a1b   :  { %4871 = vmatmul.mubr.msk.f32.vlgmr.msra.gmra.mrb[24].mxu1 %vm107_vm2, %v2858_v50 }
0x2a1c   :  { %4900 = vmatprep.mubr.msk.f32.mxu1 %vm5466_vm0, %v5467_v4  ;;  %5185 = vmatpush3.bf16.msra.mxu1 %v6233_v47 }
0x2a1d   :  { %5186 = vmatprep.subr.bf16.mxu1 %v5465_v0 }
0x2a27   :  { %v6163_v51 = vpop.permute.xlu1 %2771 }
0x2a28   :  { %4860 = vmatmul.mubr.msk.f32.vlgmr.msra.gmra.mrb[28].mxu0 %vm107_vm2, %v6163_v51 }
0x2aee   :  { %v2930_v58 = vpop.f32.mrb[24].mxu1 }
0x2aef   :  { %v2931_v61 = vadd.f32 %v2930_v58, %v2860_v57  ;;  %v4872_v63 = vpop.f32.mrb[25].mxu1 }
0x2af1   :  { %v2934_v62 = vadd.f32 %v2931_v61, %v5878_v5 }
0x2af3   :  { %5433 = vtanh.f32 %v2934_v62  ;;  %v4351_v5 = vmul.f32 -1.442695, %v2934_v62 }
0x2afb   :  { %v2852_v9 = vpop.f32.mrb[28].mxu0 }
0x2afc   :  { %v2853_v11 = vadd.f32 %v2852_v9, %v2782_v10  ;;  %v4861_v13 = vpop.f32.mrb[29].mxu0  ;;  %v4352_v9 = vld [vmem:[%s6520_s11] ss:$0 sm:$0xff] }
0x2afd   :  { %v5434_v52 = vpop.eup %5433 }
0x2afe   :  { %v2856_v60 = vadd.f32 %v2853_v11, %v5876_v2  ;;  %2968 = vrot.lane.b32.xlu0 %v5434_v52, %s5468_s29 }
0x2b00   :  { %5435 = vtanh.f32 %v2856_v60  ;;  %v4350_v15 = vmul.f32 -1.442695, %v2856_v60 }
0x2b01   :  { %5437 = vpow2.f32 %v4351_v5 }
0x2b02   :  { %5439 = vpow2.f32 %v4350_v15 }
0x2b0a   :  { %v5436_v59 = vpop.eup %5435 }
0x2b0b   :  { %2944 = vrot.lane.b32.xlu1 %v5436_v59, %s5468_s29  ;;  %v5438_v7 = vpop.eup %5437 }
0x2b0c   :  { %v2962_v16 = vadd.f32 1.0, %v5438_v7  ;;  %v5440_v6 = vpop.eup %5439 }
0x2b0d   :  { %v2938_v17 = vadd.f32 1.0, %v5440_v6 }
0x2b0e   :  { %5441 = vrcp.f32 %v2962_v16 }
0x2b0f   :  { %5443 = vrcp.f32 %v2938_v17 }
0x2b18   :  { %v5442_v18 = vpop.eup %5441 }
0x2b19   :  { %v6178_v2 = vpop.eup %5443  ;;  %v2966_v23 = vmul.f32 %v5442_v18, %v2763_v39  ;;  %v90_v39 = vld [vmem:[%s6518_s9 + $0x38] sm:$0xff] }
0x2b1a   :  { %v2942_v26 = vmul.f32 %v6178_v2, %v2739_v45  ;;  %v5179_v45 = vpack.c.bf16 %v90_v39, %v89_v38 }
0x2b70   :  { %v2969_v56 = vpop.permute.xlu0 %2968 }
0x2b71   :  { %v2971_v19 = vmul.f32 %v5442_v18, %v2969_v56 }
0x2b73   :  { %2973 = vrot.lane.b32.xlu0 %v2971_v19, %s5469_s2 }
0x2b7d   :  { %v2945_v20 = vpop.permute.xlu1 %2944 }
0x2b7e   :  { %v2947_v22 = vmul.f32 %v6178_v2, %v2945_v20 }
0x2b80   :  { %2949 = vrot.lane.b32.xlu1 %v2947_v22, %s5469_s2 }
0x2be5   :  { %v2974_v24 = vpop.permute.xlu0 %2973 }
0x2be6   :  { %v2976_v25 = vadd.f32 %v2974_v24, %v2966_v23 }
0x2be8   :  { %5445 = vtanh.f32 %v2976_v25 }
0x2bf2   :  { %v5446_v27 = vpop.eup %5445  ;;  %v2950_v28 = vpop.permute.xlu1 %2949 }
0x2bf3   :  { %v2952_v31 = vadd.f32 %v2950_v28, %v2942_v26  ;;  %2979 = vrot.lane.b32.xlu0 %v5446_v27, %s5468_s29 }
0x2bf5   :  { %5447 = vtanh.f32 %v2952_v31 }
0x2bf7   :  { %1493 = vrot.lane.b32.xlu0 %v5909_v40, %s5468_s29  ;;  %v83_v40 = vld [vmem:[%s6518_s9] sm:$0xff] }
0x2bfb   :  { %1921 = vrot.lane.b32.xlu0 %v5993_v21, %s5468_s29  ;;  %v84_v21 = vld [vmem:[%s6518_s9 + $0x8] sm:$0xff] }
0x2bfc   :  { %v5167_v33 = vpack.c.bf16 %v84_v21, %v83_v40 }
0x2bfe   :  { %5168 = vmatprep.subr.bf16.mxu0 %v5167_v33 }
0x2bff   :  { %v5448_v32 = vpop.eup %5447  ;;  %2349 = vrot.lane.b32.xlu0 %v6077_v1, %s5468_s29  ;;  %v85_v1 = vld [vmem:[%s6518_s9 + $0x10] sm:$0xff]  ;;  %5170 = vmatpush3.bf16.msra.mxu0 %v5167_v33 }
0x2c00   :  { %2955 = vrot.lane.b32.xlu1 %v5448_v32, %s5468_s29 }
0x2c03   :  { %2776 = vrot.lane.b32.xlu0 %v2769_v48, %s5468_s29  ;;  %v94_v48 = vld [vmem:[%s6519_s10 + $0x18] sm:$0xff] }
0x2c04   :  { %1707 = vrot.lane.b32.xlu1 %v5951_v30, %s5468_s29  ;;  %v86_v30 = vld [vmem:[%s6518_s9 + $0x18] sm:$0xff]  ;;  %v6239_v53 = vpack.c.bf16 %v94_v48, %v93_v46  ;;  %v98_v46 = vld [vmem:[%s6521_s12 + $0x10] sm:$0xff] }
0x2c06   :  { %5188 = vmatpush3.bf16.msra.mxu1 %v6239_v53 }
0x2c07   :  { %5189 = vmatprep.subr.bf16.mxu1 %v5465_v0 }
0x2c08   :  { %2135 = vrot.lane.b32.xlu1 %v6035_v14, %s5468_s29  ;;  %v5171_v14 = vpack.c.bf16 %v86_v30, %v85_v1 }
0x2c09   :  { %4901 = vmatmul.mubr.f32.vlgmr.msra.gmra.mrb[26].mxu1 %v5467_v4 }
0x2c0a   :  { %5172 = vmatprep.subr.bf16.mxu0 %v5171_v14  ;;  %5191 = vmatpush3.bf16.msra.mxu1 %v6233_v47 }
0x2c0b   :  { %5174 = vmatpush3.bf16.msra.mxu0 %v5171_v14  ;;  %4911 = vmatprep.mubr.msk.f32.mxu1 %vm5466_vm0, %v5467_v4 }
0x2c0c   :  { %2563 = vrot.lane.b32.xlu1 %v6121_v55, %s5468_s29  ;;  %5176 = vmatprep.subr.bf16.mxu0 %v5175_v37 }
0x2c0d   :  { %5192 = vmatprep.subr.bf16.mxu1 %v5465_v0 }
0x2c0e   :  { %5194 = vmatpush3.bf16.msra.mxu1 %v6239_v53 }
0x2c0f   :  { %5178 = vmatpush3.bf16.msra.mxu0 %v5175_v37  ;;  %5201 = vmatprep.subr.bf16.mxu1 %v5465_v0 }
0x2c10   :  { %5180 = vmatprep.subr.bf16.mxu0 %v5179_v45 }
0x2c13   :  { %5182 = vmatpush3.bf16.msra.mxu0 %v5179_v45  ;;  %v5231_v45 = vpack.c.bf16 %v97_v44, %v96_v43 }
0x2c14   :  { %5195 = vmatprep.subr.bf16.mxu0 %v5465_v0 }
0x2c65   :  { %v2980_v55 = vpop.permute.xlu0 %2979 }
0x2c66   :  { %v2982_v34 = vmul.f32 %v5442_v18, %v2980_v55 }
0x2c68   :  { %2989 = vrot.lane.b32.xlu1 %v2982_v34, %s5468_s29 }
0x2c69   :  { %v1494_v42 = vpop.permute.xlu0 %1493 }
0x2c6a   :  { %1497 = vst.msk [vmem:[#allocation2 + $0xe] sm:$0x3] %vm1496_vm7, %v1494_v42 }
0x2c6d   :  { %v1922_v49 = vpop.permute.xlu0 %1921 }
0x2c6e   :  { %1924 = vst.msk [vmem:[#allocation2 + $0xa] sm:$0x3] %vm1496_vm7, %v1922_v49 }
0x2c6f   :  { %2561 = vst.msk [vmem:[#allocation2 + $0xa] sm:$0x3] %vm1126_vm5, %v6133_v3 }
0x2c71   :  { %v2350_v50 = vpop.permute.xlu0 %2349 }
0x2c72   :  { %2352 = vst.msk [vmem:[#allocation2 + $0x6] sm:$0x3] %vm1496_vm7, %v2350_v50  ;;  %v2956_v54 = vpop.permute.xlu1 %2955 }
0x2c73   :  { %v2958_v57 = vmul.f32 %v6178_v2, %v2956_v54 }
0x2c75   :  { %2984 = vrot.lane.b32.xlu0 %v2958_v57, %s5469_s2  ;;  %v2777_v3 = vpop.permute.xlu0 %2776 }
0x2c76   :  { %2779 = vst.msk [vmem:[#allocation2 + $0x2] sm:$0x3] %vm1496_vm7, %v2777_v3  ;;  %v1708_v58 = vpop.permute.xlu1 %1707 }
0x2c77   :  { %1710 = vst.msk [vmem:[#allocation2 + $0xc] sm:$0x3] %vm1496_vm7, %v1708_v58  ;;  %v3808_v58 = vld [vmem:[%s6522_s15] sm:$0xff] }
0x2c78   :  { %2774 = vst.msk [vmem:[#allocation2 + $0xc] sm:$0x3] %vm1126_vm5, %v6163_v51 }
0x2c7a   :  { %v2136_v61 = vpop.permute.xlu1 %2135 }
0x2c7b   :  { %2138 = vst.msk [vmem:[#allocation2 + $0x8] sm:$0x3] %vm1496_vm7, %v2136_v61  ;;  %v3809_v61 = vld [vmem:[%s6522_s15 + $0x8] sm:$0xff] }
0x2c7c   :  { %2347 = vst.msk [vmem:[#allocation2 + $0x8] sm:$0x3] %vm1126_vm5, %v6089_v12 }
0x2c7e   :  { %v2564_v63 = vpop.permute.xlu1 %2563 }
0x2c7f   :  { %2566 = vst.msk [vmem:[#allocation2 + $0x4] sm:$0x3] %vm1496_vm7, %v2564_v63  ;;  %v5239_v63 = vpack.c.bf16 %v3809_v61, %v3808_v58 }
0x2cda   :  { %v2990_v62 = vpop.permute.xlu1 %2989 }
0x2cdb   :  { %2992 = vst.msk [vmem:[#allocation2] sm:$0x3] %vm1496_vm7, %v2990_v62  ;;  %v5470_v62 = vmov 1966171168  }
0x2cdc   :  { %v3148_v12 = vpop.f32.mrb[26].mxu1 }
0x2cdd   :  { %v4902_v10 = vpop.f32.mrb[27].mxu1 }
0x2ce2   :  { %v2993_v29 = vld [vmem:[#allocation2] sm:$0xff] }
0x2ce3   :  { %4889 = vmatprep.mubr.msk.f32.mxu0 %vm1049_vm3, %v2993_v29  ;;  %v3892_v29 = vunpack.c.l.s4 %v5470_v62 }
0x2ce7   :  { %v2985_v51 = vpop.permute.xlu0 %2984 }
0x2ce8   :  { %2987 = vst.msk [vmem:[#allocation2 + $0xe] sm:$0x3] %vm1126_vm5, %v2985_v51  ;;  %v3894_v51 = vlaneseq }
0x2cea   :  { %v3895_v10 = vshrl.u32 %v3894_v51, 7 }
0x2cef   :  { %v2994_v41 = vld [vmem:[#allocation2 + $0x8] sm:$0xff] }
0x2cf0   :  { %4890 = vmatmul.mubr.msk.f32.vlgmr.msra.gmra.mrb[30].mxu0 %vm1049_vm3, %v2994_v41  ;;  %v4362_v41 = vld [vmem:[%s6523_s13] ss:$0 sm:$0xff] }
0x2cf1   :  { %5197 = vmatpush3.bf16.msra.mxu0 %v6233_v47  ;;  %4922 = vmatprep.mubr.msk.f32.mxu0 %vm5466_vm0, %v5467_v4 }
0x2cf2   :  { %5198 = vmatprep.subr.bf16.mxu0 %v5465_v0 }
0x2cf5   :  { %5200 = vmatpush3.bf16.msra.mxu0 %v6239_v53 }
0x2cf6   :  { %5207 = vmatprep.subr.bf16.mxu0 %v5465_v0 }
0x2dc3   :  { %v4891_v11 = vpop.f32.mrb[30].mxu0 }
0x2dc4   :  { %v6279_v13 = vadd.f32 %v4891_v11, %v4352_v9  ;;  %v3073_v52 = vpop.f32.mrb[31].mxu0 }
0x2dc5   :  { %v3074_v60 = vadd.f32 %v4352_v9, %v3073_v52 }
0x2dc7   :  { %v3152_v59 = vadd.f32 %v3148_v12, %v3074_v60  ;;  %v3893_v12 = vunpack.c.0.s8 %v3892_v29 }
0x2dc9   :  { %5449 = vtanh.f32 %v3152_v59  ;;  %v6351_v52 = vsub.s32 %v3893_v12, %v3895_v10 }
0x2dd3   :  { %v5450_v5 = vpop.eup %5449 }
0x2dd4   :  { %3154 = vst.msk [vmem:[#allocation3] sm:$0x3] %vm1126_vm5, %v5450_v5  ;;  %4912 = vmatmul.mubr.msk.f32.vlgmr.msra.gmra.mrb[28].mxu1 %vm107_vm2, %v5450_v5 }
0x2dd5   :  { %5203 = vmatpush3.bf16.msra.mxu1 %v6233_v47  ;;  %4933 = vmatprep.mubr.msk.f32.mxu1 %vm5466_vm0, %v5467_v4 }
0x2dd6   :  { %5204 = vmatprep.subr.bf16.mxu1 %v5465_v0 }
0x2dd9   :  { %5206 = vmatpush3.bf16.msra.mxu1 %v6239_v53 }
0x2dda   :  { %5213 = vmatprep.subr.bf16.mxu1 %v5465_v0 }
0x2ea7   :  { %v3224_v15 = vpop.f32.mrb[28].mxu1 }
0x2ea8   :  { %v3229_v7 = vrot.slane %v3224_v15, 6  ;;  %v4913_v16 = vpop.f32.mrb[29].mxu1 }
0x2eaa   :  { %v3231_v6 = vadd.f32 %v3229_v7, %v3074_v60 }
0x2eac   :  { %5451 = vtanh.f32 %v3231_v6 }
0x2eb6   :  { %v5452_v17 = vpop.eup %5451 }
0x2eb7   :  { %3234 = vst.msk [vmem:[#allocation3] sm:$0xc] %vm3233_vm8, %v5452_v17  ;;  %v3236_v18 = vrot.slane %v5452_v17, 2 }
0x2eb9   :  { %4923 = vmatmul.mubr.msk.f32.vlgmr.msra.gmra.mrb[32].mxu0 %vm107_vm2, %v3236_v18 }
0x2eba   :  { %5209 = vmatpush3.bf16.msra.mxu0 %v6233_v47  ;;  %4944 = vmatprep.mubr.msk.f32.mxu0 %vm5466_vm0, %v5467_v4 }
0x2ebb   :  { %5210 = vmatprep.subr.bf16.mxu0 %v5465_v0 }
0x2ebe   :  { %5212 = vmatpush3.bf16.msra.mxu0 %v6239_v53 }
0x2ebf   :  { %5219 = vmatprep.subr.bf16.mxu0 %v5465_v0 }
0x2f8c   :  { %v3305_v56 = vpop.f32.mrb[32].mxu0 }
0x2f8d   :  { %v3310_v19 = vrot.slane %v3305_v56, 4  ;;  %v4924_v2 = vpop.f32.mrb[33].mxu0 }
0x2f8f   :  { %v3312_v20 = vadd.f32 %v3310_v19, %v3074_v60 }
0x2f91   :  { %5453 = vtanh.f32 %v3312_v20 }
0x2f9b   :  { %v5454_v22 = vpop.eup %5453 }
0x2f9c   :  { %3315 = vst.msk [vmem:[#allocation3] sm:$0x30] %vm3314_vm9, %v5454_v22  ;;  %v3317_v23 = vrot.slane %v5454_v22, 4 }
0x2f9e   :  { %4934 = vmatmul.mubr.msk.f32.vlgmr.msra.gmra.mrb[30].mxu1 %vm107_vm2, %v3317_v23 }
0x2f9f   :  { %5215 = vmatpush3.bf16.msra.mxu1 %v6233_v47  ;;  %4955 = vmatprep.mubr.msk.f32.mxu1 %vm5466_vm0, %v5467_v4 }
0x2fa0   :  { %5216 = vmatprep.subr.bf16.mxu1 %v5465_v0 }
0x2fa3   :  { %5218 = vmatpush3.bf16.msra.mxu1 %v6239_v53 }
0x2fa4   :  { %5225 = vmatprep.subr.bf16.mxu1 %v5465_v0 }
0x3071   :  { %v3386_v24 = vpop.f32.mrb[30].mxu1 }
0x3072   :  { %v3391_v25 = vrot.slane %v3386_v24, 2  ;;  %v4935_v26 = vpop.f32.mrb[31].mxu1 }
0x3074   :  { %v3393_v27 = vadd.f32 %v3391_v25, %v3074_v60 }
0x3076   :  { %5455 = vtanh.f32 %v3393_v27 }
0x3080   :  { %v5456_v28 = vpop.eup %5455 }
0x3081   :  { %3396 = vst.msk [vmem:[#allocation3] sm:$0xc0] %vm3395_vm10, %v5456_v28  ;;  %v3398_v31 = vrot.slane %v5456_v28, 6 }
0x3083   :  { %4945 = vmatmul.mubr.msk.f32.vlgmr.msra.gmra.mrb[34].mxu0 %vm107_vm2, %v3398_v31 }
0x3084   :  { %5221 = vmatpush3.bf16.msra.mxu0 %v6233_v47  ;;  %4966 = vmatprep.mubr.msk.f32.mxu0 %vm5466_vm0, %v5467_v4 }
0x3085   :  { %5222 = vmatprep.subr.bf16.mxu0 %v5465_v0 }
0x3088   :  { %5224 = vmatpush3.bf16.msra.mxu0 %v6239_v53  ;;  %v3713_v36 = vld [vmem:[#allocation3] sm:$0xff] }
0x3089   :  { %5232 = vmatprep.subr.bf16.mxu0 %v5231_v45 }
0x3156   :  { %v3467_v32 = vpop.f32.mrb[34].mxu0 }
0x3157   :  { %v3471_v40 = vadd.f32 %v3467_v32, %v6279_v13  ;;  %v4946_v21 = vpop.f32.mrb[35].mxu0 }
0x3159   :  { %5457 = vtanh.f32 %v3471_v40 }
0x3163   :  { %v5458_v1 = vpop.eup %5457 }
0x3164   :  { %3473 = vst.msk [vmem:[#allocation3 + $0x8] sm:$0x3] %vm1126_vm5, %v5458_v1  ;;  %4956 = vmatmul.mubr.msk.f32.vlgmr.msra.gmra.mrb[32].mxu1 %vm107_vm2, %v5458_v1 }
0x3165   :  { %5227 = vmatpush3.bf16.msra.mxu1 %v6233_v47  ;;  %4977 = vmatprep.mubr.msk.f32.mxu1 %vm5466_vm0, %v5467_v4  ;;  %v99_v47 = vld [vmem:[%s6521_s12 + $0x18] sm:$0xff] }
0x3166   :  { %5228 = vmatprep.subr.bf16.mxu1 %v5465_v0  ;;  %v5235_v48 = vpack.c.bf16 %v99_v47, %v98_v46 }
0x3169   :  { %5230 = vmatpush3.bf16.msra.mxu1 %v6239_v53 }
0x316a   :  { %5240 = vmatprep.subr.bf16.mxu1 %v5239_v63 }
0x3237   :  { %v3543_v33 = vpop.f32.mrb[32].mxu1 }
0x3238   :  { %v3548_v30 = vrot.slane %v3543_v33, 6  ;;  %v4957_v14 = vpop.f32.mrb[33].mxu1 }
0x323a   :  { %v3550_v55 = vadd.f32 %v3548_v30, %v6279_v13 }
0x323c   :  { %5459 = vtanh.f32 %v3550_v55 }
0x3246   :  { %v5460_v34 = vpop.eup %5459 }
0x3247   :  { %3552 = vst.msk [vmem:[#allocation3 + $0x8] sm:$0xc] %vm3233_vm8, %v5460_v34  ;;  %v3554_v35 = vrot.slane %v5460_v34, 2 }
0x3249   :  { %4967 = vmatmul.mubr.msk.f32.vlgmr.msra.gmra.mrb[36].mxu0 %vm107_vm2, %v3554_v35 }
0x324a   :  { %4988 = vmatprep.mubr.msk.f32.mxu0 %vm107_vm2, %v3713_v36  ;;  %5234 = vmatpush3.bf16.msra.mxu0 %v5231_v45  ;;  %v4320_v36 = vld [vmem:[%s6525_s16] ss:$0 sm:$0xff] }
0x324b   :  { %5236 = vmatprep.subr.bf16.mxu0 %v5235_v48 }
0x324e   :  { %5238 = vmatpush3.bf16.msra.mxu0 %v5235_v48 }
0x331c   :  { %v3623_v4 = vpop.f32.mrb[36].mxu0 }
0x331d   :  { %v3628_v37 = vrot.slane %v3623_v4, 4  ;;  %v4968_v0 = vpop.f32.mrb[37].mxu0  ;;  %v1283_v4 = vadd.f32 %v4320_v36, %v5886_v8 }
0x331f   :  { %v3630_v38 = vadd.f32 %v3628_v37, %v6279_v13  ;;  %v3956_v37 = vrot.slane %v1283_v4, 6  ;;  %v4018_v0 = vrot.slane %v1283_v4, 4 }
0x3321   :  { %5461 = vtanh.f32 %v3630_v38  ;;  %v4058_v38 = vrot.slane %v1283_v4, 2 }
0x332b   :  { %v5462_v39 = vpop.eup %5461 }
0x332c   :  { %3632 = vst.msk [vmem:[#allocation3 + $0x8] sm:$0x30] %vm3314_vm9, %v5462_v39  ;;  %v3634_v42 = vrot.slane %v5462_v39, 4 }
0x332e   :  { %4978 = vmatmul.mubr.msk.f32.vlgmr.msra.gmra.mrb[34].mxu1 %vm107_vm2, %v3634_v42 }
0x332f   :  { %5242 = vmatpush3.bf16.msra.mxu1 %v5239_v63 }
0x3401   :  { %v3703_v53 = vpop.f32.mrb[34].mxu1 }
0x3402   :  { %v3708_v49 = vrot.slane %v3703_v53, 2  ;;  %v4979_v50 = vpop.f32.mrb[35].mxu1 }
0x3404   :  { %v3710_v54 = vadd.f32 %v3708_v49, %v6279_v13 }
0x3406   :  { %5463 = vtanh.f32 %v3710_v54 }
0x3410   :  { %v5464_v57 = vpop.eup %5463 }
0x3411   :  { %3712 = vst.msk [vmem:[#allocation3 + $0x8] sm:$0xc0] %vm3395_vm10, %v5464_v57 }
0x3418   :  { %v3714_v3 = vld [vmem:[#allocation3 + $0x8] sm:$0xff] }
0x3419   :  { %4989 = vmatmul.mubr.msk.f32.vlgmr.msra.gmra.mrb[38].mxu0 %vm107_vm2, %v3714_v3 }
0x34ec   :  { %v4990_v9 = vpop.f32.mrb[38].mxu0 }
0x34ed   :  { %v3799_v11 = vadd.f32 %v4990_v9, %v4362_v41  ;;  %v3793_v13 = vpop.f32.mrb[39].mxu0 }
0x34ee   :  { %v3794_v60 = vadd.f32 %v4362_v41, %v3793_v13 }
0x34ef   :  { %vm3803_vm11 = vcmp.gt.f32.partialorder %v3799_v11, 0.0  ;;  %v3805_v59 = vmul.f32 0.2, %v3799_v11 }
0x34f0   :  { %vm3802_vm12 = vcmp.gt.f32.partialorder %v3794_v60, 0.0  ;;  %v3804_v5 = vmul.f32 0.2, %v3794_v60 }
0x34f1   :  { %v3807_v15 = vsel %vm3803_vm11, %v3799_v11, %v3805_v59 }
0x34f2   :  { %v4100_v7 = vrot.slane %v3807_v15, %v6351_v52  ;;  %v4190_v16 = vcombine.high %v3807_v15, %v3807_v15  ;;  %v3806_v6 = vsel %vm3802_vm12, %v3794_v60, %v3804_v5 }
0x34f3   :  { %4995 = vmatprep.mubr.msk.f32.mxu1 %vm1132_vm6, %v3806_v6  ;;  %v3897_v17 = vrot.slane %v3806_v6, %v6351_v52  ;;  %v3991_v18 = vcombine.high %v3806_v6, %v3806_v6 }
0x34f4   :  { %v4101_v56 = vcombine.high %v4100_v7, %v4100_v7  ;;  %v4108_v19 = vrot.slane %v4100_v7, %v6351_v52  ;;  %v4197_v2 = vrot.slane %v4190_v16, %v6351_v52  ;;  %4996 = vmatmul.mubr.msk.f32.vlgmr.msra.gmra.mrb[36].mxu1 %vm1132_vm6, %v3807_v15 }
0x34f5   :  { %v3898_v20 = vcombine.high %v3897_v17, %v3897_v17  ;;  %v3905_v22 = vrot.slane %v3897_v17, %v6351_v52  ;;  %v3998_v23 = vrot.slane %v3991_v18, %v6351_v52 }
0x34f6   :  { %v4115_v24 = vrot.slane %v4101_v56, %v6351_v52  ;;  %4118 = vst.msk [vmem:[%s6524_s18 + $0x4] sm:$0x1] %vm3915_vm13, %v4108_v19  ;;  %v4151_v25 = vcombine.high %v4108_v19, %v4108_v19  ;;  %v4198_v26 = vcombine.high %v4197_v2, %v4197_v2  ;;  %v4205_v27 = vrot.slane %v4197_v2, %v6351_v52 }
0x34f7   :  { %v3912_v28 = vrot.slane %v3898_v20, %v6351_v52  ;;  %3916 = vst.msk [vmem:[%s6524_s18] sm:$0x1] %vm3915_vm13, %v3905_v22  ;;  %v3949_v31 = vcombine.high %v3905_v22, %v3905_v22  ;;  %v3999_v32 = vcombine.high %v3998_v23, %v3998_v23  ;;  %v4006_v40 = vrot.slane %v3998_v23, %v6351_v52 }
0x34f8   :  { %4119 = vst.msk [vmem:[%s6524_s18 + $0xc] sm:$0x1] %vm3915_vm13, %v4115_v24  ;;  %v4152_v21 = vcombine.high %v4115_v24, %v4115_v24  ;;  %4155 = vst.msk [vmem:[%s6524_s18 + $0x5] sm:$0x1] %vm3915_vm13, %v4151_v25  ;;  %v4212_v1 = vrot.slane %v4198_v26, %v6351_v52  ;;  %v4249_v33 = vcombine.high %v4205_v27, %v4205_v27 }
0x34f9   :  { %4215 = vst.msk [vmem:[%s6524_s18 + $0x6] sm:$0x1] %vm3915_vm13, %v4205_v27  ;;  %3917 = vst.msk [vmem:[%s6524_s18 + $0x8] sm:$0x1] %vm3915_vm13, %v3912_v28  ;;  %v3950_v30 = vcombine.high %v3912_v28, %v3912_v28  ;;  %v4013_v14 = vrot.slane %v3999_v32, %v6351_v52  ;;  %v4052_v55 = vcombine.high %v4006_v40, %v4006_v40 }
0x34fa   :  { %3953 = vst.msk [vmem:[%s6524_s18 + $0x1] sm:$0x1] %vm3915_vm13, %v3949_v31  ;;  %4016 = vst.msk [vmem:[%s6524_s18 + $0x2] sm:$0x1] %vm3915_vm13, %v4006_v40  ;;  %v4250_v34 = vcombine.high %v4212_v1, %v4212_v1 }
0x34fb   :  { %4156 = vst.msk [vmem:[%s6524_s18 + $0xd] sm:$0x1] %vm3915_vm13, %v4152_v21  ;;  %4216 = vst.msk [vmem:[%s6524_s18 + $0xe] sm:$0x1] %vm3915_vm13, %v4212_v1  ;;  %v4053_v35 = vcombine.high %v4013_v14, %v4013_v14 }
0x34fc   :  { %4253 = vst.msk [vmem:[%s6524_s18 + $0x7] sm:$0x1] %vm3915_vm13, %v4249_v33  ;;  %3954 = vst.msk [vmem:[%s6524_s18 + $0x9] sm:$0x1] %vm3915_vm13, %v3950_v30 }
0x34fd   :  { %4017 = vst.msk [vmem:[%s6524_s18 + $0xa] sm:$0x1] %vm3915_vm13, %v4013_v14  ;;  %4056 = vst.msk [vmem:[%s6524_s18 + $0x3] sm:$0x1] %vm3915_vm13, %v4052_v55 }
0x34fe   :  { %4254 = vst.msk [vmem:[%s6524_s18 + $0xf] sm:$0x1] %vm3915_vm13, %v4250_v34  ;;  %4057 = vst.msk [vmem:[%s6524_s18 + $0xb] sm:$0x1] %vm3915_vm13, %v4053_v35 }
0x35c7   :  { %v4997_v39 = vpop.f32.mrb[36].mxu1 }
0x35c8   :  { %v4120_v42 = vadd.f32 %v4997_v39, %v1283_v4  ;;  %v3882_v43 = vpop.f32.mrb[37].mxu1  ;;  %v4157_v44 = vadd.f32 %v4997_v39, %v3956_v37  ;;  %v4217_v45 = vadd.f32 %v4997_v39, %v4018_v0  ;;  %v6435_v46 = vadd.f32 %v4997_v39, %v4058_v38 }
0x35c9   :  { %v3918_v47 = vadd.f32 %v3882_v43, %v1283_v4  ;;  %v3958_v48 = vadd.f32 %v3956_v37, %v3882_v43  ;;  %v4020_v53 = vadd.f32 %v4018_v0, %v3882_v43  ;;  %v4060_v49 = vadd.f32 %v4058_v38, %v3882_v43 }
0x35ca   :  { %vm4121_vm14 = vcmp.gt.f32.partialorder %v4120_v42, 0.0  ;;  %v4122_v50 = vmul.f32 0.2, %v4120_v42  ;;  %vm4158_vm15 = vcmp.gt.f32.partialorder %v4157_v44, 0.0  ;;  %v4159_v54 = vmul.f32 0.2, %v4157_v44 }
0x35cb   :  { %vm3919_vm0 = vcmp.gt.f32.partialorder %v3918_v47, 0.0  ;;  %v3920_v8 = vmul.f32 0.2, %v3918_v47  ;;  %vm3959_vm1 = vcmp.gt.f32.partialorder %v3958_v48, 0.0  ;;  %v3960_v57 = vmul.f32 0.2, %v3958_v48 }
0x35cc   :  { %v4123_v3 = vsel %vm4121_vm14, %v4120_v42, %v4122_v50  ;;  %vm4021_vm2 = vcmp.gt.f32.partialorder %v4020_v53, 0.0  ;;  %v4022_v58 = vmul.f32 0.2, %v4020_v53  ;;  %vm4061_vm3 = vcmp.gt.f32.partialorder %v4060_v49, 0.0 }
0x35cd   :  { %v4131_v61 = vrot.slane %v4123_v3, %v6351_v52  ;;  %v3921_v63 = vsel %vm3919_vm0, %v3918_v47, %v3920_v8  ;;  %v3961_v62 = vsel %vm3959_vm1, %v3958_v48, %v3960_v57  ;;  %v4062_v29 = vmul.f32 0.2, %v4060_v49 }
0x35ce   :  { %v3929_v51 = vrot.slane %v3921_v63, %v6351_v52  ;;  %v3969_v41 = vrot.slane %v3961_v62, %v6351_v52  ;;  %v4023_v12 = vsel %vm4021_vm2, %v4020_v53, %v4022_v58  ;;  %v4160_v10 = vsel %vm4158_vm15, %v4157_v44, %v4159_v54 }
0x35cf   :  { %v4132_v9 = vcombine.high %v4131_v61, %v4131_v61  ;;  %4371 = vst.sshfl [vmem:[%s6526_s19 + $0x4] sm:$0x1 pattern:$0x73625140] %v4131_v61  ;;  %v4025_v11 = vcombine.high %v4023_v12, %v4023_v12  ;;  %v4063_v13 = vsel %vm4061_vm3, %v4060_v49, %v4062_v29  ;;  %v4168_v60 = vrot.slane %v4160_v10, %v6351_v52 }
0x35d0   :  { %v3930_v59 = vcombine.high %v3929_v51, %v3929_v51  ;;  %4367 = vst.sshfl [vmem:[%s6526_s19] sm:$0x1 pattern:$0x73625140] %v3929_v51  ;;  %v3970_v5 = vcombine.high %v3969_v41, %v3969_v41  ;;  %v3977_v15 = vrot.slane %v3969_v41, %v6351_v52  ;;  %v4065_v7 = vcombine.high %v4063_v13, %v4063_v13 }
0x35d1   :  { %4372 = vst.sshfl [vmem:[%s6526_s19 + $0xc] sm:$0x1 pattern:$0x73625140] %v4132_v9  ;;  %v4032_v16 = vrot.slane %v4025_v11, %v6351_v52  ;;  %v4169_v6 = vcombine.high %v4168_v60, %v4168_v60  ;;  %v4176_v17 = vrot.slane %v4168_v60, %v6351_v52  ;;  %vm4218_vm4 = vcmp.gt.f32.partialorder %v4217_v45, 0.0 }
0x35d2   :  { %4368 = vst.sshfl [vmem:[%s6526_s19 + $0x8] sm:$0x1 pattern:$0x73625140] %v3930_v59  ;;  %v3984_v18 = vrot.slane %v3970_v5, %v6351_v52  ;;  %v3985_v56 = vcombine.high %v3977_v15, %v3977_v15  ;;  %v4072_v19 = vrot.slane %v4065_v7, %v6351_v52  ;;  %v4219_v2 = vmul.f32 0.2, %v4217_v45 }
0x35d3   :  { %v4033_v20 = vcombine.high %v4032_v16, %v4032_v16  ;;  %4369 = vst.sshfl [vmem:[%s6526_s19 + $0x2] sm:$0x1 pattern:$0x73625140] %v4032_v16  ;;  %v4183_v22 = vrot.slane %v4169_v6, %v6351_v52  ;;  %v4184_v23 = vcombine.high %v4176_v17, %v4176_v17  ;;  %vm4256_vm5 = vcmp.gt.f32.partialorder %v6435_v46, 0.0 }
0x35d4   :  { %v3986_v24 = vcombine.high %v3984_v18, %v3984_v18  ;;  %3989 = vst [vmem:[%s6526_s19 + $0x1] sm:$0x1] %v3985_v56  ;;  %v4073_v25 = vcombine.high %v4072_v19, %v4072_v19  ;;  %v4080_v26 = vrot.slane %v4072_v19, %v6351_v52  ;;  %v4220_v27 = vsel %vm4218_vm4, %v4217_v45, %v4219_v2 }
0x35d5   :  { %4370 = vst.sshfl [vmem:[%s6526_s19 + $0xa] sm:$0x1 pattern:$0x73625140] %v4033_v20  ;;  %v4185_v28 = vcombine.high %v4183_v22, %v4183_v22  ;;  %4188 = vst [vmem:[%s6526_s19 + $0x5] sm:$0x1] %v4184_v23  ;;  %v4222_v31 = vcombine.high %v4220_v27, %v4220_v27 }
0x35d6   :  { %v4257_v32 = vmul.f32 0.2, %v6435_v46  ;;  %3990 = vst [vmem:[%s6526_s19 + $0x9] sm:$0x1] %v3986_v24  ;;  %v4087_v40 = vrot.slane %v4073_v25, %v6351_v52  ;;  %v4088_v21 = vcombine.high %v4080_v26, %v4080_v26 }
0x35d7   :  { %4189 = vst [vmem:[%s6526_s19 + $0xd] sm:$0x1] %v4185_v28  ;;  %v4229_v1 = vrot.slane %v4222_v31, %v6351_v52 }
0x35d8   :  { %v4258_v33 = vsel %vm4256_vm5, %v6435_v46, %v4257_v32  ;;  %v4089_v30 = vcombine.high %v4087_v40, %v4087_v40  ;;  %4092 = vst [vmem:[%s6526_s19 + $0x3] sm:$0x1] %v4088_v21 }
0x35d9   :  { %v4260_v14 = vcombine.high %v4258_v33, %v4258_v33  ;;  %v4230_v55 = vcombine.high %v4229_v1, %v4229_v1  ;;  %4373 = vst.sshfl [vmem:[%s6526_s19 + $0x6] sm:$0x1 pattern:$0x73625140] %v4229_v1 }
0x35da   :  { %4093 = vst [vmem:[%s6526_s19 + $0xb] sm:$0x1] %v4089_v30 }
0x35db   :  { %v4267_v34 = vrot.slane %v4260_v14, %v6351_v52  ;;  %4374 = vst.sshfl [vmem:[%s6526_s19 + $0xe] sm:$0x1 pattern:$0x73625140] %v4230_v55 }
0x35dd   :  { %v4268_v35 = vcombine.high %v4267_v34, %v4267_v34  ;;  %v4275_v36 = vrot.slane %v4267_v34, %v6351_v52 }
0x35df   :  { %v4282_v4 = vrot.slane %v4268_v35, %v6351_v52  ;;  %v4283_v37 = vcombine.high %v4275_v36, %v4275_v36 }
0x35e1   :  { %v4284_v0 = vcombine.high %v4282_v4, %v4282_v4  ;;  %4287 = vst [vmem:[%s6526_s19 + $0x7] sm:$0x1] %v4283_v37 }
0x35e3   :  { %4288 = vst [vmem:[%s6526_s19 + $0xf] sm:$0x1] %v4284_v0 }

// kernel: _lambda_.7
= control target key start
LH: loop header
LB: loop body
LE: loop exit
PB: predicated region body
PF: predicated region fallthrough
CT: control target
= control target key end

     0   :  { %s1475_s12 = smov 0   ;;  %s1477_s13 = smov 0   ;;  %s2157_s0 = inlined_call_operand.vmem [shape: f32[3,200], index: 0, kind: input, shape index: {}]   ;;  %s2158_s1 = inlined_call_operand.vmem [shape: f32[200,4096], index: 1, kind: input, shape index: {}]   ;;  %s2159_s2 = inlined_call_operand.vmem [shape: f32[3,1], index: 2, kind: input, shape index: {}]   ;;  %s2160_s3 = inlined_call_operand.vmem [shape: f32[3,4096], index: 3, kind: output, shape index: {}]  }
   0x1   :  { %s1479_s14 = smov 0  }
   0x2 LB: > { %s1177_s15 = sadd.s32 4294967295, %s1452_s14   ;;  %s1492_s16 = sadd.s32 1, %s1452_s14   ;;  %s1452_s14 = sphi %s1479_s14, %s2163_s14   ;;  %s1448_s13 = sphi %s1477_s13, %s2162_s13   ;;  %s1444_s12 = sphi %s1475_s12, %s2161_s12  }
   0x3   : > { %s38_s17 = ssub.s32 %s1452_s14, %s1492_s16  ;;  %s41_s18 = sadd.s32 1, %s1448_s13 }
   0x4   : > { %p39_p0 = scmp.eq.s32.totalorder %s38_s17, 0  ;;  %p48_p1 = scmp.ne.s32.totalorder %s1448_s13, %s1444_s12 }
   0x5   : > { %p49_p2 = scmp.eq.s32.totalorder %s1452_s14, 0  ;;  %p1180_p4 = scmp.ge.s32.totalorder %s1452_s14, 4 }
   0x6   : > { %s1501_s19 = scalar_select %p39_p0, %s1448_s13, %s41_s18  }
   0x7   : > { %p50_p3 = por %p49_p2, %p48_p1  ;;  %127 = sbr.rel (%p1180_p4) target bundleno = 119 (0x77), region = 24 }
   0xe   : > { %130 = sbr.rel (!%p50_p3) target bundleno = 119 (0x77), region = 28  ;;  %s132_s20 = sand.u32 (%p50_p3), 1, %s1448_s13  }
   0xf   : > { %s1192_s21 = sshll.u32 (%p50_p3), %s1452_s14, 6  ;;  %s1385_s22 = smul.u32 (%p50_p3), 1600, %s132_s20 }
  0x10   : > { %s1509_s25 = scalar_lea.vmem (%p50_p3), %s2158_s1, %s1192_s21 }
  0x11   : > { %v150_v0 = vld [vmem:[%s1509_s25] sm:$0xff] (%p50_p3)  ;;  %v152_v1 = vld [vmem:[%s1509_s25 + $0x8] sm:$0xff] (%p50_p3)  ;;  %v154_v2 = vld [vmem:[%s1509_s25 + $0x10] sm:$0xff] (%p50_p3)  ;;  %s1517_s26 = scalar_lea.vmem (%p50_p3), [#allocation2], %s1385_s22 }
  0x12   : > { %v156_v3 = vld [vmem:[%s1509_s25 + $0x18] sm:$0xff] (%p50_p3)  ;;  %v158_v4 = vld [vmem:[%s1509_s25 + $0x20] sm:$0xff] (%p50_p3)  ;;  %v160_v5 = vld [vmem:[%s1509_s25 + $0x28] sm:$0xff] (%p50_p3)  ;;  %151 = vst [vmem:[%s1517_s26] sm:$0xff] (%p50_p3), %v150_v0 }
  0x13   : > { %153 = vst [vmem:[%s1517_s26 + $0x8] sm:$0xff] (%p50_p3), %v152_v1  ;;  %155 = vst [vmem:[%s1517_s26 + $0x10] sm:$0xff] (%p50_p3), %v154_v2  ;;  %v162_v6 = vld [vmem:[%s1509_s25 + $0x30] sm:$0xff] (%p50_p3)  ;;  %v164_v7 = vld [vmem:[%s1509_s25 + $0x38] sm:$0xff] (%p50_p3) }
  0x14   : > { %157 = vst [vmem:[%s1517_s26 + $0x18] sm:$0xff] (%p50_p3), %v156_v3  ;;  %159 = vst [vmem:[%s1517_s26 + $0x20] sm:$0xff] (%p50_p3), %v158_v4  ;;  %v166_v8 = vld [vmem:[%s1509_s25 + $0x100] sm:$0xff] (%p50_p3)  ;;  %v168_v9 = vld [vmem:[%s1509_s25 + $0x108] sm:$0xff] (%p50_p3) }
  0x15   : > { %161 = vst [vmem:[%s1517_s26 + $0x28] sm:$0xff] %v160_v5  ;;  %163 = vst [vmem:[%s1517_s26 + $0x30] sm:$0xff] %v162_v6  ;;  %v170_v10 = vld [vmem:[%s1509_s25 + $0x110] sm:$0xff]  ;;  %v172_v11 = vld [vmem:[%s1509_s25 + $0x118] sm:$0xff] }
  0x16   : > { %165 = vst [vmem:[%s1517_s26 + $0x38] sm:$0xff] %v164_v7  ;;  %167 = vst [vmem:[%s1517_s26 + $0x40] sm:$0xff] %v166_v8  ;;  %v174_v12 = vld [vmem:[%s1509_s25 + $0x120] sm:$0xff]  ;;  %v176_v13 = vld [vmem:[%s1509_s25 + $0x128] sm:$0xff] }
  0x17   : > { %169 = vst [vmem:[%s1517_s26 + $0x48] sm:$0xff] %v168_v9  ;;  %171 = vst [vmem:[%s1517_s26 + $0x50] sm:$0xff] %v170_v10  ;;  %v178_v14 = vld [vmem:[%s1509_s25 + $0x130] sm:$0xff]  ;;  %v180_v15 = vld [vmem:[%s1509_s25 + $0x138] sm:$0xff] }
  0x18   : > { %173 = vst [vmem:[%s1517_s26 + $0x58] sm:$0xff] %v172_v11  ;;  %175 = vst [vmem:[%s1517_s26 + $0x60] sm:$0xff] %v174_v12  ;;  %v182_v16 = vld [vmem:[%s1509_s25 + $0x200] sm:$0xff]  ;;  %v184_v17 = vld [vmem:[%s1509_s25 + $0x208] sm:$0xff] }
  0x19   : > { %177 = vst [vmem:[%s1517_s26 + $0x68] sm:$0xff] %v176_v13  ;;  %179 = vst [vmem:[%s1517_s26 + $0x70] sm:$0xff] %v178_v14  ;;  %v186_v18 = vld [vmem:[%s1509_s25 + $0x210] sm:$0xff]  ;;  %v188_v19 = vld [vmem:[%s1509_s25 + $0x218] sm:$0xff] }
  0x1a   : > { %181 = vst [vmem:[%s1517_s26 + $0x78] sm:$0xff] %v180_v15  ;;  %183 = vst [vmem:[%s1517_s26 + $0x80] sm:$0xff] %v182_v16  ;;  %v190_v20 = vld [vmem:[%s1509_s25 + $0x220] sm:$0xff]  ;;  %v192_v21 = vld [vmem:[%s1509_s25 + $0x228] sm:$0xff] }
  0x1b   : > { %185 = vst [vmem:[%s1517_s26 + $0x88] sm:$0xff] %v184_v17  ;;  %187 = vst [vmem:[%s1517_s26 + $0x90] sm:$0xff] %v186_v18  ;;  %v194_v22 = vld [vmem:[%s1509_s25 + $0x230] sm:$0xff]  ;;  %v196_v23 = vld [vmem:[%s1509_s25 + $0x238] sm:$0xff] }
  0x1c   : > { %189 = vst [vmem:[%s1517_s26 + $0x98] sm:$0xff] %v188_v19  ;;  %191 = vst [vmem:[%s1517_s26 + $0xa0] sm:$0xff] %v190_v20  ;;  %v198_v24 = vld [vmem:[%s1509_s25 + $0x300] sm:$0xff]  ;;  %v200_v25 = vld [vmem:[%s1509_s25 + $0x308] sm:$0xff] }
  0x1d   : > { %193 = vst [vmem:[%s1517_s26 + $0xa8] sm:$0xff] %v192_v21  ;;  %195 = vst [vmem:[%s1517_s26 + $0xb0] sm:$0xff] %v194_v22  ;;  %v202_v26 = vld [vmem:[%s1509_s25 + $0x310] sm:$0xff]  ;;  %v204_v27 = vld [vmem:[%s1509_s25 + $0x318] sm:$0xff] }
  0x1e   : > { %197 = vst [vmem:[%s1517_s26 + $0xb8] sm:$0xff] %v196_v23  ;;  %199 = vst [vmem:[%s1517_s26 + $0xc0] sm:$0xff] %v198_v24  ;;  %v206_v28 = vld [vmem:[%s1509_s25 + $0x320] sm:$0xff]  ;;  %v208_v29 = vld [vmem:[%s1509_s25 + $0x328] sm:$0xff] }
  0x1f   : > { %201 = vst [vmem:[%s1517_s26 + $0xc8] sm:$0xff] %v200_v25  ;;  %203 = vst [vmem:[%s1517_s26 + $0xd0] sm:$0xff] %v202_v26  ;;  %v210_v30 = vld [vmem:[%s1509_s25 + $0x330] sm:$0xff]  ;;  %v212_v31 = vld [vmem:[%s1509_s25 + $0x338] sm:$0xff] }
  0x20   : > { %205 = vst [vmem:[%s1517_s26 + $0xd8] sm:$0xff] %v204_v27  ;;  %207 = vst [vmem:[%s1517_s26 + $0xe0] sm:$0xff] %v206_v28  ;;  %v214_v32 = vld [vmem:[%s1509_s25 + $0x400] sm:$0xff]  ;;  %v216_v33 = vld [vmem:[%s1509_s25 + $0x408] sm:$0xff] }
  0x21   : > { %209 = vst [vmem:[%s1517_s26 + $0xe8] sm:$0xff] %v208_v29  ;;  %211 = vst [vmem:[%s1517_s26 + $0xf0] sm:$0xff] %v210_v30  ;;  %v218_v34 = vld [vmem:[%s1509_s25 + $0x410] sm:$0xff]  ;;  %v220_v35 = vld [vmem:[%s1509_s25 + $0x418] sm:$0xff] }
  0x22   : > { %213 = vst [vmem:[%s1517_s26 + $0xf8] sm:$0xff] %v212_v31  ;;  %215 = vst [vmem:[%s1517_s26 + $0x100] sm:$0xff] %v214_v32  ;;  %v222_v36 = vld [vmem:[%s1509_s25 + $0x420] sm:$0xff]  ;;  %v224_v37 = vld [vmem:[%s1509_s25 + $0x428] sm:$0xff] }
  0x23   : > { %217 = vst [vmem:[%s1517_s26 + $0x108] sm:$0xff] %v216_v33  ;;  %219 = vst [vmem:[%s1517_s26 + $0x110] sm:$0xff] %v218_v34  ;;  %v226_v38 = vld [vmem:[%s1509_s25 + $0x430] sm:$0xff]  ;;  %v228_v39 = vld [vmem:[%s1509_s25 + $0x438] sm:$0xff] }
  0x24   : > { %221 = vst [vmem:[%s1517_s26 + $0x118] sm:$0xff] %v220_v35  ;;  %223 = vst [vmem:[%s1517_s26 + $0x120] sm:$0xff] %v222_v36  ;;  %v230_v40 = vld [vmem:[%s1509_s25 + $0x500] sm:$0xff]  ;;  %v232_v41 = vld [vmem:[%s1509_s25 + $0x508] sm:$0xff] }
  0x25   : > { %225 = vst [vmem:[%s1517_s26 + $0x128] sm:$0xff] %v224_v37  ;;  %227 = vst [vmem:[%s1517_s26 + $0x130] sm:$0xff] %v226_v38  ;;  %v234_v42 = vld [vmem:[%s1509_s25 + $0x510] sm:$0xff]  ;;  %v236_v43 = vld [vmem:[%s1509_s25 + $0x518] sm:$0xff] }
  0x26   : > { %229 = vst [vmem:[%s1517_s26 + $0x138] sm:$0xff] %v228_v39  ;;  %231 = vst [vmem:[%s1517_s26 + $0x140] sm:$0xff] %v230_v40  ;;  %v238_v44 = vld [vmem:[%s1509_s25 + $0x520] sm:$0xff]  ;;  %v240_v45 = vld [vmem:[%s1509_s25 + $0x528] sm:$0xff] }
  0x27   : > { %233 = vst [vmem:[%s1517_s26 + $0x148] sm:$0xff] %v232_v41  ;;  %235 = vst [vmem:[%s1517_s26 + $0x150] sm:$0xff] %v234_v42  ;;  %v242_v46 = vld [vmem:[%s1509_s25 + $0x530] sm:$0xff]  ;;  %v244_v47 = vld [vmem:[%s1509_s25 + $0x538] sm:$0xff] }
  0x28   : > { %237 = vst [vmem:[%s1517_s26 + $0x158] sm:$0xff] %v236_v43  ;;  %239 = vst [vmem:[%s1517_s26 + $0x160] sm:$0xff] %v238_v44  ;;  %v246_v48 = vld [vmem:[%s1509_s25 + $0x600] sm:$0xff]  ;;  %v248_v49 = vld [vmem:[%s1509_s25 + $0x608] sm:$0xff] }
  0x29   : > { %241 = vst [vmem:[%s1517_s26 + $0x168] sm:$0xff] %v240_v45  ;;  %243 = vst [vmem:[%s1517_s26 + $0x170] sm:$0xff] %v242_v46  ;;  %v250_v50 = vld [vmem:[%s1509_s25 + $0x610] sm:$0xff]  ;;  %v252_v51 = vld [vmem:[%s1509_s25 + $0x618] sm:$0xff] }
  0x2a   : > { %245 = vst [vmem:[%s1517_s26 + $0x178] sm:$0xff] %v244_v47  ;;  %247 = vst [vmem:[%s1517_s26 + $0x180] sm:$0xff] %v246_v48  ;;  %v254_v52 = vld [vmem:[%s1509_s25 + $0x620] sm:$0xff]  ;;  %v256_v53 = vld [vmem:[%s1509_s25 + $0x628] sm:$0xff] }
  0x2b   : > { %249 = vst [vmem:[%s1517_s26 + $0x188] sm:$0xff] %v248_v49  ;;  %251 = vst [vmem:[%s1517_s26 + $0x190] sm:$0xff] %v250_v50  ;;  %v258_v54 = vld [vmem:[%s1509_s25 + $0x630] sm:$0xff]  ;;  %v260_v55 = vld [vmem:[%s1509_s25 + $0x638] sm:$0xff] }
  0x2c   : > { %253 = vst [vmem:[%s1517_s26 + $0x198] sm:$0xff] %v252_v51  ;;  %255 = vst [vmem:[%s1517_s26 + $0x1a0] sm:$0xff] %v254_v52  ;;  %v262_v56 = vld [vmem:[%s1509_s25 + $0x700] sm:$0xff]  ;;  %v264_v57 = vld [vmem:[%s1509_s25 + $0x708] sm:$0xff] }
  0x2d   : > { %257 = vst [vmem:[%s1517_s26 + $0x1a8] sm:$0xff] %v256_v53  ;;  %259 = vst [vmem:[%s1517_s26 + $0x1b0] sm:$0xff] %v258_v54  ;;  %v266_v58 = vld [vmem:[%s1509_s25 + $0x710] sm:$0xff]  ;;  %v268_v59 = vld [vmem:[%s1509_s25 + $0x718] sm:$0xff] }
  0x2e   : > { %261 = vst [vmem:[%s1517_s26 + $0x1b8] sm:$0xff] %v260_v55  ;;  %263 = vst [vmem:[%s1517_s26 + $0x1c0] sm:$0xff] %v262_v56  ;;  %v270_v60 = vld [vmem:[%s1509_s25 + $0x720] sm:$0xff]  ;;  %v272_v61 = vld [vmem:[%s1509_s25 + $0x728] sm:$0xff] }
  0x2f   : > { %265 = vst [vmem:[%s1517_s26 + $0x1c8] sm:$0xff] %v264_v57  ;;  %267 = vst [vmem:[%s1517_s26 + $0x1d0] sm:$0xff] %v266_v58  ;;  %v274_v62 = vld [vmem:[%s1509_s25 + $0x730] sm:$0xff]  ;;  %v276_v63 = vld [vmem:[%s1509_s25 + $0x738] sm:$0xff] }
  0x30   : > { %269 = vst [vmem:[%s1517_s26 + $0x1d8] sm:$0xff] %v268_v59  ;;  %271 = vst [vmem:[%s1517_s26 + $0x1e0] sm:$0xff] %v270_v60  ;;  %v278_v0 = vld [vmem:[%s1509_s25 + $0x800] sm:$0xff]  ;;  %v280_v1 = vld [vmem:[%s1509_s25 + $0x808] sm:$0xff] }
  0x31   : > { %273 = vst [vmem:[%s1517_s26 + $0x1e8] sm:$0xff] %v272_v61  ;;  %275 = vst [vmem:[%s1517_s26 + $0x1f0] sm:$0xff] %v274_v62  ;;  %v282_v2 = vld [vmem:[%s1509_s25 + $0x810] sm:$0xff]  ;;  %v284_v3 = vld [vmem:[%s1509_s25 + $0x818] sm:$0xff] }
  0x32   : > { %277 = vst [vmem:[%s1517_s26 + $0x1f8] sm:$0xff] %v276_v63  ;;  %279 = vst [vmem:[%s1517_s26 + $0x200] sm:$0xff] %v278_v0  ;;  %v286_v4 = vld [vmem:[%s1509_s25 + $0x820] sm:$0xff]  ;;  %v288_v5 = vld [vmem:[%s1509_s25 + $0x828] sm:$0xff] }
  0x33   : > { %281 = vst [vmem:[%s1517_s26 + $0x208] sm:$0xff] %v280_v1  ;;  %283 = vst [vmem:[%s1517_s26 + $0x210] sm:$0xff] %v282_v2  ;;  %v290_v6 = vld [vmem:[%s1509_s25 + $0x830] sm:$0xff]  ;;  %v292_v7 = vld [vmem:[%s1509_s25 + $0x838] sm:$0xff] }
  0x34   : > { %285 = vst [vmem:[%s1517_s26 + $0x218] sm:$0xff] %v284_v3  ;;  %287 = vst [vmem:[%s1517_s26 + $0x220] sm:$0xff] %v286_v4  ;;  %v294_v8 = vld [vmem:[%s1509_s25 + $0x900] sm:$0xff]  ;;  %v296_v9 = vld [vmem:[%s1509_s25 + $0x908] sm:$0xff] }
  0x35   : > { %289 = vst [vmem:[%s1517_s26 + $0x228] sm:$0xff] %v288_v5  ;;  %291 = vst [vmem:[%s1517_s26 + $0x230] sm:$0xff] %v290_v6  ;;  %v298_v10 = vld [vmem:[%s1509_s25 + $0x910] sm:$0xff]  ;;  %v300_v11 = vld [vmem:[%s1509_s25 + $0x918] sm:$0xff] }
  0x36   : > { %293 = vst [vmem:[%s1517_s26 + $0x238] sm:$0xff] %v292_v7  ;;  %295 = vst [vmem:[%s1517_s26 + $0x240] sm:$0xff] %v294_v8  ;;  %v302_v12 = vld [vmem:[%s1509_s25 + $0x920] sm:$0xff]  ;;  %v304_v13 = vld [vmem:[%s1509_s25 + $0x928] sm:$0xff] }
  0x37   : > { %297 = vst [vmem:[%s1517_s26 + $0x248] sm:$0xff] %v296_v9  ;;  %299 = vst [vmem:[%s1517_s26 + $0x250] sm:$0xff] %v298_v10  ;;  %v306_v14 = vld [vmem:[%s1509_s25 + $0x930] sm:$0xff]  ;;  %v308_v15 = vld [vmem:[%s1509_s25 + $0x938] sm:$0xff] }
  0x38   : > { %301 = vst [vmem:[%s1517_s26 + $0x258] sm:$0xff] %v300_v11  ;;  %303 = vst [vmem:[%s1517_s26 + $0x260] sm:$0xff] %v302_v12  ;;  %v310_v16 = vld [vmem:[%s1509_s25 + $0xa00] sm:$0xff]  ;;  %v312_v17 = vld [vmem:[%s1509_s25 + $0xa08] sm:$0xff] }
  0x39   : > { %305 = vst [vmem:[%s1517_s26 + $0x268] sm:$0xff] %v304_v13  ;;  %307 = vst [vmem:[%s1517_s26 + $0x270] sm:$0xff] %v306_v14  ;;  %v314_v18 = vld [vmem:[%s1509_s25 + $0xa10] sm:$0xff]  ;;  %v316_v19 = vld [vmem:[%s1509_s25 + $0xa18] sm:$0xff] }
  0x3a   : > { %309 = vst [vmem:[%s1517_s26 + $0x278] sm:$0xff] %v308_v15  ;;  %311 = vst [vmem:[%s1517_s26 + $0x280] sm:$0xff] %v310_v16  ;;  %v318_v20 = vld [vmem:[%s1509_s25 + $0xa20] sm:$0xff]  ;;  %v320_v21 = vld [vmem:[%s1509_s25 + $0xa28] sm:$0xff] }
  0x3b   : > { %313 = vst [vmem:[%s1517_s26 + $0x288] sm:$0xff] %v312_v17  ;;  %315 = vst [vmem:[%s1517_s26 + $0x290] sm:$0xff] %v314_v18  ;;  %v322_v22 = vld [vmem:[%s1509_s25 + $0xa30] sm:$0xff]  ;;  %v324_v23 = vld [vmem:[%s1509_s25 + $0xa38] sm:$0xff] }
  0x3c   : > { %317 = vst [vmem:[%s1517_s26 + $0x298] sm:$0xff] %v316_v19  ;;  %319 = vst [vmem:[%s1517_s26 + $0x2a0] sm:$0xff] %v318_v20  ;;  %v326_v24 = vld [vmem:[%s1509_s25 + $0xb00] sm:$0xff]  ;;  %v328_v25 = vld [vmem:[%s1509_s25 + $0xb08] sm:$0xff] }
  0x3d   : > { %321 = vst [vmem:[%s1517_s26 + $0x2a8] sm:$0xff] %v320_v21  ;;  %323 = vst [vmem:[%s1517_s26 + $0x2b0] sm:$0xff] %v322_v22  ;;  %v330_v26 = vld [vmem:[%s1509_s25 + $0xb10] sm:$0xff]  ;;  %v332_v27 = vld [vmem:[%s1509_s25 + $0xb18] sm:$0xff] }
  0x3e   : > { %325 = vst [vmem:[%s1517_s26 + $0x2b8] sm:$0xff] %v324_v23  ;;  %327 = vst [vmem:[%s1517_s26 + $0x2c0] sm:$0xff] %v326_v24  ;;  %v334_v28 = vld [vmem:[%s1509_s25 + $0xb20] sm:$0xff]  ;;  %v336_v29 = vld [vmem:[%s1509_s25 + $0xb28] sm:$0xff] }
  0x3f   : > { %329 = vst [vmem:[%s1517_s26 + $0x2c8] sm:$0xff] %v328_v25  ;;  %331 = vst [vmem:[%s1517_s26 + $0x2d0] sm:$0xff] %v330_v26  ;;  %v338_v30 = vld [vmem:[%s1509_s25 + $0xb30] sm:$0xff]  ;;  %v340_v31 = vld [vmem:[%s1509_s25 + $0xb38] sm:$0xff] }
  0x40   : > { %333 = vst [vmem:[%s1517_s26 + $0x2d8] sm:$0xff] %v332_v27  ;;  %335 = vst [vmem:[%s1517_s26 + $0x2e0] sm:$0xff] %v334_v28  ;;  %v342_v32 = vld [vmem:[%s1509_s25 + $0xc00] sm:$0xff]  ;;  %v344_v33 = vld [vmem:[%s1509_s25 + $0xc08] sm:$0xff] }
  0x41   : > { %337 = vst [vmem:[%s1517_s26 + $0x2e8] sm:$0xff] %v336_v29  ;;  %339 = vst [vmem:[%s1517_s26 + $0x2f0] sm:$0xff] %v338_v30  ;;  %v346_v34 = vld [vmem:[%s1509_s25 + $0xc10] sm:$0xff]  ;;  %v348_v35 = vld [vmem:[%s1509_s25 + $0xc18] sm:$0xff] }
  0x42   : > { %341 = vst [vmem:[%s1517_s26 + $0x2f8] sm:$0xff] %v340_v31  ;;  %343 = vst [vmem:[%s1517_s26 + $0x300] sm:$0xff] %v342_v32  ;;  %v350_v36 = vld [vmem:[%s1509_s25 + $0xc20] sm:$0xff]  ;;  %v352_v37 = vld [vmem:[%s1509_s25 + $0xc28] sm:$0xff] }
  0x43   : > { %345 = vst [vmem:[%s1517_s26 + $0x308] sm:$0xff] %v344_v33  ;;  %347 = vst [vmem:[%s1517_s26 + $0x310] sm:$0xff] %v346_v34  ;;  %v354_v38 = vld [vmem:[%s1509_s25 + $0xc30] sm:$0xff]  ;;  %v356_v39 = vld [vmem:[%s1509_s25 + $0xc38] sm:$0xff] }
  0x44   : > { %349 = vst [vmem:[%s1517_s26 + $0x318] sm:$0xff] %v348_v35  ;;  %351 = vst [vmem:[%s1517_s26 + $0x320] sm:$0xff] %v350_v36  ;;  %v358_v40 = vld [vmem:[%s1509_s25 + $0xd00] sm:$0xff]  ;;  %v360_v41 = vld [vmem:[%s1509_s25 + $0xd08] sm:$0xff] }
  0x45   : > { %353 = vst [vmem:[%s1517_s26 + $0x328] sm:$0xff] %v352_v37  ;;  %355 = vst [vmem:[%s1517_s26 + $0x330] sm:$0xff] %v354_v38  ;;  %v362_v42 = vld [vmem:[%s1509_s25 + $0xd10] sm:$0xff]  ;;  %v364_v43 = vld [vmem:[%s1509_s25 + $0xd18] sm:$0xff] }
  0x46   : > { %357 = vst [vmem:[%s1517_s26 + $0x338] sm:$0xff] %v356_v39  ;;  %359 = vst [vmem:[%s1517_s26 + $0x340] sm:$0xff] %v358_v40  ;;  %v366_v44 = vld [vmem:[%s1509_s25 + $0xd20] sm:$0xff]  ;;  %v368_v45 = vld [vmem:[%s1509_s25 + $0xd28] sm:$0xff] }
  0x47   : > { %361 = vst [vmem:[%s1517_s26 + $0x348] sm:$0xff] %v360_v41  ;;  %363 = vst [vmem:[%s1517_s26 + $0x350] sm:$0xff] %v362_v42  ;;  %v370_v46 = vld [vmem:[%s1509_s25 + $0xd30] sm:$0xff]  ;;  %v372_v47 = vld [vmem:[%s1509_s25 + $0xd38] sm:$0xff] }
  0x48   : > { %365 = vst [vmem:[%s1517_s26 + $0x358] sm:$0xff] %v364_v43  ;;  %367 = vst [vmem:[%s1517_s26 + $0x360] sm:$0xff] %v366_v44  ;;  %v374_v48 = vld [vmem:[%s1509_s25 + $0xe00] sm:$0xff]  ;;  %v376_v49 = vld [vmem:[%s1509_s25 + $0xe08] sm:$0xff] }
  0x49   : > { %369 = vst [vmem:[%s1517_s26 + $0x368] sm:$0xff] %v368_v45  ;;  %371 = vst [vmem:[%s1517_s26 + $0x370] sm:$0xff] %v370_v46  ;;  %v378_v50 = vld [vmem:[%s1509_s25 + $0xe10] sm:$0xff]  ;;  %v380_v51 = vld [vmem:[%s1509_s25 + $0xe18] sm:$0xff] }
  0x4a   : > { %373 = vst [vmem:[%s1517_s26 + $0x378] sm:$0xff] %v372_v47  ;;  %375 = vst [vmem:[%s1517_s26 + $0x380] sm:$0xff] %v374_v48  ;;  %v382_v52 = vld [vmem:[%s1509_s25 + $0xe20] sm:$0xff]  ;;  %v384_v53 = vld [vmem:[%s1509_s25 + $0xe28] sm:$0xff] }
  0x4b   : > { %377 = vst [vmem:[%s1517_s26 + $0x388] sm:$0xff] %v376_v49  ;;  %379 = vst [vmem:[%s1517_s26 + $0x390] sm:$0xff] %v378_v50  ;;  %v386_v54 = vld [vmem:[%s1509_s25 + $0xe30] sm:$0xff]  ;;  %v388_v55 = vld [vmem:[%s1509_s25 + $0xe38] sm:$0xff] }
  0x4c   : > { %381 = vst [vmem:[%s1517_s26 + $0x398] sm:$0xff] %v380_v51  ;;  %383 = vst [vmem:[%s1517_s26 + $0x3a0] sm:$0xff] %v382_v52  ;;  %v390_v56 = vld [vmem:[%s1509_s25 + $0xf00] sm:$0xff]  ;;  %v392_v57 = vld [vmem:[%s1509_s25 + $0xf08] sm:$0xff] }
  0x4d   : > { %385 = vst [vmem:[%s1517_s26 + $0x3a8] sm:$0xff] %v384_v53  ;;  %387 = vst [vmem:[%s1517_s26 + $0x3b0] sm:$0xff] %v386_v54  ;;  %v394_v58 = vld [vmem:[%s1509_s25 + $0xf10] sm:$0xff]  ;;  %v396_v59 = vld [vmem:[%s1509_s25 + $0xf18] sm:$0xff] }
  0x4e   : > { %389 = vst [vmem:[%s1517_s26 + $0x3b8] sm:$0xff] %v388_v55  ;;  %391 = vst [vmem:[%s1517_s26 + $0x3c0] sm:$0xff] %v390_v56  ;;  %v398_v60 = vld [vmem:[%s1509_s25 + $0xf20] sm:$0xff]  ;;  %v400_v61 = vld [vmem:[%s1509_s25 + $0xf28] sm:$0xff] }
  0x4f   : > { %393 = vst [vmem:[%s1517_s26 + $0x3c8] sm:$0xff] %v392_v57  ;;  %395 = vst [vmem:[%s1517_s26 + $0x3d0] sm:$0xff] %v394_v58  ;;  %v402_v62 = vld [vmem:[%s1509_s25 + $0xf30] sm:$0xff]  ;;  %v404_v63 = vld [vmem:[%s1509_s25 + $0xf38] sm:$0xff] }
  0x50   : > { %397 = vst [vmem:[%s1517_s26 + $0x3d8] sm:$0xff] %v396_v59  ;;  %399 = vst [vmem:[%s1517_s26 + $0x3e0] sm:$0xff] %v398_v60  ;;  %v406_v0 = vld [vmem:[%s1509_s25 + $0x1000] sm:$0xff]  ;;  %v408_v1 = vld [vmem:[%s1509_s25 + $0x1008] sm:$0xff] }
  0x51   : > { %401 = vst [vmem:[%s1517_s26 + $0x3e8] sm:$0xff] %v400_v61  ;;  %403 = vst [vmem:[%s1517_s26 + $0x3f0] sm:$0xff] %v402_v62  ;;  %v410_v2 = vld [vmem:[%s1509_s25 + $0x1010] sm:$0xff]  ;;  %v412_v3 = vld [vmem:[%s1509_s25 + $0x1018] sm:$0xff] }
  0x52   : > { %405 = vst [vmem:[%s1517_s26 + $0x3f8] sm:$0xff] %v404_v63  ;;  %407 = vst [vmem:[%s1517_s26 + $0x400] sm:$0xff] %v406_v0  ;;  %v414_v4 = vld [vmem:[%s1509_s25 + $0x1020] sm:$0xff]  ;;  %v416_v5 = vld [vmem:[%s1509_s25 + $0x1028] sm:$0xff] }
  0x53   : > { %409 = vst [vmem:[%s1517_s26 + $0x408] sm:$0xff] %v408_v1  ;;  %411 = vst [vmem:[%s1517_s26 + $0x410] sm:$0xff] %v410_v2  ;;  %v418_v6 = vld [vmem:[%s1509_s25 + $0x1030] sm:$0xff]  ;;  %v420_v7 = vld [vmem:[%s1509_s25 + $0x1038] sm:$0xff] }
  0x54   : > { %413 = vst [vmem:[%s1517_s26 + $0x418] sm:$0xff] %v412_v3  ;;  %415 = vst [vmem:[%s1517_s26 + $0x420] sm:$0xff] %v414_v4  ;;  %v422_v8 = vld [vmem:[%s1509_s25 + $0x1100] sm:$0xff]  ;;  %v424_v9 = vld [vmem:[%s1509_s25 + $0x1108] sm:$0xff] }
  0x55   : > { %417 = vst [vmem:[%s1517_s26 + $0x428] sm:$0xff] %v416_v5  ;;  %419 = vst [vmem:[%s1517_s26 + $0x430] sm:$0xff] %v418_v6  ;;  %v426_v10 = vld [vmem:[%s1509_s25 + $0x1110] sm:$0xff]  ;;  %v428_v11 = vld [vmem:[%s1509_s25 + $0x1118] sm:$0xff] }
  0x56   : > { %421 = vst [vmem:[%s1517_s26 + $0x438] sm:$0xff] %v420_v7  ;;  %423 = vst [vmem:[%s1517_s26 + $0x440] sm:$0xff] %v422_v8  ;;  %v430_v12 = vld [vmem:[%s1509_s25 + $0x1120] sm:$0xff]  ;;  %v432_v13 = vld [vmem:[%s1509_s25 + $0x1128] sm:$0xff] }
  0x57   : > { %425 = vst [vmem:[%s1517_s26 + $0x448] sm:$0xff] %v424_v9  ;;  %427 = vst [vmem:[%s1517_s26 + $0x450] sm:$0xff] %v426_v10  ;;  %v434_v14 = vld [vmem:[%s1509_s25 + $0x1130] sm:$0xff]  ;;  %v436_v15 = vld [vmem:[%s1509_s25 + $0x1138] sm:$0xff] }
  0x58   : > { %429 = vst [vmem:[%s1517_s26 + $0x458] sm:$0xff] %v428_v11  ;;  %431 = vst [vmem:[%s1517_s26 + $0x460] sm:$0xff] %v430_v12  ;;  %v438_v16 = vld [vmem:[%s1509_s25 + $0x1200] sm:$0xff]  ;;  %v440_v17 = vld [vmem:[%s1509_s25 + $0x1208] sm:$0xff] }
  0x59   : > { %433 = vst [vmem:[%s1517_s26 + $0x468] sm:$0xff] %v432_v13  ;;  %435 = vst [vmem:[%s1517_s26 + $0x470] sm:$0xff] %v434_v14  ;;  %v442_v18 = vld [vmem:[%s1509_s25 + $0x1210] sm:$0xff]  ;;  %v444_v19 = vld [vmem:[%s1509_s25 + $0x1218] sm:$0xff] }
  0x5a   : > { %437 = vst [vmem:[%s1517_s26 + $0x478] sm:$0xff] %v436_v15  ;;  %439 = vst [vmem:[%s1517_s26 + $0x480] sm:$0xff] %v438_v16  ;;  %v446_v20 = vld [vmem:[%s1509_s25 + $0x1220] sm:$0xff]  ;;  %v448_v21 = vld [vmem:[%s1509_s25 + $0x1228] sm:$0xff] }
  0x5b   : > { %441 = vst [vmem:[%s1517_s26 + $0x488] sm:$0xff] %v440_v17  ;;  %443 = vst [vmem:[%s1517_s26 + $0x490] sm:$0xff] %v442_v18  ;;  %v450_v22 = vld [vmem:[%s1509_s25 + $0x1230] sm:$0xff]  ;;  %v452_v23 = vld [vmem:[%s1509_s25 + $0x1238] sm:$0xff] }
  0x5c   : > { %445 = vst [vmem:[%s1517_s26 + $0x498] sm:$0xff] %v444_v19  ;;  %447 = vst [vmem:[%s1517_s26 + $0x4a0] sm:$0xff] %v446_v20  ;;  %v454_v24 = vld [vmem:[%s1509_s25 + $0x1300] sm:$0xff]  ;;  %v456_v25 = vld [vmem:[%s1509_s25 + $0x1308] sm:$0xff] }
  0x5d   : > { %449 = vst [vmem:[%s1517_s26 + $0x4a8] sm:$0xff] %v448_v21  ;;  %451 = vst [vmem:[%s1517_s26 + $0x4b0] sm:$0xff] %v450_v22  ;;  %v458_v26 = vld [vmem:[%s1509_s25 + $0x1310] sm:$0xff]  ;;  %v460_v27 = vld [vmem:[%s1509_s25 + $0x1318] sm:$0xff] }
  0x5e   : > { %453 = vst [vmem:[%s1517_s26 + $0x4b8] sm:$0xff] %v452_v23  ;;  %455 = vst [vmem:[%s1517_s26 + $0x4c0] sm:$0xff] %v454_v24  ;;  %v462_v28 = vld [vmem:[%s1509_s25 + $0x1320] sm:$0xff]  ;;  %v464_v29 = vld [vmem:[%s1509_s25 + $0x1328] sm:$0xff] }
  0x5f   : > { %457 = vst [vmem:[%s1517_s26 + $0x4c8] sm:$0xff] %v456_v25  ;;  %459 = vst [vmem:[%s1517_s26 + $0x4d0] sm:$0xff] %v458_v26  ;;  %v466_v30 = vld [vmem:[%s1509_s25 + $0x1330] sm:$0xff]  ;;  %v468_v31 = vld [vmem:[%s1509_s25 + $0x1338] sm:$0xff] }
  0x60   : > { %461 = vst [vmem:[%s1517_s26 + $0x4d8] sm:$0xff] %v460_v27  ;;  %463 = vst [vmem:[%s1517_s26 + $0x4e0] sm:$0xff] %v462_v28  ;;  %v470_v32 = vld [vmem:[%s1509_s25 + $0x1400] sm:$0xff]  ;;  %v472_v33 = vld [vmem:[%s1509_s25 + $0x1408] sm:$0xff] }
  0x61   : > { %465 = vst [vmem:[%s1517_s26 + $0x4e8] sm:$0xff] %v464_v29  ;;  %467 = vst [vmem:[%s1517_s26 + $0x4f0] sm:$0xff] %v466_v30  ;;  %v474_v34 = vld [vmem:[%s1509_s25 + $0x1410] sm:$0xff]  ;;  %v476_v35 = vld [vmem:[%s1509_s25 + $0x1418] sm:$0xff] }
  0x62   : > { %469 = vst [vmem:[%s1517_s26 + $0x4f8] sm:$0xff] %v468_v31  ;;  %471 = vst [vmem:[%s1517_s26 + $0x500] sm:$0xff] %v470_v32  ;;  %v478_v36 = vld [vmem:[%s1509_s25 + $0x1420] sm:$0xff]  ;;  %v480_v37 = vld [vmem:[%s1509_s25 + $0x1428] sm:$0xff] }
  0x63   : > { %473 = vst [vmem:[%s1517_s26 + $0x508] sm:$0xff] %v472_v33  ;;  %475 = vst [vmem:[%s1517_s26 + $0x510] sm:$0xff] %v474_v34  ;;  %v482_v38 = vld [vmem:[%s1509_s25 + $0x1430] sm:$0xff]  ;;  %v484_v39 = vld [vmem:[%s1509_s25 + $0x1438] sm:$0xff] }
  0x64   : > { %477 = vst [vmem:[%s1517_s26 + $0x518] sm:$0xff] %v476_v35  ;;  %479 = vst [vmem:[%s1517_s26 + $0x520] sm:$0xff] %v478_v36  ;;  %v486_v40 = vld [vmem:[%s1509_s25 + $0x1500] sm:$0xff]  ;;  %v488_v41 = vld [vmem:[%s1509_s25 + $0x1508] sm:$0xff] }
  0x65   : > { %481 = vst [vmem:[%s1517_s26 + $0x528] sm:$0xff] %v480_v37  ;;  %483 = vst [vmem:[%s1517_s26 + $0x530] sm:$0xff] %v482_v38  ;;  %v490_v42 = vld [vmem:[%s1509_s25 + $0x1510] sm:$0xff]  ;;  %v492_v43 = vld [vmem:[%s1509_s25 + $0x1518] sm:$0xff] }
  0x66   : > { %485 = vst [vmem:[%s1517_s26 + $0x538] sm:$0xff] %v484_v39  ;;  %487 = vst [vmem:[%s1517_s26 + $0x540] sm:$0xff] %v486_v40  ;;  %v494_v44 = vld [vmem:[%s1509_s25 + $0x1520] sm:$0xff]  ;;  %v496_v45 = vld [vmem:[%s1509_s25 + $0x1528] sm:$0xff] }
  0x67   : > { %489 = vst [vmem:[%s1517_s26 + $0x548] sm:$0xff] %v488_v41  ;;  %491 = vst [vmem:[%s1517_s26 + $0x550] sm:$0xff] %v490_v42  ;;  %v498_v46 = vld [vmem:[%s1509_s25 + $0x1530] sm:$0xff]  ;;  %v500_v47 = vld [vmem:[%s1509_s25 + $0x1538] sm:$0xff] }
  0x68   : > { %493 = vst [vmem:[%s1517_s26 + $0x558] sm:$0xff] %v492_v43  ;;  %495 = vst [vmem:[%s1517_s26 + $0x560] sm:$0xff] %v494_v44  ;;  %v502_v48 = vld [vmem:[%s1509_s25 + $0x1600] sm:$0xff]  ;;  %v504_v49 = vld [vmem:[%s1509_s25 + $0x1608] sm:$0xff] }
  0x69   : > { %497 = vst [vmem:[%s1517_s26 + $0x568] sm:$0xff] %v496_v45  ;;  %499 = vst [vmem:[%s1517_s26 + $0x570] sm:$0xff] %v498_v46  ;;  %v506_v50 = vld [vmem:[%s1509_s25 + $0x1610] sm:$0xff]  ;;  %v508_v51 = vld [vmem:[%s1509_s25 + $0x1618] sm:$0xff] }
  0x6a   : > { %501 = vst [vmem:[%s1517_s26 + $0x578] sm:$0xff] %v500_v47  ;;  %503 = vst [vmem:[%s1517_s26 + $0x580] sm:$0xff] %v502_v48  ;;  %v510_v52 = vld [vmem:[%s1509_s25 + $0x1620] sm:$0xff]  ;;  %v512_v53 = vld [vmem:[%s1509_s25 + $0x1628] sm:$0xff] }
  0x6b   : > { %505 = vst [vmem:[%s1517_s26 + $0x588] sm:$0xff] %v504_v49  ;;  %507 = vst [vmem:[%s1517_s26 + $0x590] sm:$0xff] %v506_v50  ;;  %v514_v54 = vld [vmem:[%s1509_s25 + $0x1630] sm:$0xff]  ;;  %v516_v55 = vld [vmem:[%s1509_s25 + $0x1638] sm:$0xff] }
  0x6c   : > { %509 = vst [vmem:[%s1517_s26 + $0x598] sm:$0xff] %v508_v51  ;;  %511 = vst [vmem:[%s1517_s26 + $0x5a0] sm:$0xff] %v510_v52  ;;  %v518_v56 = vld [vmem:[%s1509_s25 + $0x1700] sm:$0xff]  ;;  %v520_v57 = vld [vmem:[%s1509_s25 + $0x1708] sm:$0xff] }
  0x6d   : > { %513 = vst [vmem:[%s1517_s26 + $0x5a8] sm:$0xff] %v512_v53  ;;  %515 = vst [vmem:[%s1517_s26 + $0x5b0] sm:$0xff] %v514_v54  ;;  %v522_v58 = vld [vmem:[%s1509_s25 + $0x1710] sm:$0xff]  ;;  %v524_v59 = vld [vmem:[%s1509_s25 + $0x1718] sm:$0xff] }
  0x6e   : > { %517 = vst [vmem:[%s1517_s26 + $0x5b8] sm:$0xff] %v516_v55  ;;  %519 = vst [vmem:[%s1517_s26 + $0x5c0] sm:$0xff] %v518_v56  ;;  %v526_v60 = vld [vmem:[%s1509_s25 + $0x1720] sm:$0xff]  ;;  %v528_v61 = vld [vmem:[%s1509_s25 + $0x1728] sm:$0xff] }
  0x6f   : > { %521 = vst [vmem:[%s1517_s26 + $0x5c8] sm:$0xff] %v520_v57  ;;  %523 = vst [vmem:[%s1517_s26 + $0x5d0] sm:$0xff] %v522_v58  ;;  %v530_v62 = vld [vmem:[%s1509_s25 + $0x1730] sm:$0xff]  ;;  %v532_v63 = vld [vmem:[%s1509_s25 + $0x1738] sm:$0xff] }
  0x70   : > { %525 = vst [vmem:[%s1517_s26 + $0x5d8] sm:$0xff] %v524_v59  ;;  %527 = vst [vmem:[%s1517_s26 + $0x5e0] sm:$0xff] %v526_v60  ;;  %v534_v0 = vld [vmem:[%s1509_s25 + $0x1800] sm:$0xff]  ;;  %v536_v1 = vld [vmem:[%s1509_s25 + $0x1808] sm:$0xff] }
  0x71   : > { %529 = vst [vmem:[%s1517_s26 + $0x5e8] sm:$0xff] %v528_v61  ;;  %531 = vst [vmem:[%s1517_s26 + $0x5f0] sm:$0xff] %v530_v62  ;;  %v538_v2 = vld [vmem:[%s1509_s25 + $0x1810] sm:$0xff]  ;;  %v540_v3 = vld [vmem:[%s1509_s25 + $0x1818] sm:$0xff] }
  0x72   : > { %533 = vst [vmem:[%s1517_s26 + $0x5f8] sm:$0xff] %v532_v63  ;;  %535 = vst [vmem:[%s1517_s26 + $0x600] sm:$0xff] %v534_v0  ;;  %v542_v4 = vld [vmem:[%s1509_s25 + $0x1820] sm:$0xff]  ;;  %v544_v5 = vld [vmem:[%s1509_s25 + $0x1828] sm:$0xff] }
  0x73   : > { %537 = vst [vmem:[%s1517_s26 + $0x608] sm:$0xff] %v536_v1  ;;  %539 = vst [vmem:[%s1517_s26 + $0x610] sm:$0xff] %v538_v2  ;;  %v546_v6 = vld [vmem:[%s1509_s25 + $0x1830] sm:$0xff]  ;;  %v548_v7 = vld [vmem:[%s1509_s25 + $0x1838] sm:$0xff] }
  0x74   : > { %541 = vst [vmem:[%s1517_s26 + $0x618] sm:$0xff] %v540_v3  ;;  %543 = vst [vmem:[%s1517_s26 + $0x620] sm:$0xff] %v542_v4 }
  0x75   : > { %545 = vst [vmem:[%s1517_s26 + $0x628] sm:$0xff] %v544_v5  ;;  %547 = vst [vmem:[%s1517_s26 + $0x630] sm:$0xff] %v546_v6 }
  0x76   : > { %549 = vst [vmem:[%s1517_s26 + $0x638] sm:$0xff] %v548_v7 }
  0x77 PF: > { %p1183_p5 = scmp.ge.s32.totalorder %s1452_s14, 1  ;;  %p554_p6 = scmp.lt.s32.totalorder %s1452_s14, 5 }
  0x79   : > { %p555_p7 = pnand %p1183_p5, %p554_p6 }
  0x7a   : > { %s561_s27 = sand.u32 (!%p555_p7), 1, %s1444_s12   ;;  %v1919_v8 = vld [vmem:[%s2157_s0] sm:$0x77] (!%p555_p7)  ;;  %vm800_vm0 = vcmask (!%p555_p7), 588800   ;;  %v1454_v10 = vmov (!%p555_p7), 0   ;;  %s1184_s7 = sshll.u32 (!%p555_p7), %s1177_s15, 3 }
  0x7b   : > { %558 = sbr.rel (%p555_p7) target bundleno = 463 (0x1cf), region = 51  ;;  %v1923_v9 = vcombine.high (!%p555_p7), %v1919_v8, %v1919_v8  ;;  %1412 = vset.pattern.permute.xlu0 (!%p555_p7), %v1454_v10  ;;  %v792_v11 = vld [vmem:[%s2159_s2] sm:$0x7] (!%p555_p7)  ;;  %p586_p8 = scmp.lt.s32.totalorder (!%p555_p7), %s1184_s7, 31 }
  0x7c   : > { %s1386_s30 = smul.u32 (!%p555_p7), 1600, %s561_s27  ;;  %795 = vperm.xlu0 (!%p555_p7), %1412, %v792_v11  }
  0x7d   : > { %1186 = vmatprep.mubr.msk.f32.mxu0 (!%p555_p7), %vm800_vm0, %v1923_v9  ;;  %1187 = vmatprep.mubr.msk.f32.mxu1 (!%p555_p7), %vm800_vm0, %v1923_v9 }
  0x7e   : > { %s1932_s6 = scalar_lea.vmem (!%p555_p7), [#allocation2], %s1386_s30 }
  0x7f   : > { %v593_v12 = vld [vmem:[%s1932_s6 + $0x8] sm:$0xff] (!%p555_p7)  ;;  %v595_v14 = vld [vmem:[%s1932_s6 + $0x18] sm:$0xff] (!%p555_p7)  ;;  %v592_v17 = vld [vmem:[%s1932_s6] sm:$0xff] (!%p555_p7) }
  0x80   : > { %v601_v13 = vld [vmem:[%s1932_s6 + $0x48] sm:$0xff] (!%p555_p7)  ;;  %v603_v16 = vld [vmem:[%s1932_s6 + $0x58] sm:$0xff] (!%p555_p7)  ;;  %v600_v18 = vld [vmem:[%s1932_s6 + $0x40] sm:$0xff] (!%p555_p7) }
  0x81   : > { %v1193_v15 = vpack.c.bf16 (!%p555_p7), %v601_v13, %v593_v12  ;;  %v1241_v19 = vpack.c.bf16 (!%p555_p7), %v603_v16, %v595_v14  ;;  %v1195_v20 = vpack.c.bf16 (!%p555_p7), %v600_v18, %v592_v17  ;;  %v594_v21 = vld [vmem:[%s1932_s6 + $0x10] sm:$0xff] (!%p555_p7)  ;;  %v609_v23 = vld [vmem:[%s1932_s6 + $0x88] sm:$0xff] (!%p555_p7)  ;;  %v611_v26 = vld [vmem:[%s1932_s6 + $0x98] sm:$0xff] (!%p555_p7) }
  0x82   : > { %v602_v22 = vld [vmem:[%s1932_s6 + $0x50] sm:$0xff]  ;;  %v617_v25 = vld [vmem:[%s1932_s6 + $0xc8] sm:$0xff]  ;;  %v619_v27 = vld [vmem:[%s1932_s6 + $0xd8] sm:$0xff]  ;;  %s2165_s7 = smov (!%p586_p8, %s1184_s7), 31 }
  0x83   : > { %1194 = vmatprep.subr.bf16.mxu0 %v1193_v15  ;;  %v1243_v24 = vpack.c.bf16 %v602_v22, %v594_v21  ;;  %1242 = vmatprep.subr.bf16.mxu1 %v1241_v19  ;;  %v1197_v28 = vpack.c.bf16 %v617_v25, %v609_v23  ;;  %v1245_v29 = vpack.c.bf16 %v619_v27, %v611_v26  ;;  %v608_v30 = vld [vmem:[%s1932_s6 + $0x80] sm:$0xff]  ;;  %v610_v32 = vld [vmem:[%s1932_s6 + $0x90] sm:$0xff]  ;;  %v625_v35 = vld [vmem:[%s1932_s6 + $0x108] sm:$0xff]  ;;  %s1185_s8 = sshll.u32 %s2165_s7, 2 }
  0x84   : > { %1196 = vmatpush1.bf16.msra.mxu0 %v1195_v20  ;;  %v616_v31 = vld [vmem:[%s1932_s6 + $0xc0] sm:$0xff]  ;;  %v618_v34 = vld [vmem:[%s1932_s6 + $0xd0] sm:$0xff]  ;;  %v633_v36 = vld [vmem:[%s1932_s6 + $0x148] sm:$0xff]  ;;  %s589_s11 = scalar_lea.vmem %s2160_s3, %s1185_s8 }
  0x85   : > { %1244 = vmatpush1.bf16.msra.mxu1 %v1243_v24  ;;  %v1199_v33 = vpack.c.bf16 %v616_v31, %v608_v30  ;;  %1198 = vmatprep.subr.bf16.mxu0 %v1197_v28  ;;  %v1247_v37 = vpack.c.bf16 %v618_v34, %v610_v32  ;;  %v1201_v38 = vpack.c.bf16 %v633_v36, %v625_v35  ;;  %v627_v39 = vld [vmem:[%s1932_s6 + $0x118] sm:$0xff]  ;;  %v624_v41 = vld [vmem:[%s1932_s6 + $0x100] sm:$0xff]  ;;  %v626_v44 = vld [vmem:[%s1932_s6 + $0x110] sm:$0xff] }
  0x86   : > { %1246 = vmatprep.subr.bf16.mxu1 %v1245_v29  ;;  %v635_v40 = vld [vmem:[%s1932_s6 + $0x158] sm:$0xff]  ;;  %v632_v43 = vld [vmem:[%s1932_s6 + $0x140] sm:$0xff]  ;;  %v634_v45 = vld [vmem:[%s1932_s6 + $0x150] sm:$0xff] }
  0x87   : > { %v1249_v42 = vpack.c.bf16 %v635_v40, %v627_v39  ;;  %v1203_v46 = vpack.c.bf16 %v632_v43, %v624_v41  ;;  %v641_v47 = vld [vmem:[%s1932_s6 + $0x188] sm:$0xff]  ;;  %v643_v49 = vld [vmem:[%s1932_s6 + $0x198] sm:$0xff]  ;;  %v1251_v50 = vpack.c.bf16 %v634_v45, %v626_v44  ;;  %v640_v53 = vld [vmem:[%s1932_s6 + $0x180] sm:$0xff] }
  0x88   : > { %1200 = vmatpush1.bf16.msra.mxu0 %v1199_v33  ;;  %v649_v48 = vld [vmem:[%s1932_s6 + $0x1c8] sm:$0xff]  ;;  %v651_v52 = vld [vmem:[%s1932_s6 + $0x1d8] sm:$0xff]  ;;  %v648_v54 = vld [vmem:[%s1932_s6 + $0x1c0] sm:$0xff] }
  0x89   : > { %1248 = vmatpush1.bf16.msra.mxu1 %v1247_v37  ;;  %1202 = vmatprep.subr.bf16.mxu0 %v1201_v38  ;;  %v1205_v51 = vpack.c.bf16 %v649_v48, %v641_v47  ;;  %v1253_v55 = vpack.c.bf16 %v651_v52, %v643_v49  ;;  %v642_v56 = vld [vmem:[%s1932_s6 + $0x190] sm:$0xff]  ;;  %v657_v58 = vld [vmem:[%s1932_s6 + $0x208] sm:$0xff]  ;;  %v659_v60 = vld [vmem:[%s1932_s6 + $0x218] sm:$0xff]  ;;  %v1207_v62 = vpack.c.bf16 %v648_v54, %v640_v53 }
  0x8a   : > { %1250 = vmatprep.subr.bf16.mxu1 %v1249_v42  ;;  %v650_v57 = vld [vmem:[%s1932_s6 + $0x1d0] sm:$0xff]  ;;  %v665_v59 = vld [vmem:[%s1932_s6 + $0x248] sm:$0xff]  ;;  %v667_v61 = vld [vmem:[%s1932_s6 + $0x258] sm:$0xff] }
  0x8b   : > { %v1255_v63 = vpack.c.bf16 %v650_v57, %v642_v56  ;;  %v1209_v0 = vpack.c.bf16 %v665_v59, %v657_v58  ;;  %v656_v1 = vld [vmem:[%s1932_s6 + $0x200] sm:$0xff]  ;;  %v658_v3 = vld [vmem:[%s1932_s6 + $0x210] sm:$0xff]  ;;  %v1257_v4 = vpack.c.bf16 %v667_v61, %v659_v60  ;;  %v673_v6 = vld [vmem:[%s1932_s6 + $0x288] sm:$0xff] }
  0x8c   : > { %1204 = vmatpush1.bf16.msra.mxu0 %v1203_v46  ;;  %v664_v2 = vld [vmem:[%s1932_s6 + $0x240] sm:$0xff]  ;;  %v666_v5 = vld [vmem:[%s1932_s6 + $0x250] sm:$0xff]  ;;  %v681_v7 = vld [vmem:[%s1932_s6 + $0x2c8] sm:$0xff] }
  0x8d   : > { %1252 = vmatpush1.bf16.msra.mxu1 %v1251_v50  ;;  %1206 = vmatprep.subr.bf16.mxu0 %v1205_v51  ;;  %v675_v10 = vld [vmem:[%s1932_s6 + $0x298] sm:$0xff]  ;;  %v1211_v12 = vpack.c.bf16 %v664_v2, %v656_v1  ;;  %v1259_v13 = vpack.c.bf16 %v666_v5, %v658_v3  ;;  %v1213_v14 = vpack.c.bf16 %v681_v7, %v673_v6  ;;  %v672_v15 = vld [vmem:[%s1932_s6 + $0x280] sm:$0xff]  ;;  %v674_v17 = vld [vmem:[%s1932_s6 + $0x290] sm:$0xff] }
  0x8e   : > { %1254 = vmatprep.subr.bf16.mxu1 %v1253_v55  ;;  %v683_v11 = vld [vmem:[%s1932_s6 + $0x2d8] sm:$0xff]  ;;  %v680_v16 = vld [vmem:[%s1932_s6 + $0x2c0] sm:$0xff]  ;;  %v682_v19 = vld [vmem:[%s1932_s6 + $0x2d0] sm:$0xff] }
  0x8f   : > { %v1261_v18 = vpack.c.bf16 %v683_v11, %v675_v10  ;;  %v689_v20 = vld [vmem:[%s1932_s6 + $0x308] sm:$0xff]  ;;  %v691_v22 = vld [vmem:[%s1932_s6 + $0x318] sm:$0xff]  ;;  %v1215_v24 = vpack.c.bf16 %v680_v16, %v672_v15  ;;  %v1263_v25 = vpack.c.bf16 %v682_v19, %v674_v17  ;;  %v688_v27 = vld [vmem:[%s1932_s6 + $0x300] sm:$0xff] }
  0x90   : > { %1208 = vmatpush1.bf16.msra.mxu0 %v1207_v62  ;;  %v697_v21 = vld [vmem:[%s1932_s6 + $0x348] sm:$0xff]  ;;  %v699_v23 = vld [vmem:[%s1932_s6 + $0x358] sm:$0xff]  ;;  %v696_v28 = vld [vmem:[%s1932_s6 + $0x340] sm:$0xff] }
  0x91   : > { %1256 = vmatpush1.bf16.msra.mxu1 %v1255_v63  ;;  %1210 = vmatprep.subr.bf16.mxu0 %v1209_v0  ;;  %v1217_v26 = vpack.c.bf16 %v697_v21, %v689_v20  ;;  %v690_v29 = vld [vmem:[%s1932_s6 + $0x310] sm:$0xff]  ;;  %v1265_v30 = vpack.c.bf16 %v699_v23, %v691_v22  ;;  %v705_v32 = vld [vmem:[%s1932_s6 + $0x388] sm:$0xff]  ;;  %v707_v34 = vld [vmem:[%s1932_s6 + $0x398] sm:$0xff]  ;;  %v1219_v36 = vpack.c.bf16 %v696_v28, %v688_v27 }
  0x92   : > { %1258 = vmatprep.subr.bf16.mxu1 %v1257_v4  ;;  %v698_v31 = vld [vmem:[%s1932_s6 + $0x350] sm:$0xff]  ;;  %v713_v33 = vld [vmem:[%s1932_s6 + $0x3c8] sm:$0xff]  ;;  %v715_v35 = vld [vmem:[%s1932_s6 + $0x3d8] sm:$0xff] }
  0x93   : > { %v1267_v37 = vpack.c.bf16 %v698_v31, %v690_v29  ;;  %v1221_v38 = vpack.c.bf16 %v713_v33, %v705_v32  ;;  %v704_v39 = vld [vmem:[%s1932_s6 + $0x380] sm:$0xff]  ;;  %v706_v41 = vld [vmem:[%s1932_s6 + $0x390] sm:$0xff]  ;;  %v1269_v42 = vpack.c.bf16 %v715_v35, %v707_v34  ;;  %v721_v44 = vld [vmem:[%s1932_s6 + $0x408] sm:$0xff] }
  0x94   : > { %1212 = vmatpush1.bf16.msra.mxu0 %v1211_v12  ;;  %v712_v40 = vld [vmem:[%s1932_s6 + $0x3c0] sm:$0xff]  ;;  %v714_v43 = vld [vmem:[%s1932_s6 + $0x3d0] sm:$0xff]  ;;  %v729_v45 = vld [vmem:[%s1932_s6 + $0x448] sm:$0xff] }
  0x95   : > { %1260 = vmatpush1.bf16.msra.mxu1 %v1259_v13  ;;  %1214 = vmatprep.subr.bf16.mxu0 %v1213_v14  ;;  %v723_v46 = vld [vmem:[%s1932_s6 + $0x418] sm:$0xff]  ;;  %v1223_v48 = vpack.c.bf16 %v712_v40, %v704_v39  ;;  %v1271_v49 = vpack.c.bf16 %v714_v43, %v706_v41  ;;  %v1225_v50 = vpack.c.bf16 %v729_v45, %v721_v44  ;;  %v720_v51 = vld [vmem:[%s1932_s6 + $0x400] sm:$0xff]  ;;  %v722_v53 = vld [vmem:[%s1932_s6 + $0x410] sm:$0xff] }
  0x96   : > { %1262 = vmatprep.subr.bf16.mxu1 %v1261_v18  ;;  %v731_v47 = vld [vmem:[%s1932_s6 + $0x458] sm:$0xff]  ;;  %v728_v52 = vld [vmem:[%s1932_s6 + $0x440] sm:$0xff]  ;;  %v730_v55 = vld [vmem:[%s1932_s6 + $0x450] sm:$0xff] }
  0x97   : > { %v1273_v54 = vpack.c.bf16 %v731_v47, %v723_v46  ;;  %v737_v56 = vld [vmem:[%s1932_s6 + $0x488] sm:$0xff]  ;;  %v739_v58 = vld [vmem:[%s1932_s6 + $0x498] sm:$0xff]  ;;  %v1227_v60 = vpack.c.bf16 %v728_v52, %v720_v51  ;;  %v1275_v61 = vpack.c.bf16 %v730_v55, %v722_v53  ;;  %v736_v63 = vld [vmem:[%s1932_s6 + $0x480] sm:$0xff] }
  0x98   : > { %1216 = vmatpush1.bf16.msra.mxu0 %v1215_v24  ;;  %v745_v57 = vld [vmem:[%s1932_s6 + $0x4c8] sm:$0xff]  ;;  %v747_v59 = vld [vmem:[%s1932_s6 + $0x4d8] sm:$0xff]  ;;  %v744_v0 = vld [vmem:[%s1932_s6 + $0x4c0] sm:$0xff] }
  0x99   : > { %1264 = vmatpush1.bf16.msra.mxu1 %v1263_v25  ;;  %1218 = vmatprep.subr.bf16.mxu0 %v1217_v26  ;;  %v1229_v62 = vpack.c.bf16 %v745_v57, %v737_v56  ;;  %v738_v1 = vld [vmem:[%s1932_s6 + $0x490] sm:$0xff]  ;;  %v1277_v2 = vpack.c.bf16 %v747_v59, %v739_v58  ;;  %v753_v4 = vld [vmem:[%s1932_s6 + $0x508] sm:$0xff]  ;;  %v755_v6 = vld [vmem:[%s1932_s6 + $0x518] sm:$0xff]  ;;  %v1231_v10 = vpack.c.bf16 %v744_v0, %v736_v63 }
  0x9a   : > { %1266 = vmatprep.subr.bf16.mxu1 %v1265_v30  ;;  %v746_v3 = vld [vmem:[%s1932_s6 + $0x4d0] sm:$0xff]  ;;  %v761_v5 = vld [vmem:[%s1932_s6 + $0x548] sm:$0xff]  ;;  %v763_v7 = vld [vmem:[%s1932_s6 + $0x558] sm:$0xff] }
  0x9b   : > { %v1279_v11 = vpack.c.bf16 %v746_v3, %v738_v1  ;;  %v1233_v12 = vpack.c.bf16 %v761_v5, %v753_v4  ;;  %v752_v13 = vld [vmem:[%s1932_s6 + $0x500] sm:$0xff]  ;;  %v754_v15 = vld [vmem:[%s1932_s6 + $0x510] sm:$0xff]  ;;  %v1281_v16 = vpack.c.bf16 %v763_v7, %v755_v6  ;;  %v769_v18 = vld [vmem:[%s1932_s6 + $0x588] sm:$0xff] }
  0x9c   : > { %1220 = vmatpush1.bf16.msra.mxu0 %v1219_v36  ;;  %v760_v14 = vld [vmem:[%s1932_s6 + $0x540] sm:$0xff]  ;;  %v762_v17 = vld [vmem:[%s1932_s6 + $0x550] sm:$0xff]  ;;  %v777_v19 = vld [vmem:[%s1932_s6 + $0x5c8] sm:$0xff] }
  0x9d   : > { %1268 = vmatpush1.bf16.msra.mxu1 %v1267_v37  ;;  %1222 = vmatprep.subr.bf16.mxu0 %v1221_v38  ;;  %v771_v20 = vld [vmem:[%s1932_s6 + $0x598] sm:$0xff]  ;;  %v1235_v22 = vpack.c.bf16 %v760_v14, %v752_v13  ;;  %v1283_v23 = vpack.c.bf16 %v762_v17, %v754_v15  ;;  %v1237_v24 = vpack.c.bf16 %v777_v19, %v769_v18  ;;  %v768_v25 = vld [vmem:[%s1932_s6 + $0x580] sm:$0xff]  ;;  %v770_v28 = vld [vmem:[%s1932_s6 + $0x590] sm:$0xff] }
  0x9e   : > { %1270 = vmatprep.subr.bf16.mxu1 %v1269_v42  ;;  %v779_v21 = vld [vmem:[%s1932_s6 + $0x5d8] sm:$0xff]  ;;  %v776_v26 = vld [vmem:[%s1932_s6 + $0x5c0] sm:$0xff]  ;;  %v778_v29 = vld [vmem:[%s1932_s6 + $0x5d0] sm:$0xff] }
  0x9f   : > { %v1285_v27 = vpack.c.bf16 %v779_v21, %v771_v20  ;;  %v1239_v30 = vpack.c.bf16 %v776_v26, %v768_v25  ;;  %v1287_v31 = vpack.c.bf16 %v778_v29, %v770_v28  ;;  %v785_v32 = vld [vmem:[%s1932_s6 + $0x608] sm:$0xff]  ;;  %v787_v33 = vld [vmem:[%s1932_s6 + $0x618] sm:$0xff]  ;;  %v784_v35 = vld [vmem:[%s1932_s6 + $0x600] sm:$0xff] }
  0xa0   : > { %1224 = vmatpush1.bf16.msra.mxu0 %v1223_v48  ;;  %v597_v34 = vld [vmem:[%s1932_s6 + $0x28] sm:$0xff]  ;;  %v599_v37 = vld [vmem:[%s1932_s6 + $0x38] sm:$0xff]  ;;  %v596_v39 = vld [vmem:[%s1932_s6 + $0x20] sm:$0xff] }
  0xa1   : > { %1272 = vmatpush1.bf16.msra.mxu1 %v1271_v49  ;;  %1226 = vmatprep.subr.bf16.mxu0 %v1225_v50  ;;  %v605_v36 = vld [vmem:[%s1932_s6 + $0x68] sm:$0xff]  ;;  %v607_v38 = vld [vmem:[%s1932_s6 + $0x78] sm:$0xff]  ;;  %v604_v40 = vld [vmem:[%s1932_s6 + $0x60] sm:$0xff] }
  0xa2   : > { %1274 = vmatprep.subr.bf16.mxu1 %v1273_v54  ;;  %v598_v41 = vld [vmem:[%s1932_s6 + $0x30] sm:$0xff]  ;;  %v613_v43 = vld [vmem:[%s1932_s6 + $0xa8] sm:$0xff]  ;;  %v1289_v46 = vpack.c.bf16 %v605_v36, %v597_v34  ;;  %v615_v47 = vld [vmem:[%s1932_s6 + $0xb8] sm:$0xff]  ;;  %v1337_v49 = vpack.c.bf16 %v607_v38, %v599_v37  ;;  %v1291_v50 = vpack.c.bf16 %v604_v40, %v596_v39 }
  0xa3   : > { %v606_v42 = vld [vmem:[%s1932_s6 + $0x70] sm:$0xff]  ;;  %v621_v44 = vld [vmem:[%s1932_s6 + $0xe8] sm:$0xff]  ;;  %v623_v48 = vld [vmem:[%s1932_s6 + $0xf8] sm:$0xff] }
  0xa4   : > { %1228 = vmatpush1.bf16.msra.mxu0 %v1227_v60  ;;  %v786_v45 = vld [vmem:[%s1932_s6 + $0x610] sm:$0xff]  ;;  %v1339_v51 = vpack.c.bf16 %v606_v42, %v598_v41  ;;  %v1293_v52 = vpack.c.bf16 %v621_v44, %v613_v43  ;;  %v612_v53 = vld [vmem:[%s1932_s6 + $0xa0] sm:$0xff]  ;;  %v1341_v56 = vpack.c.bf16 %v623_v48, %v615_v47  ;;  %v629_v58 = vld [vmem:[%s1932_s6 + $0x128] sm:$0xff] }
  0xa5   : > { %1276 = vmatpush1.bf16.msra.mxu1 %v1275_v61  ;;  %1230 = vmatprep.subr.bf16.mxu0 %v1229_v62  ;;  %v620_v54 = vld [vmem:[%s1932_s6 + $0xe0] sm:$0xff]  ;;  %v614_v55 = vld [vmem:[%s1932_s6 + $0xb0] sm:$0xff]  ;;  %v637_v59 = vld [vmem:[%s1932_s6 + $0x168] sm:$0xff] }
  0xa6   : > { %1278 = vmatprep.subr.bf16.mxu1 %v1277_v2  ;;  %v622_v57 = vld [vmem:[%s1932_s6 + $0xf0] sm:$0xff]  ;;  %v631_v60 = vld [vmem:[%s1932_s6 + $0x138] sm:$0xff]  ;;  %v1295_v62 = vpack.c.bf16 %v620_v54, %v612_v53  ;;  %v1297_v0 = vpack.c.bf16 %v637_v59, %v629_v58  ;;  %v628_v1 = vld [vmem:[%s1932_s6 + $0x120] sm:$0xff] }
  0xa7   : > { %v639_v61 = vld [vmem:[%s1932_s6 + $0x178] sm:$0xff]  ;;  %v1343_v63 = vpack.c.bf16 %v622_v57, %v614_v55  ;;  %v636_v2 = vld [vmem:[%s1932_s6 + $0x160] sm:$0xff]  ;;  %v630_v3 = vld [vmem:[%s1932_s6 + $0x130] sm:$0xff] }
  0xa8   : > { %1232 = vmatpush1.bf16.msra.mxu0 %v1231_v10  ;;  %v1345_v4 = vpack.c.bf16 %v639_v61, %v631_v60  ;;  %v638_v5 = vld [vmem:[%s1932_s6 + $0x170] sm:$0xff]  ;;  %v645_v6 = vld [vmem:[%s1932_s6 + $0x1a8] sm:$0xff]  ;;  %v647_v10 = vld [vmem:[%s1932_s6 + $0x1b8] sm:$0xff] }
  0xa9   : > { %1280 = vmatpush1.bf16.msra.mxu1 %v1279_v11  ;;  %1234 = vmatprep.subr.bf16.mxu0 %v1233_v12  ;;  %v653_v7 = vld [vmem:[%s1932_s6 + $0x1e8] sm:$0xff]  ;;  %v655_v11 = vld [vmem:[%s1932_s6 + $0x1f8] sm:$0xff]  ;;  %v1299_v12 = vpack.c.bf16 %v636_v2, %v628_v1  ;;  %v1347_v13 = vpack.c.bf16 %v638_v5, %v630_v3  ;;  %v644_v15 = vld [vmem:[%s1932_s6 + $0x1a0] sm:$0xff] }
  0xaa   : > { %1282 = vmatprep.subr.bf16.mxu1 %v1281_v16  ;;  %v1301_v14 = vpack.c.bf16 %v653_v7, %v645_v6  ;;  %v652_v16 = vld [vmem:[%s1932_s6 + $0x1e0] sm:$0xff]  ;;  %v646_v17 = vld [vmem:[%s1932_s6 + $0x1b0] sm:$0xff]  ;;  %v1349_v18 = vpack.c.bf16 %v655_v11, %v647_v10  ;;  %v661_v20 = vld [vmem:[%s1932_s6 + $0x228] sm:$0xff] }
  0xab   : > { %v654_v19 = vld [vmem:[%s1932_s6 + $0x1f0] sm:$0xff]  ;;  %v663_v21 = vld [vmem:[%s1932_s6 + $0x238] sm:$0xff]  ;;  %v660_v26 = vld [vmem:[%s1932_s6 + $0x220] sm:$0xff] }
  0xac   : > { %1236 = vmatpush1.bf16.msra.mxu0 %v1235_v22  ;;  %v671_v22 = vld [vmem:[%s1932_s6 + $0x278] sm:$0xff]  ;;  %v662_v28 = vld [vmem:[%s1932_s6 + $0x230] sm:$0xff]  ;;  %v676_v38 = vld [vmem:[%s1932_s6 + $0x2a0] sm:$0xff] }
  0xad   : > { %1284 = vmatpush1.bf16.msra.mxu1 %v1283_v23  ;;  %1238 = vmatprep.subr.bf16.mxu0 %v1237_v24  ;;  %v1303_v23 = vpack.c.bf16 %v652_v16, %v644_v15  ;;  %v1351_v24 = vpack.c.bf16 %v654_v19, %v646_v17  ;;  %v1353_v29 = vpack.c.bf16 %v671_v22, %v663_v21  ;;  %v687_v34 = vld [vmem:[%s1932_s6 + $0x2f8] sm:$0xff]  ;;  %v684_v39 = vld [vmem:[%s1932_s6 + $0x2e0] sm:$0xff]  ;;  %v678_v40 = vld [vmem:[%s1932_s6 + $0x2b0] sm:$0xff] }
  0xae   : > { %1286 = vmatprep.subr.bf16.mxu1 %v1285_v27  ;;  %v668_v27 = vld [vmem:[%s1932_s6 + $0x260] sm:$0xff]  ;;  %v686_v42 = vld [vmem:[%s1932_s6 + $0x2f0] sm:$0xff]  ;;  %v693_v43 = vld [vmem:[%s1932_s6 + $0x328] sm:$0xff]  ;;  %v1311_v47 = vpack.c.bf16 %v684_v39, %v676_v38 }
  0xaf   : > { %v701_v44 = vld [vmem:[%s1932_s6 + $0x368] sm:$0xff]  ;;  %v1359_v48 = vpack.c.bf16 %v686_v42, %v678_v40  ;;  %v702_v54 = vld [vmem:[%s1932_s6 + $0x370] sm:$0xff]  ;;  %v711_v57 = vld [vmem:[%s1932_s6 + $0x3b8] sm:$0xff] }
  0xb0   : > { %1240 = vmatpush1.bf16.msra.mxu0 %v1239_v30  ;;  %v670_v30 = vld [vmem:[%s1932_s6 + $0x270] sm:$0xff]  ;;  %v709_v55 = vld [vmem:[%s1932_s6 + $0x3a8] sm:$0xff]  ;;  %v719_v58 = vld [vmem:[%s1932_s6 + $0x3f8] sm:$0xff] }
  0xb1   : > { %1288 = vmatpush1.bf16.msra.mxu1 %v1287_v31  ;;  %851 = vmatprep.subr.mxu0 %v785_v32  ;;  %v677_v31 = vld [vmem:[%s1932_s6 + $0x2a8] sm:$0xff]  ;;  %v1355_v36 = vpack.c.bf16 %v670_v30, %v662_v28  ;;  %v1365_v1 = vpack.c.bf16 %v719_v58, %v711_v57  ;;  %v718_v2 = vld [vmem:[%s1932_s6 + $0x3f0] sm:$0xff]  ;;  %v727_v5 = vld [vmem:[%s1932_s6 + $0x438] sm:$0xff] }
  0xb2   : > { %922 = vmatprep.subr.mxu1 %v787_v33  ;;  %v685_v32 = vld [vmem:[%s1932_s6 + $0x2e8] sm:$0xff]  ;;  %v679_v33 = vld [vmem:[%s1932_s6 + $0x2b8] sm:$0xff]  ;;  %v734_v16 = vld [vmem:[%s1932_s6 + $0x470] sm:$0xff] }
  0xb3   : > { %v1309_v37 = vpack.c.bf16 %v685_v32, %v677_v31  ;;  %v1357_v41 = vpack.c.bf16 %v687_v34, %v679_v33  ;;  %v725_v3 = vld [vmem:[%s1932_s6 + $0x428] sm:$0xff]  ;;  %v735_v6 = vld [vmem:[%s1932_s6 + $0x478] sm:$0xff]  ;;  %v766_v39 = vld [vmem:[%s1932_s6 + $0x570] sm:$0xff] }
  0xb4   : > { %852 = vmatpush1.msra.mxu0 %v784_v35  ;;  %v1307_v35 = vpack.c.bf16 %v668_v27, %v660_v26  ;;  %v1369_v15 = vpack.c.bf16 %v735_v6, %v727_v5  ;;  %v741_v17 = vld [vmem:[%s1932_s6 + $0x4a8] sm:$0xff]  ;;  %v743_v19 = vld [vmem:[%s1932_s6 + $0x4b8] sm:$0xff]  ;;  %v750_v27 = vld [vmem:[%s1932_s6 + $0x4f0] sm:$0xff] }
  0xb5   : > { %923 = vmatpush1.msra.mxu1 %v786_v45  ;;  %868 = vmatmul.mubr.f32.vlgmr.msra.gmra.mrb[0].mxu0 %v1919_v8  ;;  %v695_v45 = vld [vmem:[%s1932_s6 + $0x338] sm:$0xff]  ;;  %v757_v28 = vld [vmem:[%s1932_s6 + $0x528] sm:$0xff]  ;;  %v790_v57 = vld [vmem:[%s1932_s6 + $0x630] sm:$0xff] }
  0xb6   : > { %939 = vmatmul.mubr.f32.vlgmr.msra.gmra.mrb[0].mxu1 %v1919_v8  ;;  %1290 = vmatprep.subr.bf16.mxu0 %v1289_v46  ;;  %v703_v46 = vld [vmem:[%s1932_s6 + $0x378] sm:$0xff]  ;;  %v773_v40 = vld [vmem:[%s1932_s6 + $0x5a8] sm:$0xff] }
  0xb7   : > { %1338 = vmatprep.subr.bf16.mxu1 %v1337_v49  ;;  %1292 = vmatpush1.bf16.msra.mxu0 %v1291_v50  ;;  %v1313_v49 = vpack.c.bf16 %v701_v44, %v693_v43  ;;  %v692_v50 = vld [vmem:[%s1932_s6 + $0x320] sm:$0xff]  ;;  %v1361_v53 = vpack.c.bf16 %v703_v46, %v695_v45  ;;  %v759_v30 = vld [vmem:[%s1932_s6 + $0x538] sm:$0xff] }
  0xb8   : > { %1340 = vmatpush1.bf16.msra.mxu1 %v1339_v51  ;;  %1294 = vmatprep.subr.bf16.mxu0 %v1293_v52  ;;  %v700_v51 = vld [vmem:[%s1932_s6 + $0x360] sm:$0xff]  ;;  %v694_v52 = vld [vmem:[%s1932_s6 + $0x330] sm:$0xff]  ;;  %v767_v31 = vld [vmem:[%s1932_s6 + $0x578] sm:$0xff] }
  0xb9   : > { %1342 = vmatprep.subr.bf16.mxu1 %v1341_v56  ;;  %1188 = vmatprep.mubr.msk.f32.mxu0 %vm800_vm0, %v1923_v9  ;;  %v717_v56 = vld [vmem:[%s1932_s6 + $0x3e8] sm:$0xff]  ;;  %v1315_v59 = vpack.c.bf16 %v700_v51, %v692_v50  ;;  %v1363_v60 = vpack.c.bf16 %v702_v54, %v694_v52  ;;  %v1377_v38 = vpack.c.bf16 %v767_v31, %v759_v30  ;;  %v775_v42 = vld [vmem:[%s1932_s6 + $0x5b8] sm:$0xff]  ;;  %v774_v50 = vld [vmem:[%s1932_s6 + $0x5b0] sm:$0xff] }
  0xba   : > { %1189 = vmatprep.mubr.msk.f32.mxu1 %vm800_vm0, %v1923_v9  ;;  %v669_v9 = vld [vmem:[%s1932_s6 + $0x268] sm:$0xff]  ;;  %v1317_v61 = vpack.c.bf16 %v717_v56, %v709_v55  ;;  %v783_v43 = vld [vmem:[%s1932_s6 + $0x5f8] sm:$0xff]  ;;  %v782_v51 = vld [vmem:[%s1932_s6 + $0x5f0] sm:$0xff] }
  0xbb   : > { %1296 = vmatpush1.bf16.msra.mxu0 %v1295_v62  ;;  %v1305_v25 = vpack.c.bf16 %v669_v9, %v661_v20  ;;  %v708_v62 = vld [vmem:[%s1932_s6 + $0x3a0] sm:$0xff]  ;;  %v751_v20 = vld [vmem:[%s1932_s6 + $0x4f8] sm:$0xff]  ;;  %v789_v54 = vld [vmem:[%s1932_s6 + $0x628] sm:$0xff] }
  0xbc   : > { %1344 = vmatpush1.bf16.msra.mxu1 %v1343_v63  ;;  %1298 = vmatprep.subr.bf16.mxu0 %v1297_v0  ;;  %v716_v63 = vld [vmem:[%s1932_s6 + $0x3e0] sm:$0xff]  ;;  %v710_v0 = vld [vmem:[%s1932_s6 + $0x3b0] sm:$0xff]  ;;  %v1373_v26 = vpack.c.bf16 %v751_v20, %v743_v19  ;;  %v791_v55 = vld [vmem:[%s1932_s6 + $0x638] sm:$0xff] }
  0xbd   : > { %1346 = vmatprep.subr.bf16.mxu1 %v1345_v4  ;;  %v733_v4 = vld [vmem:[%s1932_s6 + $0x468] sm:$0xff]  ;;  %v1319_v7 = vpack.c.bf16 %v716_v63, %v708_v62  ;;  %v1367_v10 = vpack.c.bf16 %v718_v2, %v710_v0  ;;  %v788_v56 = vld [vmem:[%s1932_s6 + $0x620] sm:$0xff] }
  0xbe   : > { %v1321_v11 = vpack.c.bf16 %v733_v4, %v725_v3 }
  0xbf   : > { %1300 = vmatpush1.bf16.msra.mxu0 %v1299_v12  ;;  %v724_v12 = vld [vmem:[%s1932_s6 + $0x420] sm:$0xff] }
  0xc0   : > { %1348 = vmatpush1.bf16.msra.mxu1 %v1347_v13  ;;  %1302 = vmatprep.subr.bf16.mxu0 %v1301_v14  ;;  %v732_v13 = vld [vmem:[%s1932_s6 + $0x460] sm:$0xff]  ;;  %v726_v14 = vld [vmem:[%s1932_s6 + $0x430] sm:$0xff] }
  0xc1   : > { %1350 = vmatprep.subr.bf16.mxu1 %v1349_v18  ;;  %v749_v18 = vld [vmem:[%s1932_s6 + $0x4e8] sm:$0xff]  ;;  %v1323_v9 = vpack.c.bf16 %v732_v13, %v724_v12  ;;  %v1371_v21 = vpack.c.bf16 %v734_v16, %v726_v14 }
  0xc2   : > { %v1325_v22 = vpack.c.bf16 %v749_v18, %v741_v17 }
  0xc3   : > { %1304 = vmatpush1.bf16.msra.mxu0 %v1303_v23  ;;  %v740_v23 = vld [vmem:[%s1932_s6 + $0x4a0] sm:$0xff] }
  0xc4   : > { %1352 = vmatpush1.bf16.msra.mxu1 %v1351_v24  ;;  %1306 = vmatprep.subr.bf16.mxu0 %v1305_v25  ;;  %v748_v24 = vld [vmem:[%s1932_s6 + $0x4e0] sm:$0xff]  ;;  %v742_v25 = vld [vmem:[%s1932_s6 + $0x4b0] sm:$0xff] }
  0xc5   : > { %1354 = vmatprep.subr.bf16.mxu1 %v1353_v29  ;;  %v765_v29 = vld [vmem:[%s1932_s6 + $0x568] sm:$0xff]  ;;  %v1327_v32 = vpack.c.bf16 %v748_v24, %v740_v23  ;;  %v1375_v33 = vpack.c.bf16 %v750_v27, %v742_v25 }
  0xc6   : > { %v1329_v34 = vpack.c.bf16 %v765_v29, %v757_v28 }
  0xc7   : > { %1308 = vmatpush1.bf16.msra.mxu0 %v1307_v35  ;;  %v756_v35 = vld [vmem:[%s1932_s6 + $0x520] sm:$0xff] }
  0xc8   : > { %1356 = vmatpush1.bf16.msra.mxu1 %v1355_v36  ;;  %1310 = vmatprep.subr.bf16.mxu0 %v1309_v37  ;;  %v764_v36 = vld [vmem:[%s1932_s6 + $0x560] sm:$0xff]  ;;  %v758_v37 = vld [vmem:[%s1932_s6 + $0x530] sm:$0xff] }
  0xc9   : > { %1358 = vmatprep.subr.bf16.mxu1 %v1357_v41  ;;  %v781_v41 = vld [vmem:[%s1932_s6 + $0x5e8] sm:$0xff]  ;;  %v1331_v44 = vpack.c.bf16 %v764_v36, %v756_v35  ;;  %v1379_v45 = vpack.c.bf16 %v766_v39, %v758_v37 }
  0xca   : > { %v1333_v46 = vpack.c.bf16 %v781_v41, %v773_v40 }
  0xcb   : > { %1312 = vmatpush1.bf16.msra.mxu0 %v1311_v47  ;;  %v772_v47 = vld [vmem:[%s1932_s6 + $0x5a0] sm:$0xff] }
  0xcc   : > { %1360 = vmatpush1.bf16.msra.mxu1 %v1359_v48  ;;  %1314 = vmatprep.subr.bf16.mxu0 %v1313_v49  ;;  %v780_v48 = vld [vmem:[%s1932_s6 + $0x5e0] sm:$0xff]  ;;  %v1381_v49 = vpack.c.bf16 %v783_v43, %v775_v42 }
  0xcd   : > { %1362 = vmatprep.subr.bf16.mxu1 %v1361_v53  ;;  %v1335_v52 = vpack.c.bf16 %v780_v48, %v772_v47  ;;  %v1383_v53 = vpack.c.bf16 %v782_v51, %v774_v50 }
  0xcf   : > { %1316 = vmatpush1.bf16.msra.mxu0 %v1315_v59 }
  0xd0   : > { %1364 = vmatpush1.bf16.msra.mxu1 %v1363_v60  ;;  %1318 = vmatprep.subr.bf16.mxu0 %v1317_v61 }
  0xd1   : > { %1366 = vmatprep.subr.bf16.mxu1 %v1365_v1 }
  0xd3   : > { %1320 = vmatpush1.bf16.msra.mxu0 %v1319_v7 }
  0xd4   : > { %1368 = vmatpush1.bf16.msra.mxu1 %v1367_v10  ;;  %1322 = vmatprep.subr.bf16.mxu0 %v1321_v11 }
  0xd5   : > { %1370 = vmatprep.subr.bf16.mxu1 %v1369_v15 }
  0xd7   : > { %1324 = vmatpush1.bf16.msra.mxu0 %v1323_v9 }
  0xd8   : > { %1372 = vmatpush1.bf16.msra.mxu1 %v1371_v21  ;;  %1326 = vmatprep.subr.bf16.mxu0 %v1325_v22 }
  0xd9   : > { %1374 = vmatprep.subr.bf16.mxu1 %v1373_v26 }
  0xdb   : > { %1328 = vmatpush1.bf16.msra.mxu0 %v1327_v32 }
  0xdc   : > { %1376 = vmatpush1.bf16.msra.mxu1 %v1375_v33  ;;  %1330 = vmatprep.subr.bf16.mxu0 %v1329_v34 }
  0xdd   : > { %1378 = vmatprep.subr.bf16.mxu1 %v1377_v38 }
  0xdf   : > { %1332 = vmatpush1.bf16.msra.mxu0 %v1331_v44 }
  0xe0   : > { %1380 = vmatpush1.bf16.msra.mxu1 %v1379_v45  ;;  %1334 = vmatprep.subr.bf16.mxu0 %v1333_v46 }
  0xe1   : > { %1382 = vmatprep.subr.bf16.mxu1 %v1381_v49 }
  0xe3   : > { %1336 = vmatpush1.bf16.msra.mxu0 %v1335_v52 }
  0xe4   : > { %1384 = vmatpush1.bf16.msra.mxu1 %v1383_v53  ;;  %993 = vmatprep.subr.mxu0 %v789_v54 }
  0xe5   : > { %1064 = vmatprep.subr.mxu1 %v791_v55 }
  0xe7   : > { %994 = vmatpush1.msra.mxu0 %v788_v56 }
  0xe8   : > { %1065 = vmatpush1.msra.mxu1 %v790_v57  ;;  %1010 = vmatmul.mubr.f32.vlgmr.msra.gmra.mrb[2].mxu0 %v1919_v8 }
  0xe9   : > { %1081 = vmatmul.mubr.f32.vlgmr.msra.gmra.mrb[2].mxu1 %v1919_v8 }
  0xfb   : > { %v796_v58 = vpop.permute.xlu0 %795 }
 0x188   : > { %v869_v59 = vpop.f32.mrb[0].mxu0 }
 0x189   : > { %v940_v60 = vpop.f32.mrb[0].mxu1  ;;  %v870_v61 = vadd.f32 %v869_v59, %v796_v58  ;;  %v871_v62 = vpop.f32.mrb[1].mxu0 }
 0x18a   : > { %v941_v63 = vadd.f32 %v940_v60, %v796_v58  ;;  %v872_v0 = vadd.f32 %v871_v62, %v796_v58  ;;  %v942_v1 = vpop.f32.mrb[1].mxu1 }
 0x18b   : > { %1414 = vtanh.f32 %v870_v61  ;;  %v943_v2 = vadd.f32 %v942_v1, %v796_v58 }
 0x18c   : > { %1416 = vtanh.f32 %v941_v63 }
 0x18d   : > { %1418 = vtanh.f32 %v872_v0 }
 0x18e   : > { %1420 = vtanh.f32 %v943_v2 }
 0x195   : > { %v1415_v3 = vpop.eup %1414 }
 0x196   : > { %v1417_v8 = vpop.eup %1416 }
 0x197   : > { %v1419_v4 = vpop.eup %1418 }
 0x198   : > { %v1421_v5 = vpop.eup %1420  ;;  %v1103_v6 = vcombine.low %v1415_v3, %v1419_v4 }
 0x199   : > { %v1104_v7 = vcombine.low %v1417_v8, %v1421_v5 }
 0x19a   : > { %1111 = vst [vmem:[%s589_s11] sm:$0x77] %v1103_v6 }
 0x19b   : > { %1112 = vst [vmem:[%s589_s11 + $0x8] sm:$0x77] %v1104_v7 }
 0x1bb   : > { %v1011_v10 = vpop.f32.mrb[2].mxu0 }
 0x1bc   : > { %v1012_v11 = vadd.f32 %v1011_v10, %v796_v58  ;;  %v1082_v12 = vpop.f32.mrb[2].mxu1  ;;  %v1013_v13 = vpop.f32.mrb[3].mxu0 }
 0x1bd   : > { %v1083_v14 = vadd.f32 %v1082_v12, %v796_v58  ;;  %v1014_v15 = vadd.f32 %v1013_v13, %v796_v58  ;;  %v1084_v16 = vpop.f32.mrb[3].mxu1 }
 0x1be   : > { %1422 = vtanh.f32 %v1012_v11  ;;  %v1085_v17 = vadd.f32 %v1084_v16, %v796_v58 }
 0x1bf   : > { %1424 = vtanh.f32 %v1083_v14 }
 0x1c0   : > { %1426 = vtanh.f32 %v1014_v15 }
 0x1c1   : > { %1428 = vtanh.f32 %v1085_v17 }
 0x1c8   : > { %v1423_v18 = vpop.eup %1422 }
 0x1c9   : > { %v1425_v19 = vpop.eup %1424 }
 0x1ca   : > { %v1427_v20 = vpop.eup %1426 }
 0x1cb   : > { %v1429_v9 = vpop.eup %1428  ;;  %v1105_v21 = vcombine.low %v1423_v18, %v1427_v20 }
 0x1cc   : > { %v1106_v22 = vcombine.low %v1425_v19, %v1429_v9 }
 0x1cd   : > { %1113 = vst [vmem:[%s589_s11 + $0x10] sm:$0x77] %v1105_v21 }
 0x1ce   : > { %1114 = vst [vmem:[%s589_s11 + $0x18] sm:$0x77] %v1106_v22 }
 0x1cf PF: > { %p10_p9 = scmp.ge.s32.totalorder %s1492_s16, 6   ;;  %s2161_s12 = smov %s1448_s13 }
 0x1d0   : > { %s2162_s13 = smov %s1501_s19  ;;  %s2163_s14 = smov %s1492_s16 }
 0x1d1   :  { %12 = sbr.rel (!%p10_p9) target bundleno = 2 (0x2), region = 90 }

</bundles_post_ra>
